<compile_context>
chip_gen: v6e
topology: v6e:2x2x1
jax: 0.10.0
libtpu: 0.0.40
codegen_flags: <defaults>
</compile_context>

<pallas_src>
import functools

import jax
import jax.numpy as jnp
from jax import lax
from jax.experimental import pallas as pl
from jax.experimental.pallas import tpu as pltpu

# Full-f32 MXU passes: at these shapes the kernel is XLU/store-bound
# (output M = 2C rows of the MXU), so the extra passes are hidden.
_PRECISION = lax.Precision.HIGHEST


# ----------------------------- Pallas kernel -------------------------------
def _skip_layers_kernel(x_ref, w_ref, bias_ref, gam_ref, beta_ref,
                        mask_ref, red_ref, o_ref, *, W, inv_n):
    """One grid step == one ComplexConvBlock layer (3x3 / stride 1 / pad 1).

    x_ref    : (2C, Np)      initial activations (resident, fetched once)
    w_ref    : (1, 2C, 18C)  block-complex im2col weights for this layer
    bias_ref : (1, 2C, 1)    combined conv bias [br-bi ; br+bi]
    gam_ref  : (1, 3C, 1)    BN gammas [gamma_r ; gamma_i ; gamma_ir]
    beta_ref : (1, 2C, 1)    BN betas  [beta_r ; beta_i]
    mask_ref : (9, Np)       precomputed 3x3 boundary / valid-lane masks
    red_ref  : (Np, 128)     column 0 = 1.0 on valid lanes (MXU reduction vec)
    o_ref    : (2C, Np)      resident output block, carries activations
    """
    l = pl.program_id(0)
    C2, N = o_ref.shape
    C = C2 // 2

    # Layer 0: seed the resident output block with the input activations.
    @pl.when(l == 0)
    def _():
        o_ref[...] = x_ref[...]

    cur = o_ref[...]                                      # (2C, Np) f32
    a = jnp.where(cur >= 0, cur, 0.01 * cur)              # LeakyReLU(0.01)

    # im2col: 9 static lane-rolls (XLU) gated by precomputed boundary masks.
    # The circular roll across image/batch/pad boundaries is safe only because
    # the masks zero those contributions — keep that invariant.
    pieces = []
    k = 0
    for di in (-1, 0, 1):
        for dj in (-1, 0, 1):
            s = di * W + dj
            shifted = a if s == 0 else pltpu.roll(a, shift=(-s) % N, axis=1)
            pieces.append(shifted * mask_ref[k:k + 1, :])
            k += 1
    patch = jnp.concatenate(pieces, axis=0)               # (18C, Np)

    # Block-complex 3x3 conv as ONE deep MXU matmul, + bias, + residual.
    y = jnp.dot(w_ref[0], patch, preferred_element_type=jnp.float32,
                precision=_PRECISION)
    y = y + bias_ref[0] + a                               # (2C, Np)

    # ComplexBatchNorm — two-pass centered moments.  Lane reductions run on
    # the otherwise-idle MXU (dot against the resident valid-lane matrix),
    # keeping the XLU free for the rolls above.  Pad lanes are excluded.
    red = red_ref[...]                                    # (Np, 128)
    mu = jnp.dot(y, red, preferred_element_type=jnp.float32,
                 precision=_PRECISION)[:, 0:1] * inv_n    # (2C, 1)
    c = y - mu
    c_re, c_im = c[:C], c[C:]
    rows = jnp.concatenate([c * c, c_re * c_im], axis=0)  # (3C, Np)
    mom = jnp.dot(rows, red, preferred_element_type=jnp.float32,
                  precision=_PRECISION)[:, 0:1] * inv_n   # (3C, 1)
    var_r = mom[:C]
    var_i = mom[C:2 * C]
    cov_ir = mom[2 * C:]

    eps = jnp.float32(1e-8)
    tau = var_r + var_i
    det = var_r * var_i - cov_ir * cov_ir + eps
    det_sqrt = jnp.sqrt(det)
    t = jnp.sqrt(tau + 2.0 * det_sqrt)
    inv_st = 1.0 / (det_sqrt * t + eps)                   # exact f32 divide

    gam = gam_ref[0]                                      # (3C, 1)
    ism_r = (var_i + det_sqrt) * inv_st * gam[:C]
    ism_i = (var_r + det_sqrt) * inv_st * gam[C:2 * C]
    ism_ir = (-cov_ir) * inv_st * gam[2 * C:]

    coef_same = jnp.concatenate([ism_r, ism_i], axis=0)      # (2C, 1)
    coef_cross = jnp.concatenate([ism_ir, ism_ir], axis=0)   # (2C, 1)
    c_swap = jnp.concatenate([c_im, c_re], axis=0)           # [c_im ; c_re]
    o_ref[...] = coef_same * c + coef_cross * c_swap + beta_ref[0]


# ------------------------------ JAX wrapper --------------------------------
def _pack_params(params):
    """Pack per-layer PyTorch-style params into stacked kernel arrays."""
    w_big, bias, gam, bet = [], [], [], []
    for p in params:
        blocks = []
        for di in range(3):
            for dj in range(3):
                a = p["wr"][di, dj].T          # (C_out, C_in)
                b = p["wi"][di, dj].T
                blocks.append(jnp.block([[a, -b], [b, a]]))   # (2C, 2C)
        w_big.append(jnp.concatenate(blocks, axis=1))          # (2C, 18C)
        br, bi = p["br"][0], p["bi"][0]                         # (C,)
        bias.append(jnp.concatenate([br - bi, br + bi])[:, None])
        gam.append(jnp.concatenate([p["gr"][0], p["gi"][0], p["gir"][0]])[:, None])
        bet.append(jnp.concatenate([p["beta_r"][0], p["beta_i"][0]])[:, None])
    return (jnp.stack(w_big), jnp.stack(bias), jnp.stack(gam), jnp.stack(bet))


def _make_lane_constants(B, H, W, N_pad):
    """Precompute the 9 boundary masks and the MXU reduction matrix."""
    N = B * H * W
    lane = jnp.arange(N_pad, dtype=jnp.int32)
    rem = lane % (H * W)
    h_idx = rem // W
    w_idx = rem % W
    valid = lane < N                                      # true-data lanes
    masks = []
    for di in (-1, 0, 1):
        for dj in (-1, 0, 1):
            hh = h_idx + di
            ww = w_idx + dj
            m = (hh >= 0) & (hh < H) & (ww >= 0) & (ww < W) & valid
            masks.append(m)
    masks = jnp.stack(masks).astype(jnp.float32)          # (9, N_pad)
    red = jnp.zeros((N_pad, 128), jnp.float32)
    red = red.at[:, 0].set(valid.astype(jnp.float32))     # col 0 = valid lanes
    return masks, red


@jax.jit
def skip_layers_forward(x, params):
    """x: (B, C, H, W, 2) (PyTorch layout). Returns the same layout."""
    x = x.astype(jnp.float32)
    B, C, H, W, _ = x.shape
    N = B * H * W
    N_pad = ((N + 127) // 128) * 128                      # lane-dense padding

    xr = jnp.transpose(x[..., 0], (1, 0, 2, 3)).reshape(C, N)
    xi = jnp.transpose(x[..., 1], (1, 0, 2, 3)).reshape(C, N)
    xs = jnp.concatenate([xr, xi], axis=0)                # (2C, N)
    xs = jnp.pad(xs, ((0, 0), (0, N_pad - N)))            # (2C, N_pad)

    masks, red = _make_lane_constants(B, H, W, N_pad)
    w_big, bias, gam, bet = _pack_params(params)
    L = w_big.shape[0]

    out = pl.pallas_call(
        functools.partial(_skip_layers_kernel, W=W, inv_n=1.0 / N),
        out_shape=jax.ShapeDtypeStruct((2 * C, N_pad), jnp.float32),
        grid_spec=pltpu.PrefetchScalarGridSpec(
            num_scalar_prefetch=0,
            grid=(L,),
            in_specs=[
                pl.BlockSpec((2 * C, N_pad), lambda l: (0, 0)),         # x (resident)
                pl.BlockSpec((1, 2 * C, 18 * C), lambda l: (l, 0, 0)),  # weights
                pl.BlockSpec((1, 2 * C, 1), lambda l: (l, 0, 0)),       # conv bias
                pl.BlockSpec((1, 3 * C, 1), lambda l: (l, 0, 0)),       # BN gammas
                pl.BlockSpec((1, 2 * C, 1), lambda l: (l, 0, 0)),       # BN betas
                pl.BlockSpec((9, N_pad), lambda l: (0, 0)),             # masks
                pl.BlockSpec((N_pad, 128), lambda l: (0, 0)),           # reduce vec
            ],
            out_specs=pl.BlockSpec((2 * C, N_pad), lambda l: (0, 0)),
        ),
        input_output_aliases={0: 0},                       # xs HBM buffer reused
        compiler_params=pltpu.CompilerParams(
            dimension_semantics=("arbitrary",),
            vmem_limit_bytes=64 * 1024 * 1024),
    )(xs, w_big, bias, gam, bet, masks, red)

    out = out[:, :N]
    out_re = out[:C].reshape(C, B, H, W)
    out_im = out[C:].reshape(C, B, H, W)
    res = jnp.stack([out_re, out_im], axis=-1)            # (C, B, H, W, 2)
    return jnp.transpose(res, (1, 0, 2, 3, 4))            # (B, C, H, W, 2)


# ---------------- pure-JAX reference (for silent validation) ----------------
def _ref_conv(inp, w):
    return lax.conv_general_dilated(
        inp, w, window_strides=(1, 1), padding=((1, 1), (1, 1)),
        dimension_numbers=("NHWC", "HWIO", "NHWC"),
        precision=lax.Precision.HIGHEST)


def _ref_block(xr, xi, p):
    ar = jnp.where(xr >= 0, xr, 0.01 * xr)
    ai = jnp.where(xi >= 0, xi, 0.01 * xi)
    y_re = _ref_conv(ar, p["wr"]) - _ref_conv(ai, p["wi"]) + (p["br"] - p["bi"])
    y_im = _ref_conv(ai, p["wr"]) + _ref_conv(ar, p["wi"]) + (p["br"] + p["bi"])
    y_re = y_re + ar
    y_im = y_im + ai
    n = y_re.shape[0] * y_re.shape[1] * y_re.shape[2]
    mu_r = jnp.mean(y_re, axis=(0, 1, 2), keepdims=True)
    mu_i = jnp.mean(y_im, axis=(0, 1, 2), keepdims=True)
    c_r = y_re - mu_r
    c_i = y_im - mu_i
    var_r = jnp.sum(c_r * c_r, axis=(0, 1, 2)) / n
    var_i = jnp.sum(c_i * c_i, axis=(0, 1, 2)) / n
    cov_ir = jnp.sum(c_r * c_i, axis=(0, 1, 2)) / n
    tau = var_r + var_i
    det = var_r * var_i - cov_ir ** 2 + 1e-8
    det_sqrt = jnp.sqrt(det)
    t = jnp.sqrt(tau + 2 * det_sqrt)
    inverse_st = 1.0 / (det_sqrt * t + 1e-8)
    ism_r = (var_i + det_sqrt) * inverse_st * p["gr"][0]
    ism_i = (var_r + det_sqrt) * inverse_st * p["gi"][0]
    ism_ir = -cov_ir * inverse_st * p["gir"][0]
    out_re = ism_r * c_r + ism_ir * c_i + p["beta_r"][0]
    out_im = ism_ir * c_r + ism_i * c_i + p["beta_i"][0]
    return out_re, out_im


def ref_forward(x, params):
    x = x.astype(jnp.float32)
    xr = jnp.transpose(x[..., 0], (0, 2, 3, 1))
    xi = jnp.transpose(x[..., 1], (0, 2, 3, 1))
    for p in params:
        xr, xi = _ref_block(xr, xi, p)
    out = jnp.stack((xr, xi), axis=-1)
    return jnp.transpose(out, (0, 3, 1, 2, 4))


if __name__ == "__main__":
    key = jax.random.PRNGKey(0)
    B, C, H, W = 2, 8, 16, 16      # N = B*H*W = 512 lanes, 2C = 16 sublanes
    num_layers = 3

    k_x, *k_layers = jax.random.split(key, 1 + num_layers)
    x = jax.random.normal(k_x, (B, C, H, W, 2), jnp.float32)

    params = []
    scale = 1.0 / (9 * C) ** 0.5
    for kl in k_layers:
        k1, k2, k3, k4 = jax.random.split(kl, 4)
        params.append(dict(
            wr=jax.random.normal(k1, (3, 3, C, C), jnp.float32) * scale,   # HWIO
            wi=jax.random.normal(k2, (3, 3, C, C), jnp.float32) * scale,
            br=jax.random.normal(k3, (1, C), jnp.float32) * scale,
            bi=jax.random.normal(k4, (1, C), jnp.float32) * scale,
            # ComplexBatchNorm parameters at their module-init values:
            gr=jnp.full((1, C), 1.0 / jnp.sqrt(2.0), jnp.float32),
            gi=jnp.full((1, C), 1.0 / jnp.sqrt(2.0), jnp.float32),
            gir=jnp.zeros((1, C), jnp.float32),
            beta_r=jnp.zeros((1, C), jnp.float32),
            beta_i=jnp.zeros((1, C), jnp.float32),
        ))

    out = skip_layers_forward(x, params)
    out = jax.block_until_ready(out)

    ref = ref_forward(x, params)
    max_err = float(jnp.max(jnp.abs(out - ref)))
    # Both sides now run full-precision matmuls, centered BN moments and exact
    # divides, so agreement is ~1e-5; genuine layout / mask / weight bugs
    # produce O(0.1+) errors.
    assert jnp.allclose(out, ref, atol=2e-3, rtol=1e-2), max_err

    print("KERNEL_OK")
</pallas_src>

<mosaic_0001>
module attributes {stable_mosaic.version = 11 : i64} {
  func.func @_skip_layers_kernel(%arg0: i32, %arg1: memref<16x512xf32, #tpu.memory_space<vmem>>, %arg2: memref<1x16x144xf32, #tpu.memory_space<vmem>>, %arg3: memref<1x16x1xf32, #tpu.memory_space<vmem>>, %arg4: memref<1x24x1xf32, #tpu.memory_space<vmem>>, %arg5: memref<1x16x1xf32, #tpu.memory_space<vmem>>, %arg6: memref<9x512xf32, #tpu.memory_space<vmem>>, %arg7: memref<512x128xf32, #tpu.memory_space<vmem>>, %arg8: memref<16x512xf32, #tpu.memory_space<vmem>>) attributes {dimension_semantics = [#tpu.dimension_semantics<arbitrary>], iteration_bounds = array<i64: 3>, scalar_prefetch = 0 : i64, scratch_operands = 0 : i64, tpu.core_type = #tpu.core_type<tc>, window_params = [{pipeline_mode = #tpu.pipeline_mode<synchronous>, transform_indices = @transform_0, window_bounds = array<i64: 16, 512>}, {transform_indices = @transform_1, window_bounds = array<i64: 1, 16, 144>}, {transform_indices = @transform_2, window_bounds = array<i64: 1, 16, 1>}, {transform_indices = @transform_3, window_bounds = array<i64: 1, 24, 1>}, {transform_indices = @transform_4, window_bounds = array<i64: 1, 16, 1>}, {pipeline_mode = #tpu.pipeline_mode<synchronous>, transform_indices = @transform_5, window_bounds = array<i64: 9, 512>}, {pipeline_mode = #tpu.pipeline_mode<synchronous>, transform_indices = @transform_6, window_bounds = array<i64: 512, 128>}, {pipeline_mode = #tpu.pipeline_mode<synchronous>, transform_indices = @transform_7, window_bounds = array<i64: 16, 512>}]} {
    %c0_i32 = arith.constant 0 : i32
    %0 = arith.cmpi eq, %arg0, %c0_i32 : i32
    %1 = arith.extui %0 : i1 to i32
    %c0_i32_0 = arith.constant 0 : i32
    %2 = arith.cmpi ne, %1, %c0_i32_0 : i32
    scf.if %2 {
      %c0_39 = arith.constant 0 : index
      %c0_40 = arith.constant 0 : index
      %116 = vector.load %arg1[%c0_39, %c0_40] : memref<16x512xf32, #tpu.memory_space<vmem>>, vector<16x512xf32>
      %c0_41 = arith.constant 0 : index
      %c0_42 = arith.constant 0 : index
      %117 = vector.load %arg8[%c0_41, %c0_42] : memref<16x512xf32, #tpu.memory_space<vmem>>, vector<16x512xf32>
      tpu.vector_store %arg8[%c0_41, %c0_42], %116 {strides = array<i32>} : memref<16x512xf32, #tpu.memory_space<vmem>>, vector<16x512xf32>,
    } else {
    }
    %c0 = arith.constant 0 : index
    %c0_1 = arith.constant 0 : index
    %3 = vector.load %arg8[%c0, %c0_1] : memref<16x512xf32, #tpu.memory_space<vmem>>, vector<16x512xf32>
    %cst = arith.constant 0.000000e+00 : f32
    %4 = vector.broadcast %cst : f32 to vector<16x512xf32>
    %5 = arith.cmpf oge, %3, %4 : vector<16x512xf32>
    %cst_2 = arith.constant 0.00999999977 : f32
    %6 = vector.broadcast %cst_2 : f32 to vector<16x512xf32>
    %7 = arith.mulf %6, %3 : vector<16x512xf32>
    %8 = arith.select %5, %3, %7 : vector<16x512xi1>, vector<16x512xf32>
    %c17_i32 = arith.constant 17 : i32
    %9 = tpu.dynamic_rotate %8 by %c17_i32 dim 1 : vector<16x512xf32>, i32 -> vector<16x512xf32>
    %c0_3 = arith.constant 0 : index
    %c0_4 = arith.constant 0 : index
    %10 = vector.load %arg6[%c0_3, %c0_4] : memref<9x512xf32, #tpu.memory_space<vmem>>, vector<1x512xf32>
    %11 = vector.broadcast %10 : vector<1x512xf32> to vector<16x512xf32>
    %12 = arith.mulf %9, %11 : vector<16x512xf32>
    %c16_i32 = arith.constant 16 : i32
    %13 = tpu.dynamic_rotate %8 by %c16_i32 dim 1 : vector<16x512xf32>, i32 -> vector<16x512xf32>
    %c1 = arith.constant 1 : index
    %c0_5 = arith.constant 0 : index
    %14 = vector.load %arg6[%c1, %c0_5] : memref<9x512xf32, #tpu.memory_space<vmem>>, vector<1x512xf32>
    %15 = vector.broadcast %14 : vector<1x512xf32> to vector<16x512xf32>
    %16 = arith.mulf %13, %15 : vector<16x512xf32>
    %c15_i32 = arith.constant 15 : i32
    %17 = tpu.dynamic_rotate %8 by %c15_i32 dim 1 : vector<16x512xf32>, i32 -> vector<16x512xf32>
    %c2 = arith.constant 2 : index
    %c0_6 = arith.constant 0 : index
    %18 = vector.load %arg6[%c2, %c0_6] : memref<9x512xf32, #tpu.memory_space<vmem>>, vector<1x512xf32>
    %19 = vector.broadcast %18 : vector<1x512xf32> to vector<16x512xf32>
    %20 = arith.mulf %17, %19 : vector<16x512xf32>
    %c1_i32 = arith.constant 1 : i32
    %21 = tpu.dynamic_rotate %8 by %c1_i32 dim 1 : vector<16x512xf32>, i32 -> vector<16x512xf32>
    %c3 = arith.constant 3 : index
    %c0_7 = arith.constant 0 : index
    %22 = vector.load %arg6[%c3, %c0_7] : memref<9x512xf32, #tpu.memory_space<vmem>>, vector<1x512xf32>
    %23 = vector.broadcast %22 : vector<1x512xf32> to vector<16x512xf32>
    %24 = arith.mulf %21, %23 : vector<16x512xf32>
    %c4 = arith.constant 4 : index
    %c0_8 = arith.constant 0 : index
    %25 = vector.load %arg6[%c4, %c0_8] : memref<9x512xf32, #tpu.memory_space<vmem>>, vector<1x512xf32>
    %26 = vector.broadcast %25 : vector<1x512xf32> to vector<16x512xf32>
    %27 = arith.mulf %8, %26 : vector<16x512xf32>
    %c511_i32 = arith.constant 511 : i32
    %28 = tpu.dynamic_rotate %8 by %c511_i32 dim 1 : vector<16x512xf32>, i32 -> vector<16x512xf32>
    %c5 = arith.constant 5 : index
    %c0_9 = arith.constant 0 : index
    %29 = vector.load %arg6[%c5, %c0_9] : memref<9x512xf32, #tpu.memory_space<vmem>>, vector<1x512xf32>
    %30 = vector.broadcast %29 : vector<1x512xf32> to vector<16x512xf32>
    %31 = arith.mulf %28, %30 : vector<16x512xf32>
    %c497_i32 = arith.constant 497 : i32
    %32 = tpu.dynamic_rotate %8 by %c497_i32 dim 1 : vector<16x512xf32>, i32 -> vector<16x512xf32>
    %c6 = arith.constant 6 : index
    %c0_10 = arith.constant 0 : index
    %33 = vector.load %arg6[%c6, %c0_10] : memref<9x512xf32, #tpu.memory_space<vmem>>, vector<1x512xf32>
    %34 = vector.broadcast %33 : vector<1x512xf32> to vector<16x512xf32>
    %35 = arith.mulf %32, %34 : vector<16x512xf32>
    %c496_i32 = arith.constant 496 : i32
    %36 = tpu.dynamic_rotate %8 by %c496_i32 dim 1 : vector<16x512xf32>, i32 -> vector<16x512xf32>
    %c7 = arith.constant 7 : index
    %c0_11 = arith.constant 0 : index
    %37 = vector.load %arg6[%c7, %c0_11] : memref<9x512xf32, #tpu.memory_space<vmem>>, vector<1x512xf32>
    %38 = vector.broadcast %37 : vector<1x512xf32> to vector<16x512xf32>
    %39 = arith.mulf %36, %38 : vector<16x512xf32>
    %c495_i32 = arith.constant 495 : i32
    %40 = tpu.dynamic_rotate %8 by %c495_i32 dim 1 : vector<16x512xf32>, i32 -> vector<16x512xf32>
    %c8 = arith.constant 8 : index
    %c0_12 = arith.constant 0 : index
    %41 = vector.load %arg6[%c8, %c0_12] : memref<9x512xf32, #tpu.memory_space<vmem>>, vector<1x512xf32>
    %42 = vector.broadcast %41 : vector<1x512xf32> to vector<16x512xf32>
    %43 = arith.mulf %40, %42 : vector<16x512xf32>
    %44 = tpu.concatenate %12, %16, %20, %24, %27, %31, %35, %39, %43 in 0 : vector<16x512xf32>, vector<16x512xf32>, vector<16x512xf32>, vector<16x512xf32>, vector<16x512xf32>, vector<16x512xf32>, vector<16x512xf32>, vector<16x512xf32>, vector<16x512xf32> -> vector<144x512xf32>
    %c0_13 = arith.constant 0 : index
    %c0_14 = arith.constant 0 : index
    %c0_15 = arith.constant 0 : index
    %45 = vector.load %arg2[%c0_13, %c0_14, %c0_15] : memref<1x16x144xf32, #tpu.memory_space<vmem>>, vector<1x16x144xf32>
    %46 = vector.shape_cast %45 : vector<1x16x144xf32> to vector<16x144xf32>
    %cst_16 = arith.constant dense<0.000000e+00> : vector<16x512xf32>
    %47 = tpu.matmul %46, %44, %cst_16 {dimension_numbers = #tpu.dot_dimension_numbers<[1], [0], [0], [1], [0, 0, 1, 1], [], []>, precision = #tpu.contract_precision<fp32>} : vector<16x144xf32>, vector<144x512xf32>, vector<16x512xf32> -> vector<16x512xf32>
    %c0_17 = arith.constant 0 : index
    %c0_18 = arith.constant 0 : index
    %c0_19 = arith.constant 0 : index
    %48 = vector.load %arg3[%c0_17, %c0_18, %c0_19] : memref<1x16x1xf32, #tpu.memory_space<vmem>>, vector<1x16x1xf32>
    %49 = vector.shape_cast %48 : vector<1x16x1xf32> to vector<16x1xf32>
    %50 = vector.broadcast %49 : vector<16x1xf32> to vector<16x512xf32>
    %51 = arith.addf %47, %50 : vector<16x512xf32>
    %52 = arith.addf %51, %8 : vector<16x512xf32>
    %c0_20 = arith.constant 0 : index
    %c0_21 = arith.constant 0 : index
    %53 = vector.load %arg7[%c0_20, %c0_21] : memref<512x128xf32, #tpu.memory_space<vmem>>, vector<512x128xf32>
    %cst_22 = arith.constant dense<0.000000e+00> : vector<16x128xf32>
    %54 = tpu.matmul %52, %53, %cst_22 {dimension_numbers = #tpu.dot_dimension_numbers<[1], [0], [0], [1], [0, 0, 1, 1], [], []>, precision = #tpu.contract_precision<fp32>} : vector<16x512xf32>, vector<512x128xf32>, vector<16x128xf32> -> vector<16x128xf32>
    %55 = vector.extract_strided_slice %54 {offsets = [0, 0], sizes = [16, 1], strides = [1, 1]} : vector<16x128xf32> to vector<16x1xf32>
    %cst_23 = arith.constant 0.001953125 : f32
    %56 = vector.broadcast %cst_23 : f32 to vector<16x1xf32>
    %57 = arith.mulf %55, %56 : vector<16x1xf32>
    %58 = vector.broadcast %57 : vector<16x1xf32> to vector<16x512xf32>
    %59 = arith.subf %52, %58 : vector<16x512xf32>
    %60 = vector.extract_strided_slice %59 {offsets = [0, 0], sizes = [8, 512], strides = [1, 1]} : vector<16x512xf32> to vector<8x512xf32>
    %61 = vector.extract_strided_slice %59 {offsets = [8, 0], sizes = [8, 512], strides = [1, 1]} : vector<16x512xf32> to vector<8x512xf32>
    %62 = arith.mulf %59, %59 : vector<16x512xf32>
    %63 = arith.mulf %60, %61 : vector<8x512xf32>
    %64 = tpu.concatenate %62, %63 in 0 : vector<16x512xf32>, vector<8x512xf32> -> vector<24x512xf32>
    %cst_24 = arith.constant dense<0.000000e+00> : vector<24x128xf32>
    %65 = tpu.matmul %64, %53, %cst_24 {dimension_numbers = #tpu.dot_dimension_numbers<[1], [0], [0], [1], [0, 0, 1, 1], [], []>, precision = #tpu.contract_precision<fp32>} : vector<24x512xf32>, vector<512x128xf32>, vector<24x128xf32> -> vector<24x128xf32>
    %66 = vector.extract_strided_slice %65 {offsets = [0, 0], sizes = [24, 1], strides = [1, 1]} : vector<24x128xf32> to vector<24x1xf32>
    %cst_25 = arith.constant 0.001953125 : f32
    %67 = vector.broadcast %cst_25 : f32 to vector<24x1xf32>
    %68 = arith.mulf %66, %67 : vector<24x1xf32>
    %69 = vector.extract_strided_slice %68 {offsets = [0, 0], sizes = [8, 1], strides = [1, 1]} : vector<24x1xf32> to vector<8x1xf32>
    %70 = vector.extract_strided_slice %68 {offsets = [8, 0], sizes = [8, 1], strides = [1, 1]} : vector<24x1xf32> to vector<8x1xf32>
    %71 = vector.extract_strided_slice %68 {offsets = [16, 0], sizes = [8, 1], strides = [1, 1]} : vector<24x1xf32> to vector<8x1xf32>
    %72 = arith.addf %69, %70 : vector<8x1xf32>
    %73 = arith.mulf %69, %70 : vector<8x1xf32>
    %74 = arith.mulf %71, %71 : vector<8x1xf32>
    %75 = arith.subf %73, %74 : vector<8x1xf32>
    %cst_26 = arith.constant 9.99999993E-9 : f32
    %76 = vector.broadcast %cst_26 : f32 to vector<8x1xf32>
    %77 = arith.addf %75, %76 : vector<8x1xf32>
    %78 = math.sqrt %77 : vector<8x1xf32>
    %cst_27 = arith.constant 2.000000e+00 : f32
    %79 = vector.broadcast %cst_27 : f32 to vector<8x1xf32>
    %80 = arith.mulf %79, %78 : vector<8x1xf32>
    %81 = arith.addf %72, %80 : vector<8x1xf32>
    %82 = math.sqrt %81 : vector<8x1xf32>
    %83 = arith.mulf %78, %82 : vector<8x1xf32>
    %cst_28 = arith.constant 9.99999993E-9 : f32
    %84 = vector.broadcast %cst_28 : f32 to vector<8x1xf32>
    %85 = arith.addf %83, %84 : vector<8x1xf32>
    %cst_29 = arith.constant 1.000000e+00 : f32
    %86 = vector.broadcast %cst_29 : f32 to vector<8x1xf32>
    %87 = arith.divf %86, %85 : vector<8x1xf32>
    %c0_30 = arith.constant 0 : index
    %c0_31 = arith.constant 0 : index
    %c0_32 = arith.constant 0 : index
    %88 = vector.load %arg4[%c0_30, %c0_31, %c0_32] : memref<1x24x1xf32, #tpu.memory_space<vmem>>, vector<1x24x1xf32>
    %89 = vector.shape_cast %88 : vector<1x24x1xf32> to vector<24x1xf32>
    %90 = arith.addf %70, %78 : vector<8x1xf32>
    %91 = arith.mulf %90, %87 : vector<8x1xf32>
    %92 = vector.extract_strided_slice %89 {offsets = [0, 0], sizes = [8, 1], strides = [1, 1]} : vector<24x1xf32> to vector<8x1xf32>
    %93 = arith.mulf %91, %92 : vector<8x1xf32>
    %94 = arith.addf %69, %78 : vector<8x1xf32>
    %95 = arith.mulf %94, %87 : vector<8x1xf32>
    %96 = vector.extract_strided_slice %89 {offsets = [8, 0], sizes = [8, 1], strides = [1, 1]} : vector<24x1xf32> to vector<8x1xf32>
    %97 = arith.mulf %95, %96 : vector<8x1xf32>
    %cst_33 = arith.constant 0.000000e+00 : f32
    %98 = vector.broadcast %cst_33 : f32 to vector<8x1xf32>
    %99 = arith.subf %98, %71 : vector<8x1xf32>
    %100 = arith.mulf %99, %87 : vector<8x1xf32>
    %101 = vector.extract_strided_slice %89 {offsets = [16, 0], sizes = [8, 1], strides = [1, 1]} : vector<24x1xf32> to vector<8x1xf32>
    %102 = arith.mulf %100, %101 : vector<8x1xf32>
    %103 = tpu.concatenate %93, %97 in 0 : vector<8x1xf32>, vector<8x1xf32> -> vector<16x1xf32>
    %104 = tpu.concatenate %102, %102 in 0 : vector<8x1xf32>, vector<8x1xf32> -> vector<16x1xf32>
    %105 = tpu.concatenate %61, %60 in 0 : vector<8x512xf32>, vector<8x512xf32> -> vector<16x512xf32>
    %106 = vector.broadcast %103 : vector<16x1xf32> to vector<16x512xf32>
    %107 = arith.mulf %106, %59 : vector<16x512xf32>
    %108 = vector.broadcast %104 : vector<16x1xf32> to vector<16x512xf32>
    %109 = arith.mulf %108, %105 : vector<16x512xf32>
    %110 = arith.addf %107, %109 : vector<16x512xf32>
    %c0_34 = arith.constant 0 : index
    %c0_35 = arith.constant 0 : index
    %c0_36 = arith.constant 0 : index
    %111 = vector.load %arg5[%c0_34, %c0_35, %c0_36] : memref<1x16x1xf32, #tpu.memory_space<vmem>>, vector<1x16x1xf32>
    %112 = vector.shape_cast %111 : vector<1x16x1xf32> to vector<16x1xf32>
    %113 = vector.broadcast %112 : vector<16x1xf32> to vector<16x512xf32>
    %114 = arith.addf %110, %113 : vector<16x512xf32>
    %c0_37 = arith.constant 0 : index
    %c0_38 = arith.constant 0 : index
    %115 = vector.load %arg8[%c0_37, %c0_38] : memref<16x512xf32, #tpu.memory_space<vmem>>, vector<16x512xf32>
    tpu.vector_store %arg8[%c0_37, %c0_38], %114 {strides = array<i32>} : memref<16x512xf32, #tpu.memory_space<vmem>>, vector<16x512xf32>,
    return
  }
  func.func @transform_0(%arg0: i32) -> (i32, i32) {
    %c0_i32 = arith.constant 0 : i32
    %c0_i32_0 = arith.constant 0 : i32
    %c0_i32_1 = arith.constant 0 : i32
    return %c0_i32, %c0_i32_0 : i32, i32
  }
  func.func @transform_1(%arg0: i32) -> (i32, i32, i32) {
    %c0_i32 = arith.constant 0 : i32
    %c0_i32_0 = arith.constant 0 : i32
    %c0_i32_1 = arith.constant 0 : i32
    return %arg0, %c0_i32, %c0_i32_0 : i32, i32, i32
  }
  func.func @transform_2(%arg0: i32) -> (i32, i32, i32) {
    %c0_i32 = arith.constant 0 : i32
    %c0_i32_0 = arith.constant 0 : i32
    %c0_i32_1 = arith.constant 0 : i32
    return %arg0, %c0_i32, %c0_i32_0 : i32, i32, i32
  }
  func.func @transform_3(%arg0: i32) -> (i32, i32, i32) {
    %c0_i32 = arith.constant 0 : i32
    %c0_i32_0 = arith.constant 0 : i32
    %c0_i32_1 = arith.constant 0 : i32
    return %arg0, %c0_i32, %c0_i32_0 : i32, i32, i32
  }
  func.func @transform_4(%arg0: i32) -> (i32, i32, i32) {
    %c0_i32 = arith.constant 0 : i32
    %c0_i32_0 = arith.constant 0 : i32
    %c0_i32_1 = arith.constant 0 : i32
    return %arg0, %c0_i32, %c0_i32_0 : i32, i32, i32
  }
  func.func @transform_5(%arg0: i32) -> (i32, i32) {
    %c0_i32 = arith.constant 0 : i32
    %c0_i32_0 = arith.constant 0 : i32
    %c0_i32_1 = arith.constant 0 : i32
    return %c0_i32, %c0_i32_0 : i32, i32
  }
  func.func @transform_6(%arg0: i32) -> (i32, i32) {
    %c0_i32 = arith.constant 0 : i32
    %c0_i32_0 = arith.constant 0 : i32
    %c0_i32_1 = arith.constant 0 : i32
    return %c0_i32, %c0_i32_0 : i32, i32
  }
  func.func @transform_7(%arg0: i32) -> (i32, i32) {
    %c0_i32 = arith.constant 0 : i32
    %c0_i32_0 = arith.constant 0 : i32
    %c0_i32_1 = arith.constant 0 : i32
    return %c0_i32, %c0_i32_0 : i32, i32
  }
}

</mosaic_0001>

<bundles_post_ra>
// kernel: skip_layers_forward.1
= control target key start
LH: loop header
LB: loop body
LE: loop exit
PB: predicated region body
PF: predicated region fallthrough
CT: control target
= control target key end

     0   :  { %s7962_s24 = smov 0   ;;  %s12133_s0 = inlined_call_operand.vmem [shape: f32[16,512], index: 0, kind: input, shape index: {}, may-alias: {0,7}]   ;;  %s12134_s1 = inlined_call_operand.vmem [shape: f32[3,16,144], index: 1, kind: input, shape index: {}]   ;;  %s12135_s2 = inlined_call_operand.vmem [shape: f32[3,16,1], index: 2, kind: input, shape index: {}]   ;;  %s12136_s3 = inlined_call_operand.vmem [shape: f32[3,24,1], index: 3, kind: input, shape index: {}]   ;;  %s12137_s4 = inlined_call_operand.vmem [shape: f32[3,16,1], index: 4, kind: input, shape index: {}]   ;;  %s12138_s5 = inlined_call_operand.vmem [shape: f32[9,512], index: 5, kind: input, shape index: {}]   ;;  %s12139_s6 = inlined_call_operand.vmem [shape: f32[512,128], index: 6, kind: input, shape index: {}]   ;;  %s12140_s7 = inlined_call_operand.vmem [shape: f32[16,512], index: 7, kind: output, shape index: {}, may-alias: {0,7}]  }
   0x1 LB: > { %s6902_s25 = sadd.s32 4294967295, %s7911_s24   ;;  %p6905_p0 = scmp.ge.s32.totalorder %s7911_s24, 1  ;;  %s7911_s24 = sphi %s7962_s24, %s17_s24  }
   0x2   : > { %p262_p1 = scmp.lt.s32.totalorder %s7911_s24, 4 }
   0x4   : > { %p263_p2 = pnand %p6905_p0, %p262_p1 }
   0x6   : > { %266 = sbr.rel (%p263_p2) target bundleno = 1705 (0x6a9), region = 48 }
   0xb   : > { %p304_p3 = scmp.lt.s32.totalorder %s6902_s25, 2  ;;  %p6913_p4 = scmp.ne.s32.totalorder %s6902_s25, 0 }
   0xd   : > { %s305_s26 = scalar_select %p304_p3, %s6902_s25, 2 }
   0xf   : > { %s6924_s27 = sshll.u32 %s305_s26, 5  ;;  %s6925_s28 = sshll.u32 %s305_s26, 4 }
  0x10   : > { %s7973_s8 = scalar_lea.vmem %s12134_s1, %s6924_s27  ;;  %s7978_s11 = scalar_lea.vmem %s12135_s2, %s6925_s28 }
  0x11   : > { %s7875_s12 = smul.u32 24, %s305_s26  ;;  %s7983_s15 = scalar_lea.vmem %s12137_s4, %s6925_s28 }
  0x12   : > { %327 = sbr.rel (%p6913_p4) target bundleno = 43 (0x2b), region = 52 }
  0x13   : > { %s7988_s18 = scalar_lea.vmem %s12136_s3, %s7875_s12 }
  0x17   : > { %v328_v0 = vld [vmem:[%s12133_s0] sm:$0xff]  ;;  %v329_v1 = vld [vmem:[%s12133_s0 + $0x8] sm:$0xff]  ;;  %v330_v2 = vld [vmem:[%s12133_s0 + $0x10] sm:$0xff] }
  0x18   : > { %336 = vst [vmem:[%s12140_s7] sm:$0xff] %v328_v0  ;;  %337 = vst [vmem:[%s12140_s7 + $0x8] sm:$0xff] %v329_v1 }
  0x19   : > { %338 = vst [vmem:[%s12140_s7 + $0x10] sm:$0xff] %v330_v2 }
  0x20   : > { %v331_v3 = vld [vmem:[%s12133_s0 + $0x18] sm:$0xff]  ;;  %v332_v4 = vld [vmem:[%s12133_s0 + $0x20] sm:$0xff]  ;;  %v333_v5 = vld [vmem:[%s12133_s0 + $0x28] sm:$0xff] }
  0x21   : > { %339 = vst [vmem:[%s12140_s7 + $0x18] sm:$0xff] %v331_v3  ;;  %340 = vst [vmem:[%s12140_s7 + $0x20] sm:$0xff] %v332_v4 }
  0x22   : > { %341 = vst [vmem:[%s12140_s7 + $0x28] sm:$0xff] %v333_v5 }
  0x29   : > { %v334_v6 = vld [vmem:[%s12133_s0 + $0x30] sm:$0xff]  ;;  %v335_v7 = vld [vmem:[%s12133_s0 + $0x38] sm:$0xff] }
  0x2a   : > { %342 = vst [vmem:[%s12140_s7 + $0x30] sm:$0xff] %v334_v6  ;;  %343 = vst [vmem:[%s12140_s7 + $0x38] sm:$0xff] %v335_v7 }
  0x2b PF: > { %v349_v8 = vld [vmem:[%s12140_s7 + $0x28] sm:$0xff]  ;;  %v348_v9 = vld [vmem:[%s12140_s7 + $0x20] sm:$0xff]  ;;  %v346_v15 = vld [vmem:[%s12140_s7 + $0x10] sm:$0xff]  ;;  %s7913_s29 = smov 112   ;;  %s7914_s30 = smov 113   ;;  %vm872_vm8 = vcmask 130048   ;;  %v392_v39 = vlaneseq }
  0x2c   : > { %vm357_vm0 = vcmp.ge.f32.partialorder %v349_v8, 0.0  ;;  %v365_v11 = vmul.f32 0.01, %v349_v8  ;;  %vm356_vm1 = vcmp.ge.f32.partialorder %v348_v9, 0.0  ;;  %v364_v12 = vmul.f32 0.01, %v348_v9 }
  0x2d   : > { %v345_v14 = vld [vmem:[%s12140_s7 + $0x8] sm:$0xff]  ;;  %v344_v16 = vld [vmem:[%s12140_s7] sm:$0xff]  ;;  %v362_v22 = vmul.f32 0.01, %v346_v15  ;;  %vm354_vm4 = vcmp.ge.f32.partialorder %v346_v15, 0.0  ;;  %s7915_s25 = smov 127  }
  0x2e   : > { %v8056_v17 = vsel %vm357_vm0, %v349_v8, %v365_v11  ;;  %v8058_v18 = vsel %vm356_vm1, %v348_v9, %v364_v12  ;;  %vm353_vm3 = vcmp.ge.f32.partialorder %v345_v14, 0.0  ;;  %v361_v19 = vmul.f32 0.01, %v345_v14  ;;  %v347_v28 = vld [vmem:[%s12140_s7 + $0x18] sm:$0xff]  ;;  %s7916_s14 = smov 1   ;;  %s7917_s16 = smov 15  }
  0x2f   : > { %12890 = vst [vmem:[#allocation2_spill] sm:$0xff] %v8056_v17  ;;  %12891 = vst [vmem:[#allocation3_spill] sm:$0xff] %v8058_v18  ;;  %750 = vrot.lane.b32.xlu0 %v8056_v17, %s7913_s29  ;;  %746 = vrot.lane.b32.xlu1 %v8058_v18, %s7913_s29  ;;  %v360_v23 = vmul.f32 0.01, %v344_v16  ;;  %vm352_vm5 = vcmp.ge.f32.partialorder %v344_v16, 0.0  ;;  %v8072_v24 = vsel %vm354_vm4, %v346_v15, %v362_v22  ;;  %vm355_vm7 = vcmp.ge.f32.partialorder %v347_v28, 0.0 }
  0x30   : > { %v8066_v21 = vsel %vm353_vm3, %v345_v14, %v361_v19  ;;  %12894 = vst [vmem:[#allocation6_spill] sm:$0xff] %v8072_v24  ;;  %v363_v30 = vmul.f32 0.01, %v347_v28  ;;  %s7918_s17 = smov 16   ;;  %s7919_s19 = smov 17   ;;  %v857_v32 = vld [vmem:[%s7973_s8 + $0x8] sm:$0xff] }
  0x31   : > { %v350_v10 = vld [vmem:[%s12140_s7 + $0x30] sm:$0xff]  ;;  %12893 = vst [vmem:[#allocation5_spill] sm:$0xff] %v8066_v21  ;;  %v8074_v25 = vsel %vm352_vm5, %v344_v16, %v360_v23  ;;  %v351_v26 = vld [vmem:[%s12140_s7 + $0x38] sm:$0xff]  ;;  %v874_v33 = vsel %vm872_vm8, %v857_v32, 0  ;;  %s7920_s20 = smov 111   ;;  %v8202_v40 = vshrl.u32 %v392_v39, 7 }
  0x32   : > { %vm358_vm2 = vcmp.ge.f32.partialorder %v350_v10, 0.0  ;;  %v366_v13 = vmul.f32 0.01, %v350_v10  ;;  %12895 = vst [vmem:[#allocation7_spill] sm:$0xff] %v8074_v25  ;;  %v367_v27 = vmul.f32 0.01, %v351_v26  ;;  %v8120_v31 = vsel %vm355_vm7, %v347_v28, %v363_v30 }
  0x33   : > { %748 = vrot.lane.b32.xlu1 %v8066_v21, %s7913_s29  ;;  %vm359_vm6 = vcmp.ge.f32.partialorder %v351_v26, 0.0  ;;  %12897 = vst [vmem:[#allocation9_spill] sm:$0xff] %v8120_v31  ;;  %v8160_v34 = vand.u32 4294901760, %v874_v33  ;;  %v8208_v41 = vand.u32 127, %v392_v39  ;;  %v8211_v42 = vsub.s32 0, %v8202_v40 }
  0x34   : > { %v8064_v20 = vsel %vm358_vm2, %v350_v10, %v366_v13  ;;  %v8114_v29 = vsel %vm359_vm6, %v351_v26, %v367_v27  ;;  %v6920_v43 = vld [vmem:[%s12138_s5 + $0x7] ss:$8 sm:$0xf]  ;;  %v8223_v45 = vsub.s32 1, %v8202_v40 }
  0x35   : > { %12892 = vst [vmem:[#allocation4_spill] sm:$0xff] %v8064_v20  ;;  %754 = vrot.lane.b32.xlu0 %v8064_v20, %s7913_s29  ;;  %12896 = vst [vmem:[#allocation8_spill] sm:$0xff] %v8114_v29  ;;  %v8167_v35 = vsub.f32 %v874_v33, %v8160_v34  ;;  %1257 = vmatprep.mubr.f32.mxu1 %v8160_v34  ;;  %vm760_vm9 = vcmp.lt.s32.totalorder %v8208_v41, 112  ;;  %v775_v44 = vrot.slane %v6920_v43, %v8211_v42  ;;  %v6919_v57 = vld [vmem:[%s12138_s5 + $0x6] ss:$8 sm:$0xf] }
  0x36   : > { %12898 = vst [vmem:[#allocation10_spill] sm:$0xff] %v8160_v34  ;;  %v779_v50 = vrot.slane %v6920_v43, %v8223_v45  ;;  %v723_v63 = vrot.slane %v6919_v57, %v8223_v45  ;;  %vm704_vm10 = vcmp.lt.s32.totalorder %v8208_v41, 113  ;;  %v719_v10 = vrot.slane %v6919_v57, %v8211_v42  ;;  %v6917_v16 = vld [vmem:[%s12138_s5 + $0x4] ss:$8 sm:$0xf] }
  0x37   : > { %744 = vrot.lane.b32.xlu1 %v8074_v25, %s7913_s29  ;;  %12899 = vst [vmem:[#allocation11_spill] sm:$0xff] %v8167_v35  ;;  %v8171_v36 = vand.u32 4294901760, %v8167_v35  ;;  %v6918_v43 = vld [vmem:[%s12138_s5 + $0x5] ss:$8 sm:$0xf]  ;;  %vm648_vm11 = vcmp.lt.s32.totalorder %v8208_v41, 127 }
  0x38   : > { %vm561_vm12 = vcmp.lt.s32.totalorder %v8208_v41, 1  ;;  %vm505_vm13 = vcmp.lt.s32.totalorder %v8208_v41, 15  ;;  %vm449_vm14 = vcmp.lt.s32.totalorder %v8208_v41, 16  ;;  %vm394_vm15 = vcmp.lt.s32.totalorder %v8208_v41, 17 }
  0x39   : > { %752 = vrot.lane.b32.xlu0 %v8072_v24, %s7913_s29  ;;  %12900 = vst [vmem:[#allocation12_spill] sm:$0xff] %v8171_v36  ;;  %v982_v37 = vsub.f32 %v8167_v35, %v8171_v36  ;;  %vm816_vm0 = vcmp.lt.s32.totalorder %v8208_v41, 111 }
  0x3b   : > { %698 = vrot.lane.b32.xlu1 %v8064_v20, %s7914_s30  ;;  %v8179_v38 = vand.u32 4294901760, %v982_v37 }
  0x3d   : > { %694 = vrot.lane.b32.xlu0 %v8056_v17, %s7914_s30  ;;  %12901 = vst [vmem:[#allocation13_spill] sm:$0xff] %v8179_v38  ;;  %984 = vmatprep.mubr.f32.mxu0 %v8179_v38 }
  0x3f   : > { %692 = vrot.lane.b32.xlu1 %v8066_v21, %s7914_s30 }
  0x41   : > { %690 = vrot.lane.b32.xlu0 %v8058_v18, %s7914_s30 }
  0x43   : > { %688 = vrot.lane.b32.xlu1 %v8074_v25, %s7914_s30 }
  0x45   : > { %696 = vrot.lane.b32.xlu0 %v8072_v24, %s7914_s30 }
  0x47   : > { %642 = vrot.lane.b32.xlu1 %v8064_v20, %s7915_s25 }
  0x49   : > { %638 = vrot.lane.b32.xlu0 %v8056_v17, %s7915_s25 }
  0x4b   : > { %636 = vrot.lane.b32.xlu1 %v8066_v21, %s7915_s25 }
  0x4d   : > { %634 = vrot.lane.b32.xlu0 %v8058_v18, %s7915_s25 }
  0x4f   : > { %632 = vrot.lane.b32.xlu1 %v8074_v25, %s7915_s25 }
  0x51   : > { %640 = vrot.lane.b32.xlu0 %v8072_v24, %s7915_s25 }
  0x53   : > { %551 = vrot.lane.b32.xlu1 %v8056_v17, %s7916_s14 }
  0x55   : > { %547 = vrot.lane.b32.xlu0 %v8058_v18, %s7916_s14 }
  0x57   : > { %545 = vrot.lane.b32.xlu1 %v8074_v25, %s7916_s14 }
  0x59   : > { %559 = vrot.lane.b32.xlu0 %v8114_v29, %s7916_s14 }
  0x5b   : > { %557 = vrot.lane.b32.xlu1 %v8120_v31, %s7916_s14 }
  0x5d   : > { %549 = vrot.lane.b32.xlu0 %v8066_v21, %s7916_s14 }
  0x5f   : > { %495 = vrot.lane.b32.xlu1 %v8056_v17, %s7917_s16 }
  0x61   : > { %491 = vrot.lane.b32.xlu0 %v8058_v18, %s7917_s16 }
  0x63   : > { %489 = vrot.lane.b32.xlu1 %v8074_v25, %s7917_s16 }
  0x65   : > { %503 = vrot.lane.b32.xlu0 %v8114_v29, %s7917_s16 }
  0x67   : > { %501 = vrot.lane.b32.xlu1 %v8120_v31, %s7917_s16 }
  0x69   : > { %493 = vrot.lane.b32.xlu0 %v8066_v21, %s7917_s16 }
  0x6b   : > { %439 = vrot.lane.b32.xlu1 %v8056_v17, %s7918_s17 }
  0x6d   : > { %435 = vrot.lane.b32.xlu0 %v8058_v18, %s7918_s17 }
  0x6f   : > { %433 = vrot.lane.b32.xlu1 %v8074_v25, %s7918_s17 }
  0x71   : > { %447 = vrot.lane.b32.xlu0 %v8114_v29, %s7918_s17 }
  0x73   : > { %445 = vrot.lane.b32.xlu1 %v8120_v31, %s7918_s17 }
  0x75   : > { %437 = vrot.lane.b32.xlu0 %v8066_v21, %s7918_s17 }
  0x77   : > { %382 = vrot.lane.b32.xlu1 %v8056_v17, %s7919_s19 }
  0x79   : > { %378 = vrot.lane.b32.xlu0 %v8058_v18, %s7919_s19 }
  0x7b   : > { %376 = vrot.lane.b32.xlu1 %v8074_v25, %s7919_s19 }
  0x7d   : > { %390 = vrot.lane.b32.xlu0 %v8114_v29, %s7919_s19 }
  0x7f   : > { %388 = vrot.lane.b32.xlu1 %v8120_v31, %s7919_s19 }
  0x81   : > { %380 = vrot.lane.b32.xlu0 %v8066_v21, %s7919_s19 }
  0x83   : > { %810 = vrot.lane.b32.xlu1 %v8064_v20, %s7920_s20 }
  0x85   : > { %806 = vrot.lane.b32.xlu0 %v8056_v17, %s7920_s20 }
  0x87   : > { %804 = vrot.lane.b32.xlu1 %v8066_v21, %s7920_s20 }
  0x89   : > { %802 = vrot.lane.b32.xlu0 %v8058_v18, %s7920_s20 }
  0x8b   : > { %800 = vrot.lane.b32.xlu1 %v8074_v25, %s7920_s20 }
  0x8d   : > { %808 = vrot.lane.b32.xlu0 %v8072_v24, %s7920_s20 }
  0x8f   : > { %756 = vrot.lane.b32.xlu1 %v8120_v31, %s7913_s29 }
  0x91   : > { %758 = vrot.lane.b32.xlu0 %v8114_v29, %s7913_s29 }
  0x93   : > { %700 = vrot.lane.b32.xlu1 %v8120_v31, %s7914_s30 }
  0x95   : > { %702 = vrot.lane.b32.xlu0 %v8114_v29, %s7914_s30 }
  0x97   : > { %644 = vrot.lane.b32.xlu1 %v8120_v31, %s7915_s25 }
  0x99   : > { %646 = vrot.lane.b32.xlu0 %v8114_v29, %s7915_s25 }
  0x9b   : > { %553 = vrot.lane.b32.xlu1 %v8072_v24, %s7916_s14 }
  0x9d   : > { %555 = vrot.lane.b32.xlu0 %v8064_v20, %s7916_s14 }
  0x9f   : > { %497 = vrot.lane.b32.xlu1 %v8072_v24, %s7917_s16 }
  0xa1   : > { %499 = vrot.lane.b32.xlu0 %v8064_v20, %s7917_s16  ;;  %v751_v46 = vpop.permute.xlu0 %750  ;;  %v8225_v47 = vpop.permute.xlu1 %746 }
  0xa2   : > { %12902 = vst [vmem:[#allocation14_spill] sm:$0xff] %v8225_v47  ;;  %v766_v48 = vsel %vm760_vm9, %v8225_v47, %v751_v46 }
  0xa3   : > { %v796_v49 = vmul.f32 %v775_v44, %v766_v48  ;;  %441 = vrot.lane.b32.xlu1 %v8072_v24, %s7918_s17  ;;  %v607_v48 = vrot.slane %v6917_v16, %v8211_v42 }
  0xa5   : > { %443 = vrot.lane.b32.xlu0 %v8064_v20, %s7918_s17  ;;  %v8235_v51 = vand.u32 4294901760, %v796_v49  ;;  %v749_v53 = vpop.permute.xlu1 %748 }
  0xa7   : > { %v8237_v52 = vpop.permute.xlu0 %754  ;;  %v8243_v55 = vsub.f32 %v796_v49, %v8235_v51  ;;  %384 = vrot.lane.b32.xlu1 %v8072_v24, %s7919_s19 }
  0xa8   : > { %12903 = vst [vmem:[#allocation15_spill] sm:$0xff] %v8237_v52  ;;  %v764_v54 = vsel %vm760_vm9, %v751_v46, %v8237_v52  ;;  %v611_v46 = vrot.slane %v6917_v16, %v8223_v45 }
  0xa9   : > { %v797_v56 = vmul.f32 %v779_v50, %v764_v54  ;;  %386 = vrot.lane.b32.xlu0 %v8064_v20, %s7919_s19  ;;  %v8256_v60 = vpop.permute.xlu1 %744  ;;  %v12145_v0 = vand.u32 4294901760, %v8243_v55 }
  0xaa   : > { %12905 = vst [vmem:[#allocation17_spill] sm:$0xff] %v8256_v60  ;;  %v765_v62 = vsel %vm760_vm9, %v8256_v60, %v749_v53 }
  0xab   : > { %v8252_v58 = vand.u32 4294901760, %v797_v56  ;;  %v8254_v59 = vpop.permute.xlu0 %752  ;;  %v792_v3 = vmul.f32 %v775_v44, %v765_v62  ;;  %812 = vrot.lane.b32.xlu1 %v8120_v31, %s7920_s20  ;;  %v1021_v11 = vsub.f32 %v8243_v55, %v12145_v0 }
  0xac   : > { %12904 = vst [vmem:[#allocation16_spill] sm:$0xff] %v8254_v59  ;;  %v763_v61 = vsel %vm760_vm9, %v749_v53, %v8254_v59 }
  0xad   : > { %v8267_v1 = vsub.f32 %v797_v56, %v8252_v58  ;;  %v793_v2 = vmul.f32 %v779_v50, %v763_v61  ;;  %880 = vmatprep.subr.mxu0 %v8252_v58  ;;  %814 = vrot.lane.b32.xlu0 %v8114_v29, %s7920_s20  ;;  %v8278_v5 = vand.u32 4294901760, %v792_v3  ;;  %v8280_v7 = vpop.permute.xlu1 %698  ;;  %v1022_v32 = vand.u32 4294901760, %v1021_v11 }
  0xae   : > { %882 = vmatpush1.msra.mxu0 %v8235_v51  ;;  %12906 = vst [vmem:[#allocation18_spill] sm:$0xff] %v8280_v7 }
  0xaf   : > { %v8276_v4 = vand.u32 4294901760, %v793_v2  ;;  %v695_v6 = vpop.permute.xlu0 %694  ;;  %v12146_v8 = vand.u32 4294901760, %v8267_v1  ;;  %v8294_v13 = vsub.f32 %v792_v3, %v8278_v5 }
  0xb0   : > { %v708_v9 = vsel %vm704_vm10, %v695_v6, %v8280_v7 }
  0xb1   : > { %v8291_v12 = vsub.f32 %v793_v2, %v8276_v4  ;;  %v741_v14 = vmul.f32 %v723_v63, %v708_v9  ;;  %884 = vmatprep.subr.mxu0 %v8276_v4  ;;  %v1015_v15 = vsub.f32 %v8267_v1, %v12146_v8  ;;  %v693_v23 = vpop.permute.xlu1 %692  ;;  %v12142_v28 = vand.u32 4294901760, %v8294_v13 }
  0xb2   : > { %886 = vmatpush1.msra.mxu0 %v8278_v5  ;;  %v667_v2 = vrot.slane %v6918_v43, %v8223_v45 }
  0xb3   : > { %v8304_v19 = vand.u32 4294901760, %v741_v14  ;;  %v8306_v22 = vpop.permute.xlu0 %690  ;;  %v1016_v26 = vand.u32 4294901760, %v1015_v15  ;;  %v12144_v27 = vand.u32 4294901760, %v8291_v12  ;;  %v1033_v44 = vsub.f32 %v8294_v13, %v12142_v28 }
  0xb4   : > { %12907 = vst [vmem:[#allocation19_spill] sm:$0xff] %v8306_v22  ;;  %v710_v30 = vsel %vm704_vm10, %v8306_v22, %v695_v6  ;;  %v628_v15 = vmul.f32 %v607_v48, %v8058_v18 }
  0xb5   : > { %v8314_v33 = vsub.f32 %v741_v14, %v8304_v19  ;;  %v740_v37 = vmul.f32 %v719_v10, %v710_v30  ;;  %888 = vmatprep.subr.mxu0 %v8304_v19  ;;  %1017 = vmatprep.subr.mxu1 %v1016_v26  ;;  %v1027_v39 = vsub.f32 %v8291_v12, %v12144_v27  ;;  %v8332_v53 = vpop.permute.xlu1 %688  ;;  %v1034_v62 = vand.u32 4294901760, %v1033_v44 }
  0xb6   : > { %1023 = vmatpush1.msra.mxu1 %v1022_v32  ;;  %12909 = vst [vmem:[#allocation21_spill] sm:$0xff] %v8332_v53  ;;  %v709_v61 = vsel %vm704_vm10, %v8332_v53, %v693_v23  ;;  %v629_v14 = vmul.f32 %v611_v46, %v8056_v17 }
  0xb7   : > { %v8328_v49 = vand.u32 4294901760, %v740_v37  ;;  %v8330_v50 = vpop.permute.xlu0 %696  ;;  %v1028_v54 = vand.u32 4294901760, %v1027_v39  ;;  %v12141_v56 = vand.u32 4294901760, %v8314_v33  ;;  %v736_v9 = vmul.f32 %v719_v10, %v709_v61 }
  0xb8   : > { %12908 = vst [vmem:[#allocation20_spill] sm:$0xff] %v8330_v50  ;;  %v707_v57 = vsel %vm704_vm10, %v693_v23, %v8330_v50  ;;  %v625_v39 = vmul.f32 %v611_v46, %v8066_v21  ;;  %v624_v46 = vmul.f32 %v607_v48, %v8074_v25 }
  0xb9   : > { %v8343_v3 = vsub.f32 %v740_v37, %v8328_v49  ;;  %v737_v6 = vmul.f32 %v723_v63, %v707_v57  ;;  %890 = vmatpush1.msra.mxu0 %v8328_v49  ;;  %1029 = vmatprep.subr.mxu1 %v1028_v54  ;;  %v1039_v11 = vsub.f32 %v8314_v33, %v12141_v56  ;;  %v8354_v23 = vand.u32 4294901760, %v736_v9  ;;  %v8356_v10 = vpop.permute.xlu1 %642 }
  0xba   : > { %1035 = vmatpush1.msra.mxu1 %v1034_v62  ;;  %12910 = vst [vmem:[#allocation22_spill] sm:$0xff] %v8356_v10  ;;  %v663_v37 = vrot.slane %v6918_v43, %v8211_v42  ;;  %v8375_v62 = vand.u32 4294901760, %v629_v14  ;;  %v8377_v43 = vand.u32 4294901760, %v628_v15  ;;  %v8394_v48 = vand.u32 4294901760, %v625_v39 }
  0xbb   : > { %v8352_v16 = vand.u32 4294901760, %v737_v6  ;;  %v639_v63 = vpop.permute.xlu0 %638  ;;  %v12143_v26 = vand.u32 4294901760, %v8343_v3  ;;  %v1040_v32 = vand.u32 4294901760, %v1039_v11  ;;  %v8368_v54 = vsub.f32 %v736_v9, %v8354_v23 }
  0xbc   : > { %v652_v30 = vsel %vm648_vm11, %v639_v63, %v8356_v10  ;;  %12911 = vst [vmem:[#allocation23_spill] sm:$0xff] %v8375_v62  ;;  %12912 = vst [vmem:[#allocation24_spill] sm:$0xff] %v8377_v43  ;;  %v8406_v8 = vand.u32 4294901760, %v624_v46  ;;  %v8409_v17 = vsub.f32 %v629_v14, %v8375_v62  ;;  %v8432_v38 = vsub.f32 %v625_v39, %v8394_v48 }
  0xbd   : > { %v8365_v44 = vsub.f32 %v737_v6, %v8352_v16  ;;  %v685_v57 = vmul.f32 %v667_v2, %v652_v30  ;;  %892 = vmatprep.subr.mxu0 %v8352_v16  ;;  %v1045_v61 = vsub.f32 %v8343_v3, %v12143_v26  ;;  %1041 = vmatprep.subr.mxu1 %v1040_v32  ;;  %v637_v11 = vpop.permute.xlu1 %636  ;;  %v12151_v28 = vand.u32 4294901760, %v8368_v54  ;;  %v8392_v26 = vld [vmem:[%s12138_s5 + $0x3] ss:$8 sm:$0xf] }
  0xbe   : > { %894 = vmatpush1.msra.mxu0 %v8354_v23  ;;  %12915 = vst [vmem:[#allocation27_spill] sm:$0xff] %v8392_v26  ;;  %12916 = vst [vmem:[#allocation28_spill] sm:$0xff] %v8394_v48 }
  0xbf   : > { %v8380_v6 = vand.u32 4294901760, %v685_v57  ;;  %v8382_v9 = vpop.permute.xlu0 %634  ;;  %v1046_v30 = vand.u32 4294901760, %v1045_v61  ;;  %v12150_v56 = vand.u32 4294901760, %v8365_v44  ;;  %12917 = vst [vmem:[#allocation29_spill] sm:$0xff] %v8406_v8 }
  0xc0   : > { %12914 = vst [vmem:[#allocation26_spill] sm:$0xff] %v8382_v9  ;;  %v654_v32 = vsel %vm648_vm11, %v8382_v9, %v639_v63  ;;  %v1057_v63 = vsub.f32 %v8368_v54, %v12151_v28 }
  0xc1   : > { %12913 = vst [vmem:[#allocation25_spill] sm:$0xff] %v8380_v6  ;;  %v8397_v27 = vsub.f32 %v685_v57, %v8380_v6  ;;  %v684_v0 = vmul.f32 %v663_v37, %v654_v32  ;;  %896 = vmatprep.subr.mxu0 %v8380_v6  ;;  %1047 = vmatpush1.msra.mxu1 %v1046_v30  ;;  %v8418_v30 = vpop.permute.xlu1 %632 }
  0xc2   : > { %v1051_v61 = vsub.f32 %v8365_v44, %v12150_v56  ;;  %v8412_v57 = vsub.f32 %v628_v15, %v8377_v43  ;;  %12920 = vst [vmem:[#allocation32_spill] sm:$0xff] %v8418_v30  ;;  %v8422_v56 = vrot.slane %v8392_v26, %v8223_v45  ;;  %v653_v15 = vsel %vm648_vm11, %v8418_v30, %v637_v11 }
  0xc3   : > { %v8414_v32 = vand.u32 4294901760, %v684_v0  ;;  %v8416_v18 = vpop.permute.xlu0 %640  ;;  %v12158_v28 = vand.u32 4294901760, %v8397_v27  ;;  %v1058_v25 = vand.u32 4294901760, %v1057_v63  ;;  %v680_v9 = vmul.f32 %v663_v37, %v653_v15 }
  0xc4   : > { %12919 = vst [vmem:[#allocation31_spill] sm:$0xff] %v8416_v18  ;;  %v1052_v21 = vand.u32 4294901760, %v1051_v61  ;;  %v651_v14 = vsel %vm648_vm11, %v637_v11, %v8416_v18  ;;  %v8445_v63 = vsub.f32 %v624_v46, %v8406_v8 }
  0xc5   : > { %12918 = vst [vmem:[#allocation30_spill] sm:$0xff] %v8414_v32  ;;  %v8435_v61 = vsub.f32 %v684_v0, %v8414_v32  ;;  %v681_v34 = vmul.f32 %v667_v2, %v651_v14  ;;  %898 = vmatpush1.msra.mxu0 %v8414_v32  ;;  %v1063_v53 = vsub.f32 %v8397_v27, %v12158_v28  ;;  %v8449_v2 = vand.u32 4294901760, %v680_v9 }
  0xc6   : > { %1053 = vmatprep.subr.mxu1 %v1052_v21  ;;  %v8451_v21 = vpop.permute.xlu1 %551  ;;  %v576_v28 = vrot.slane %v8392_v26, %v8211_v42 }
  0xc7   : > { %1059 = vmatpush1.msra.mxu1 %v1058_v25  ;;  %v8447_v0 = vand.u32 4294901760, %v681_v34  ;;  %12922 = vst [vmem:[#allocation34_spill] sm:$0xff] %v8449_v2  ;;  %v548_v37 = vpop.permute.xlu0 %547  ;;  %12923 = vst [vmem:[#allocation35_spill] sm:$0xff] %v8451_v21  ;;  %v12163_v25 = vand.u32 4294901760, %v8435_v61  ;;  %v1064_v15 = vand.u32 4294901760, %v1063_v53  ;;  %v8464_v11 = vsub.f32 %v680_v9, %v8449_v2 }
  0xc8   : > { %v567_v14 = vsel %vm561_vm12, %v548_v37, %v8451_v21  ;;  %v12924_v53 = vand.u32 4294901760, %v8409_v17 }
  0xc9   : > { %12921 = vst [vmem:[#allocation33_spill] sm:$0xff] %v8447_v0  ;;  %v8461_v39 = vsub.f32 %v681_v34, %v8447_v0  ;;  %v598_v30 = vmul.f32 %v8422_v56, %v567_v14  ;;  %900 = vmatprep.subr.mxu0 %v8447_v0  ;;  %v1069_v21 = vsub.f32 %v8435_v61, %v12163_v25  ;;  %v12925_v34 = vand.u32 4294901760, %v8412_v57 }
  0xca   : > { %1065 = vmatprep.subr.mxu1 %v1064_v15  ;;  %902 = vmatpush1.msra.mxu0 %v8449_v2  ;;  %v1087_v46 = vsub.f32 %v8409_v17, %v12924_v53  ;;  %v546_v25 = vpop.permute.xlu1 %545  ;;  %v12175_v50 = vand.u32 4294901760, %v8464_v11 }
  0xcb   : > { %v1093_v9 = vsub.f32 %v8412_v57, %v12925_v34  ;;  %v8479_v14 = vand.u32 4294901760, %v598_v30  ;;  %v8481_v10 = vpop.permute.xlu0 %559  ;;  %904 = vmatprep.subr.mxu0 %v8375_v62  ;;  %v1070_v15 = vand.u32 4294901760, %v1069_v21  ;;  %v12170_v22 = vand.u32 4294901760, %v8461_v39 }
  0xcc   : > { %12927 = vst [vmem:[#allocation37_spill] sm:$0xff] %v8481_v10  ;;  %v569_v53 = vsel %vm561_vm12, %v8481_v10, %v548_v37  ;;  %906 = vmatpush1.msra.mxu0 %v8377_v43  ;;  %v12928_v34 = vand.u32 4294901760, %v8432_v38  ;;  %v8503_v37 = vld [vmem:[%s12138_s5 + $0x2] ss:$8 sm:$0xf]  ;;  %v12930_v10 = vand.u32 4294901760, %v8445_v63 }
  0xcd   : > { %12926 = vst [vmem:[#allocation36_spill] sm:$0xff] %v8479_v14  ;;  %v8494_v7 = vsub.f32 %v598_v30, %v8479_v14  ;;  %v597_v60 = vmul.f32 %v576_v28, %v569_v53  ;;  %908 = vmatprep.subr.mxu0 %v8394_v48  ;;  %1071 = vmatpush1.msra.mxu1 %v1070_v15  ;;  %12929 = vst [vmem:[#allocation38_spill] sm:$0xff] %v8503_v37  ;;  %v1094_v53 = vand.u32 4294901760, %v1093_v9 }
  0xce   : > { %v1099_v18 = vsub.f32 %v8432_v38, %v12928_v34  ;;  %v1075_v21 = vsub.f32 %v8461_v39, %v12170_v22  ;;  %910 = vmatpush1.msra.mxu0 %v8406_v8  ;;  %v1081_v30 = vsub.f32 %v8464_v11, %v12175_v50  ;;  %v1088_v34 = vand.u32 4294901760, %v1087_v46  ;;  %v8516_v52 = vpop.permute.xlu1 %557 }
  0xcf   : > { %v1105_v15 = vsub.f32 %v8445_v63, %v12930_v10  ;;  %v8512_v59 = vand.u32 4294901760, %v597_v60  ;;  %v8514_v22 = vpop.permute.xlu0 %549  ;;  %12933 = vst [vmem:[#allocation41_spill] sm:$0xff] %v8516_v52  ;;  %912 = vmatprep.subr.mxu0 %v8479_v14  ;;  %v568_v10 = vsel %vm561_vm12, %v8516_v52, %v546_v25  ;;  %v524_v50 = vrot.slane %v8503_v37, %v8223_v45 }
  0xd0   : > { %12932 = vst [vmem:[#allocation40_spill] sm:$0xff] %v8514_v22  ;;  %v1076_v26 = vand.u32 4294901760, %v1075_v21  ;;  %v566_v46 = vsel %vm561_vm12, %v546_v25, %v8514_v22  ;;  %v1082_v9 = vand.u32 4294901760, %v1081_v30  ;;  %v593_v24 = vmul.f32 %v576_v28, %v568_v10 }
  0xd1   : > { %12931 = vst [vmem:[#allocation39_spill] sm:$0xff] %v8512_v59  ;;  %v8530_v31 = vsub.f32 %v597_v60, %v8512_v59  ;;  %v594_v21 = vmul.f32 %v8422_v56, %v566_v46  ;;  %914 = vmatpush1.msra.mxu0 %v8512_v59  ;;  %v1100_v47 = vand.u32 4294901760, %v1099_v18  ;;  %v1106_v22 = vand.u32 4294901760, %v1105_v15 }
  0xd2   : > { %1077 = vmatprep.subr.mxu1 %v1076_v26  ;;  %v12934_v20 = vand.u32 4294901760, %v8494_v7  ;;  %v8539_v52 = vand.u32 4294901760, %v593_v24  ;;  %v8541_v60 = vpop.permute.xlu1 %495  ;;  %v520_v56 = vrot.slane %v8503_v37, %v8211_v42 }
  0xd3   : > { %1083 = vmatpush1.msra.mxu1 %v1082_v9  ;;  %v8537_v30 = vand.u32 4294901760, %v594_v21  ;;  %v492_v29 = vpop.permute.xlu0 %491  ;;  %12937 = vst [vmem:[#allocation44_spill] sm:$0xff] %v8541_v60  ;;  %v12186_v28 = vand.u32 4294901760, %v8530_v31 }
  0xd4   : > { %v1111_v25 = vsub.f32 %v8494_v7, %v12934_v20  ;;  %12936 = vst [vmem:[#allocation43_spill] sm:$0xff] %v8539_v52  ;;  %1089 = vmatprep.subr.mxu1 %v1088_v34  ;;  %v511_v18 = vsel %vm505_vm13, %v492_v29, %v8541_v60  ;;  %v8553_v26 = vsub.f32 %v593_v24, %v8539_v52  ;;  %v8582_v60 = vld [vmem:[%s12138_s5 + $0x1] ss:$8 sm:$0xf] }
  0xd5   : > { %12935 = vst [vmem:[#allocation42_spill] sm:$0xff] %v8537_v30  ;;  %1095 = vmatpush1.msra.mxu1 %v1094_v53  ;;  %v8550_v20 = vsub.f32 %v594_v21, %v8537_v30  ;;  %v542_v15 = vmul.f32 %v524_v50, %v511_v18  ;;  %916 = vmatprep.subr.mxu0 %v8537_v30 }
  0xd6   : > { %12938 = vst [vmem:[#allocation45_spill] sm:$0xff] %v8553_v26  ;;  %1101 = vmatprep.subr.mxu1 %v1100_v47  ;;  %v1112_v34 = vand.u32 4294901760, %v1111_v25  ;;  %918 = vmatpush1.msra.mxu0 %v8539_v52  ;;  %v1117_v53 = vsub.f32 %v8530_v31, %v12186_v28  ;;  %v490_v9 = vpop.permute.xlu1 %489  ;;  %v12190_v21 = vand.u32 4294901760, %v8553_v26 }
  0xd7   : > { %1107 = vmatpush1.msra.mxu1 %v1106_v22  ;;  %v8560_v46 = vand.u32 4294901760, %v542_v15  ;;  %v8562_v10 = vpop.permute.xlu0 %503  ;;  %v12189_v24 = vand.u32 4294901760, %v8550_v20 }
  0xd8   : > { %12940 = vst [vmem:[#allocation47_spill] sm:$0xff] %v8562_v10  ;;  %1113 = vmatprep.subr.mxu1 %v1112_v34  ;;  %v513_v47 = vsel %vm505_vm13, %v8562_v10, %v492_v29  ;;  %v1118_v25 = vand.u32 4294901760, %v1117_v53  ;;  %v1129_v34 = vsub.f32 %v8553_v26, %v12190_v21 }
  0xd9   : > { %12939 = vst [vmem:[#allocation46_spill] sm:$0xff] %v8560_v46  ;;  %v8570_v22 = vsub.f32 %v542_v15, %v8560_v46  ;;  %v541_v18 = vmul.f32 %v520_v56, %v513_v47  ;;  %920 = vmatprep.subr.mxu0 %v8560_v46  ;;  %v1123_v28 = vsub.f32 %v8550_v20, %v12189_v24 }
  0xda   : > { %1119 = vmatpush1.msra.mxu1 %v1118_v25  ;;  %v8588_v53 = vpop.permute.xlu1 %501  ;;  %v1130_v10 = vand.u32 4294901760, %v1129_v34  ;;  %v468_v25 = vrot.slane %v8582_v60, %v8223_v45 }
  0xdb   : > { %12941 = vst [vmem:[#allocation48_spill] sm:$0xff] %v8570_v22  ;;  %v8584_v29 = vand.u32 4294901760, %v541_v18  ;;  %v8586_v15 = vpop.permute.xlu0 %493  ;;  %12944 = vst [vmem:[#allocation51_spill] sm:$0xff] %v8588_v53  ;;  %v1124_v47 = vand.u32 4294901760, %v1123_v28  ;;  %v12203_v24 = vand.u32 4294901760, %v8570_v22  ;;  %v512_v37 = vsel %vm505_vm13, %v8588_v53, %v490_v9 }
  0xdc   : > { %12943 = vst [vmem:[#allocation50_spill] sm:$0xff] %v8586_v15  ;;  %v510_v21 = vsel %vm505_vm13, %v490_v9, %v8586_v15  ;;  %v537_v34 = vmul.f32 %v520_v56, %v512_v37  ;;  %v7921_v9 = vmov 0   ;;  %v860_v37 = vld [vmem:[%s7978_s11] sm:$0xff] }
  0xdd   : > { %12942 = vst [vmem:[#allocation49_spill] sm:$0xff] %v8584_v29  ;;  %v8601_v36 = vsub.f32 %v541_v18, %v8584_v29  ;;  %v538_v28 = vmul.f32 %v524_v50, %v510_v21  ;;  %922 = vmatpush1.msra.mxu0 %v8584_v29  ;;  %1125 = vmatprep.subr.mxu1 %v1124_v47 }
  0xde   : > { %1131 = vmatpush1.msra.mxu1 %v1130_v10  ;;  %v1135_v15 = vsub.f32 %v8570_v22, %v12203_v24  ;;  %7893 = vset.pattern.permute.xlu0 %v7921_v9  ;;  %v8609_v46 = vand.u32 4294901760, %v537_v34  ;;  %v8611_v30 = vpop.permute.xlu1 %439  ;;  %v464_v21 = vrot.slane %v8582_v60, %v8211_v42 }
  0xdf   : > { %12945 = vst [vmem:[#allocation52_spill] sm:$0xff] %v8601_v36  ;;  %v8607_v53 = vand.u32 4294901760, %v538_v28  ;;  %v436_v52 = vpop.permute.xlu0 %435  ;;  %v12210_v50 = vand.u32 4294901760, %v8601_v36  ;;  %7894 = vset.pattern.permute.xlu1 %v7921_v9  ;;  %864 = vperm.xlu0 %7893, %v860_v37  }
  0xe0   : > { %12947 = vst [vmem:[#allocation54_spill] sm:$0xff] %v8609_v46  ;;  %v455_v56 = vsel %vm449_vm14, %v436_v52, %v8611_v30  ;;  %v1136_v10 = vand.u32 4294901760, %v1135_v15  ;;  %v8624_v47 = vsub.f32 %v537_v34, %v8609_v46 }
  0xe1   : > { %12946 = vst [vmem:[#allocation53_spill] sm:$0xff] %v8607_v53  ;;  %v8621_v18 = vsub.f32 %v538_v28, %v8607_v53  ;;  %v486_v24 = vmul.f32 %v468_v25, %v455_v56  ;;  %924 = vmatprep.subr.mxu0 %v8607_v53  ;;  %v1141_v9 = vsub.f32 %v8601_v36, %v12210_v50 }
  0xe2   : > { %12949 = vst [vmem:[#allocation56_spill] sm:$0xff] %v8624_v47  ;;  %1137 = vmatprep.subr.mxu1 %v1136_v10  ;;  %926 = vmatpush1.msra.mxu0 %v8609_v46  ;;  %v434_v37 = vpop.permute.xlu1 %433  ;;  %v12220_v34 = vand.u32 4294901760, %v8624_v47 }
  0xe3   : > { %12948 = vst [vmem:[#allocation55_spill] sm:$0xff] %v8621_v18  ;;  %v8631_v15 = vand.u32 4294901760, %v486_v24  ;;  %v8633_v29 = vpop.permute.xlu0 %447  ;;  %v1142_v28 = vand.u32 4294901760, %v1141_v9  ;;  %v12215_v59 = vand.u32 4294901760, %v8621_v18 }
  0xe4   : > { %v457_v56 = vsel %vm449_vm14, %v8633_v29, %v436_v52  ;;  %v8650_v9 = vld [vmem:[%s12138_s5] ss:$8 sm:$0xf]  ;;  %v1153_v52 = vsub.f32 %v8624_v47, %v12220_v34 }
  0xe5   : > { %12950 = vst [vmem:[#allocation57_spill] sm:$0xff] %v8631_v15  ;;  %v8641_v53 = vsub.f32 %v486_v24, %v8631_v15  ;;  %v485_v10 = vmul.f32 %v464_v21, %v457_v56  ;;  %928 = vmatprep.subr.mxu0 %v8631_v15  ;;  %1143 = vmatpush1.msra.mxu1 %v1142_v28 }
  0xe6   : > { %v1147_v50 = vsub.f32 %v8621_v18, %v12215_v59  ;;  %v8659_v56 = vpop.permute.xlu1 %445  ;;  %v1154_v8 = vand.u32 4294901760, %v1153_v52  ;;  %v412_v34 = vrot.slane %v8650_v9, %v8223_v45 }
  0xe7   : > { %12951 = vst [vmem:[#allocation58_spill] sm:$0xff] %v8641_v53  ;;  %v8655_v46 = vand.u32 4294901760, %v485_v10  ;;  %v8657_v24 = vpop.permute.xlu0 %437  ;;  %v12231_v15 = vand.u32 4294901760, %v8641_v53  ;;  %v456_v14 = vsel %vm449_vm14, %v8659_v56, %v434_v37 }
  0xe8   : > { %v1148_v28 = vand.u32 4294901760, %v1147_v50  ;;  %v454_v59 = vsel %vm449_vm14, %v434_v37, %v8657_v24  ;;  %v481_v62 = vmul.f32 %v464_v21, %v456_v14 }
  0xe9   : > { %12952 = vst [vmem:[#allocation59_spill] sm:$0xff] %v8655_v46  ;;  %v8671_v48 = vsub.f32 %v485_v10, %v8655_v46  ;;  %v482_v43 = vmul.f32 %v468_v25, %v454_v59  ;;  %930 = vmatpush1.msra.mxu0 %v8655_v46  ;;  %v1159_v50 = vsub.f32 %v8641_v53, %v12231_v15 }
  0xea   : > { %1149 = vmatprep.subr.mxu1 %v1148_v28  ;;  %v8680_v52 = vand.u32 4294901760, %v481_v62  ;;  %v8682_v0 = vpop.permute.xlu1 %382 }
  0xeb   : > { %12953 = vst [vmem:[#allocation60_spill] sm:$0xff] %v8671_v48  ;;  %1155 = vmatpush1.msra.mxu1 %v1154_v8  ;;  %v8678_v37 = vand.u32 4294901760, %v482_v43  ;;  %v379_v2 = vpop.permute.xlu0 %378  ;;  %12956 = vst [vmem:[#allocation63_spill] sm:$0xff] %v8682_v0  ;;  %v12241_v59 = vand.u32 4294901760, %v8671_v48  ;;  %v1160_v25 = vand.u32 4294901760, %v1159_v50  ;;  %v408_v8 = vrot.slane %v8650_v9, %v8211_v42 }
  0xec   : > { %12955 = vst [vmem:[#allocation62_spill] sm:$0xff] %v8680_v52  ;;  %v400_v14 = vsel %vm394_vm15, %v379_v2, %v8682_v0  ;;  %v8694_v10 = vsub.f32 %v481_v62, %v8680_v52  ;;  %v859_v0 = vld [vmem:[%s7973_s8 + $0x18] sm:$0xff] }
  0xed   : > { %12954 = vst [vmem:[#allocation61_spill] sm:$0xff] %v8678_v37  ;;  %v8691_v21 = vsub.f32 %v482_v43, %v8678_v37  ;;  %v430_v28 = vmul.f32 %v412_v34, %v400_v14  ;;  %932 = vmatprep.subr.mxu0 %v8678_v37  ;;  %v1165_v15 = vsub.f32 %v8671_v48, %v12241_v59  ;;  %v856_v14 = vld [vmem:[%s7973_s8] sm:$0xff] }
  0xee   : > { %12958 = vst [vmem:[#allocation65_spill] sm:$0xff] %v8694_v10  ;;  %1161 = vmatprep.subr.mxu1 %v1160_v25  ;;  %934 = vmatpush1.msra.mxu0 %v8680_v52  ;;  %v377_v53 = vpop.permute.xlu1 %376  ;;  %v8722_v62 = vld [vmem:[%s12138_s5 + $0x20] ss:$8 sm:$0xf]  ;;  %v12963_v52 = vand.u32 4294901760, %v8694_v10  ;;  %v8727_v48 = vand.u32 4294901760, %v856_v14 }
  0xef   : > { %12957 = vst [vmem:[#allocation64_spill] sm:$0xff] %v8691_v21  ;;  %v8701_v50 = vand.u32 4294901760, %v430_v28  ;;  %v8703_v46 = vpop.permute.xlu0 %390  ;;  %v1166_v43 = vand.u32 4294901760, %v1165_v15  ;;  %v12248_v47 = vand.u32 4294901760, %v8691_v21  ;;  %12962 = vst [vmem:[#allocation69_spill] sm:$0xff] %v8722_v62  ;;  %v835_v18 = vrot.slane %v8722_v62, %v8223_v45 }
  0xf0   : > { %12960 = vst [vmem:[#allocation67_spill] sm:$0xff] %v8703_v46  ;;  %v402_v37 = vsel %vm394_vm15, %v8703_v46, %v379_v2  ;;  %v1177_v2 = vsub.f32 %v8694_v10, %v12963_v52  ;;  %12964 = vst [vmem:[#allocation70_spill] sm:$0xff] %v8727_v48  ;;  %v8757_v45 = vsub.f32 %v856_v14, %v8727_v48 }
  0xf1   : > { %12959 = vst [vmem:[#allocation66_spill] sm:$0xff] %v8701_v50  ;;  %v8713_v25 = vsub.f32 %v430_v28, %v8701_v50  ;;  %v429_v59 = vmul.f32 %v408_v8, %v402_v37  ;;  %936 = vmatprep.subr.mxu0 %v8701_v50  ;;  %1167 = vmatpush1.msra.mxu1 %v1166_v43 }
  0xf2   : > { %v1171_v15 = vsub.f32 %v8691_v21, %v12248_v47  ;;  %v8733_v43 = vpop.permute.xlu1 %388  ;;  %v877_v21 = vsel %vm872_vm8, %v859_v0, 0  ;;  %v1178_v10 = vand.u32 4294901760, %v1177_v2  ;;  %v858_v0 = vld [vmem:[%s7973_s8 + $0x10] sm:$0xff]  ;;  %12970 = vst [vmem:[#allocation76_spill] sm:$0xff] %v8757_v45 }
  0xf3   : > { %12961 = vst [vmem:[#allocation68_spill] sm:$0xff] %v8713_v25  ;;  %v8729_v28 = vand.u32 4294901760, %v429_v59  ;;  %v8731_v37 = vpop.permute.xlu0 %380  ;;  %12967 = vst [vmem:[#allocation73_spill] sm:$0xff] %v8733_v43  ;;  %v12260_v47 = vand.u32 4294901760, %v8713_v25  ;;  %v401_v52 = vsel %vm394_vm15, %v8733_v43, %v377_v53  ;;  %v8754_v2 = vand.u32 4294901760, %v877_v21 }
  0xf4   : > { %12966 = vst [vmem:[#allocation72_spill] sm:$0xff] %v8731_v37  ;;  %v1172_v50 = vand.u32 4294901760, %v1171_v15  ;;  %v399_v32 = vsel %vm394_vm15, %v377_v53, %v8731_v37  ;;  %v425_v6 = vmul.f32 %v408_v8, %v401_v52 }
  0xf5   : > { %12965 = vst [vmem:[#allocation71_spill] sm:$0xff] %v8729_v28  ;;  %v8746_v46 = vsub.f32 %v429_v59, %v8729_v28  ;;  %v426_v15 = vmul.f32 %v412_v34, %v399_v32  ;;  %938 = vmatpush1.msra.mxu0 %v8729_v28  ;;  %v1183_v53 = vsub.f32 %v8713_v25, %v12260_v47  ;;  %12969 = vst [vmem:[#allocation75_spill] sm:$0xff] %v8754_v2 }
  0xf6   : > { %1173 = vmatprep.subr.mxu1 %v1172_v50  ;;  %v8761_v32 = vand.u32 4294901760, %v425_v6  ;;  %v8763_v8 = vpop.permute.xlu1 %810  ;;  %v831_v47 = vrot.slane %v8722_v62, %v8211_v42  ;;  %v8771_v28 = vand.u32 4294901760, %v858_v0  ;;  %v8785_v42 = vand.u32 4294901760, %v8757_v45 }
  0xf7   : > { %12968 = vst [vmem:[#allocation74_spill] sm:$0xff] %v8746_v46  ;;  %1179 = vmatpush1.msra.mxu1 %v1178_v10  ;;  %v8759_v59 = vand.u32 4294901760, %v426_v15  ;;  %v807_v34 = vpop.permute.xlu0 %806  ;;  %12973 = vst [vmem:[#allocation79_spill] sm:$0xff] %v8763_v8  ;;  %v12272_v50 = vand.u32 4294901760, %v8746_v46  ;;  %v1184_v52 = vand.u32 4294901760, %v1183_v53  ;;  %v8788_v53 = vsub.f32 %v877_v21, %v8754_v2 }
  0xf8   : > { %12972 = vst [vmem:[#allocation78_spill] sm:$0xff] %v8761_v32  ;;  %v820_v10 = vsel %vm816_vm0, %v807_v34, %v8763_v8  ;;  %12974 = vst [vmem:[#allocation80_spill] sm:$0xff] %v8771_v28  ;;  %v8777_v25 = vsub.f32 %v425_v6, %v8761_v32 }
  0xf9   : > { %12971 = vst [vmem:[#allocation77_spill] sm:$0xff] %v8759_v59  ;;  %v8774_v14 = vsub.f32 %v426_v15, %v8759_v59  ;;  %v853_v37 = vmul.f32 %v835_v18, %v820_v10  ;;  %940 = vmatprep.subr.mxu0 %v8759_v59  ;;  %v1189_v43 = vsub.f32 %v8746_v46, %v12272_v50  ;;  %12977 = vst [vmem:[#allocation83_spill] sm:$0xff] %v8785_v42 }
  0xfa   : > { %12976 = vst [vmem:[#allocation82_spill] sm:$0xff] %v8777_v25  ;;  %1185 = vmatprep.subr.mxu1 %v1184_v52  ;;  %942 = vmatpush1.msra.mxu0 %v8761_v32  ;;  %12978 = vst [vmem:[#allocation84_spill] sm:$0xff] %v8788_v53  ;;  %v805_v10 = vpop.permute.xlu1 %804  ;;  %v12281_v62 = vand.u32 4294901760, %v8777_v25  ;;  %v8800_v50 = vsub.f32 %v858_v0, %v8771_v28 }
  0xfb   : > { %12975 = vst [vmem:[#allocation81_spill] sm:$0xff] %v8774_v14  ;;  %v8790_v15 = vand.u32 4294901760, %v853_v37  ;;  %v8792_v6 = vpop.permute.xlu0 %802  ;;  %v1190_v8 = vand.u32 4294901760, %v1189_v43  ;;  %v12282_v59 = vand.u32 4294901760, %v8774_v14 }
  0xfc   : > { %12980 = vst [vmem:[#allocation86_spill] sm:$0xff] %v8792_v6  ;;  %v822_v52 = vsel %vm816_vm0, %v8792_v6, %v807_v34  ;;  %12981 = vst [vmem:[#allocation87_spill] sm:$0xff] %v8800_v50  ;;  %v1201_v2 = vsub.f32 %v8777_v25, %v12281_v62  ;;  %v988_v34 = vsub.f32 %v8757_v45, %v8785_v42 }
  0xfd   : > { %12979 = vst [vmem:[#allocation85_spill] sm:$0xff] %v8790_v15  ;;  %v8803_v21 = vsub.f32 %v853_v37, %v8790_v15  ;;  %v852_v32 = vmul.f32 %v831_v47, %v822_v52  ;;  %972 = vmatprep.subr.mxu0 %v8790_v15  ;;  %1191 = vmatpush1.msra.mxu1 %v1190_v8  ;;  %v8822_v15 = vand.u32 4294901760, %v8788_v53 }
  0xfe   : > { %v1195_v43 = vsub.f32 %v8774_v14, %v12282_v59  ;;  %v8818_v37 = vpop.permute.xlu1 %800  ;;  %v1202_v42 = vand.u32 4294901760, %v1201_v2 }
  0xff   : > { %12982 = vst [vmem:[#allocation88_spill] sm:$0xff] %v8803_v21  ;;  %v8814_v0 = vand.u32 4294901760, %v852_v32  ;;  %v8816_v28 = vpop.permute.xlu0 %808  ;;  %v12295_v8 = vand.u32 4294901760, %v8803_v21  ;;  %12984 = vst [vmem:[#allocation90_spill] sm:$0xff] %v8822_v15  ;;  %v821_v59 = vsel %vm816_vm0, %v8818_v37, %v805_v10 }
 0x100   : > { %12983 = vst [vmem:[#allocation89_spill] sm:$0xff] %v8816_v28  ;;  %v1196_v52 = vand.u32 4294901760, %v1195_v43  ;;  %v819_v62 = vsel %vm816_vm0, %v805_v10, %v8816_v28  ;;  %v848_v14 = vmul.f32 %v831_v47, %v821_v59  ;;  %v8835_v43 = vand.u32 4294901760, %v8800_v50  ;;  %v861_v28 = vld [vmem:[%s7978_s11 + $0x8] sm:$0xff] }
 0x101   : > { %v8831_v45 = vsub.f32 %v852_v32, %v8814_v0  ;;  %v849_v25 = vmul.f32 %v835_v18, %v819_v62  ;;  %974 = vmatpush2.msra.mxu0 %v8814_v0  ;;  %v1235_v46 = vsub.f32 %v8803_v21, %v12295_v8  ;;  %v8849_v47 = vand.u32 4294901760, %v988_v34  ;;  %869 = vperm.xlu1 %7894, %v861_v28  }
 0x102   : > { %1197 = vmatprep.subr.mxu1 %v1196_v52  ;;  %12986 = vst [vmem:[#allocation92_spill] sm:$0xff] %v8835_v43  ;;  %v8843_v2 = vand.u32 4294901760, %v848_v14  ;;  %v8847_v18 = vpop.permute.xlu1 %756  ;;  %v998_v62 = vsub.f32 %v8788_v53, %v8822_v15 }
 0x103   : > { %12985 = vst [vmem:[#allocation91_spill] sm:$0xff] %v8831_v45  ;;  %1203 = vmatpush1.msra.mxu1 %v1202_v42  ;;  %v8841_v6 = vand.u32 4294901760, %v849_v25  ;;  %v8845_v32 = vpop.permute.xlu0 %758  ;;  %12988 = vst [vmem:[#allocation94_spill] sm:$0xff] %v8847_v18  ;;  %v12298_v59 = vand.u32 4294901760, %v8831_v45  ;;  %v1004_v42 = vsub.f32 %v8800_v50, %v8835_v43  ;;  %v1236_v10 = vand.u32 4294901760, %v1235_v46  ;;  %v13009_v18 = vld [vmem:[#allocation30_spill] sm:$0xff] }
 0x104   : > { %12987 = vst [vmem:[#allocation93_spill] sm:$0xff] %v8845_v32  ;;  %12989 = vst [vmem:[#allocation95_spill] sm:$0xff] %v8849_v47  ;;  %v8864_v34 = vand.u32 4294901760, %v998_v62  ;;  %v13010_v32 = vld [vmem:[#allocation63_spill] sm:$0xff] }
 0x105   : > { %976 = vmatprep.subr.mxu0 %v8841_v6  ;;  %1237 = vmatprep.subr.mxu1 %v1236_v10  ;;  %v1241_v28 = vsub.f32 %v8831_v45, %v12298_v59  ;;  %v8871_v46 = vsub.f32 %v849_v25, %v8841_v6 }
 0x106   : > { %978 = vmatpush2.msra.mxu0 %v8843_v2  ;;  %v8860_v8 = vpop.permute.xlu1 %700  ;;  %12992 = vst [vmem:[#allocation98_spill] sm:$0xff] %v8864_v34 }
 0x107   : > { %v8858_v52 = vpop.permute.xlu0 %702  ;;  %12991 = vst [vmem:[#allocation97_spill] sm:$0xff] %v8860_v8  ;;  %1275 = vmatprep.subr.mxu0 %v8267_v1  ;;  %990 = vmatmul.mubr.f32.vlgmr.msra.gmra.mxu0 %v8849_v47  ;;  %12993 = vst [vmem:[#allocation99_spill] sm:$0xff] %v8871_v46  ;;  %v8877_v8 = vand.u32 4294901760, %v1004_v42  ;;  %v1242_v59 = vand.u32 4294901760, %v1241_v28  ;;  %v12304_v25 = vand.u32 4294901760, %v8871_v46 }
 0x108   : > { %12990 = vst [vmem:[#allocation96_spill] sm:$0xff] %v8858_v52  ;;  %1278 = vmatpush1.msra.mxu0 %v8243_v55  ;;  %v8874_v52 = vsub.f32 %v848_v14, %v8843_v2  ;;  %1000 = vmatprep.mubr.f32.mxu0 %v8864_v34 }
 0x109   : > { %1281 = vmatprep.subr.mxu0 %v8291_v12  ;;  %12995 = vst [vmem:[#allocation101_spill] sm:$0xff] %v8877_v8  ;;  %1243 = vmatpush2.msra.mxu1 %v1242_v59  ;;  %v1247_v28 = vsub.f32 %v8871_v46, %v12304_v25  ;;  %v8915_v25 = vsub.s32 3, %v8202_v40 }
 0x10a   : > { %12994 = vst [vmem:[#allocation100_spill] sm:$0xff] %v8874_v52  ;;  %1284 = vmatpush1.msra.mxu0 %v8294_v13  ;;  %v8882_v10 = vpop.permute.xlu1 %644  ;;  %v12305_v14 = vand.u32 4294901760, %v8874_v52 }
 0x10b   : > { %v8880_v62 = vpop.permute.xlu0 %646  ;;  %12997 = vst [vmem:[#allocation103_spill] sm:$0xff] %v8882_v10  ;;  %1287 = vmatprep.subr.mxu0 %v8314_v33  ;;  %1006 = vmatmul.mubr.f32.gmra.mxu0 %v8877_v8  ;;  %v1248_v8 = vand.u32 4294901760, %v1247_v28  ;;  %v8919_v28 = vsub.s32 2, %v8202_v40  ;;  %v420_v10 = vrot.slane %v8650_v9, %v8915_v25 }
 0x10c   : > { %12996 = vst [vmem:[#allocation102_spill] sm:$0xff] %v8880_v62  ;;  %1290 = vmatpush1.msra.mxu0 %v8343_v3  ;;  %1411 = vmatprep.mubr.f32.mxu0 %v8167_v35  ;;  %v1253_v59 = vsub.f32 %v8874_v52, %v12305_v14 }
 0x10d   : > { %1293 = vmatprep.subr.mxu0 %v8365_v44  ;;  %1249 = vmatprep.subr.mxu1 %v1248_v8  ;;  %v476_v8 = vrot.slane %v8582_v60, %v8915_v25 }
 0x10e   : > { %1296 = vmatpush1.msra.mxu0 %v8368_v54  ;;  %v8894_v47 = vpop.permute.xlu1 %553  ;;  %v1254_v34 = vand.u32 4294901760, %v1253_v59 }
 0x10f   : > { %v8892_v42 = vpop.permute.xlu0 %555  ;;  %12999 = vst [vmem:[#allocation105_spill] sm:$0xff] %v8894_v47  ;;  %1299 = vmatprep.subr.mxu0 %v8397_v27 }
 0x110   : > { %12998 = vst [vmem:[#allocation104_spill] sm:$0xff] %v8892_v42  ;;  %1302 = vmatpush1.msra.mxu0 %v8435_v61  ;;  %1255 = vmatpush2.msra.mxu1 %v1254_v34  ;;  %v472_v34 = vrot.slane %v8582_v60, %v8919_v28 }
 0x111   : > { %1305 = vmatprep.subr.mxu0 %v8461_v39  ;;  %1259 = vmatmul.mubr.f32.vlgmr.msra.gmra.mxu1 %v8727_v48  ;;  %v416_v48 = vrot.slane %v8650_v9, %v8919_v28  ;;  %v13008_v9 = vld [vmem:[#allocation55_spill] sm:$0xff] }
 0x112   : > { %1308 = vmatpush1.msra.mxu0 %v8464_v11  ;;  %v8909_v42 = vpop.permute.xlu1 %497  ;;  %1431 = vmatprep.subr.mxu1 %v8252_v58 }
 0x113   : > { %v8907_v47 = vpop.permute.xlu0 %499  ;;  %13001 = vst [vmem:[#allocation107_spill] sm:$0xff] %v8909_v42  ;;  %1311 = vmatprep.subr.mxu0 %v8409_v17  ;;  %1433 = vmatpush1.msra.mxu1 %v8235_v51 }
 0x114   : > { %13000 = vst [vmem:[#allocation106_spill] sm:$0xff] %v8907_v47  ;;  %1314 = vmatpush1.msra.mxu0 %v8412_v57  ;;  %1435 = vmatprep.subr.mxu1 %v8276_v4 }
 0x115   : > { %1317 = vmatprep.subr.mxu0 %v8432_v38  ;;  %1437 = vmatpush1.msra.mxu1 %v8278_v5 }
 0x116   : > { %1320 = vmatpush1.msra.mxu0 %v8445_v63  ;;  %v442_v14 = vpop.permute.xlu1 %441  ;;  %1439 = vmatprep.subr.mxu1 %v8304_v19 }
 0x117   : > { %v444_v59 = vpop.permute.xlu0 %443  ;;  %1323 = vmatprep.subr.mxu0 %v8494_v7  ;;  %1441 = vmatpush1.msra.mxu1 %v8328_v49 }
 0x118   : > { %1326 = vmatpush1.msra.mxu0 %v8530_v31  ;;  %v451_v40 = vsel %vm449_vm14, %v444_v59, %v8633_v29  ;;  %v453_v60 = vsel %vm449_vm14, %v8611_v30, %v444_v59  ;;  %1443 = vmatprep.subr.mxu1 %v8352_v16  ;;  %v450_v29 = vsel %vm449_vm14, %v442_v14, %v8659_v56  ;;  %v13006_v56 = vld [vmem:[#allocation25_spill] sm:$0xff] }
 0x119   : > { %1329 = vmatprep.subr.mxu0 %v8550_v20  ;;  %v8942_v42 = vmul.f32 %v476_v8, %v451_v40  ;;  %v8946_v47 = vmul.f32 %v472_v34, %v453_v60  ;;  %1445 = vmatpush1.msra.mxu1 %v8354_v23  ;;  %v452_v30 = vsel %vm449_vm14, %v8657_v24, %v442_v14  ;;  %v13007_v60 = vld [vmem:[#allocation67_spill] sm:$0xff]  ;;  %v13011_v14 = vld [vmem:[#allocation56_spill] sm:$0xff] }
 0x11a   : > { %1332 = vmatpush1.msra.mxu0 %v8553_v26  ;;  %v385_v62 = vpop.permute.xlu1 %384  ;;  %v8959_v59 = vmul.f32 %v476_v8, %v450_v29  ;;  %v8962_v40 = vmul.f32 %v472_v34, %v452_v30  ;;  %1447 = vmatprep.subr.mxu1 %v13006_v56  ;;  %v13012_v8 = vld [vmem:[#allocation69_spill] sm:$0xff] }
 0x11b   : > { %v387_v35 = vpop.permute.xlu0 %386  ;;  %13002 = vst [vmem:[#allocation108_spill] sm:$0xff] %v8942_v42  ;;  %1335 = vmatprep.subr.mxu0 %v8570_v22  ;;  %13003 = vst [vmem:[#allocation109_spill] sm:$0xff] %v8946_v47  ;;  %1449 = vmatpush1.msra.mxu1 %v13009_v18  ;;  %v839_v34 = vrot.slane %v13012_v8, %v8919_v28  ;;  %v13013_v29 = vld [vmem:[#allocation33_spill] sm:$0xff]  ;;  %v13020_v22 = vld [vmem:[#allocation79_spill] sm:$0xff] }
 0x11c   : > { %13004 = vst [vmem:[#allocation110_spill] sm:$0xff] %v8959_v59  ;;  %1338 = vmatpush1.msra.mxu0 %v8601_v36  ;;  %13005 = vst [vmem:[#allocation111_spill] sm:$0xff] %v8962_v40  ;;  %v396_v42 = vsel %vm394_vm15, %v387_v35, %v13007_v60  ;;  %v398_v24 = vsel %vm394_vm15, %v13010_v32, %v387_v35  ;;  %1451 = vmatprep.subr.mxu1 %v13013_v29  ;;  %v13016_v40 = vld [vmem:[#allocation58_spill] sm:$0xff]  ;;  %v13018_v36 = vld [vmem:[#allocation73_spill] sm:$0xff] }
 0x11d   : > { %1341 = vmatprep.subr.mxu0 %v13008_v9  ;;  %v8977_v30 = vmul.f32 %v416_v48, %v398_v24  ;;  %v8979_v59 = vmul.f32 %v420_v10, %v396_v42  ;;  %v843_v60 = vrot.slane %v13012_v8, %v8915_v25  ;;  %v13017_v9 = vld [vmem:[#allocation34_spill] sm:$0xff]  ;;  %v395_v35 = vsel %vm394_vm15, %v385_v62, %v13018_v36  ;;  %v13019_v32 = vld [vmem:[#allocation72_spill] sm:$0xff]  ;;  %v13021_v24 = vld [vmem:[#allocation23_spill] sm:$0xff] }
 0x11e   : > { %1344 = vmatpush1.msra.mxu0 %v13011_v14  ;;  %1453 = vmatpush1.msra.mxu1 %v13017_v9  ;;  %v397_v14 = vsel %vm394_vm15, %v13019_v32, %v385_v62  ;;  %v13022_v8 = vld [vmem:[#allocation60_spill] sm:$0xff]  ;;  %v13026_v36 = vld [vmem:[#allocation86_spill] sm:$0xff]  ;;  %v13031_v29 = vld [vmem:[#allocation29_spill] sm:$0xff] }
 0x11f   : > { %v815_v47 = vpop.permute.xlu0 %814  ;;  %13014 = vst [vmem:[#allocation25_spill] sm:$0xff] %v8977_v30  ;;  %13015 = vst [vmem:[#allocation67_spill] sm:$0xff] %v8979_v59  ;;  %1347 = vmatprep.subr.mxu0 %v13016_v40  ;;  %1455 = vmatprep.subr.mxu1 %v13021_v24  ;;  %v813_v30 = vpop.permute.xlu1 %812  ;;  %v8996_v59 = vmul.f32 %v416_v48, %v397_v14  ;;  %v8998_v40 = vmul.f32 %v420_v10, %v395_v35  ;;  %v13025_v9 = vld [vmem:[#allocation24_spill] sm:$0xff]  ;;  %v13032_v48 = vld [vmem:[#allocation89_spill] sm:$0xff] }
 0x120   : > { %v818_v42 = vsel %vm816_vm0, %v13020_v22, %v815_v47  ;;  %1350 = vmatpush1.msra.mxu0 %v13022_v8  ;;  %1457 = vmatpush1.msra.mxu1 %v13025_v9  ;;  %v824_v26 = vsel %vm816_vm0, %v815_v47, %v13026_v36  ;;  %v13028_v32 = vld [vmem:[#allocation28_spill] sm:$0xff]  ;;  %v817_v10 = vsel %vm816_vm0, %v13032_v48, %v813_v30  ;;  %v13033_v14 = vld [vmem:[#allocation65_spill] sm:$0xff]  ;;  %v13041_v48 = vld [vmem:[#allocation43_spill] sm:$0xff] }
 0x121   : > { %13023 = vst [vmem:[#allocation30_spill] sm:$0xff] %v8996_v59  ;;  %13024 = vst [vmem:[#allocation63_spill] sm:$0xff] %v8998_v40  ;;  %v9004_v62 = vmul.f32 %v839_v34, %v818_v42  ;;  %1459 = vmatprep.subr.mxu1 %v13028_v32  ;;  %v9007_v22 = vmul.f32 %v843_v60, %v824_v26  ;;  %v13030_v24 = vld [vmem:[#allocation64_spill] sm:$0xff]  ;;  %v823_v47 = vsel %vm816_vm0, %v813_v30, %v8818_v37  ;;  %v13040_v59 = vld [vmem:[#allocation74_spill] sm:$0xff] }
 0x122   : > { %1353 = vmatprep.subr.mxu0 %v13030_v24  ;;  %1461 = vmatpush1.msra.mxu1 %v13031_v29  ;;  %v9018_v35 = vmul.f32 %v839_v34, %v817_v10  ;;  %v13035_v42 = vld [vmem:[#allocation36_spill] sm:$0xff]  ;;  %v9022_v36 = vmul.f32 %v843_v60, %v823_v47  ;;  %v13042_v40 = vld [vmem:[#allocation81_spill] sm:$0xff]  ;;  %v13044_v37 = vld [vmem:[#allocation82_spill] sm:$0xff] }
 0x123   : > { %13027 = vst [vmem:[#allocation69_spill] sm:$0xff] %v9004_v62  ;;  %13029 = vst [vmem:[#allocation73_spill] sm:$0xff] %v9007_v22  ;;  %1356 = vmatpush1.msra.mxu0 %v13033_v14  ;;  %1463 = vmatprep.subr.mxu1 %v13035_v42  ;;  %v13036_v26 = vld [vmem:[#allocation68_spill] sm:$0xff]  ;;  %v13038_v62 = vld [vmem:[#allocation39_spill] sm:$0xff] }
 0x124   : > { %13034 = vst [vmem:[#allocation72_spill] sm:$0xff] %v9018_v35  ;;  %1359 = vmatprep.subr.mxu0 %v13036_v26  ;;  %13037 = vst [vmem:[#allocation79_spill] sm:$0xff] %v9022_v36  ;;  %1465 = vmatpush1.msra.mxu1 %v13038_v62  ;;  %v13039_v22 = vld [vmem:[#allocation42_spill] sm:$0xff]  ;;  %v13045_v34 = vld [vmem:[#allocation49_spill] sm:$0xff] }
 0x125   : > { %1467 = vmatprep.subr.mxu1 %v13039_v22  ;;  %1362 = vmatpush1.msra.mxu0 %v13040_v59  ;;  %v13043_v14 = vld [vmem:[#allocation46_spill] sm:$0xff]  ;;  %v13046_v30 = vld [vmem:[#allocation53_spill] sm:$0xff]  ;;  %v13049_v47 = vld [vmem:[#allocation59_spill] sm:$0xff] }
 0x126   : > { %1469 = vmatpush1.msra.mxu1 %v13041_v48  ;;  %1365 = vmatprep.subr.mxu0 %v13042_v40  ;;  %v13047_v60 = vld [vmem:[#allocation54_spill] sm:$0xff]  ;;  %v13048_v10 = vld [vmem:[#allocation57_spill] sm:$0xff]  ;;  %v13050_v35 = vld [vmem:[#allocation76_spill] sm:$0xff] }
 0x127   : > { %1471 = vmatprep.subr.mxu1 %v13043_v14  ;;  %1368 = vmatpush1.msra.mxu0 %v13044_v37  ;;  %v13051_v36 = vld [vmem:[#allocation61_spill] sm:$0xff]  ;;  %v13053_v37 = vld [vmem:[#allocation62_spill] sm:$0xff] }
 0x128   : > { %1473 = vmatpush1.msra.mxu1 %v13045_v34  ;;  %1399 = vmatprep.subr.mxu0 %v8803_v21  ;;  %v13052_v21 = vand.u32 4294901760, %v8267_v1  ;;  %v13061_v1 = vld [vmem:[#allocation78_spill] sm:$0xff] }
 0x129   : > { %1475 = vmatprep.subr.mxu1 %v13046_v30  ;;  %1402 = vmatpush2.msra.mxu0 %v8831_v45  ;;  %v13054_v45 = vand.u32 4294901760, %v8243_v55  ;;  %v13063_v55 = vld [vmem:[#allocation85_spill] sm:$0xff] }
 0x12a   : > { %1477 = vmatpush1.msra.mxu1 %v13047_v60  ;;  %1405 = vmatprep.subr.mxu0 %v8871_v46  ;;  %v13055_v60 = vld [vmem:[#allocation66_spill] sm:$0xff]  ;;  %v13056_v46 = vld [vmem:[#allocation75_spill] sm:$0xff] }
 0x12b   : > { %1479 = vmatprep.subr.mxu1 %v13048_v10  ;;  %1408 = vmatpush2.msra.mxu0 %v8874_v52  ;;  %v13057_v10 = vld [vmem:[#allocation71_spill] sm:$0xff]  ;;  %v13058_v52 = vand.u32 4294901760, %v8291_v12  ;;  %v13065_v12 = vand.u32 4294901760, %v8343_v3 }
 0x12c   : > { %1481 = vmatpush1.msra.mxu1 %v13049_v47  ;;  %1414 = vmatmul.mubr.f32.vlgmr.msra.gmra.mxu0 %v13050_v35  ;;  %v13059_v35 = vld [vmem:[#allocation77_spill] sm:$0xff]  ;;  %v13069_v3 = vld [vmem:[#allocation83_spill] sm:$0xff] }
 0x12d   : > { %1483 = vmatprep.subr.mxu1 %v13051_v36  ;;  %1558 = vmatprep.subr.mxu0 %v13052_v21  ;;  %v13060_v36 = vld [vmem:[#allocation80_spill] sm:$0xff]  ;;  %v13062_v21 = vand.u32 4294901760, %v8294_v13 }
 0x12e   : > { %1485 = vmatpush1.msra.mxu1 %v13053_v37  ;;  %1562 = vmatpush1.msra.mxu0 %v13054_v45  ;;  %v13064_v45 = vand.u32 4294901760, %v8314_v33  ;;  %v13067_v13 = vld [vmem:[#allocation12_spill] sm:$0xff] }
 0x12f   : > { %1487 = vmatprep.subr.mxu1 %v13055_v60  ;;  %1265 = vmatprep.mubr.f32.mxu1 %v13056_v46  ;;  %v7901_v33 = vld [vmem:[%s12138_s5 + $0x4] ss:$8 sm:$0xf] }
 0x130   : > { %1489 = vmatpush1.msra.mxu1 %v13057_v10  ;;  %1566 = vmatprep.subr.mxu0 %v13058_v52  ;;  %v13066_v52 = vand.u32 4294901760, %v8365_v44  ;;  %v13071_v44 = vand.u32 4294901760, %v8435_v61 }
 0x131   : > { %1491 = vmatprep.subr.mxu1 %v13059_v35  ;;  %1267 = vmatmul.mubr.f32.gmra.mxu1 %v13060_v36 }
 0x132   : > { %1493 = vmatpush1.msra.mxu1 %v13061_v1  ;;  %1570 = vmatpush1.msra.mxu0 %v13062_v21  ;;  %v619_v21 = vrot.slane %v7901_v33, %v8915_v25 }
 0x133   : > { %1421 = vmatprep.mubr.f32.mxu0 %v8788_v53  ;;  %1523 = vmatprep.subr.mxu1 %v13063_v55  ;;  %v13171_v53 = vld [vmem:[#allocation107_spill] sm:$0xff] }
 0x134   : > { %1574 = vmatprep.subr.mxu0 %v13064_v45  ;;  %1424 = vmatmul.mubr.f32.gmra.mxu0 %v8800_v50  ;;  %v13068_v45 = vand.u32 4294901760, %v8368_v54  ;;  %v13073_v54 = vld [vmem:[#allocation8_spill] sm:$0xff] }
 0x135   : > { %1525 = vmatpush2.msra.mxu1 %v8814_v0  ;;  %1578 = vmatpush1.msra.mxu0 %v13065_v12  ;;  %v13070_v12 = vand.u32 4294901760, %v8397_v27  ;;  %v13074_v27 = vand.u32 4294901760, %v8464_v11  ;;  %v13079_v11 = vand.u32 4294901760, %v8432_v38 }
 0x136   : > { %1527 = vmatprep.subr.mxu1 %v8841_v6  ;;  %1582 = vmatprep.subr.mxu0 %v13066_v52  ;;  %v615_v52 = vrot.slane %v7901_v33, %v8919_v28 }
 0x137   : > { %1529 = vmatpush2.msra.mxu1 %v8843_v2  ;;  %1533 = vmatprep.mubr.f32.mxu1 %v13067_v13  ;;  %v13072_v13 = vand.u32 4294901760, %v8461_v39 }
 0x138   : > { %1586 = vmatpush1.msra.mxu0 %v13068_v45  ;;  %1537 = vmatmul.mubr.f32.vlgmr.msra.gmra.mxu1 %v13069_v3  ;;  %v631_v45 = vmul.f32 %v619_v21, %v13073_v54 }
 0x139   : > { %1590 = vmatprep.subr.mxu0 %v13070_v12  ;;  %1745 = vmatprep.subr.mxu1 %v8252_v58  ;;  %v13075_v58 = vand.u32 4294901760, %v8409_v17  ;;  %v13080_v17 = vld [vmem:[#allocation6_spill] sm:$0xff] }
 0x13a   : > { %1594 = vmatpush1.msra.mxu0 %v13071_v44  ;;  %1747 = vmatpush1.msra.mxu1 %v8235_v51  ;;  %v13076_v51 = vld [vmem:[#allocation4_spill] sm:$0xff]  ;;  %v9100_v39 = vand.u32 4294901760, %v631_v45  ;;  %v13088_v44 = vld [vmem:[#allocation45_spill] sm:$0xff] }
 0x13b   : > { %1598 = vmatprep.subr.mxu0 %v13072_v13  ;;  %1749 = vmatprep.subr.mxu1 %v8276_v4  ;;  %v630_v61 = vmul.f32 %v615_v52, %v13076_v51  ;;  %v13077_v4 = vand.u32 4294901760, %v8412_v57  ;;  %v13081_v13 = vand.u32 4294901760, %v8445_v63  ;;  %v13084_v57 = vand.u32 4294901760, %v8530_v31  ;;  %v13103_v51 = vld [vmem:[#allocation55_spill] sm:$0xff] }
 0x13c   : > { %1545 = vmatprep.mubr.f32.mxu1 %v8822_v15  ;;  %1602 = vmatpush1.msra.mxu0 %v13074_v27  ;;  %13078 = vst [vmem:[#allocation60_spill] sm:$0xff] %v9100_v39  ;;  %v9118_v38 = vsub.f32 %v631_v45, %v9100_v39  ;;  %v13085_v63 = vand.u32 4294901760, %v8550_v20  ;;  %v13090_v45 = vld [vmem:[#allocation34_spill] sm:$0xff]  ;;  %v13091_v20 = vld [vmem:[#allocation9_spill] sm:$0xff]  ;;  %v13119_v15 = vld [vmem:[#allocation19_spill] sm:$0xff] }
 0x13d   : > { %1751 = vmatpush1.msra.mxu1 %v8278_v5  ;;  %1606 = vmatprep.subr.mxu0 %v13075_v58  ;;  %v626_v5 = vmul.f32 %v615_v52, %v13080_v17  ;;  %v13089_v52 = vand.u32 4294901760, %v13088_v44  ;;  %v627_v27 = vmul.f32 %v619_v21, %v13091_v20  ;;  %v7904_v58 = vld [vmem:[%s12138_s5 + $0x5] ss:$8 sm:$0xf] }
 0x13e   : > { %1549 = vmatmul.mubr.f32.gmra.mxu1 %v8835_v43  ;;  %1753 = vmatprep.subr.mxu1 %v8304_v19  ;;  %v13082_v19 = vand.u32 4294901760, %v8494_v7  ;;  %v13112_v20 = vld [vmem:[#allocation18_spill] sm:$0xff] }
 0x13f   : > { %1610 = vmatpush1.msra.mxu0 %v13077_v4  ;;  %1755 = vmatpush1.msra.mxu1 %v8328_v49  ;;  %v9112_v49 = vand.u32 4294901760, %v630_v61  ;;  %v9128_v31 = vand.u32 4294901760, %v626_v5  ;;  %v671_v4 = vrot.slane %v7904_v58, %v8919_v28 }
 0x140   : > { %1614 = vmatprep.subr.mxu0 %v13079_v11  ;;  %1757 = vmatprep.subr.mxu1 %v8352_v16  ;;  %v7902_v16 = vld [vmem:[%s12138_s5 + $0x7] ss:$8 sm:$0xf]  ;;  %v9146_v11 = vrot.slane %v7904_v58, %v8915_v25 }
 0x141   : > { %1618 = vmatpush1.msra.mxu0 %v13081_v13  ;;  %1759 = vmatpush1.msra.mxu1 %v8354_v23  ;;  %13083 = vst [vmem:[#allocation24_spill] sm:$0xff] %v9112_v49  ;;  %v783_v23 = vrot.slane %v7902_v16, %v8919_v28  ;;  %v787_v7 = vrot.slane %v7902_v16, %v8915_v25  ;;  %13087 = vst [vmem:[#allocation86_spill] sm:$0xff] %v9128_v31  ;;  %v13092_v13 = vld [vmem:[#allocation48_spill] sm:$0xff] }
 0x142   : > { %1622 = vmatprep.subr.mxu0 %v13082_v19  ;;  %1761 = vmatprep.subr.mxu1 %v13006_v56  ;;  %v13086_v56 = vld [vmem:[#allocation33_spill] sm:$0xff]  ;;  %v13093_v19 = vand.u32 4294901760, %v13092_v13  ;;  %v9152_v16 = vsub.f32 %v630_v61, %v9112_v49  ;;  %v13100_v13 = vld [vmem:[#allocation15_spill] sm:$0xff]  ;;  %v13111_v61 = vld [vmem:[#allocation96_spill] sm:$0xff] }
 0x143   : > { %1626 = vmatpush1.msra.mxu0 %v13084_v57  ;;  %1763 = vmatpush1.msra.mxu1 %v13009_v18  ;;  %v7903_v18 = vld [vmem:[%s12138_s5 + $0x6] ss:$8 sm:$0xf] }
 0x144   : > { %1630 = vmatprep.subr.mxu0 %v13085_v63  ;;  %1765 = vmatprep.subr.mxu1 %v13086_v56  ;;  %v727_v33 = vrot.slane %v7903_v18, %v8919_v28  ;;  %v9135_v12 = vrot.slane %v7903_v18, %v8915_v25  ;;  %v13094_v57 = vld [vmem:[#allocation23_spill] sm:$0xff]  ;;  %v13095_v63 = vld [vmem:[#allocation14_spill] sm:$0xff]  ;;  %v13096_v56 = vld [vmem:[#allocation93_spill] sm:$0xff] }
 0x145   : > { %1634 = vmatpush1.msra.mxu0 %v13089_v52  ;;  %1767 = vmatpush1.msra.mxu1 %v13090_v45  ;;  %v768_v21 = vsel %vm760_vm9, %v13096_v56, %v13095_v63  ;;  %v13097_v18 = vld [vmem:[#allocation27_spill] sm:$0xff]  ;;  %v13098_v45 = vld [vmem:[#allocation52_spill] sm:$0xff] }
 0x146   : > { %1638 = vmatprep.subr.mxu0 %v13093_v19  ;;  %1769 = vmatprep.subr.mxu1 %v13094_v57  ;;  %v9160_v44 = vrot.slane %v13097_v18, %v8919_v28  ;;  %v9164_v52 = vrot.slane %v13097_v18, %v8915_v25  ;;  %v13099_v58 = vand.u32 4294901760, %v13098_v45  ;;  %v762_v19 = vsel %vm760_vm9, %v13100_v13, %v13096_v56  ;;  %v13101_v57 = vld [vmem:[#allocation94_spill] sm:$0xff]  ;;  %v13102_v63 = vld [vmem:[#allocation16_spill] sm:$0xff] }
 0x147   : > { %1771 = vmatpush1.msra.mxu1 %v13025_v9  ;;  %v761_v54 = vsel %vm760_vm9, %v13102_v63, %v13101_v57  ;;  %v13104_v18 = vand.u32 4294901760, %v13103_v51  ;;  %v9182_v45 = vsub.f32 %v626_v5, %v9128_v31  ;;  %v13106_v9 = vld [vmem:[#allocation17_spill] sm:$0xff]  ;;  %v13107_v56 = vld [vmem:[#allocation38_spill] sm:$0xff]  ;;  %v13108_v51 = vld [vmem:[#allocation56_spill] sm:$0xff]  ;;  %v799_v5 = vmul.f32 %v787_v7, %v768_v21 }
 0x148   : > { %1642 = vmatpush1.msra.mxu0 %v13099_v58  ;;  %1773 = vmatprep.subr.mxu1 %v13028_v32  ;;  %v767_v58 = vsel %vm760_vm9, %v13101_v57, %v13106_v9  ;;  %v9190_v13 = vrot.slane %v13107_v56, %v8919_v28  ;;  %v9194_v63 = vrot.slane %v13107_v56, %v8915_v25  ;;  %v9199_v32 = vand.u32 4294901760, %v627_v27  ;;  %v13113_v9 = vld [vmem:[#allocation97_spill] sm:$0xff]  ;;  %v13114_v28 = vld [vmem:[#allocation20_spill] sm:$0xff]  ;;  %v13115_v25 = vld [vmem:[#allocation58_spill] sm:$0xff] }
 0x149   : > { %1646 = vmatprep.subr.mxu0 %v13104_v18  ;;  %13105 = vst [vmem:[#allocation28_spill] sm:$0xff] %v9182_v45  ;;  %v13109_v18 = vand.u32 4294901760, %v13108_v51  ;;  %1775 = vmatpush1.msra.mxu1 %v13031_v29  ;;  %v706_v57 = vsel %vm704_vm10, %v13112_v20, %v13111_v61  ;;  %v705_v17 = vsel %vm704_vm10, %v13114_v28, %v13113_v9  ;;  %v13116_v56 = vand.u32 4294901760, %v13115_v25  ;;  %v13120_v25 = vld [vmem:[#allocation102_spill] sm:$0xff] }
 0x14a   : > { %13110 = vst [vmem:[#allocation64_spill] sm:$0xff] %v9199_v32  ;;  %1777 = vmatprep.subr.mxu1 %v13035_v42  ;;  %v12337_v29 = vand.u32 4294901760, %v9152_v16  ;;  %v798_v51 = vmul.f32 %v783_v23, %v762_v19  ;;  %v13117_v21 = vand.u32 4294901760, %v13022_v8  ;;  %v13118_v20 = vand.u32 4294901760, %v9118_v38 }
 0x14b   : > { %1650 = vmatpush1.msra.mxu0 %v13109_v18  ;;  %v794_v18 = vmul.f32 %v783_v23, %v761_v54  ;;  %1779 = vmatpush1.msra.mxu1 %v13038_v62  ;;  %v795_v28 = vmul.f32 %v787_v7, %v767_v58  ;;  %v712_v42 = vsel %vm704_vm10, %v13111_v61, %v13119_v15  ;;  %v13122_v8 = vand.u32 4294901760, %v13030_v24  ;;  %v13123_v7 = vld [vmem:[#allocation103_spill] sm:$0xff]  ;;  %v13125_v15 = vld [vmem:[#allocation65_spill] sm:$0xff] }
 0x14c   : > { %1654 = vmatprep.subr.mxu0 %v13116_v56  ;;  %v9219_v43 = vsub.f32 %v9118_v38, %v13118_v20  ;;  %v13121_v56 = vld [vmem:[#allocation22_spill] sm:$0xff]  ;;  %1781 = vmatprep.subr.mxu1 %v13039_v22  ;;  %v12336_v62 = vand.u32 4294901760, %v9182_v45  ;;  %v742_v23 = vmul.f32 %v727_v33, %v706_v57  ;;  %v738_v19 = vmul.f32 %v727_v33, %v705_v17  ;;  %v13124_v58 = vld [vmem:[#allocation31_spill] sm:$0xff]  ;;  %v13127_v24 = vld [vmem:[#allocation21_spill] sm:$0xff] }
 0x14d   : > { %1658 = vmatpush1.msra.mxu0 %v13117_v21  ;;  %v650_v54 = vsel %vm648_vm11, %v13121_v56, %v13120_v25  ;;  %v649_v21 = vsel %vm648_vm11, %v13124_v58, %v13123_v7  ;;  %v13126_v61 = vand.u32 4294901760, %v13125_v15  ;;  %1783 = vmatpush1.msra.mxu1 %v13041_v48  ;;  %v9240_v20 = vand.u32 4294901760, %v799_v5  ;;  %v13130_v56 = vld [vmem:[#allocation26_spill] sm:$0xff] }
 0x14e   : > { %1662 = vmatprep.subr.mxu0 %v13122_v8  ;;  %v711_v22 = vsel %vm704_vm10, %v13113_v9, %v13127_v24  ;;  %v13128_v57 = vand.u32 4294901760, %v13036_v26  ;;  %1785 = vmatprep.subr.mxu1 %v13043_v14  ;;  %v9252_v17 = vsub.f32 %v9152_v16, %v12337_v29  ;;  %v9255_v33 = vsub.f32 %v627_v27, %v9199_v32  ;;  %v13131_v26 = vld [vmem:[#allocation32_spill] sm:$0xff] }
 0x14f   : > { %1666 = vmatpush1.msra.mxu0 %v13126_v61  ;;  %v9257_v48 = vand.u32 4294901760, %v798_v51  ;;  %v656_v9 = vsel %vm648_vm11, %v13120_v25, %v13130_v56  ;;  %v686_v8 = vmul.f32 %v671_v4, %v650_v54  ;;  %v655_v14 = vsel %vm648_vm11, %v13123_v7, %v13131_v26  ;;  %1787 = vmatpush1.msra.mxu1 %v13045_v34  ;;  %v13141_v26 = vld [vmem:[#allocation57_spill] sm:$0xff] }
 0x150   : > { %1670 = vmatprep.subr.mxu0 %v13128_v57  ;;  %13129 = vst [vmem:[#allocation29_spill] sm:$0xff] %v9255_v33  ;;  %v13132_v58 = vand.u32 4294901760, %v13040_v59  ;;  %v9270_v27 = vand.u32 4294901760, %v794_v18  ;;  %v743_v15 = vmul.f32 %v9135_v12, %v712_v42  ;;  %v682_v61 = vmul.f32 %v671_v4, %v649_v21  ;;  %1789 = vmatprep.subr.mxu1 %v13046_v30  ;;  %v13136_v42 = vld [vmem:[#allocation82_spill] sm:$0xff]  ;;  %v13139_v57 = vld [vmem:[#allocation88_spill] sm:$0xff] }
 0x151   : > { %v13133_v24 = vand.u32 4294901760, %v13042_v40  ;;  %v9279_v25 = vsub.f32 %v9182_v45, %v12336_v62  ;;  %v9281_v54 = vand.u32 4294901760, %v795_v28  ;;  %v9283_v59 = vand.u32 4294901760, %v742_v23  ;;  %v13138_v40 = vld [vmem:[#allocation54_spill] sm:$0xff]  ;;  %v13150_v62 = vld [vmem:[#allocation100_spill] sm:$0xff] }
 0x152   : > { %1674 = vmatpush1.msra.mxu0 %v13132_v58  ;;  %v739_v34 = vmul.f32 %v9135_v12, %v711_v22  ;;  %v9286_v7 = vand.u32 4294901760, %v738_v19  ;;  %v13137_v4 = vand.u32 4294901760, %v13136_v42  ;;  %1791 = vmatpush1.msra.mxu1 %v13138_v40  ;;  %v687_v30 = vmul.f32 %v9146_v11, %v656_v9  ;;  %v13143_v9 = vld [vmem:[#allocation91_spill] sm:$0xff] }
 0x153   : > { %1678 = vmatprep.subr.mxu0 %v13133_v24  ;;  %13134 = vst [vmem:[#allocation89_spill] sm:$0xff] %v9283_v59  ;;  %v683_v21 = vmul.f32 %v9146_v11, %v655_v14  ;;  %v13140_v56 = vand.u32 4294901760, %v13139_v57  ;;  %1793 = vmatprep.subr.mxu1 %v13141_v26  ;;  %v9299_v22 = vsub.f32 %v799_v5, %v9240_v20  ;;  %v9304_v42 = vand.u32 4294901760, %v686_v8  ;;  %v13146_v5 = vld [vmem:[#allocation99_spill] sm:$0xff]  ;;  %v13155_v26 = vld [vmem:[#allocation37_spill] sm:$0xff] }
 0x154   : > { %13135 = vst [vmem:[#allocation36_spill] sm:$0xff] %v9286_v7  ;;  %1682 = vmatpush1.msra.mxu0 %v13137_v4  ;;  %v9302_v24 = vsub.f32 %v798_v51, %v9257_v48  ;;  %v13144_v4 = vand.u32 4294901760, %v13143_v9  ;;  %1795 = vmatpush1.msra.mxu1 %v13049_v47  ;;  %v12338_v11 = vand.u32 4294901760, %v9255_v33  ;;  %v9311_v14 = vsub.f32 %v794_v18, %v9270_v27  ;;  %v13148_v51 = vld [vmem:[#allocation61_spill] sm:$0xff]  ;;  %v13157_v12 = vld [vmem:[#allocation35_spill] sm:$0xff] }
 0x155   : > { %1714 = vmatprep.subr.mxu0 %v13140_v56  ;;  %13142 = vst [vmem:[#allocation68_spill] sm:$0xff] %v9304_v42  ;;  %v9313_v40 = vand.u32 4294901760, %v743_v15  ;;  %v9315_v57 = vand.u32 4294901760, %v682_v61  ;;  %v13147_v56 = vand.u32 4294901760, %v13146_v5  ;;  %1797 = vmatprep.subr.mxu1 %v13148_v51  ;;  %v9322_v9 = vsub.f32 %v795_v28, %v9281_v54  ;;  %v13152_v5 = vld [vmem:[#allocation10_spill] sm:$0xff]  ;;  %v13156_v28 = vld [vmem:[#allocation104_spill] sm:$0xff] }
 0x156   : > { %1718 = vmatpush2.msra.mxu0 %v13144_v4  ;;  %v9325_v47 = vsub.f32 %v742_v23, %v9283_v59  ;;  %v9327_v4 = vand.u32 4294901760, %v739_v34  ;;  %v9330_v18 = vsub.f32 %v738_v19, %v9286_v7  ;;  %v13151_v29 = vand.u32 4294901760, %v13150_v62  ;;  %1728 = vmatprep.mubr.f32.mxu0 %v13152_v5  ;;  %v13158_v62 = vld [vmem:[#allocation70_spill] sm:$0xff] }
 0x157   : > { %13145 = vst [vmem:[#allocation39_spill] sm:$0xff] %v9315_v57  ;;  %1722 = vmatprep.subr.mxu0 %v13147_v56  ;;  %v9335_v56 = vand.u32 4294901760, %v687_v30  ;;  %v9337_v51 = vand.u32 4294901760, %v683_v21  ;;  %v563_v23 = vsel %vm561_vm12, %v13156_v28, %v13155_v26  ;;  %v565_v19 = vsel %vm561_vm12, %v13157_v12, %v13156_v28  ;;  %1799 = vmatpush1.msra.mxu1 %v13053_v37 }
 0x158   : > { %13149 = vst [vmem:[#allocation42_spill] sm:$0xff] %v9327_v4  ;;  %1726 = vmatpush2.msra.mxu0 %v13151_v29  ;;  %v9351_v58 = vsub.f32 %v686_v8, %v9304_v42  ;;  %1801 = vmatprep.subr.mxu1 %v13055_v60  ;;  %v9359_v3 = vsub.f32 %v9255_v33, %v12338_v11  ;;  %v13159_v8 = vld [vmem:[#allocation41_spill] sm:$0xff]  ;;  %v13172_v33 = vld [vmem:[#allocation50_spill] sm:$0xff] }
 0x159   : > { %13153 = vst [vmem:[#allocation74_spill] sm:$0xff] %v9335_v56  ;;  %13154 = vst [vmem:[#allocation43_spill] sm:$0xff] %v9337_v51  ;;  %1730 = vmatmul.mubr.f32.vlgmr.msra.gmra.mxu0 %v13158_v62  ;;  %1862 = vmatprep.subr.mxu0 %v9240_v20  ;;  %v9363_v12 = vsub.f32 %v743_v15, %v9313_v40  ;;  %v9366_v28 = vsub.f32 %v682_v61, %v9315_v57  ;;  %v13160_v29 = vld [vmem:[#allocation105_spill] sm:$0xff]  ;;  %v13164_v15 = vld [vmem:[#allocation106_spill] sm:$0xff] }
 0x15a   : > { %v562_v60 = vsel %vm561_vm12, %v13160_v29, %v13159_v8  ;;  %1803 = vmatpush1.msra.mxu1 %v13057_v10  ;;  %1864 = vmatpush1.msra.mxu0 %v9257_v48  ;;  %v599_v26 = vmul.f32 %v9160_v44, %v565_v19  ;;  %v600_v37 = vmul.f32 %v9164_v52, %v563_v23  ;;  %v13161_v23 = vld [vmem:[#allocation40_spill] sm:$0xff] }
 0x15b   : > { %1805 = vmatprep.subr.mxu1 %v13059_v35  ;;  %1866 = vmatprep.subr.mxu0 %v9281_v54  ;;  %v9381_v61 = vsub.f32 %v739_v34, %v9327_v4  ;;  %v9385_v10 = vsub.f32 %v687_v30, %v9335_v56  ;;  %v9388_v11 = vsub.f32 %v683_v21, %v9337_v51  ;;  %v13162_v30 = vand.u32 4294901760, %v9299_v22 }
 0x15c   : > { %1736 = vmatprep.mubr.f32.mxu0 %v13056_v46  ;;  %1807 = vmatpush1.msra.mxu1 %v13061_v1  ;;  %v564_v34 = vsel %vm561_vm12, %v13161_v23, %v13160_v29  ;;  %v596_v19 = vmul.f32 %v9164_v52, %v562_v60  ;;  %v13163_v1 = vld [vmem:[#allocation47_spill] sm:$0xff]  ;;  %v13165_v52 = vand.u32 4294901760, %v9302_v24  ;;  %v9414_v60 = vand.u32 4294901760, %v600_v37 }
 0x15d   : > { %1868 = vmatpush1.msra.mxu0 %v9270_v27  ;;  %1837 = vmatprep.subr.mxu1 %v13063_v55  ;;  %v1997_v21 = vsub.f32 %v9299_v22, %v13162_v30  ;;  %v507_v35 = vsel %vm505_vm13, %v13164_v15, %v13163_v1  ;;  %v9416_v23 = vand.u32 4294901760, %v599_v26  ;;  %v13168_v30 = vld [vmem:[#allocation44_spill] sm:$0xff]  ;;  %v13169_v1 = vand.u32 4294901760, %v9322_v9  ;;  %v13170_v55 = vld [vmem:[#allocation51_spill] sm:$0xff] }
 0x15e   : > { %1738 = vmatmul.mubr.f32.gmra.mxu0 %v13060_v36  ;;  %1870 = vmatprep.subr.mxu0 %v9313_v40  ;;  %v2003_v29 = vsub.f32 %v9302_v24, %v13165_v52  ;;  %13166 = vst [vmem:[#allocation81_spill] sm:$0xff] %v9414_v60  ;;  %v509_v8 = vsel %vm505_vm13, %v13168_v30, %v13164_v15  ;;  %v9439_v30 = vand.u32 4294901760, %v596_v19 }
 0x15f   : > { %13167 = vst [vmem:[#allocation46_spill] sm:$0xff] %v9416_v23  ;;  %1839 = vmatpush2.msra.mxu1 %v8814_v0  ;;  %1872 = vmatpush1.msra.mxu0 %v9283_v59  ;;  %v2009_v50 = vsub.f32 %v9322_v9, %v13169_v1  ;;  %v595_v52 = vmul.f32 %v9160_v44, %v564_v34  ;;  %v1998_v34 = vand.u32 4294901760, %v1997_v21 }
 0x160   : > { %v506_v45 = vsel %vm505_vm13, %v13171_v53, %v13170_v55  ;;  %v508_v15 = vsel %vm505_vm13, %v13172_v33, %v13171_v53  ;;  %1841 = vmatprep.subr.mxu1 %v8841_v6  ;;  %1874 = vmatprep.subr.mxu0 %v9327_v4  ;;  %13173 = vst [vmem:[#allocation49_spill] sm:$0xff] %v9439_v30  ;;  %v13174_v55 = vand.u32 4294901760, %v9311_v14  ;;  %v2004_v6 = vand.u32 4294901760, %v2003_v29 }
 0x161   : > { %v544_v44 = vmul.f32 %v9194_v63, %v507_v35  ;;  %1843 = vmatpush2.msra.mxu1 %v8843_v2  ;;  %1845 = vmatprep.mubr.f32.mxu1 %v13152_v5  ;;  %v543_v53 = vmul.f32 %v9190_v13, %v509_v8  ;;  %v13175_v33 = vand.u32 4294901760, %v9363_v12  ;;  %v12351_v2 = vand.u32 4294901760, %v9385_v10 }
 0x162   : > { %v2015_v41 = vsub.f32 %v9311_v14, %v13174_v55  ;;  %1876 = vmatpush1.msra.mxu0 %v9286_v7  ;;  %1847 = vmatmul.mubr.f32.vlgmr.msra.gmra.mxu1 %v13158_v62  ;;  %v539_v1 = vmul.f32 %v9190_v13, %v508_v15  ;;  %v540_v21 = vmul.f32 %v9194_v63, %v506_v45  ;;  %v2010_v55 = vand.u32 4294901760, %v2009_v50 }
 0x163   : > { %v2021_v35 = vsub.f32 %v9363_v12, %v13175_v33  ;;  %1878 = vmatprep.subr.mxu0 %v9335_v56  ;;  %1999 = vmatprep.subr.mxu1 %v1998_v34  ;;  %v13176_v8 = vand.u32 4294901760, %v9325_v47  ;;  %v9461_v29 = vsub.f32 %v600_v37, %v9414_v60  ;;  %v9463_v7 = vand.u32 4294901760, %v595_v52 }
 0x164   : > { %1880 = vmatpush1.msra.mxu0 %v9304_v42  ;;  %2005 = vmatpush1.msra.mxu1 %v2004_v6  ;;  %v13178_v13 = vand.u32 4294901760, %v9381_v61  ;;  %v9471_v50 = vsub.f32 %v599_v26, %v9416_v23  ;;  %v9473_v15 = vand.u32 4294901760, %v544_v44  ;;  %v2016_v37 = vand.u32 4294901760, %v2015_v41 }
 0x165   : > { %v2027_v0 = vsub.f32 %v9325_v47, %v13176_v8  ;;  %13177 = vst [vmem:[#allocation53_spill] sm:$0xff] %v9463_v7  ;;  %1882 = vmatprep.subr.mxu0 %v9337_v51  ;;  %2011 = vmatprep.subr.mxu1 %v2010_v55  ;;  %v13180_v34 = vand.u32 4294901760, %v9330_v18  ;;  %v9480_v6 = vsub.f32 %v596_v19, %v9439_v30  ;;  %v9482_v8 = vand.u32 4294901760, %v543_v53 }
 0x166   : > { %v2033_v45 = vsub.f32 %v9381_v61, %v13178_v13  ;;  %13179 = vst [vmem:[#allocation59_spill] sm:$0xff] %v9473_v15  ;;  %1853 = vmatprep.mubr.f32.mxu1 %v13056_v46  ;;  %1884 = vmatpush1.msra.mxu0 %v9315_v57  ;;  %v2022_v26 = vand.u32 4294901760, %v2021_v35  ;;  %v2045_v13 = vsub.f32 %v9385_v10, %v12351_v2  ;;  %v9489_v55 = vand.u32 4294901760, %v540_v21  ;;  %v13185_v35 = vld [vmem:[#allocation109_spill] sm:$0xff] }
 0x167   : > { %v2039_v33 = vsub.f32 %v9330_v18, %v13180_v34  ;;  %13181 = vst [vmem:[#allocation62_spill] sm:$0xff] %v9482_v8  ;;  %v9491_v41 = vand.u32 4294901760, %v539_v1  ;;  %2017 = vmatpush1.msra.mxu1 %v2016_v37  ;;  %1886 = vmatprep.subr.mxu0 %v9100_v39  ;;  %v2028_v19 = vand.u32 4294901760, %v2027_v0  ;;  %v13184_v34 = vand.u32 4294901760, %v9351_v58  ;;  %v13189_v39 = vld [vmem:[#allocation111_spill] sm:$0xff] }
 0x168   : > { %13182 = vst [vmem:[#allocation66_spill] sm:$0xff] %v9489_v55  ;;  %v9498_v51 = vsub.f32 %v595_v52, %v9463_v7  ;;  %v9501_v57 = vand.u32 4294901760, %v13185_v35  ;;  %1855 = vmatmul.mubr.f32.gmra.mxu1 %v13060_v36  ;;  %2023 = vmatprep.subr.mxu1 %v2022_v26  ;;  %v2034_v2 = vand.u32 4294901760, %v2033_v45  ;;  %v13187_v42 = vand.u32 4294901760, %v9388_v11  ;;  %v13191_v26 = vld [vmem:[#allocation108_spill] sm:$0xff] }
 0x169   : > { %13183 = vst [vmem:[#allocation71_spill] sm:$0xff] %v9491_v41  ;;  %v2051_v63 = vsub.f32 %v9351_v58, %v13184_v34  ;;  %v9508_v0 = vsub.f32 %v544_v44, %v9473_v15  ;;  %v9511_v56 = vand.u32 4294901760, %v13189_v39  ;;  %1888 = vmatpush1.msra.mxu0 %v9112_v49  ;;  %2029 = vmatpush1.msra.mxu1 %v2028_v19  ;;  %v2040_v52 = vand.u32 4294901760, %v2039_v33 }
 0x16a   : > { %13186 = vst [vmem:[#allocation77_spill] sm:$0xff] %v9501_v57  ;;  %v2057_v37 = vsub.f32 %v9388_v11, %v13187_v42  ;;  %v13190_v34 = vand.u32 4294901760, %v9366_v28  ;;  %v9518_v45 = vsub.f32 %v543_v53, %v9482_v8  ;;  %v9521_v59 = vand.u32 4294901760, %v13191_v26  ;;  %1890 = vmatprep.subr.mxu0 %v9199_v32  ;;  %2035 = vmatprep.subr.mxu1 %v2034_v2  ;;  %v13196_v2 = vld [vmem:[#allocation110_spill] sm:$0xff] }
 0x16b   : > { %13188 = vst [vmem:[#allocation78_spill] sm:$0xff] %v9508_v0  ;;  %v2046_v42 = vand.u32 4294901760, %v2045_v13  ;;  %v9527_v33 = vsub.f32 %v540_v21, %v9489_v55  ;;  %v9530_v19 = vsub.f32 %v539_v1, %v9491_v41  ;;  %1892 = vmatpush1.msra.mxu0 %v9128_v31  ;;  %2041 = vmatpush1.msra.mxu1 %v2040_v52  ;;  %v2052_v53 = vand.u32 4294901760, %v2051_v63 }
 0x16c   : > { %v2063_v4 = vsub.f32 %v9366_v28, %v13190_v34  ;;  %13192 = vst [vmem:[#allocation85_spill] sm:$0xff] %v9521_v59  ;;  %v9535_v34 = vsub.f32 %v13185_v35, %v9501_v57  ;;  %v9538_v13 = vand.u32 4294901760, %v13196_v2  ;;  %1894 = vmatprep.subr.mxu0 %v9414_v60  ;;  %v2058_v49 = vand.u32 4294901760, %v2057_v37  ;;  %2239 = vmatprep.mubr.f32.mxu1 %v13152_v5  ;;  %v13255_v5 = vld [vmem:[#allocation49_spill] sm:$0xff] }
 0x16d   : > { %13193 = vst [vmem:[#allocation33_spill] sm:$0xff] %v9527_v33  ;;  %13194 = vst [vmem:[#allocation45_spill] sm:$0xff] %v9530_v19  ;;  %2047 = vmatprep.subr.mxu1 %v2046_v42  ;;  %v9545_v44 = vsub.f32 %v13189_v39, %v9511_v56  ;;  %1896 = vmatpush1.msra.mxu0 %v9416_v23  ;;  %v2082_v35 = vand.u32 4294901760, %v9359_v3  ;;  %v9552_v42 = vsub.f32 %v13191_v26, %v9521_v59  ;;  %v13202_v3 = vld [vmem:[#allocation25_spill] sm:$0xff] }
 0x16e   : > { %13195 = vst [vmem:[#allocation34_spill] sm:$0xff] %v9535_v34  ;;  %13197 = vst [vmem:[#allocation48_spill] sm:$0xff] %v9538_v13  ;;  %2053 = vmatpush1.msra.mxu1 %v2052_v53  ;;  %v2064_v63 = vand.u32 4294901760, %v2063_v4  ;;  %1898 = vmatprep.subr.mxu0 %v9439_v30  ;;  %v13200_v37 = vand.u32 4294901760, %v9461_v29  ;;  %v13201_v4 = vld [vmem:[#allocation67_spill] sm:$0xff]  ;;  %v9564_v52 = vand.u32 4294901760, %v13202_v3 }
 0x16f   : > { %13198 = vst [vmem:[#allocation23_spill] sm:$0xff] %v9545_v44  ;;  %13199 = vst [vmem:[#allocation14_spill] sm:$0xff] %v9552_v42  ;;  %2059 = vmatprep.subr.mxu1 %v2058_v49  ;;  %v9561_v21 = vand.u32 4294901760, %v13201_v4  ;;  %1900 = vmatpush1.msra.mxu0 %v9463_v7  ;;  %v13203_v26 = vand.u32 4294901760, %v9471_v50  ;;  %v13205_v53 = vand.u32 4294901760, %v9219_v43  ;;  %v13206_v1 = vand.u32 4294901760, %v9480_v6 }
 0x170   : > { %v2093_v39 = vsub.f32 %v9461_v29, %v13200_v37  ;;  %2065 = vmatpush1.msra.mxu1 %v2064_v63  ;;  %v9573_v37 = vsub.f32 %v13196_v2, %v9538_v13  ;;  %1902 = vmatprep.subr.mxu0 %v9473_v15  ;;  %v13208_v30 = vld [vmem:[#allocation30_spill] sm:$0xff]  ;;  %v13209_v2 = vand.u32 4294901760, %v9252_v17  ;;  %v13210_v43 = vand.u32 4294901760, %v9498_v51 }
 0x171   : > { %v2099_v49 = vsub.f32 %v9471_v50, %v13203_v26  ;;  %2071 = vmatprep.subr.mxu1 %v13205_v53  ;;  %v2105_v7 = vsub.f32 %v9480_v6, %v13206_v1  ;;  %v13207_v26 = vld [vmem:[#allocation63_spill] sm:$0xff]  ;;  %v9587_v31 = vand.u32 4294901760, %v13208_v30  ;;  %1904 = vmatpush1.msra.mxu0 %v9482_v8  ;;  %v13211_v1 = vld [vmem:[#allocation73_spill] sm:$0xff]  ;;  %v13212_v63 = vand.u32 4294901760, %v9508_v0 }
 0x172   : > { %13204 = vst [vmem:[#allocation93_spill] sm:$0xff] %v9573_v37  ;;  %v9584_v60 = vand.u32 4294901760, %v13207_v26  ;;  %2077 = vmatpush1.msra.mxu1 %v13209_v2  ;;  %v2111_v53 = vsub.f32 %v9498_v51, %v13210_v43  ;;  %v9596_v15 = vand.u32 4294901760, %v13211_v1  ;;  %1906 = vmatprep.subr.mxu0 %v9489_v55  ;;  %v2094_v23 = vand.u32 4294901760, %v2093_v39  ;;  %v13217_v55 = vld [vmem:[#allocation69_spill] sm:$0xff] }
 0x173   : > { %2083 = vmatprep.subr.mxu1 %v2082_v35  ;;  %v2117_v32 = vsub.f32 %v9508_v0, %v13212_v63  ;;  %v9605_v17 = vsub.f32 %v13201_v4, %v9561_v21  ;;  %v9609_v2 = vsub.f32 %v13202_v3, %v9564_v52  ;;  %1908 = vmatpush1.msra.mxu0 %v9491_v41  ;;  %v13215_v43 = vand.u32 4294901760, %v9279_v25 }
 0x174   : > { %v2100_v35 = vand.u32 4294901760, %v2099_v49  ;;  %v13216_v39 = vand.u32 4294901760, %v9518_v45  ;;  %v9618_v8 = vand.u32 4294901760, %v13217_v55  ;;  %1910 = vmatprep.subr.mxu0 %v9521_v59  ;;  %v2106_v4 = vand.u32 4294901760, %v2105_v7 }
 0x175   : > { %13213 = vst [vmem:[#allocation27_spill] sm:$0xff] %v9605_v17  ;;  %13214 = vst [vmem:[#allocation52_spill] sm:$0xff] %v9609_v2  ;;  %2089 = vmatpush1.msra.mxu1 %v13215_v43  ;;  %v13218_v3 = vand.u32 4294901760, %v9527_v33  ;;  %v9627_v25 = vsub.f32 %v13207_v26, %v9584_v60  ;;  %v9631_v49 = vsub.f32 %v13208_v30, %v9587_v31  ;;  %1912 = vmatpush1.msra.mxu0 %v9501_v57 }
 0x176   : > { %v2123_v63 = vsub.f32 %v9518_v45, %v13216_v39  ;;  %2095 = vmatprep.subr.mxu1 %v2094_v23  ;;  %v2112_v43 = vand.u32 4294901760, %v2111_v53  ;;  %v13221_v7 = vand.u32 4294901760, %v9530_v19  ;;  %v9639_v39 = vsub.f32 %v13211_v1, %v9596_v15  ;;  %1914 = vmatprep.subr.mxu0 %v9538_v13  ;;  %v13224_v53 = vld [vmem:[#allocation72_spill] sm:$0xff] }
 0x177   : > { %v2129_v0 = vsub.f32 %v9527_v33, %v13218_v3  ;;  %13219 = vst [vmem:[#allocation15_spill] sm:$0xff] %v9627_v25  ;;  %13220 = vst [vmem:[#allocation94_spill] sm:$0xff] %v9631_v49  ;;  %2101 = vmatpush1.msra.mxu1 %v2100_v35  ;;  %v13222_v3 = vld [vmem:[#allocation79_spill] sm:$0xff]  ;;  %v2118_v30 = vand.u32 4294901760, %v2117_v32  ;;  %v13223_v26 = vand.u32 4294901760, %v9552_v42  ;;  %v9649_v57 = vand.u32 4294901760, %v13224_v53  ;;  %1916 = vmatpush1.msra.mxu0 %v9511_v56 }
 0x178   : > { %v2135_v23 = vsub.f32 %v9530_v19, %v13221_v7  ;;  %v9642_v41 = vand.u32 4294901760, %v13222_v3  ;;  %2107 = vmatprep.subr.mxu1 %v2106_v4  ;;  %v2124_v7 = vand.u32 4294901760, %v2123_v63  ;;  %v13225_v1 = vand.u32 4294901760, %v9535_v34  ;;  %1918 = vmatprep.subr.mxu0 %v9561_v21 }
 0x179   : > { %v2141_v35 = vsub.f32 %v9552_v42, %v13223_v26  ;;  %2113 = vmatpush1.msra.mxu1 %v2112_v43  ;;  %v12394_v19 = vand.u32 4294901760, %v9605_v17  ;;  %v2130_v32 = vand.u32 4294901760, %v2129_v0  ;;  %v13226_v26 = vand.u32 4294901760, %v9573_v37  ;;  %1920 = vmatpush1.msra.mxu0 %v9564_v52 }
 0x17a   : > { %v2147_v59 = vsub.f32 %v9535_v34, %v13225_v1  ;;  %2119 = vmatprep.subr.mxu1 %v2118_v30  ;;  %v9663_v43 = vsub.f32 %v13217_v55, %v9618_v8  ;;  %v2136_v63 = vand.u32 4294901760, %v2135_v23  ;;  %v12395_v1 = vand.u32 4294901760, %v9627_v25  ;;  %1922 = vmatprep.subr.mxu0 %v9584_v60 }
 0x17b   : > { %v2153_v13 = vsub.f32 %v9573_v37, %v13226_v26  ;;  %2125 = vmatpush1.msra.mxu1 %v2124_v7  ;;  %v9670_v30 = vsub.f32 %v13222_v3, %v9642_v41  ;;  %v2142_v0 = vand.u32 4294901760, %v2141_v35  ;;  %v13227_v26 = vand.u32 4294901760, %v9545_v44  ;;  %1924 = vmatpush1.msra.mxu0 %v9587_v31 }
 0x17c   : > { %2131 = vmatprep.subr.mxu1 %v2130_v32  ;;  %v9678_v7 = vsub.f32 %v13224_v53, %v9649_v57  ;;  %v2148_v23 = vand.u32 4294901760, %v2147_v59  ;;  %v2165_v3 = vsub.f32 %v9605_v17, %v12394_v19  ;;  %v12396_v4 = vand.u32 4294901760, %v9639_v39  ;;  %1954 = vmatprep.subr.mxu0 %v9596_v15  ;;  %v13231_v53 = vld [vmem:[#allocation13_spill] sm:$0xff] }
 0x17d   : > { %v2159_v55 = vsub.f32 %v9545_v44, %v13227_v26  ;;  %2137 = vmatpush1.msra.mxu1 %v2136_v63  ;;  %v2154_v35 = vand.u32 4294901760, %v2153_v13  ;;  %v13229_v32 = vand.u32 4294901760, %v9609_v2  ;;  %1956 = vmatpush2.msra.mxu0 %v9618_v8  ;;  %v2177_v59 = vsub.f32 %v9627_v25, %v12395_v1 }
 0x17e   : > { %13228 = vst [vmem:[#allocation16_spill] sm:$0xff] %v9678_v7  ;;  %2143 = vmatprep.subr.mxu1 %v2142_v0  ;;  %1958 = vmatprep.subr.mxu0 %v9642_v41  ;;  %v13230_v0 = vand.u32 4294901760, %v9631_v49  ;;  %v2217_v1 = vsub.f32 %v9639_v39, %v12396_v4  ;;  %v13233_v19 = vand.u32 4294901760, %v9663_v43 }
 0x17f   : > { %v2171_v26 = vsub.f32 %v9609_v2, %v13229_v32  ;;  %2149 = vmatpush1.msra.mxu1 %v2148_v23  ;;  %v2160_v63 = vand.u32 4294901760, %v2159_v55  ;;  %1960 = vmatpush2.msra.mxu0 %v9649_v57  ;;  %v2166_v23 = vand.u32 4294901760, %v2165_v3 }
 0x180   : > { %2155 = vmatprep.subr.mxu1 %v2154_v35  ;;  %v2183_v13 = vsub.f32 %v9631_v49, %v13230_v0  ;;  %1966 = vmatprep.mubr.f32.mxu0 %v13231_v53  ;;  %v13232_v35 = vld [vmem:[#allocation95_spill] sm:$0xff]  ;;  %v2178_v0 = vand.u32 4294901760, %v2177_v59  ;;  %v2223_v32 = vsub.f32 %v9663_v43, %v13233_v19  ;;  %v13234_v53 = vand.u32 4294901760, %v9670_v30 }
 0x181   : > { %2161 = vmatpush1.msra.mxu1 %v2160_v63  ;;  %1972 = vmatmul.mubr.f32.vlgmr.msra.gmra.mxu0 %v13232_v35  ;;  %v2172_v55 = vand.u32 4294901760, %v2171_v26  ;;  %v2218_v26 = vand.u32 4294901760, %v2217_v1  ;;  %v13235_v63 = vand.u32 4294901760, %v9678_v7 }
 0x182   : > { %2167 = vmatprep.subr.mxu1 %v2166_v23  ;;  %2257 = vmatprep.subr.mxu0 %v9299_v22  ;;  %v2184_v3 = vand.u32 4294901760, %v2183_v13  ;;  %v2229_v4 = vsub.f32 %v9670_v30, %v13234_v53  ;;  %v13236_v23 = vld [vmem:[#allocation98_spill] sm:$0xff]  ;;  %v2224_v19 = vand.u32 4294901760, %v2223_v32  ;;  %v13237_v13 = vld [vmem:[#allocation101_spill] sm:$0xff] }
 0x183   : > { %2173 = vmatpush1.msra.mxu1 %v2172_v55  ;;  %2260 = vmatpush1.msra.mxu0 %v9302_v24  ;;  %v2235_v59 = vsub.f32 %v9678_v7, %v13235_v63  ;;  %v13239_v32 = vld [vmem:[#allocation29_spill] sm:$0xff]  ;;  %v13240_v55 = vld [vmem:[#allocation42_spill] sm:$0xff]  ;;  %v13245_v63 = vld [vmem:[#allocation43_spill] sm:$0xff] }
 0x184   : > { %2179 = vmatprep.subr.mxu1 %v2178_v0  ;;  %2263 = vmatprep.subr.mxu0 %v9322_v9  ;;  %v2230_v35 = vand.u32 4294901760, %v2229_v4  ;;  %v13238_v4 = vld [vmem:[#allocation89_spill] sm:$0xff]  ;;  %v13241_v0 = vld [vmem:[#allocation28_spill] sm:$0xff]  ;;  %v13243_v53 = vld [vmem:[#allocation74_spill] sm:$0xff] }
 0x185   : > { %1982 = vmatprep.mubr.f32.mxu0 %v13236_v23  ;;  %2185 = vmatpush1.msra.mxu1 %v2184_v3  ;;  %v2236_v1 = vand.u32 4294901760, %v2235_v59  ;;  %v13242_v3 = vld [vmem:[#allocation36_spill] sm:$0xff]  ;;  %v13246_v59 = vld [vmem:[#allocation39_spill] sm:$0xff]  ;;  %v13247_v23 = vld [vmem:[#allocation78_spill] sm:$0xff] }
 0x186   : > { %2266 = vmatpush1.msra.mxu0 %v9311_v14  ;;  %2219 = vmatprep.subr.mxu1 %v2218_v26  ;;  %v13244_v26 = vld [vmem:[#allocation68_spill] sm:$0xff] }
 0x187   : > { %1988 = vmatmul.mubr.f32.gmra.mxu0 %v13237_v13  ;;  %2269 = vmatprep.subr.mxu0 %v9363_v12  ;;  %v13249_v13 = vld [vmem:[#allocation24_spill] sm:$0xff] }
 0x188   : > { %2225 = vmatpush2.msra.mxu1 %v2224_v19  ;;  %2272 = vmatpush1.msra.mxu0 %v9325_v47  ;;  %v13248_v19 = vld [vmem:[#allocation60_spill] sm:$0xff] }
 0x189   : > { %2231 = vmatprep.subr.mxu1 %v2230_v35  ;;  %2275 = vmatprep.subr.mxu0 %v9381_v61  ;;  %v13250_v35 = vld [vmem:[#allocation64_spill] sm:$0xff] }
 0x18a   : > { %2237 = vmatpush2.msra.mxu1 %v2236_v1  ;;  %2278 = vmatpush1.msra.mxu0 %v9330_v18  ;;  %v13251_v1 = vld [vmem:[#allocation45_spill] sm:$0xff] }
 0x18b   : > { %2241 = vmatmul.mubr.f32.vlgmr.msra.gmra.mxu1 %v13158_v62  ;;  %2281 = vmatprep.subr.mxu0 %v9385_v10  ;;  %v13254_v62 = vld [vmem:[#allocation46_spill] sm:$0xff] }
 0x18c   : > { %2413 = vmatprep.subr.mxu1 %v9240_v20  ;;  %2284 = vmatpush1.msra.mxu0 %v9351_v58 }
 0x18d   : > { %2415 = vmatpush1.msra.mxu1 %v9257_v48  ;;  %2287 = vmatprep.subr.mxu0 %v9388_v11 }
 0x18e   : > { %2417 = vmatprep.subr.mxu1 %v9281_v54  ;;  %2247 = vmatprep.mubr.f32.mxu1 %v13056_v46  ;;  %v13253_v46 = vld [vmem:[#allocation81_spill] sm:$0xff] }
 0x18f   : > { %2290 = vmatpush1.msra.mxu0 %v9366_v28  ;;  %2419 = vmatpush1.msra.mxu1 %v9270_v27 }
 0x190   : > { %2293 = vmatprep.subr.mxu0 %v9118_v38  ;;  %2249 = vmatmul.mubr.f32.gmra.mxu1 %v13060_v36  ;;  %v13252_v36 = vld [vmem:[#allocation86_spill] sm:$0xff] }
 0x191   : > { %2421 = vmatprep.subr.mxu1 %v9313_v40  ;;  %2296 = vmatpush1.msra.mxu0 %v9152_v16 }
 0x192   : > { %2423 = vmatpush1.msra.mxu1 %v13238_v4  ;;  %2299 = vmatprep.subr.mxu0 %v13239_v32 }
 0x193   : > { %2425 = vmatprep.subr.mxu1 %v13240_v55  ;;  %2302 = vmatpush1.msra.mxu0 %v13241_v0 }
 0x194   : > { %2427 = vmatpush1.msra.mxu1 %v13242_v3  ;;  %2305 = vmatprep.subr.mxu0 %v9461_v29 }
 0x195   : > { %2429 = vmatprep.subr.mxu1 %v13243_v53  ;;  %2308 = vmatpush1.msra.mxu0 %v9471_v50 }
 0x196   : > { %2431 = vmatpush1.msra.mxu1 %v13244_v26  ;;  %2311 = vmatprep.subr.mxu0 %v9480_v6 }
 0x197   : > { %2433 = vmatprep.subr.mxu1 %v13245_v63  ;;  %2314 = vmatpush1.msra.mxu0 %v9498_v51 }
 0x198   : > { %2435 = vmatpush1.msra.mxu1 %v13246_v59  ;;  %2317 = vmatprep.subr.mxu0 %v13247_v23 }
 0x199   : > { %2437 = vmatprep.subr.mxu1 %v13248_v19  ;;  %2320 = vmatpush1.msra.mxu0 %v9518_v45 }
 0x19a   : > { %2439 = vmatpush1.msra.mxu1 %v13249_v13  ;;  %2323 = vmatprep.subr.mxu0 %v9527_v33  ;;  %v13256_v33 = vld [vmem:[#allocation53_spill] sm:$0xff] }
 0x19b   : > { %2441 = vmatprep.subr.mxu1 %v13250_v35  ;;  %2326 = vmatpush1.msra.mxu0 %v13251_v1  ;;  %v13257_v1 = vld [vmem:[#allocation59_spill] sm:$0xff] }
 0x19c   : > { %2443 = vmatpush1.msra.mxu1 %v13252_v36  ;;  %2329 = vmatprep.subr.mxu0 %v9552_v42  ;;  %v13258_v42 = vld [vmem:[#allocation62_spill] sm:$0xff] }
 0x19d   : > { %2445 = vmatprep.subr.mxu1 %v13253_v46  ;;  %2332 = vmatpush1.msra.mxu0 %v9535_v34  ;;  %v13259_v34 = vld [vmem:[#allocation66_spill] sm:$0xff] }
 0x19e   : > { %2447 = vmatpush1.msra.mxu1 %v13254_v62  ;;  %2335 = vmatprep.subr.mxu0 %v9573_v37  ;;  %v13260_v37 = vld [vmem:[#allocation71_spill] sm:$0xff] }
 0x19f   : > { %2449 = vmatprep.subr.mxu1 %v13255_v5  ;;  %2338 = vmatpush1.msra.mxu0 %v9545_v44  ;;  %v13261_v44 = vld [vmem:[#allocation85_spill] sm:$0xff] }
 0x1a0   : > { %2451 = vmatpush1.msra.mxu1 %v13256_v33  ;;  %2341 = vmatprep.subr.mxu0 %v9605_v17  ;;  %v13262_v17 = vld [vmem:[#allocation77_spill] sm:$0xff] }
 0x1a1   : > { %2453 = vmatprep.subr.mxu1 %v13257_v1  ;;  %2344 = vmatpush1.msra.mxu0 %v9609_v2  ;;  %v13263_v2 = vld [vmem:[#allocation48_spill] sm:$0xff] }
 0x1a2   : > { %2455 = vmatpush1.msra.mxu1 %v13258_v42  ;;  %2347 = vmatprep.subr.mxu0 %v9627_v25  ;;  %v13264_v25 = vld [vmem:[#allocation11_spill] sm:$0xff] }
 0x1a3   : > { %2457 = vmatprep.subr.mxu1 %v13259_v34  ;;  %2350 = vmatpush1.msra.mxu0 %v9631_v49  ;;  %v13265_v49 = vld [vmem:[#allocation76_spill] sm:$0xff] }
 0x1a4   : > { %2459 = vmatpush1.msra.mxu1 %v13260_v37  ;;  %2381 = vmatprep.subr.mxu0 %v9639_v39 }
 0x1a5   : > { %2461 = vmatprep.subr.mxu1 %v13261_v44  ;;  %2384 = vmatpush2.msra.mxu0 %v9663_v43  ;;  %v13266_v44 = vand.u32 4294901760, %v9299_v22  ;;  %v13271_v22 = vld [vmem:[#allocation87_spill] sm:$0xff] }
 0x1a6   : > { %2463 = vmatpush1.msra.mxu1 %v13262_v17  ;;  %2387 = vmatprep.subr.mxu0 %v9670_v30  ;;  %v13267_v17 = vand.u32 4294901760, %v9302_v24  ;;  %v13273_v24 = vand.u32 4294901760, %v9325_v47  ;;  %v13279_v47 = vand.u32 4294901760, %v9351_v58  ;;  %v13287_v58 = vand.u32 4294901760, %v13241_v0 }
 0x1a7   : > { %2465 = vmatprep.subr.mxu1 %v13263_v2  ;;  %2390 = vmatpush2.msra.mxu0 %v9678_v7  ;;  %v13268_v7 = vand.u32 4294901760, %v9322_v9  ;;  %v13274_v9 = vand.u32 4294901760, %v9381_v61  ;;  %v13280_v61 = vand.u32 4294901760, %v9388_v11  ;;  %v2882_v11 = vld [vmem:[%s12139_s6 + $0xf8] sm:$0xff] }
 0x1a8   : > { %2393 = vmatprep.mubr.f32.mxu0 %v13264_v25  ;;  %2467 = vmatpush1.msra.mxu1 %v9511_v56  ;;  %v13269_v25 = vld [vmem:[#allocation84_spill] sm:$0xff] }
 0x1a9   : > { %2396 = vmatmul.mubr.f32.vlgmr.msra.gmra.mxu0 %v13265_v49  ;;  %2469 = vmatprep.subr.mxu1 %v9561_v21  ;;  %v13270_v49 = vand.u32 4294901760, %v9311_v14  ;;  %v13275_v14 = vld [vmem:[#allocation12_spill] sm:$0xff] }
 0x1aa   : > { %2540 = vmatprep.subr.mxu0 %v13266_v44  ;;  %2471 = vmatpush1.msra.mxu1 %v9564_v52  ;;  %v13272_v44 = vand.u32 4294901760, %v9363_v12  ;;  %v13278_v12 = vand.u32 4294901760, %v9385_v10  ;;  %v13283_v10 = vand.u32 4294901760, %v9118_v38  ;;  %v13288_v38 = vand.u32 4294901760, %v9461_v29 }
 0x1ab   : > { %2544 = vmatpush1.msra.mxu0 %v13267_v17  ;;  %2473 = vmatprep.subr.mxu1 %v9584_v60  ;;  %v13276_v17 = vand.u32 4294901760, %v9330_v18  ;;  %v13282_v18 = vand.u32 4294901760, %v9366_v28  ;;  %v2866_v28 = vld [vmem:[%s12139_s6 + $0x78] sm:$0xff]  ;;  %v13292_v29 = vand.u32 4294901760, %v13247_v23 }
 0x1ac   : > { %2548 = vmatprep.subr.mxu0 %v13268_v7  ;;  %2403 = vmatprep.mubr.f32.mxu0 %v13269_v25  ;;  %v13277_v7 = vld [vmem:[#allocation83_spill] sm:$0xff]  ;;  %v13281_v25 = vld [vmem:[#allocation90_spill] sm:$0xff] }
 0x1ad   : > { %2475 = vmatpush1.msra.mxu1 %v9587_v31  ;;  %2552 = vmatpush1.msra.mxu0 %v13270_v49  ;;  %v13305_v49 = vld [vmem:[#allocation34_spill] sm:$0xff] }
 0x1ae   : > { %2505 = vmatprep.subr.mxu1 %v9596_v15  ;;  %2406 = vmatmul.mubr.f32.gmra.mxu0 %v13271_v22  ;;  %v13306_v22 = vand.u32 4294901760, %v13305_v49 }
 0x1af   : > { %2556 = vmatprep.subr.mxu0 %v13272_v44  ;;  %2507 = vmatpush2.msra.mxu1 %v9618_v8 }
 0x1b0   : > { %2560 = vmatpush1.msra.mxu0 %v13273_v24  ;;  %2509 = vmatprep.subr.mxu1 %v9642_v41  ;;  %v13309_v24 = vld [vmem:[#allocation93_spill] sm:$0xff] }
 0x1b1   : > { %2564 = vmatprep.subr.mxu0 %v13274_v9  ;;  %2511 = vmatpush2.msra.mxu1 %v9649_v57  ;;  %v13310_v9 = vand.u32 4294901760, %v13309_v24  ;;  %v13346_v24 = vand.u32 4294901760, %v9670_v30  ;;  %v13351_v30 = vld [vmem:[#allocation10_spill] sm:$0xff] }
 0x1b2   : > { %2515 = vmatprep.mubr.f32.mxu1 %v13275_v14  ;;  %2568 = vmatpush1.msra.mxu0 %v13276_v17  ;;  %v13312_v17 = vld [vmem:[#allocation23_spill] sm:$0xff] }
 0x1b3   : > { %2519 = vmatmul.mubr.f32.vlgmr.msra.gmra.mxu1 %v13277_v7  ;;  %2572 = vmatprep.subr.mxu0 %v13278_v12  ;;  %v13313_v7 = vand.u32 4294901760, %v13312_v17 }
 0x1b4   : > { %2727 = vmatprep.subr.mxu1 %v9240_v20  ;;  %2576 = vmatpush1.msra.mxu0 %v13279_v47  ;;  %v13284_v20 = vld [vmem:[#allocation92_spill] sm:$0xff]  ;;  %v2878_v47 = vld [vmem:[%s12139_s6 + $0xd8] sm:$0xff] }
 0x1b5   : > { %2729 = vmatpush1.msra.mxu1 %v9257_v48  ;;  %2580 = vmatprep.subr.mxu0 %v13280_v61  ;;  %v13285_v48 = vand.u32 4294901760, %v9152_v16  ;;  %v13289_v16 = vand.u32 4294901760, %v9471_v50  ;;  %v2881_v50 = vld [vmem:[%s12139_s6 + $0xf0] sm:$0xff]  ;;  %v13316_v61 = vld [vmem:[#allocation27_spill] sm:$0xff] }
 0x1b6   : > { %2731 = vmatprep.subr.mxu1 %v9281_v54  ;;  %2527 = vmatprep.mubr.f32.mxu1 %v13281_v25  ;;  %v13286_v54 = vand.u32 4294901760, %v13239_v32  ;;  %v2880_v32 = vld [vmem:[%s12139_s6 + $0xe8] sm:$0xff]  ;;  %v13317_v25 = vand.u32 4294901760, %v13316_v61  ;;  %v13349_v61 = vld [vmem:[#allocation16_spill] sm:$0xff] }
 0x1b7   : > { %2584 = vmatpush1.msra.mxu0 %v13282_v18  ;;  %2733 = vmatpush1.msra.mxu1 %v9270_v27  ;;  %v13290_v27 = vand.u32 4294901760, %v9480_v6  ;;  %v13293_v6 = vand.u32 4294901760, %v9518_v45  ;;  %v2864_v45 = vld [vmem:[%s12139_s6 + $0x68] sm:$0xff] }
 0x1b8   : > { %2588 = vmatprep.subr.mxu0 %v13283_v10  ;;  %2531 = vmatmul.mubr.f32.gmra.mxu1 %v13284_v20  ;;  %v9905_v44 = vand.u32 4294901760, %v2864_v45  ;;  %v2877_v20 = vld [vmem:[%s12139_s6 + $0xd0] sm:$0xff] }
 0x1b9   : > { %2735 = vmatprep.subr.mxu1 %v9313_v40  ;;  %2592 = vmatpush1.msra.mxu0 %v13285_v48  ;;  %v13291_v40 = vand.u32 4294901760, %v9498_v51  ;;  %v9868_v51 = vand.u32 4294901760, %v2882_v11  ;;  %v13321_v48 = vld [vmem:[#allocation52_spill] sm:$0xff] }
 0x1ba   : > { %2737 = vmatpush1.msra.mxu1 %v13238_v4  ;;  %2596 = vmatprep.subr.mxu0 %v13286_v54  ;;  %v2865_v4 = vld [vmem:[%s12139_s6 + $0x70] sm:$0xff]  ;;  %13308 = vst [vmem:[#allocation97_spill] sm:$0xff] %v9905_v44  ;;  %v13322_v54 = vand.u32 4294901760, %v13321_v48 }
 0x1bb   : > { %2739 = vmatprep.subr.mxu1 %v13240_v55  ;;  %2600 = vmatpush1.msra.mxu0 %v13287_v58  ;;  %13294 = vst [vmem:[#allocation55_spill] sm:$0xff] %v9868_v51  ;;  %v13295_v55 = vld [vmem:[#allocation33_spill] sm:$0xff] }
 0x1bc   : > { %2741 = vmatpush1.msra.mxu1 %v13242_v3  ;;  %2604 = vmatprep.subr.mxu0 %v13288_v38  ;;  %v13296_v0 = vand.u32 4294901760, %v13295_v55  ;;  %v9879_v3 = vand.u32 4294901760, %v2866_v28  ;;  %v2861_v38 = vld [vmem:[%s12139_s6 + $0x50] sm:$0xff]  ;;  %v13335_v55 = vand.u32 4294901760, %v9639_v39  ;;  %v13341_v39 = vand.u32 4294901760, %v9663_v43 }
 0x1bd   : > { %2743 = vmatprep.subr.mxu1 %v13243_v53  ;;  %2608 = vmatpush1.msra.mxu0 %v13289_v16  ;;  %v13298_v53 = vld [vmem:[#allocation45_spill] sm:$0xff]  ;;  %v13325_v16 = vld [vmem:[#allocation15_spill] sm:$0xff] }
 0x1be   : > { %2745 = vmatpush1.msra.mxu1 %v13244_v26  ;;  %2612 = vmatprep.subr.mxu0 %v13290_v27  ;;  %13297 = vst [vmem:[#allocation17_spill] sm:$0xff] %v9879_v3  ;;  %v13299_v26 = vand.u32 4294901760, %v13298_v53  ;;  %v9914_v14 = vsub.f32 %v2866_v28, %v9879_v3  ;;  %v13326_v27 = vand.u32 4294901760, %v13325_v16  ;;  %v2876_v28 = vld [vmem:[%s12139_s6 + $0xc8] sm:$0xff] }
 0x1bf   : > { %2747 = vmatprep.subr.mxu1 %v13245_v63  ;;  %2616 = vmatpush1.msra.mxu0 %v13291_v40  ;;  %v9887_v63 = vand.u32 4294901760, %v2881_v50  ;;  %v9962_v40 = vand.u32 4294901760, %v2878_v47 }
 0x1c0   : > { %2749 = vmatpush1.msra.mxu1 %v13246_v59  ;;  %2620 = vmatprep.subr.mxu0 %v13292_v29  ;;  %v13301_v59 = vld [vmem:[#allocation14_spill] sm:$0xff]  ;;  %13311 = vst [vmem:[#allocation20_spill] sm:$0xff] %v9914_v14  ;;  %v2860_v29 = vld [vmem:[%s12139_s6 + $0x48] sm:$0xff] }
 0x1c1   : > { %2751 = vmatprep.subr.mxu1 %v13248_v19  ;;  %2624 = vmatpush1.msra.mxu0 %v13293_v6  ;;  %13300 = vst [vmem:[#allocation38_spill] sm:$0xff] %v9887_v63  ;;  %v13302_v23 = vand.u32 4294901760, %v13301_v59  ;;  %v9892_v19 = vand.u32 4294901760, %v2865_v4  ;;  %13328 = vst [vmem:[#allocation26_spill] sm:$0xff] %v9962_v40  ;;  %v2875_v59 = vld [vmem:[%s12139_s6 + $0xc0] sm:$0xff] }
 0x1c2   : > { %2753 = vmatpush1.msra.mxu1 %v13249_v13  ;;  %2628 = vmatprep.subr.mxu0 %v13296_v0  ;;  %v9894_v13 = vand.u32 4294901760, %v2880_v32  ;;  %v13336_v0 = vld [vmem:[#allocation85_spill] sm:$0xff] }
 0x1c3   : > { %2755 = vmatprep.subr.mxu1 %v13250_v35  ;;  %2632 = vmatpush1.msra.mxu0 %v13299_v26  ;;  %13303 = vst [vmem:[#allocation56_spill] sm:$0xff] %v9892_v19  ;;  %v2879_v35 = vld [vmem:[%s12139_s6 + $0xe0] sm:$0xff]  ;;  %v9995_v26 = vand.u32 4294901760, %v2861_v38 }
 0x1c4   : > { %2757 = vmatpush1.msra.mxu1 %v13252_v36  ;;  %2636 = vmatprep.subr.mxu0 %v13302_v23  ;;  %13304 = vst [vmem:[#allocation96_spill] sm:$0xff] %v9894_v13  ;;  %v9903_v36 = vsub.f32 %v2882_v11, %v9868_v51  ;;  %v9922_v12 = vand.u32 4294901760, %v2879_v35  ;;  %v9937_v18 = vsub.f32 %v2880_v32, %v9894_v13  ;;  %v9960_v11 = vand.u32 4294901760, %v9914_v14  ;;  %v13342_v23 = vld [vmem:[#allocation77_spill] sm:$0xff] }
 0x1c5   : > { %2759 = vmatprep.subr.mxu1 %v13253_v46  ;;  %2640 = vmatpush1.msra.mxu0 %v13306_v22  ;;  %v2863_v46 = vld [vmem:[%s12139_s6 + $0x60] sm:$0xff]  ;;  %v9981_v32 = vand.u32 4294901760, %v2877_v20  ;;  %13340 = vst [vmem:[#allocation61_spill] sm:$0xff] %v9995_v26  ;;  %v10008_v22 = vand.u32 4294901760, %v2876_v28 }
 0x1c6   : > { %2761 = vmatpush1.msra.mxu1 %v13254_v62  ;;  %13307 = vst [vmem:[#allocation18_spill] sm:$0xff] %v9903_v36  ;;  %2644 = vmatprep.subr.mxu0 %v13310_v9  ;;  %v9920_v62 = vsub.f32 %v2881_v50, %v9887_v63  ;;  %13315 = vst [vmem:[#allocation19_spill] sm:$0xff] %v9922_v12  ;;  %v9939_v10 = vand.u32 4294901760, %v2863_v46  ;;  %v9948_v58 = vand.u32 4294901760, %v9903_v36  ;;  %v13330_v50 = vld [vmem:[#allocation94_spill] sm:$0xff]  ;;  %v9990_v53 = vand.u32 4294901760, %v9937_v18 }
 0x1c7   : > { %2763 = vmatprep.subr.mxu1 %v13255_v5  ;;  %2648 = vmatpush1.msra.mxu0 %v13313_v7  ;;  %v2862_v5 = vld [vmem:[%s12139_s6 + $0x58] sm:$0xff]  ;;  %13319 = vst [vmem:[#allocation22_spill] sm:$0xff] %v9937_v18  ;;  %13327 = vst [vmem:[#allocation21_spill] sm:$0xff] %v9960_v11  ;;  %v13331_v6 = vand.u32 4294901760, %v13330_v50  ;;  %v3046_v43 = vsub.f32 %v9914_v14, %v9960_v11  ;;  %v10018_v9 = vsub.f32 %v2878_v47, %v9962_v40  ;;  %v2859_v7 = vld [vmem:[%s12139_s6 + $0x40] sm:$0xff] }
 0x1c8   : > { %2765 = vmatpush1.msra.mxu1 %v13256_v33  ;;  %13314 = vst [vmem:[#allocation58_spill] sm:$0xff] %v9920_v62  ;;  %2652 = vmatprep.subr.mxu0 %v13317_v25  ;;  %v9934_v33 = vsub.f32 %v2865_v4, %v9892_v19  ;;  %13320 = vst [vmem:[#allocation103_spill] sm:$0xff] %v9939_v10  ;;  %v9979_v4 = vsub.f32 %v2879_v35, %v9922_v12  ;;  %v13350_v25 = vand.u32 4294901760, %v13349_v61 }
 0x1c9   : > { %2767 = vmatprep.subr.mxu1 %v13257_v1  ;;  %2656 = vmatpush1.msra.mxu0 %v13322_v54  ;;  %13323 = vst [vmem:[#allocation31_spill] sm:$0xff] %v9948_v58  ;;  %v9951_v1 = vsub.f32 %v2864_v45, %v9905_v44  ;;  %13334 = vst [vmem:[#allocation88_spill] sm:$0xff] %v9981_v32  ;;  %v3158_v35 = vsub.f32 %v9903_v36, %v9948_v58  ;;  %v13355_v54 = vld [vmem:[#allocation70_spill] sm:$0xff] }
 0x1ca   : > { %13318 = vst [vmem:[#allocation102_spill] sm:$0xff] %v9934_v33  ;;  %2769 = vmatpush1.msra.mxu1 %v13258_v42  ;;  %2660 = vmatprep.subr.mxu0 %v13326_v27  ;;  %v9964_v42 = vand.u32 4294901760, %v2862_v5  ;;  %13333 = vst [vmem:[#allocation54_spill] sm:$0xff] %v9979_v4  ;;  %v9987_v45 = vand.u32 4294901760, %v9934_v33  ;;  %v10032_v48 = vand.u32 4294901760, %v9979_v4  ;;  %v10035_v47 = vsub.f32 %v2877_v20, %v9981_v32  ;;  %v13358_v20 = vld [vmem:[#allocation75_spill] sm:$0xff] }
 0x1cb   : > { %13324 = vst [vmem:[#allocation65_spill] sm:$0xff] %v9951_v1  ;;  %2771 = vmatprep.subr.mxu1 %v13259_v34  ;;  %2664 = vmatpush1.msra.mxu0 %v13331_v6  ;;  %v9976_v34 = vand.u32 4294901760, %v9920_v62  ;;  %13338 = vst [vmem:[#allocation91_spill] sm:$0xff] %v9990_v53  ;;  %v10006_v49 = vand.u32 4294901760, %v9951_v1  ;;  %v3172_v27 = vsub.f32 %v9937_v18, %v9990_v53  ;;  %v2857_v53 = vld [vmem:[%s12139_s6 + $0x30] sm:$0xff] }
 0x1cc   : > { %13329 = vst [vmem:[#allocation32_spill] sm:$0xff] %v9964_v42  ;;  %2773 = vmatpush1.msra.mxu1 %v13260_v37  ;;  %2696 = vmatprep.subr.mxu0 %v13335_v55  ;;  %13337 = vst [vmem:[#allocation57_spill] sm:$0xff] %v9987_v45  ;;  %v9993_v37 = vsub.f32 %v2863_v46, %v9939_v10  ;;  %v10010_v46 = vand.u32 4294901760, %v2860_v29  ;;  %v10021_v17 = vsub.f32 %v2862_v5, %v9964_v42 }
 0x1cd   : > { %13332 = vst [vmem:[#allocation82_spill] sm:$0xff] %v9976_v34  ;;  %2775 = vmatprep.subr.mxu1 %v13336_v0  ;;  %2700 = vmatpush2.msra.mxu0 %v13341_v39  ;;  %13343 = vst [vmem:[#allocation100_spill] sm:$0xff] %v10006_v49  ;;  %v10037_v5 = vand.u32 4294901760, %v2875_v59  ;;  %v3053_v16 = vsub.f32 %v9934_v33, %v9987_v45  ;;  %v10049_v6 = vsub.f32 %v2861_v38, %v9995_v26  ;;  %v2874_v38 = vld [vmem:[%s12139_s6 + $0xb8] sm:$0xff] }
 0x1ce   : > { %13339 = vst [vmem:[#allocation99_spill] sm:$0xff] %v9993_v37  ;;  %2777 = vmatpush1.msra.mxu1 %v13342_v23  ;;  %13344 = vst [vmem:[#allocation37_spill] sm:$0xff] %v10008_v22  ;;  %2704 = vmatprep.subr.mxu0 %v13346_v24  ;;  %v10046_v50 = vand.u32 4294901760, %v9993_v37  ;;  %v10056_v55 = vsub.f32 %v2876_v28, %v10008_v22  ;;  %v10059_v0 = vsub.f32 %v2860_v29, %v10010_v46 }
 0x1cf   : > { %13345 = vst [vmem:[#allocation104_spill] sm:$0xff] %v10010_v46  ;;  %2779 = vmatprep.subr.mxu1 %v13263_v2  ;;  %13347 = vst [vmem:[#allocation35_spill] sm:$0xff] %v10018_v9  ;;  %2708 = vmatpush2.msra.mxu0 %v13350_v25  ;;  %v3165_v2 = vsub.f32 %v9920_v62, %v9976_v34  ;;  %v10061_v39 = vand.u32 4294901760, %v2859_v7  ;;  %v10070_v23 = vand.u32 4294901760, %v3046_v43  ;;  %v10073_v28 = vand.u32 4294901760, %v10018_v9  ;;  %v2858_v43 = vld [vmem:[%s12139_s6 + $0x38] sm:$0xff] }
 0x1d0   : > { %13348 = vst [vmem:[#allocation41_spill] sm:$0xff] %v10021_v17  ;;  %2710 = vmatprep.mubr.f32.mxu0 %v13351_v30  ;;  %13352 = vst [vmem:[#allocation105_spill] sm:$0xff] %v10032_v48  ;;  %2781 = vmatpush1.msra.mxu1 %v9511_v56  ;;  %v3060_v56 = vsub.f32 %v9951_v1, %v10006_v49  ;;  %v10076_v29 = vand.u32 4294901760, %v10021_v17  ;;  %v3179_v61 = vsub.f32 %v9979_v4, %v10032_v48  ;;  %v2867_v4 = vld [vmem:[%s12139_s6 + $0x80] sm:$0xff] }
 0x1d1   : > { %13353 = vst [vmem:[#allocation40_spill] sm:$0xff] %v10035_v47  ;;  %13354 = vst [vmem:[#allocation47_spill] sm:$0xff] %v10037_v5  ;;  %2712 = vmatmul.mubr.f32.vlgmr.msra.gmra.mxu0 %v13355_v54  ;;  %2783 = vmatprep.subr.mxu1 %v9561_v21  ;;  %v10068_v21 = vand.u32 4294901760, %v3158_v35  ;;  %v10079_v24 = vand.u32 4294901760, %v3165_v2  ;;  %v10088_v35 = vsub.f32 %v2875_v59, %v10037_v5  ;;  %v10095_v25 = vand.u32 4294901760, %v3053_v16  ;;  %v2873_v59 = vld [vmem:[%s12139_s6 + $0xb0] sm:$0xff] }
 0x1d2   : > { %13356 = vst [vmem:[#allocation106_spill] sm:$0xff] %v10046_v50  ;;  %13357 = vst [vmem:[#allocation44_spill] sm:$0xff] %v10049_v6  ;;  %2718 = vmatprep.mubr.f32.mxu0 %v13358_v20  ;;  %2785 = vmatpush1.msra.mxu1 %v9564_v52  ;;  %v10085_v52 = vand.u32 4294901760, %v10035_v47  ;;  %v10100_v2 = vand.u32 4294901760, %v10049_v6  ;;  %v10102_v48 = vand.u32 4294901760, %v2874_v38  ;;  %v10108_v49 = vand.u32 4294901760, %v3172_v27 }
 0x1d3   : > { %13359 = vst [vmem:[#allocation51_spill] sm:$0xff] %v10056_v55  ;;  %13360 = vst [vmem:[#allocation107_spill] sm:$0xff] %v10059_v0  ;;  %2827 = vmatprep.mubr.f32.mxu1 %v13351_v30  ;;  %2787 = vmatprep.subr.mxu1 %v9584_v60  ;;  %v13369_v60 = vld [vmem:[#allocation80_spill] sm:$0xff]  ;;  %v3067_v30 = vsub.f32 %v9993_v37, %v10046_v50  ;;  %v10115_v16 = vand.u32 4294901760, %v10059_v0  ;;  %v10118_v50 = vsub.f32 %v2859_v7, %v10061_v39  ;;  %v2872_v7 = vld [vmem:[%s12139_s6 + $0xa8] sm:$0xff] }
 0x1d4   : > { %13361 = vst [vmem:[#allocation50_spill] sm:$0xff] %v10061_v39  ;;  %13362 = vst [vmem:[#allocation109_spill] sm:$0xff] %v10068_v21  ;;  %6927 = vmatprep.subr.mxu0 %v9868_v51  ;;  %2789 = vmatpush1.msra.mxu1 %v9587_v31  ;;  %v10112_v31 = vand.u32 4294901760, %v10056_v55  ;;  %v3186_v27 = vsub.f32 %v10018_v9, %v10073_v28  ;;  %v3074_v45 = vsub.f32 %v10021_v17, %v10076_v29  ;;  %v2853_v17 = vld [vmem:[%s12139_s6 + $0x10] sm:$0xff]  ;;  %v2851_v1 = vld [vmem:[%s12139_s6] sm:$0xff] }
 0x1d5   : > { %13363 = vst [vmem:[#allocation111_spill] sm:$0xff] %v10070_v23  ;;  %13364 = vst [vmem:[#allocation108_spill] sm:$0xff] %v10073_v28  ;;  %2720 = vmatmul.mubr.f32.gmra.mxu0 %v13369_v60  ;;  %2819 = vmatprep.subr.mxu1 %v9596_v15  ;;  %v10124_v15 = vand.u32 4294901760, %v3060_v56  ;;  %v10131_v34 = vand.u32 4294901760, %v2858_v43  ;;  %v10137_v11 = vand.u32 4294901760, %v3179_v61  ;;  %v10143_v56 = vand.u32 4294901760, %v10088_v35 }
 0x1d6   : > { %13365 = vst [vmem:[#allocation110_spill] sm:$0xff] %v10076_v29  ;;  %13366 = vst [vmem:[#allocation67_spill] sm:$0xff] %v10079_v24  ;;  %6928 = vmatpush3.msra.mxu0 %v9879_v3  ;;  %2821 = vmatpush2.msra.mxu1 %v9618_v8  ;;  %v3193_v8 = vsub.f32 %v10035_v47, %v10085_v52  ;;  %v10145_v29 = vand.u32 4294901760, %v2873_v59  ;;  %v2856_v28 = vld [vmem:[%s12139_s6 + $0x28] sm:$0xff]  ;;  %v10151_v58 = vand.u32 4294901760, %v3067_v30  ;;  %v2871_v47 = vld [vmem:[%s12139_s6 + $0xa0] sm:$0xff] }
 0x1d7   : > { %13367 = vst [vmem:[#allocation25_spill] sm:$0xff] %v10085_v52  ;;  %13368 = vst [vmem:[#allocation63_spill] sm:$0xff] %v10088_v35  ;;  %6929 = vmatprep.subr.mxu0 %v9887_v63  ;;  %2823 = vmatprep.subr.mxu1 %v9642_v41  ;;  %v3081_v41 = vsub.f32 %v10049_v6, %v10100_v2  ;;  %v10157_v61 = vsub.f32 %v2874_v38, %v10102_v48  ;;  %v10159_v52 = vand.u32 4294901760, %v2857_v53  ;;  %v2855_v6 = vld [vmem:[%s12139_s6 + $0x20] sm:$0xff] }
 0x1d8   : > { %13370 = vst [vmem:[#allocation30_spill] sm:$0xff] %v10095_v25  ;;  %13371 = vst [vmem:[#allocation73_spill] sm:$0xff] %v10100_v2  ;;  %6930 = vmatpush3.msra.mxu0 %v9892_v19  ;;  %2825 = vmatpush2.msra.mxu1 %v9649_v57  ;;  %v3200_v57 = vsub.f32 %v10056_v55, %v10112_v31  ;;  %v3088_v30 = vsub.f32 %v10059_v0, %v10115_v16  ;;  %v10171_v2 = vand.u32 4294901760, %v10118_v50  ;;  %v2870_v0 = vld [vmem:[%s12139_s6 + $0x98] sm:$0xff] }
 0x1d9   : > { %13372 = vst [vmem:[#allocation69_spill] sm:$0xff] %v10102_v48  ;;  %13373 = vst [vmem:[#allocation79_spill] sm:$0xff] %v10108_v49  ;;  %6931 = vmatprep.subr.mxu0 %v9894_v13  ;;  %2829 = vmatmul.mubr.f32.vlgmr.msra.gmra.mxu1 %v13355_v54  ;;  %v10173_v38 = vand.u32 4294901760, %v2872_v7  ;;  %v10180_v54 = vand.u32 4294901760, %v3186_v27  ;;  %v10193_v55 = vand.u32 4294901760, %v3193_v8  ;;  %v2854_v27 = vld [vmem:[%s12139_s6 + $0x18] sm:$0xff] }
 0x1da   : > { %13374 = vst [vmem:[#allocation72_spill] sm:$0xff] %v10112_v31  ;;  %13375 = vst [vmem:[#allocation13_spill] sm:$0xff] %v10115_v16  ;;  %6965 = vmatprep.subr.mxu1 %v10068_v21  ;;  %2835 = vmatprep.mubr.f32.mxu1 %v13358_v20  ;;  %v10182_v21 = vand.u32 4294901760, %v3074_v45  ;;  %v10185_v31 = vsub.f32 %v2858_v43, %v10131_v34  ;;  %v10187_v16 = vand.u32 4294901760, %v2856_v28  ;;  %v10201_v43 = vand.u32 4294901760, %v2871_v47 }
 0x1db   : > { %13376 = vst [vmem:[#allocation95_spill] sm:$0xff] %v10118_v50  ;;  %13377 = vst [vmem:[#allocation98_spill] sm:$0xff] %v10124_v15  ;;  %6966 = vmatpush3.msra.mxu1 %v10070_v23  ;;  %6932 = vmatpush3.msra.mxu0 %v9905_v44  ;;  %v3207_v20 = vsub.f32 %v10088_v35, %v10143_v56  ;;  %v10199_v45 = vsub.f32 %v2873_v59, %v10145_v29  ;;  %v10207_v23 = vand.u32 4294901760, %v3081_v41 }
 0x1dc   : > { %13378 = vst [vmem:[#allocation101_spill] sm:$0xff] %v10131_v34  ;;  %13379 = vst [vmem:[#allocation89_spill] sm:$0xff] %v10137_v11  ;;  %6967 = vmatprep.subr.mxu1 %v10079_v24  ;;  %6933 = vmatprep.subr.mxu0 %v9922_v12  ;;  %v10211_v8 = vand.u32 4294901760, %v10157_v61  ;;  %v10214_v24 = vsub.f32 %v2857_v53, %v10159_v52  ;;  %v10216_v59 = vand.u32 4294901760, %v2855_v6  ;;  %v10223_v41 = vand.u32 4294901760, %v3200_v57 }
 0x1dd   : > { %13380 = vst [vmem:[#allocation29_spill] sm:$0xff] %v10143_v56  ;;  %13381 = vst [vmem:[#allocation42_spill] sm:$0xff] %v10145_v29  ;;  %6968 = vmatpush3.msra.mxu1 %v10095_v25  ;;  %v2869_v56 = vld [vmem:[%s12139_s6 + $0x90] sm:$0xff]  ;;  %v3095_v25 = vsub.f32 %v10118_v50, %v10171_v2  ;;  %v10228_v35 = vsub.f32 %v2872_v7, %v10173_v38  ;;  %v10230_v53 = vand.u32 4294901760, %v2870_v0  ;;  %v10236_v9 = vand.u32 4294901760, %v3088_v30  ;;  %v2852_v50 = vld [vmem:[%s12139_s6 + $0x8] sm:$0xff] }
 0x1de   : > { %13382 = vst [vmem:[#allocation28_spill] sm:$0xff] %v10151_v58  ;;  %13383 = vst [vmem:[#allocation36_spill] sm:$0xff] %v10157_v61  ;;  %2837 = vmatmul.mubr.f32.gmra.mxu1 %v13369_v60  ;;  %6969 = vmatprep.subr.mxu1 %v10108_v49  ;;  %v10240_v60 = vand.u32 4294901760, %v10185_v31  ;;  %v10243_v57 = vsub.f32 %v2856_v28, %v10187_v16  ;;  %v10245_v7 = vand.u32 4294901760, %v2854_v27  ;;  %v2868_v49 = vld [vmem:[%s12139_s6 + $0x88] sm:$0xff]  ;;  %v10255_v30 = vand.u32 4294901760, %v10199_v45 }
 0x1df   : > { %13384 = vst [vmem:[#allocation74_spill] sm:$0xff] %v10159_v52  ;;  %13385 = vst [vmem:[#allocation68_spill] sm:$0xff] %v10171_v2  ;;  %6970 = vmatpush3.msra.mxu1 %v10124_v15  ;;  %6934 = vmatpush3.msra.mxu0 %v9939_v10  ;;  %v10251_v2 = vand.u32 4294901760, %v3207_v20  ;;  %v10258_v15 = vsub.f32 %v2871_v47, %v10201_v43  ;;  %v10260_v28 = vand.u32 4294901760, %v2869_v56  ;;  %v10275_v47 = vand.u32 4294901760, %v2853_v17 }
 0x1e0   : > { %13386 = vst [vmem:[#allocation43_spill] sm:$0xff] %v10173_v38  ;;  %13387 = vst [vmem:[#allocation39_spill] sm:$0xff] %v10180_v54  ;;  %6971 = vmatprep.subr.mxu1 %v10137_v11  ;;  %6935 = vmatprep.subr.mxu0 %v9962_v40  ;;  %v3214_v20 = vsub.f32 %v10157_v61, %v10211_v8  ;;  %v10270_v11 = vand.u32 4294901760, %v10214_v24  ;;  %v10273_v37 = vsub.f32 %v2855_v6, %v10216_v59 }
 0x1e1   : > { %13388 = vst [vmem:[#allocation78_spill] sm:$0xff] %v10182_v21  ;;  %13389 = vst [vmem:[#allocation60_spill] sm:$0xff] %v10185_v31  ;;  %6972 = vmatpush3.msra.mxu1 %v10151_v58  ;;  %6936 = vmatpush3.msra.mxu0 %v9964_v42  ;;  %v10281_v58 = vand.u32 4294901760, %v3095_v25  ;;  %v10288_v61 = vsub.f32 %v2870_v0, %v10230_v53  ;;  %v10290_v6 = vand.u32 4294901760, %v2868_v49  ;;  %v10305_v0 = vand.u32 4294901760, %v2852_v50 }
 0x1e2   : > { %13390 = vst [vmem:[#allocation24_spill] sm:$0xff] %v10187_v16  ;;  %13391 = vst [vmem:[#allocation64_spill] sm:$0xff] %v10193_v55  ;;  %6973 = vmatprep.subr.mxu1 %v10180_v54  ;;  %6937 = vmatprep.subr.mxu0 %v9981_v32  ;;  %v3102_v25 = vsub.f32 %v10185_v31, %v10240_v60  ;;  %v10300_v54 = vand.u32 4294901760, %v10243_v57  ;;  %v10303_v18 = vsub.f32 %v2854_v27, %v10245_v7 }
 0x1e3   : > { %13392 = vst [vmem:[#allocation86_spill] sm:$0xff] %v10199_v45  ;;  %13393 = vst [vmem:[#allocation81_spill] sm:$0xff] %v10201_v43  ;;  %6974 = vmatpush3.msra.mxu1 %v10182_v21  ;;  %6938 = vmatpush3.msra.mxu0 %v9995_v26  ;;  %v3221_v33 = vsub.f32 %v10199_v45, %v10255_v30  ;;  %v10312_v21 = vand.u32 4294901760, %v10258_v15  ;;  %v10317_v31 = vand.u32 4294901760, %v2867_v4  ;;  %v10329_v45 = vand.u32 4294901760, %v2851_v1 }
 0x1e4   : > { %13394 = vst [vmem:[#allocation46_spill] sm:$0xff] %v10207_v23  ;;  %13395 = vst [vmem:[#allocation49_spill] sm:$0xff] %v10211_v8  ;;  %v10285_v8 = vand.u32 4294901760, %v10228_v35  ;;  %6975 = vmatprep.subr.mxu1 %v10193_v55  ;;  %6939 = vmatprep.subr.mxu0 %v10008_v22  ;;  %v3109_v27 = vsub.f32 %v10214_v24, %v10270_v11  ;;  %v10324_v55 = vand.u32 4294901760, %v10273_v37 }
 0x1e5   : > { %13396 = vst [vmem:[#allocation53_spill] sm:$0xff] %v10214_v24  ;;  %13397 = vst [vmem:[#allocation59_spill] sm:$0xff] %v10216_v59  ;;  %6976 = vmatpush3.msra.mxu1 %v10207_v23  ;;  %6940 = vmatpush3.msra.mxu0 %v10010_v46  ;;  %v10341_v24 = vsub.f32 %v2868_v49, %v10290_v6  ;;  %v3235_v49 = vsub.f32 %v10258_v15, %v10312_v21 }
 0x1e6   : > { %13398 = vst [vmem:[#allocation62_spill] sm:$0xff] %v10223_v41  ;;  %13399 = vst [vmem:[#allocation66_spill] sm:$0xff] %v10228_v35  ;;  %6977 = vmatprep.subr.mxu1 %v10223_v41  ;;  %v3228_v23 = vsub.f32 %v10228_v35, %v10285_v8  ;;  %6941 = vmatprep.subr.mxu0 %v10037_v5  ;;  %v3116_v41 = vsub.f32 %v10243_v57, %v10300_v54  ;;  %v10356_v35 = vand.u32 4294901760, %v3221_v33 }
 0x1e7   : > { %13400 = vst [vmem:[#allocation71_spill] sm:$0xff] %v10230_v53  ;;  %13401 = vst [vmem:[#allocation48_spill] sm:$0xff] %v10236_v9  ;;  %6978 = vmatpush3.msra.mxu1 %v10236_v9  ;;  %6942 = vmatpush3.msra.mxu0 %v10061_v39  ;;  %v10365_v9 = vsub.f32 %v2867_v4, %v10317_v31 }
 0x1e8   : > { %13402 = vst [vmem:[#allocation11_spill] sm:$0xff] %v10240_v60  ;;  %13403 = vst [vmem:[#allocation76_spill] sm:$0xff] %v10243_v57  ;;  %v10315_v60 = vsub.f32 %v2869_v56, %v10260_v28  ;;  %v10332_v56 = vand.u32 4294901760, %v3214_v20  ;;  %v10350_v20 = vand.u32 4294901760, %v10303_v18  ;;  %6979 = vmatprep.subr.mxu1 %v10251_v2  ;;  %6943 = vmatprep.subr.mxu0 %v10102_v48 }
 0x1e9   : > { %13404 = vst [vmem:[#allocation84_spill] sm:$0xff] %v10245_v7  ;;  %13405 = vst [vmem:[#allocation87_spill] sm:$0xff] %v10251_v2  ;;  %6980 = vmatpush3.msra.mxu1 %v10281_v58  ;;  %6944 = vmatpush3.msra.mxu0 %v10131_v34  ;;  %v10377_v2 = vsub.f32 %v2851_v1, %v10329_v45 }
 0x1ea   : > { %13406 = vst [vmem:[#allocation12_spill] sm:$0xff] %v10255_v30  ;;  %13407 = vst [vmem:[#allocation83_spill] sm:$0xff] %v10258_v15  ;;  %v10327_v30 = vsub.f32 %v2853_v17, %v10275_v47  ;;  %v10344_v17 = vand.u32 4294901760, %v3102_v25  ;;  %v10362_v25 = vand.u32 4294901760, %v10315_v60  ;;  %6981 = vmatprep.subr.mxu1 %v10332_v56  ;;  %6945 = vmatprep.subr.mxu0 %v10145_v29 }
 0x1eb   : > { %13408 = vst [vmem:[#allocation90_spill] sm:$0xff] %v10260_v28  ;;  %13409 = vst [vmem:[#allocation92_spill] sm:$0xff] %v10270_v11  ;;  %v10338_v11 = vand.u32 4294901760, %v10288_v61  ;;  %v3130_v1 = vsub.f32 %v10303_v18, %v10350_v20  ;;  %6946 = vmatpush3.msra.mxu0 %v10159_v52 }
 0x1ec   : > { %13410 = vst [vmem:[#allocation33_spill] sm:$0xff] %v10273_v37  ;;  %13411 = vst [vmem:[#allocation45_spill] sm:$0xff] %v10275_v47  ;;  %v10374_v33 = vand.u32 4294901760, %v10327_v30  ;;  %6982 = vmatpush3.msra.mxu1 %v10344_v17  ;;  %6947 = vmatprep.subr.mxu0 %v10173_v38 }
 0x1ed   : > { %13412 = vst [vmem:[#allocation14_spill] sm:$0xff] %v10281_v58  ;;  %13413 = vst [vmem:[#allocation34_spill] sm:$0xff] %v10285_v8  ;;  %v10353_v8 = vsub.f32 %v2852_v50, %v10305_v0  ;;  %v3123_v50 = vsub.f32 %v10273_v37, %v10324_v55  ;;  %v3242_v4 = vsub.f32 %v10288_v61, %v10338_v11  ;;  %v10389_v58 = vand.u32 4294901760, %v3116_v41 }
 0x1ee   : > { %13414 = vst [vmem:[#allocation93_spill] sm:$0xff] %v10288_v61  ;;  %13415 = vst [vmem:[#allocation23_spill] sm:$0xff] %v10290_v6  ;;  %6983 = vmatprep.subr.mxu1 %v10356_v35  ;;  %v10404_v41 = vand.u32 4294901760, %v10365_v9  ;;  %6948 = vmatpush3.msra.mxu0 %v10187_v16 }
 0x1ef   : > { %13416 = vst [vmem:[#allocation27_spill] sm:$0xff] %v10300_v54  ;;  %13417 = vst [vmem:[#allocation52_spill] sm:$0xff] %v10303_v18  ;;  %v10368_v54 = vand.u32 4294901760, %v3109_v27  ;;  %v10386_v27 = vand.u32 4294901760, %v10341_v24  ;;  %6949 = vmatprep.subr.mxu0 %v10201_v43 }
 0x1f0   : > { %13418 = vst [vmem:[#allocation15_spill] sm:$0xff] %v10305_v0  ;;  %13419 = vst [vmem:[#allocation94_spill] sm:$0xff] %v10312_v21  ;;  %v10380_v21 = vand.u32 4294901760, %v3228_v23  ;;  %v10395_v23 = vand.u32 4294901760, %v10353_v8  ;;  %6950 = vmatpush3.msra.mxu0 %v10216_v59 }
 0x1f1   : > { %13420 = vst [vmem:[#allocation85_spill] sm:$0xff] %v10315_v60  ;;  %13421 = vst [vmem:[#allocation77_spill] sm:$0xff] %v10317_v31  ;;  %6984 = vmatpush3.msra.mxu1 %v10368_v54  ;;  %6951 = vmatprep.subr.mxu0 %v10230_v53 }
 0x1f2   : > { %13422 = vst [vmem:[#allocation16_spill] sm:$0xff] %v10324_v55  ;;  %13423 = vst [vmem:[#allocation10_spill] sm:$0xff] %v10327_v30  ;;  %6985 = vmatprep.subr.mxu1 %v10380_v21  ;;  %6952 = vmatpush3.msra.mxu0 %v10245_v7 }
 0x1f3   : > { %13424 = vst [vmem:[#allocation70_spill] sm:$0xff] %v10329_v45  ;;  %13425 = vst [vmem:[#allocation75_spill] sm:$0xff] %v10332_v56  ;;  %v10398_v56 = vand.u32 4294901760, %v3235_v49  ;;  %v10413_v49 = vand.u32 4294901760, %v10377_v2  ;;  %6986 = vmatpush3.msra.mxu1 %v10389_v58  ;;  %6953 = vmatprep.subr.mxu0 %v10260_v28 }
 0x1f4   : > { %13426 = vst [vmem:[#allocation80_spill] sm:$0xff] %v10338_v11  ;;  %13427 = vst [vmem:[#allocation112_spill] sm:$0xff] %v10341_v24  ;;  %v3249_v11 = vsub.f32 %v10315_v60, %v10362_v25  ;;  %6954 = vmatpush3.msra.mxu0 %v10275_v47 }
 0x1f5   : > { %13428 = vst [vmem:[#allocation113_spill] sm:$0xff] %v10344_v17  ;;  %13429 = vst [vmem:[#allocation114_spill] sm:$0xff] %v10350_v20  ;;  %v10407_v17 = vand.u32 4294901760, %v3123_v50  ;;  %v3137_v20 = vsub.f32 %v10327_v30, %v10374_v33  ;;  %v10422_v50 = vand.u32 4294901760, %v3130_v1  ;;  %6987 = vmatprep.subr.mxu1 %v10398_v56  ;;  %v3151_v1 = vsub.f32 %v10377_v2, %v10413_v49 }
 0x1f6   : > { %13430 = vst [vmem:[#allocation115_spill] sm:$0xff] %v10353_v8  ;;  %13431 = vst [vmem:[#allocation116_spill] sm:$0xff] %v10356_v35  ;;  %v10416_v35 = vand.u32 4294901760, %v3242_v4  ;;  %v3263_v4 = vsub.f32 %v10365_v9, %v10404_v41  ;;  %6955 = vmatprep.subr.mxu0 %v10290_v6 }
 0x1f7   : > { %13432 = vst [vmem:[#allocation117_spill] sm:$0xff] %v10362_v25  ;;  %13433 = vst [vmem:[#allocation118_spill] sm:$0xff] %v10365_v9  ;;  %v3256_v25 = vsub.f32 %v10341_v24, %v10386_v27  ;;  %6988 = vmatpush3.msra.mxu1 %v10407_v17  ;;  %6956 = vmatpush3.msra.mxu0 %v10305_v0 }
 0x1f8   : > { %13434 = vst [vmem:[#allocation119_spill] sm:$0xff] %v10368_v54  ;;  %13435 = vst [vmem:[#allocation120_spill] sm:$0xff] %v10374_v33  ;;  %v3144_v54 = vsub.f32 %v10353_v8, %v10395_v23  ;;  %v10428_v33 = vand.u32 4294901760, %v3249_v11  ;;  %6989 = vmatprep.subr.mxu1 %v10416_v35  ;;  %6957 = vmatprep.subr.mxu0 %v10317_v31 }
 0x1f9   : > { %13436 = vst [vmem:[#allocation121_spill] sm:$0xff] %v10377_v2  ;;  %13437 = vst [vmem:[#allocation122_spill] sm:$0xff] %v10380_v21  ;;  %v10434_v21 = vand.u32 4294901760, %v3137_v20  ;;  %6990 = vmatpush3.msra.mxu1 %v10422_v50  ;;  %v10448_v20 = vand.u32 4294901760, %v3263_v4  ;;  %6958 = vmatpush3.msra.mxu0 %v10329_v45 }
 0x1fa   : > { %13438 = vst [vmem:[#allocation123_spill] sm:$0xff] %v10386_v27  ;;  %13439 = vst [vmem:[#allocation124_spill] sm:$0xff] %v10389_v58  ;;  %v10440_v58 = vand.u32 4294901760, %v3256_v25  ;;  %v10444_v11 = vand.u32 4294901760, %v3144_v54  ;;  %6991 = vmatprep.subr.mxu1 %v10428_v33  ;;  %7003 = vmatprep.subr.mxu0 %v9903_v36  ;;  %v991_v54 = vpop.f32.mrf.mxu0 }
 0x1fb   : > { %13440 = vst [vmem:[#allocation125_spill] sm:$0xff] %v10395_v23  ;;  %13441 = vst [vmem:[#allocation126_spill] sm:$0xff] %v10398_v56  ;;  %6992 = vmatpush3.msra.mxu1 %v10434_v21  ;;  %v10463_v56 = vpop.permute.xlu0 %864 }
 0x1fc   : > { %13442 = vst [vmem:[#allocation127_spill] sm:$0xff] %v10404_v41  ;;  %13443 = vst [vmem:[#allocation128_spill] sm:$0xff] %v10407_v17  ;;  %v10452_v17 = vand.u32 4294901760, %v3151_v1  ;;  %6993 = vmatprep.subr.mxu1 %v10440_v58  ;;  %v993_v25 = vpop.f32.mrf.mxu0  ;;  %v1260_v1 = vpop.f32.mrf.mxu1  ;;  %v992_v36 = vadd.f32 %v991_v54, %v10463_v56 }
 0x1fd   : > { %13444 = vst [vmem:[#allocation129_spill] sm:$0xff] %v10413_v49  ;;  %13445 = vst [vmem:[#allocation130_spill] sm:$0xff] %v10416_v35  ;;  %6994 = vmatpush3.msra.mxu1 %v10444_v11  ;;  %v10466_v41 = vpop.permute.xlu1 %869  ;;  %v994_v27 = vadd.f32 %v993_v25, %v10463_v56 }
 0x1fe   : > { %13446 = vst [vmem:[#allocation131_spill] sm:$0xff] %v10422_v50  ;;  %13447 = vst [vmem:[#allocation132_spill] sm:$0xff] %v10428_v33  ;;  %6995 = vmatprep.subr.mxu1 %v10448_v20  ;;  %v1007_v4 = vpop.f32.mrf.mxu0  ;;  %v1261_v2 = vadd.f32 %v1260_v1, %v992_v36 }
 0x1ff   : > { %13448 = vst [vmem:[#allocation133_spill] sm:$0xff] %v10434_v21  ;;  %13449 = vst [vmem:[#allocation134_spill] sm:$0xff] %v10440_v58  ;;  %6996 = vmatpush3.msra.mxu1 %v10452_v17  ;;  %v1262_v58 = vpop.f32.mrf.mxu1  ;;  %v1008_v9 = vadd.f32 %v1007_v4, %v10466_v41 }
 0x200   : > { %13450 = vst [vmem:[#allocation135_spill] sm:$0xff] %v10444_v11  ;;  %13451 = vst [vmem:[#allocation136_spill] sm:$0xff] %v10448_v20  ;;  %7041 = vmatprep.subr.mxu1 %v9868_v51  ;;  %v1009_v21 = vpop.f32.mrf.mxu0  ;;  %v1263_v24 = vadd.f32 %v1262_v58, %v994_v27  ;;  %v13454_v58 = vld [vmem:[#allocation7_spill] sm:$0xff] }
 0x201   : > { %13452 = vst [vmem:[#allocation137_spill] sm:$0xff] %v10452_v17  ;;  %v1268_v50 = vpop.f32.mrf.mxu1  ;;  %13453 = vst [vmem:[#allocation138_spill] sm:$0xff] %v10463_v56  ;;  %v1010_v60 = vadd.f32 %v1009_v21, %v10466_v41 }
 0x202   : > { %v1415_v33 = vpop.f32.mrf.mxu0  ;;  %v1269_v61 = vadd.f32 %v1268_v50, %v1008_v9 }
 0x203   : > { %v1270_v11 = vpop.f32.mrf.mxu1  ;;  %v1416_v30 = vadd.f32 %v1415_v33, %v1261_v2 }
 0x204   : > { %v1417_v35 = vpop.f32.mrf.mxu0  ;;  %v1271_v37 = vadd.f32 %v1270_v11, %v1010_v60 }
 0x205   : > { %v1538_v20 = vpop.f32.mrf.mxu1  ;;  %v1418_v51 = vadd.f32 %v1417_v35, %v1263_v24 }
 0x206   : > { %v1425_v49 = vpop.f32.mrf.mxu0  ;;  %v1539_v45 = vadd.f32 %v1538_v20, %v1416_v30 }
 0x207   : > { %v1540_v23 = vpop.f32.mrf.mxu1  ;;  %v1426_v25 = vadd.f32 %v1425_v49, %v1269_v61 }
 0x208   : > { %v1427_v17 = vpop.f32.mrf.mxu0  ;;  %v1541_v31 = vadd.f32 %v1540_v23, %v1418_v51  ;;  %v13456_v51 = vld [vmem:[#allocation5_spill] sm:$0xff] }
 0x209   : > { %v1550_v8 = vpop.f32.mrf.mxu1  ;;  %v1428_v4 = vadd.f32 %v1427_v17, %v1271_v37 }
 0x20a   : > { %v1551_v6 = vadd.f32 %v1550_v8, %v1426_v25 }
 0x20b   : > { %v1552_v54 = vpop.f32.mrf.mxu1 }
 0x20c   : > { %v1553_v24 = vadd.f32 %v1552_v54, %v1428_v4 }
 0x219   : > { %v1731_v55 = vpop.f32.mrf.mxu0 }
 0x21a   : > { %v1732_v15 = vadd.f32 %v1731_v55, %v1539_v45 }
 0x21b   : > { %v1733_v18 = vpop.f32.mrf.mxu0 }
 0x21c   : > { %v1734_v56 = vadd.f32 %v1733_v18, %v1541_v31 }
 0x21e   : > { %v1739_v0 = vpop.f32.mrf.mxu0 }
 0x21f   : > { %v1740_v9 = vadd.f32 %v1739_v0, %v1551_v6 }
 0x220   : > { %v1741_v33 = vpop.f32.mrf.mxu0 }
 0x221   : > { %v1742_v61 = vadd.f32 %v1741_v33, %v1553_v24  ;;  %v13462_v33 = vld [vmem:[#allocation102_spill] sm:$0xff] }
 0x222   : > { %v1848_v57 = vpop.f32.mrf.mxu1 }
 0x223   : > { %v1849_v36 = vadd.f32 %v1848_v57, %v1732_v15  ;;  %v13458_v57 = vld [vmem:[#allocation3_spill] sm:$0xff] }
 0x224   : > { %v1850_v1 = vpop.f32.mrf.mxu1 }
 0x225   : > { %v10472_v2 = vadd.f32 %v1849_v36, %v13454_v58  ;;  %v1851_v21 = vadd.f32 %v1850_v1, %v1734_v56  ;;  %v13460_v56 = vld [vmem:[#allocation2_spill] sm:$0xff] }
 0x227   : > { %13455 = vst [vmem:[#allocation7_spill] sm:$0xff] %v10472_v2  ;;  %v10475_v35 = vand.u32 4294901760, %v10472_v2  ;;  %v10478_v55 = vadd.f32 %v1851_v21, %v13456_v51  ;;  %v13464_v51 = vld [vmem:[#allocation65_spill] sm:$0xff] }
 0x228   : > { %v1856_v45 = vpop.f32.mrf.mxu1 }
 0x229   : > { %13457 = vst [vmem:[#allocation5_spill] sm:$0xff] %v10478_v55  ;;  %v10482_v18 = vsub.f32 %v10472_v2, %v10475_v35  ;;  %v10485_v37 = vand.u32 4294901760, %v10478_v55  ;;  %v1857_v31 = vadd.f32 %v1856_v45, %v1740_v9  ;;  %v13463_v9 = vld [vmem:[#allocation22_spill] sm:$0xff]  ;;  %v2892_v2 = vld [vmem:[%s12139_s6 + $0x148] sm:$0xff] }
 0x22a   : > { %v1858_v15 = vpop.f32.mrf.mxu1  ;;  %v13465_v45 = vld [vmem:[#allocation54_spill] sm:$0xff] }
 0x22b   : > { %v12579_v8 = vand.u32 4294901760, %v10482_v18  ;;  %v3012_v60 = vsub.f32 %v10478_v55, %v10485_v37  ;;  %v10491_v30 = vadd.f32 %v1857_v31, %v13458_v57  ;;  %v1859_v6 = vadd.f32 %v1858_v15, %v1742_v61  ;;  %3267 = vmatprep.mubr.f32.mxu1 %v10485_v37  ;;  %v13466_v61 = vld [vmem:[#allocation99_spill] sm:$0xff]  ;;  %v13468_v15 = vld [vmem:[#allocation41_spill] sm:$0xff]  ;;  %v13469_v57 = vld [vmem:[#allocation40_spill] sm:$0xff] }
 0x22c   : > { %3269 = vmatmul.mubr.f32.vlgmr.msra.gmra.mxu1 %v10475_v35  ;;  %v13467_v31 = vld [vmem:[#allocation35_spill] sm:$0xff] }
 0x22d   : > { %13459 = vst [vmem:[#allocation3_spill] sm:$0xff] %v10491_v30  ;;  %v10496_v0 = vand.u32 4294901760, %v10491_v30  ;;  %v10499_v17 = vadd.f32 %v1859_v6, %v13460_v56  ;;  %7042 = vmatpush3.msra.mxu1 %v9879_v3  ;;  %v3013_v27 = vand.u32 4294901760, %v3012_v60  ;;  %v3020_v23 = vsub.f32 %v10482_v18, %v12579_v8  ;;  %v13471_v6 = vld [vmem:[#allocation51_spill] sm:$0xff] }
 0x22e   : > { %7043 = vmatprep.subr.mxu1 %v9887_v63  ;;  %v13472_v56 = vld [vmem:[#allocation107_spill] sm:$0xff] }
 0x22f   : > { %13461 = vst [vmem:[#allocation2_spill] sm:$0xff] %v10499_v17  ;;  %v10508_v49 = vsub.f32 %v10491_v30, %v10496_v0  ;;  %v10511_v50 = vand.u32 4294901760, %v10499_v17  ;;  %7044 = vmatpush3.msra.mxu1 %v9892_v19  ;;  %v3014_v11 = vsub.f32 %v3012_v60, %v3013_v27  ;;  %v3021_v36 = vand.u32 4294901760, %v3020_v23  ;;  %v13474_v23 = vld [vmem:[#allocation95_spill] sm:$0xff] }
 0x230   : > { %7045 = vmatprep.subr.mxu1 %v9894_v13  ;;  %v13483_v8 = vld [vmem:[#allocation83_spill] sm:$0xff] }
 0x231   : > { %v10517_v20 = vsub.f32 %v10499_v17, %v10511_v50  ;;  %3274 = vmatprep.mubr.f32.mxu1 %v10511_v50  ;;  %7046 = vmatpush3.msra.mxu1 %v9905_v44  ;;  %v3015_v54 = vand.u32 4294901760, %v3014_v11  ;;  %v12578_v25 = vand.u32 4294901760, %v10508_v49  ;;  %v13475_v11 = vld [vmem:[#allocation36_spill] sm:$0xff]  ;;  %v2908_v55 = vld [vmem:[%s12139_s6 + $0x1c8] sm:$0xff] }
 0x232   : > { %3276 = vmatmul.mubr.f32.gmra.mxu1 %v10496_v0  ;;  %7047 = vmatprep.subr.mxu1 %v9922_v12 }
 0x233   : > { %3527 = vmatprep.mubr.f32.mxu1 %v3013_v27  ;;  %7048 = vmatpush3.msra.mxu1 %v9939_v10  ;;  %v3028_v1 = vand.u32 4294901760, %v10517_v20  ;;  %v3035_v4 = vsub.f32 %v10508_v49, %v12578_v25  ;;  %v13473_v27 = vld [vmem:[#allocation63_spill] sm:$0xff] }
 0x234   : > { %3016 = vmatprep.mubr.f32.mxu0 %v3015_v54  ;;  %7049 = vmatprep.subr.mxu1 %v9962_v40  ;;  %v13476_v54 = vld [vmem:[#allocation60_spill] sm:$0xff]  ;;  %v13482_v25 = vld [vmem:[#allocation15_spill] sm:$0xff] }
 0x235   : > { %3022 = vmatmul.mubr.f32.vlgmr.msra.gmra.mxu0 %v3021_v36  ;;  %7050 = vmatpush3.msra.mxu1 %v9964_v42  ;;  %v3029_v58 = vsub.f32 %v10517_v20, %v3028_v1  ;;  %v3036_v24 = vand.u32 4294901760, %v3035_v4  ;;  %v13477_v36 = vld [vmem:[#allocation86_spill] sm:$0xff]  ;;  %v13478_v4 = vld [vmem:[#allocation53_spill] sm:$0xff] }
 0x236   : > { %7004 = vmatpush3.msra.mxu0 %v9914_v14  ;;  %7051 = vmatprep.subr.mxu1 %v9981_v32 }
 0x237   : > { %7005 = vmatprep.subr.mxu0 %v9920_v62  ;;  %7052 = vmatpush3.msra.mxu1 %v9995_v26  ;;  %v3030_v21 = vand.u32 4294901760, %v3029_v58  ;;  %v13479_v58 = vld [vmem:[#allocation66_spill] sm:$0xff]  ;;  %v13523_v62 = vld [vmem:[#allocation73_spill] sm:$0xff] }
 0x238   : > { %7006 = vmatpush3.msra.mxu0 %v13462_v33  ;;  %7053 = vmatprep.subr.mxu1 %v10008_v22  ;;  %v2909_v33 = vld [vmem:[%s12139_s6 + $0x1d0] sm:$0xff] }
 0x239   : > { %3031 = vmatprep.mubr.f32.mxu0 %v3030_v21  ;;  %7007 = vmatprep.subr.mxu0 %v13463_v9  ;;  %v13480_v21 = vld [vmem:[#allocation23_spill] sm:$0xff]  ;;  %v13519_v9 = vld [vmem:[#allocation25_spill] sm:$0xff] }
 0x23a   : > { %3037 = vmatmul.mubr.f32.gmra.mxu0 %v3036_v24  ;;  %7054 = vmatpush3.msra.mxu1 %v10010_v46  ;;  %v13481_v24 = vld [vmem:[#allocation76_spill] sm:$0xff] }
 0x23b   : > { %7008 = vmatpush3.msra.mxu0 %v13464_v51  ;;  %3411 = vmatprep.mubr.f32.mxu0 %v3012_v60  ;;  %v13470_v60 = vld [vmem:[#allocation44_spill] sm:$0xff]  ;;  %v2910_v51 = vld [vmem:[%s12139_s6 + $0x1d8] sm:$0xff] }
 0x23c   : > { %7009 = vmatprep.subr.mxu0 %v13465_v45  ;;  %7055 = vmatprep.subr.mxu1 %v10037_v5 }
 0x23d   : > { %7010 = vmatpush3.msra.mxu0 %v13466_v61  ;;  %7056 = vmatpush3.msra.mxu1 %v10061_v39  ;;  %v13514_v61 = vld [vmem:[#allocation108_spill] sm:$0xff] }
 0x23e   : > { %7011 = vmatprep.subr.mxu0 %v13467_v31  ;;  %7057 = vmatprep.subr.mxu1 %v10102_v48 }
 0x23f   : > { %7012 = vmatpush3.msra.mxu0 %v13468_v15  ;;  %7058 = vmatpush3.msra.mxu1 %v10131_v34  ;;  %v13511_v15 = vld [vmem:[#allocation106_spill] sm:$0xff] }
 0x240   : > { %7013 = vmatprep.subr.mxu0 %v13469_v57  ;;  %7059 = vmatprep.subr.mxu1 %v10145_v29 }
 0x241   : > { %7014 = vmatpush3.msra.mxu0 %v13470_v60  ;;  %7060 = vmatpush3.msra.mxu1 %v10159_v52 }
 0x242   : > { %7015 = vmatprep.subr.mxu0 %v13471_v6  ;;  %7061 = vmatprep.subr.mxu1 %v10173_v38 }
 0x243   : > { %7016 = vmatpush3.msra.mxu0 %v13472_v56  ;;  %7062 = vmatpush3.msra.mxu1 %v10187_v16  ;;  %v13505_v56 = vld [vmem:[#allocation100_spill] sm:$0xff] }
 0x244   : > { %7017 = vmatprep.subr.mxu0 %v13473_v27  ;;  %7063 = vmatprep.subr.mxu1 %v10201_v43  ;;  %v13490_v27 = vld [vmem:[#allocation52_spill] sm:$0xff] }
 0x245   : > { %7018 = vmatpush3.msra.mxu0 %v13474_v23  ;;  %7064 = vmatpush3.msra.mxu1 %v10216_v59  ;;  %v13487_v23 = vld [vmem:[#allocation93_spill] sm:$0xff] }
 0x246   : > { %7019 = vmatprep.subr.mxu0 %v13475_v11  ;;  %7065 = vmatprep.subr.mxu1 %v10230_v53  ;;  %v13485_v11 = vld [vmem:[#allocation33_spill] sm:$0xff] }
 0x247   : > { %7020 = vmatpush3.msra.mxu0 %v13476_v54  ;;  %7066 = vmatpush3.msra.mxu1 %v10245_v7  ;;  %v13484_v54 = vld [vmem:[#allocation77_spill] sm:$0xff] }
 0x248   : > { %7021 = vmatprep.subr.mxu0 %v13477_v36  ;;  %7067 = vmatprep.subr.mxu1 %v10260_v28  ;;  %v13486_v36 = vld [vmem:[#allocation70_spill] sm:$0xff] }
 0x249   : > { %7022 = vmatpush3.msra.mxu0 %v13478_v4  ;;  %7068 = vmatpush3.msra.mxu1 %v10275_v47  ;;  %v13488_v4 = vand.u32 4294901760, %v10482_v18 }
 0x24a   : > { %7023 = vmatprep.subr.mxu0 %v13479_v58  ;;  %7069 = vmatprep.subr.mxu1 %v13480_v21  ;;  %v13489_v58 = vld [vmem:[#allocation55_spill] sm:$0xff] }
 0x24b   : > { %7024 = vmatpush3.msra.mxu0 %v13481_v24  ;;  %7070 = vmatpush3.msra.mxu1 %v13482_v25  ;;  %v13491_v24 = vld [vmem:[#allocation85_spill] sm:$0xff] }
 0x24c   : > { %7025 = vmatprep.subr.mxu0 %v13483_v8  ;;  %7071 = vmatprep.subr.mxu1 %v13484_v54  ;;  %v13492_v8 = vld [vmem:[#allocation10_spill] sm:$0xff] }
 0x24d   : > { %7026 = vmatpush3.msra.mxu0 %v13485_v11  ;;  %7072 = vmatpush3.msra.mxu1 %v13486_v36  ;;  %v13493_v11 = vld [vmem:[#allocation112_spill] sm:$0xff] }
 0x24e   : > { %7027 = vmatprep.subr.mxu0 %v13487_v23  ;;  %3531 = vmatmul.mubr.f32.vlgmr.msra.gmra.mxu1 %v13488_v4  ;;  %v13494_v23 = vand.u32 4294901760, %v10508_v49  ;;  %v13495_v4 = vld [vmem:[#allocation115_spill] sm:$0xff] }
 0x24f   : > { %7117 = vmatprep.subr.mxu1 %v13489_v58  ;;  %7028 = vmatpush3.msra.mxu0 %v13490_v27  ;;  %v2912_v27 = vld [vmem:[%s12139_s6 + $0x1e8] sm:$0xff] }
 0x250   : > { %3538 = vmatprep.mubr.f32.mxu1 %v3028_v1  ;;  %7118 = vmatpush3.msra.mxu1 %v9879_v3  ;;  %v13496_v1 = vld [vmem:[#allocation118_spill] sm:$0xff]  ;;  %v10642_v60 = vand.u32 4294901760, %v2912_v27 }
 0x251   : > { %7029 = vmatprep.subr.mxu0 %v13491_v24  ;;  %7119 = vmatprep.subr.mxu1 %v9887_v63  ;;  %v2890_v63 = vld [vmem:[%s12139_s6 + $0x138] sm:$0xff]  ;;  %v13565_v3 = vld [vmem:[#allocation94_spill] sm:$0xff] }
 0x252   : > { %7030 = vmatpush3.msra.mxu0 %v13492_v8  ;;  %7120 = vmatpush3.msra.mxu1 %v9892_v19  ;;  %v13497_v8 = vld [vmem:[#allocation121_spill] sm:$0xff]  ;;  %13509 = vst [vmem:[#allocation143_spill] sm:$0xff] %v10642_v60 }
 0x253   : > { %7031 = vmatprep.subr.mxu0 %v13493_v11  ;;  %3542 = vmatmul.mubr.f32.gmra.mxu1 %v13494_v23  ;;  %v13498_v11 = vld [vmem:[#allocation31_spill] sm:$0xff]  ;;  %v13499_v23 = vld [vmem:[#allocation21_spill] sm:$0xff] }
 0x254   : > { %7121 = vmatprep.subr.mxu1 %v9894_v13  ;;  %7032 = vmatpush3.msra.mxu0 %v13495_v4  ;;  %v13500_v4 = vld [vmem:[#allocation82_spill] sm:$0xff] }
 0x255   : > { %7122 = vmatpush3.msra.mxu1 %v9905_v44  ;;  %3819 = vmatprep.mubr.f32.mxu1 %v10485_v37  ;;  %v13553_v44 = vld [vmem:[#allocation92_spill] sm:$0xff]  ;;  %v13556_v13 = vld [vmem:[#allocation34_spill] sm:$0xff] }
 0x256   : > { %7033 = vmatprep.subr.mxu0 %v13496_v1  ;;  %7123 = vmatprep.subr.mxu1 %v9922_v12  ;;  %v2914_v1 = vld [vmem:[%s12139_s6 + $0x1f8] sm:$0xff] }
 0x257   : > { %7034 = vmatpush3.msra.mxu0 %v13497_v8  ;;  %7124 = vmatpush3.msra.mxu1 %v9939_v10  ;;  %v2898_v8 = vld [vmem:[%s12139_s6 + $0x178] sm:$0xff]  ;;  %v10622_v24 = vand.u32 4294901760, %v2914_v1 }
 0x258   : > { %3414 = vmatmul.mubr.f32.vlgmr.msra.gmra.mxu0 %v10482_v18  ;;  %7079 = vmatprep.subr.mxu0 %v13498_v11  ;;  %v2913_v18 = vld [vmem:[%s12139_s6 + $0x1f0] sm:$0xff]  ;;  %v13502_v11 = vld [vmem:[#allocation91_spill] sm:$0xff] }
 0x259   : > { %7125 = vmatprep.subr.mxu1 %v9962_v40  ;;  %3420 = vmatprep.mubr.f32.mxu0 %v10517_v20  ;;  %v13501_v20 = vld [vmem:[#allocation57_spill] sm:$0xff]  ;;  %13503 = vst [vmem:[#allocation139_spill] sm:$0xff] %v10622_v24  ;;  %v10634_v6 = vand.u32 4294901760, %v2913_v18 }
 0x25a   : > { %7080 = vmatpush3.msra.mxu0 %v13499_v23  ;;  %7126 = vmatpush3.msra.mxu1 %v9964_v42  ;;  %v2897_v23 = vld [vmem:[%s12139_s6 + $0x170] sm:$0xff]  ;;  %v13545_v42 = vld [vmem:[#allocation11_spill] sm:$0xff] }
 0x25b   : > { %7081 = vmatprep.subr.mxu0 %v13500_v4  ;;  %7127 = vmatprep.subr.mxu1 %v9981_v32  ;;  %v10624_v4 = vand.u32 4294901760, %v2898_v8  ;;  %13506 = vst [vmem:[#allocation141_spill] sm:$0xff] %v10634_v6  ;;  %v10663_v45 = vsub.f32 %v2913_v18, %v10634_v6  ;;  %v10681_v18 = vsub.f32 %v2912_v27, %v10642_v60  ;;  %v2893_v27 = vld [vmem:[%s12139_s6 + $0x150] sm:$0xff] }
 0x25c   : > { %7082 = vmatpush3.msra.mxu0 %v13501_v20  ;;  %7128 = vmatpush3.msra.mxu1 %v9995_v26  ;;  %v2896_v20 = vld [vmem:[%s12139_s6 + $0x168] sm:$0xff]  ;;  %v13542_v26 = vld [vmem:[#allocation49_spill] sm:$0xff] }
 0x25d   : > { %3423 = vmatmul.mubr.f32.gmra.mxu0 %v10508_v49  ;;  %7083 = vmatprep.subr.mxu0 %v13502_v11  ;;  %13504 = vst [vmem:[#allocation140_spill] sm:$0xff] %v10624_v4  ;;  %v10638_v49 = vand.u32 4294901760, %v2897_v23  ;;  %v13508_v11 = vld [vmem:[#allocation105_spill] sm:$0xff]  ;;  %v10644_v57 = vand.u32 4294901760, %v2896_v20  ;;  %v10655_v31 = vsub.f32 %v2898_v8, %v10624_v4  ;;  %13515 = vst [vmem:[#allocation147_spill] sm:$0xff] %v10663_v45  ;;  %v10705_v17 = vand.u32 4294901760, %v10663_v45 }
 0x25e   : > { %7129 = vmatprep.subr.mxu1 %v10008_v22  ;;  %7084 = vmatpush3.msra.mxu0 %v13505_v56  ;;  %v2911_v56 = vld [vmem:[%s12139_s6 + $0x1e0] sm:$0xff]  ;;  %13520 = vst [vmem:[#allocation150_spill] sm:$0xff] %v10681_v18 }
 0x25f   : > { %3708 = vmatprep.mubr.f32.mxu0 %v10485_v37  ;;  %7130 = vmatpush3.msra.mxu1 %v10010_v46  ;;  %13507 = vst [vmem:[#allocation142_spill] sm:$0xff] %v10638_v49  ;;  %13510 = vst [vmem:[#allocation144_spill] sm:$0xff] %v10644_v57  ;;  %v10652_v37 = vsub.f32 %v2914_v1, %v10622_v24  ;;  %v10668_v1 = vsub.f32 %v2897_v23, %v10638_v49  ;;  %v10670_v8 = vand.u32 4294901760, %v2911_v56  ;;  %v2891_v22 = vld [vmem:[%s12139_s6 + $0x140] sm:$0xff] }
 0x260   : > { %7085 = vmatprep.subr.mxu0 %v13508_v11  ;;  %7131 = vmatprep.subr.mxu1 %v10037_v5  ;;  %13513 = vst [vmem:[#allocation146_spill] sm:$0xff] %v10655_v31  ;;  %v2895_v11 = vld [vmem:[%s12139_s6 + $0x160] sm:$0xff]  ;;  %v10684_v23 = vsub.f32 %v2896_v20, %v10644_v57  ;;  %v10697_v14 = vand.u32 4294901760, %v10655_v31  ;;  %v13526_v20 = vld [vmem:[#allocation72_spill] sm:$0xff]  ;;  %13527 = vst [vmem:[#allocation155_spill] sm:$0xff] %v10705_v17  ;;  %v10749_v46 = vand.u32 4294901760, %v2908_v55 }
 0x261   : > { %7086 = vmatpush3.msra.mxu0 %v13511_v15  ;;  %7132 = vmatpush3.msra.mxu1 %v10061_v39  ;;  %13512 = vst [vmem:[#allocation145_spill] sm:$0xff] %v10652_v37  ;;  %v13516_v15 = vld [vmem:[#allocation110_spill] sm:$0xff]  ;;  %13517 = vst [vmem:[#allocation148_spill] sm:$0xff] %v10668_v1  ;;  %v13539_v5 = vld [vmem:[#allocation68_spill] sm:$0xff]  ;;  %v10788_v12 = vand.u32 4294901760, %v2891_v22 }
 0x262   : > { %7087 = vmatprep.subr.mxu0 %v13514_v61  ;;  %7133 = vmatprep.subr.mxu1 %v10102_v48  ;;  %13518 = vst [vmem:[#allocation149_spill] sm:$0xff] %v10670_v8  ;;  %v2894_v61 = vld [vmem:[%s12139_s6 + $0x158] sm:$0xff]  ;;  %13521 = vst [vmem:[#allocation151_spill] sm:$0xff] %v10684_v23  ;;  %v10730_v48 = vand.u32 4294901760, %v10681_v18  ;;  %v10733_v39 = vand.u32 4294901760, %v10684_v23 }
 0x263   : > { %7088 = vmatpush3.msra.mxu0 %v13516_v15  ;;  %7134 = vmatpush3.msra.mxu1 %v10131_v34  ;;  %v10686_v15 = vand.u32 4294901760, %v2895_v11  ;;  %13525 = vst [vmem:[#allocation154_spill] sm:$0xff] %v10697_v14  ;;  %v10709_v30 = vand.u32 4294901760, %v2894_v61  ;;  %v13534_v34 = vld [vmem:[#allocation29_spill] sm:$0xff]  ;;  %13540 = vst [vmem:[#allocation165_spill] sm:$0xff] %v10749_v46  ;;  %v10840_v58 = vsub.f32 %v2891_v22, %v10788_v12  ;;  %v2889_v22 = vld [vmem:[%s12139_s6 + $0x130] sm:$0xff] }
 0x264   : > { %7089 = vmatprep.subr.mxu0 %v13519_v9  ;;  %7135 = vmatprep.subr.mxu1 %v10145_v29  ;;  %v10694_v9 = vand.u32 4294901760, %v10652_v37  ;;  %v10725_v29 = vand.u32 4294901760, %v2909_v33  ;;  %13535 = vst [vmem:[#allocation161_spill] sm:$0xff] %v10730_v48  ;;  %13536 = vst [vmem:[#allocation162_spill] sm:$0xff] %v10733_v39 }
 0x265   : > { %13522 = vst [vmem:[#allocation152_spill] sm:$0xff] %v10686_v15  ;;  %7090 = vmatpush3.msra.mxu0 %v13523_v62  ;;  %7136 = vmatpush3.msra.mxu1 %v10159_v52  ;;  %v10707_v62 = vand.u32 4294901760, %v2910_v51  ;;  %13529 = vst [vmem:[#allocation157_spill] sm:$0xff] %v10709_v30  ;;  %v13530_v52 = vld [vmem:[#allocation13_spill] sm:$0xff]  ;;  %v10764_v32 = vsub.f32 %v2894_v61, %v10709_v30  ;;  %v4090_v61 = vsub.f32 %v10681_v18, %v10730_v48  ;;  %v13597_v18 = vld [vmem:[#allocation127_spill] sm:$0xff] }
 0x266   : > { %13524 = vst [vmem:[#allocation153_spill] sm:$0xff] %v10694_v9  ;;  %7091 = vmatprep.subr.mxu0 %v13526_v20  ;;  %7137 = vmatprep.subr.mxu1 %v10173_v38  ;;  %v10720_v20 = vand.u32 4294901760, %v10668_v1  ;;  %v10723_v38 = vsub.f32 %v2911_v56, %v10670_v8  ;;  %13533 = vst [vmem:[#allocation160_spill] sm:$0xff] %v10725_v29  ;;  %v2907_v56 = vld [vmem:[%s12139_s6 + $0x1c0] sm:$0xff]  ;;  %v10868_v48 = vand.u32 4294901760, %v2890_v63 }
 0x267   : > { %13528 = vst [vmem:[#allocation156_spill] sm:$0xff] %v10707_v62  ;;  %7092 = vmatpush3.msra.mxu0 %v13530_v52  ;;  %7138 = vmatpush3.msra.mxu1 %v10187_v16  ;;  %v10736_v52 = vsub.f32 %v2895_v11, %v10686_v15  ;;  %v10738_v16 = vand.u32 4294901760, %v2893_v27  ;;  %v10751_v11 = vand.u32 4294901760, %v2892_v2  ;;  %13544 = vst [vmem:[#allocation168_spill] sm:$0xff] %v10764_v32  ;;  %v10776_v10 = vand.u32 4294901760, %v2907_v56 }
 0x268   : > { %13531 = vst [vmem:[#allocation158_spill] sm:$0xff] %v10720_v20  ;;  %13532 = vst [vmem:[#allocation159_spill] sm:$0xff] %v10723_v38  ;;  %7093 = vmatprep.subr.mxu0 %v13534_v34  ;;  %7139 = vmatprep.subr.mxu1 %v10201_v43  ;;  %v4076_v34 = vsub.f32 %v10652_v37, %v10694_v9  ;;  %v3964_v43 = vsub.f32 %v10655_v31, %v10697_v14  ;;  %v10887_v9 = vpop.f32.mrf.mxu0  ;;  %v2899_v31 = vld [vmem:[%s12139_s6 + $0x180] sm:$0xff]  ;;  %v11023_v37 = vpop.f32.mrf.mxu1 }
 0x269   : > { %13537 = vst [vmem:[#allocation163_spill] sm:$0xff] %v10736_v52  ;;  %13538 = vst [vmem:[#allocation164_spill] sm:$0xff] %v10738_v16  ;;  %7094 = vmatpush3.msra.mxu0 %v13539_v5  ;;  %7140 = vmatpush3.msra.mxu1 %v10216_v59  ;;  %v4083_v5 = vsub.f32 %v10663_v45, %v10705_v17  ;;  %v10761_v59 = vsub.f32 %v2910_v51, %v10707_v62  ;;  %v13549_v51 = vld [vmem:[#allocation12_spill] sm:$0xff]  ;;  %v13577_v17 = vld [vmem:[#allocation114_spill] sm:$0xff] }
 0x26a   : > { %13541 = vst [vmem:[#allocation166_spill] sm:$0xff] %v10751_v11  ;;  %7095 = vmatprep.subr.mxu0 %v13542_v26  ;;  %7141 = vmatprep.subr.mxu1 %v10230_v53  ;;  %v3971_v40 = vsub.f32 %v10668_v1, %v10720_v20  ;;  %v10771_v26 = vand.u32 4294901760, %v10723_v38  ;;  %v10774_v53 = vsub.f32 %v2909_v33, %v10725_v29  ;;  %13548 = vst [vmem:[#allocation171_spill] sm:$0xff] %v10776_v10  ;;  %v2904_v20 = vld [vmem:[%s12139_s6 + $0x1a8] sm:$0xff] }
 0x26b   : > { %13543 = vst [vmem:[#allocation167_spill] sm:$0xff] %v10761_v59  ;;  %7096 = vmatpush3.msra.mxu0 %v13545_v42  ;;  %7142 = vmatpush3.msra.mxu1 %v10245_v7  ;;  %v10783_v42 = vand.u32 4294901760, %v10736_v52  ;;  %v10786_v7 = vsub.f32 %v2893_v27, %v10738_v16  ;;  %13552 = vst [vmem:[#allocation174_spill] sm:$0xff] %v10788_v12  ;;  %v3978_v33 = vsub.f32 %v10684_v23, %v10733_v39  ;;  %v13574_v39 = vld [vmem:[#allocation80_spill] sm:$0xff]  ;;  %v10945_v23 = vpop.f32.mrf.mxu0  ;;  %v2884_v1 = vld [vmem:[%s12139_s6 + $0x108] sm:$0xff] }
 0x26c   : > { %13546 = vst [vmem:[#allocation169_spill] sm:$0xff] %v10771_v26  ;;  %13547 = vst [vmem:[#allocation170_spill] sm:$0xff] %v10774_v53  ;;  %7097 = vmatprep.subr.mxu0 %v13549_v51  ;;  %7143 = vmatprep.subr.mxu1 %v10260_v28  ;;  %v10795_v51 = vsub.f32 %v2908_v55, %v10749_v46  ;;  %v10798_v28 = vsub.f32 %v2892_v2, %v10751_v11  ;;  %v10802_v27 = vand.u32 4294901760, %v4076_v34  ;;  %v2906_v55 = vld [vmem:[%s12139_s6 + $0x1b8] sm:$0xff]  ;;  %v13561_v2 = vld [vmem:[#allocation27_spill] sm:$0xff] }
 0x26d   : > { %13550 = vst [vmem:[#allocation172_spill] sm:$0xff] %v10783_v42  ;;  %13551 = vst [vmem:[#allocation173_spill] sm:$0xff] %v10786_v7  ;;  %7098 = vmatpush3.msra.mxu0 %v13553_v44  ;;  %7144 = vmatpush3.msra.mxu1 %v10275_v47  ;;  %v10804_v19 = vand.u32 4294901760, %v3964_v43  ;;  %v10807_v44 = vand.u32 4294901760, %v10761_v59  ;;  %v10810_v47 = vand.u32 4294901760, %v10764_v32  ;;  %v4097_v34 = vsub.f32 %v10723_v38, %v10771_v26  ;;  %v13569_v26 = vld [vmem:[#allocation16_spill] sm:$0xff]  ;;  %v11006_v45 = vpop.f32.mrf.mxu0 }
 0x26e   : > { %13554 = vst [vmem:[#allocation175_spill] sm:$0xff] %v10795_v51  ;;  %13555 = vst [vmem:[#allocation176_spill] sm:$0xff] %v10798_v28  ;;  %7099 = vmatprep.subr.mxu0 %v13556_v13  ;;  %7145 = vmatprep.subr.mxu1 %v13480_v21  ;;  %v10817_v13 = vand.u32 4294901760, %v4083_v5  ;;  %v10822_v43 = vand.u32 4294901760, %v10774_v53  ;;  %v10825_v21 = vsub.f32 %v2907_v56, %v10776_v10  ;;  %v2905_v56 = vld [vmem:[%s12139_s6 + $0x1b0] sm:$0xff]  ;;  %v13588_v38 = vld [vmem:[#allocation123_spill] sm:$0xff] }
 0x26f   : > { %13557 = vst [vmem:[#allocation177_spill] sm:$0xff] %v10802_v27  ;;  %13558 = vst [vmem:[#allocation178_spill] sm:$0xff] %v10804_v19  ;;  %7100 = vmatpush3.msra.mxu0 %v13561_v2  ;;  %7146 = vmatpush3.msra.mxu1 %v13482_v25  ;;  %v10832_v2 = vand.u32 4294901760, %v3971_v40  ;;  %v3985_v5 = vsub.f32 %v10736_v52, %v10783_v42  ;;  %v10837_v25 = vand.u32 4294901760, %v10786_v7  ;;  %v10850_v40 = vand.u32 4294901760, %v10795_v51  ;;  %v13585_v52 = vld [vmem:[#allocation120_spill] sm:$0xff] }
 0x270   : > { %13559 = vst [vmem:[#allocation179_spill] sm:$0xff] %v10807_v44  ;;  %13560 = vst [vmem:[#allocation180_spill] sm:$0xff] %v10810_v47  ;;  %7101 = vmatprep.subr.mxu0 %v13565_v3  ;;  %7147 = vmatprep.subr.mxu1 %v13484_v54  ;;  %v10847_v3 = vand.u32 4294901760, %v4090_v61  ;;  %v10853_v54 = vand.u32 4294901760, %v10798_v28  ;;  %v10855_v42 = vand.u32 4294901760, %v2906_v55  ;;  %v4104_v61 = vsub.f32 %v10761_v59, %v10807_v44  ;;  %v2903_v59 = vld [vmem:[%s12139_s6 + $0x1a0] sm:$0xff] }
 0x271   : > { %13562 = vst [vmem:[#allocation181_spill] sm:$0xff] %v10817_v13  ;;  %13563 = vst [vmem:[#allocation182_spill] sm:$0xff] %v10822_v43  ;;  %7102 = vmatpush3.msra.mxu0 %v13569_v26  ;;  %7148 = vmatpush3.msra.mxu1 %v13486_v36  ;;  %v10862_v26 = vand.u32 4294901760, %v3978_v33  ;;  %v3992_v36 = vsub.f32 %v10764_v32, %v10810_v47  ;;  %v4111_v33 = vsub.f32 %v10774_v53, %v10822_v43  ;;  %v2888_v47 = vld [vmem:[%s12139_s6 + $0x128] sm:$0xff]  ;;  %v13581_v32 = vld [vmem:[#allocation117_spill] sm:$0xff] }
 0x272   : > { %13564 = vst [vmem:[#allocation183_spill] sm:$0xff] %v10825_v21  ;;  %13566 = vst [vmem:[#allocation184_spill] sm:$0xff] %v10832_v2  ;;  %7103 = vmatprep.subr.mxu0 %v13574_v39  ;;  %3821 = vmatmul.mubr.f32.vlgmr.msra.gmra.mxu1 %v10475_v35  ;;  %v10875_v39 = vand.u32 4294901760, %v4097_v34  ;;  %v10880_v44 = vand.u32 4294901760, %v10825_v21  ;;  %v10882_v14 = vand.u32 4294901760, %v2905_v56  ;;  %v10891_v34 = vand.u32 4294901760, %v3985_v5 }
 0x273   : > { %13567 = vst [vmem:[#allocation185_spill] sm:$0xff] %v10837_v25  ;;  %13568 = vst [vmem:[#allocation186_spill] sm:$0xff] %v10840_v58  ;;  %7104 = vmatpush3.msra.mxu0 %v13577_v17  ;;  %3826 = vmatprep.mubr.f32.mxu1 %v10511_v50  ;;  %v3999_v17 = vsub.f32 %v10786_v7, %v10837_v25  ;;  %v10896_v43 = vand.u32 4294901760, %v10840_v58  ;;  %v10898_v53 = vand.u32 4294901760, %v2889_v22  ;;  %v10912_v25 = vand.u32 4294901760, %v2904_v20  ;;  %v2887_v7 = vld [vmem:[%s12139_s6 + $0x120] sm:$0xff] }
 0x274   : > { %13570 = vst [vmem:[#allocation187_spill] sm:$0xff] %v10847_v3  ;;  %13571 = vst [vmem:[#allocation188_spill] sm:$0xff] %v10850_v40  ;;  %7105 = vmatprep.subr.mxu0 %v13581_v32  ;;  %7193 = vmatprep.subr.mxu1 %v10802_v27  ;;  %v4118_v5 = vsub.f32 %v10795_v51, %v10850_v40  ;;  %v4006_v32 = vsub.f32 %v10798_v28, %v10853_v54  ;;  %v13593_v28 = vld [vmem:[#allocation125_spill] sm:$0xff] }
 0x275   : > { %13572 = vst [vmem:[#allocation189_spill] sm:$0xff] %v10853_v54  ;;  %13573 = vst [vmem:[#allocation190_spill] sm:$0xff] %v10855_v42  ;;  %7106 = vmatpush3.msra.mxu0 %v13585_v52  ;;  %7194 = vmatpush3.msra.mxu1 %v10804_v19  ;;  %v10910_v27 = vsub.f32 %v2906_v55, %v10855_v42  ;;  %v10919_v52 = vand.u32 4294901760, %v4104_v61  ;;  %v10921_v19 = vand.u32 4294901760, %v3992_v36  ;;  %v10926_v54 = vand.u32 4294901760, %v2888_v47  ;;  %v2902_v55 = vld [vmem:[%s12139_s6 + $0x198] sm:$0xff] }
 0x276   : > { %13575 = vst [vmem:[#allocation191_spill] sm:$0xff] %v10862_v26  ;;  %13576 = vst [vmem:[#allocation192_spill] sm:$0xff] %v10868_v48  ;;  %7107 = vmatprep.subr.mxu0 %v13588_v38  ;;  %3828 = vmatmul.mubr.f32.gmra.mxu1 %v10496_v0  ;;  %v10924_v40 = vsub.f32 %v2890_v63, %v10868_v48  ;;  %v10933_v38 = vand.u32 4294901760, %v4111_v33  ;;  %v4125_v61 = vsub.f32 %v10825_v21, %v10880_v44  ;;  %v2886_v51 = vld [vmem:[%s12139_s6 + $0x118] sm:$0xff] }
 0x277   : > { %13578 = vst [vmem:[#allocation193_spill] sm:$0xff] %v10875_v39  ;;  %13579 = vst [vmem:[#allocation194_spill] sm:$0xff] %v10880_v44  ;;  %7108 = vmatpush3.msra.mxu0 %v13593_v28  ;;  %7195 = vmatprep.subr.mxu1 %v10817_v13  ;;  %v10938_v36 = vsub.f32 %v2905_v56, %v10882_v14  ;;  %v10940_v63 = vand.u32 4294901760, %v2903_v59  ;;  %v10949_v33 = vand.u32 4294901760, %v3999_v17  ;;  %v10956_v13 = vand.u32 4294901760, %v2887_v7  ;;  %v2901_v44 = vld [vmem:[%s12139_s6 + $0x190] sm:$0xff] }
 0x278   : > { %13580 = vst [vmem:[#allocation195_spill] sm:$0xff] %v10882_v14  ;;  %13582 = vst [vmem:[#allocation196_spill] sm:$0xff] %v10891_v34  ;;  %7109 = vmatprep.subr.mxu0 %v13597_v18  ;;  %7196 = vmatpush3.msra.mxu1 %v10832_v2  ;;  %v4013_v28 = vsub.f32 %v10840_v58, %v10896_v43  ;;  %v10954_v56 = vsub.f32 %v2889_v22, %v10898_v53  ;;  %v13601_v21 = vld [vmem:[#allocation129_spill] sm:$0xff]  ;;  %v10963_v18 = vand.u32 4294901760, %v4118_v5  ;;  %v2900_v58 = vld [vmem:[%s12139_s6 + $0x188] sm:$0xff] }
 0x279   : > { %13583 = vst [vmem:[#allocation197_spill] sm:$0xff] %v10896_v43  ;;  %13584 = vst [vmem:[#allocation198_spill] sm:$0xff] %v10898_v53  ;;  %7110 = vmatpush3.msra.mxu0 %v13601_v21  ;;  %7197 = vmatprep.subr.mxu1 %v10847_v3  ;;  %v10966_v17 = vand.u32 4294901760, %v10910_v27  ;;  %v10969_v2 = vsub.f32 %v2904_v20, %v10912_v25  ;;  %v10971_v22 = vand.u32 4294901760, %v2902_v55  ;;  %v2885_v43 = vld [vmem:[%s12139_s6 + $0x110] sm:$0xff]  ;;  %v10978_v21 = vand.u32 4294901760, %v4006_v32 }
 0x27a   : > { %13586 = vst [vmem:[#allocation199_spill] sm:$0xff] %v10910_v27  ;;  %13587 = vst [vmem:[#allocation200_spill] sm:$0xff] %v10912_v25  ;;  %3710 = vmatmul.mubr.f32.vlgmr.msra.gmra.mxu0 %v10475_v35  ;;  %7198 = vmatpush3.msra.mxu1 %v10862_v26  ;;  %v10981_v5 = vand.u32 4294901760, %v10924_v40  ;;  %v10984_v3 = vsub.f32 %v2888_v47, %v10926_v54  ;;  %v10986_v20 = vand.u32 4294901760, %v2886_v51  ;;  %v10993_v35 = vand.u32 4294901760, %v4125_v61 }
 0x27b   : > { %13589 = vst [vmem:[#allocation201_spill] sm:$0xff] %v10919_v52  ;;  %13590 = vst [vmem:[#allocation202_spill] sm:$0xff] %v10921_v19  ;;  %3715 = vmatprep.mubr.f32.mxu0 %v10511_v50  ;;  %7199 = vmatprep.subr.mxu1 %v10875_v39  ;;  %v10996_v32 = vand.u32 4294901760, %v10938_v36  ;;  %v10999_v26 = vsub.f32 %v2903_v59, %v10940_v63  ;;  %v11001_v47 = vand.u32 4294901760, %v2901_v44  ;;  %v11010_v50 = vand.u32 4294901760, %v4013_v28 }
 0x27c   : > { %13591 = vst [vmem:[#allocation203_spill] sm:$0xff] %v10924_v40  ;;  %13592 = vst [vmem:[#allocation204_spill] sm:$0xff] %v10926_v54  ;;  %7200 = vmatpush3.msra.mxu1 %v10891_v34  ;;  %7155 = vmatprep.subr.mxu0 %v10622_v24  ;;  %v11013_v61 = vand.u32 4294901760, %v10954_v56  ;;  %v11016_v59 = vsub.f32 %v2887_v7, %v10956_v13  ;;  %v11018_v39 = vand.u32 4294901760, %v2885_v43  ;;  %v11030_v34 = vand.u32 4294901760, %v10969_v2 }
 0x27d   : > { %13594 = vst [vmem:[#allocation205_spill] sm:$0xff] %v10933_v38  ;;  %13595 = vst [vmem:[#allocation206_spill] sm:$0xff] %v10938_v36  ;;  %7201 = vmatprep.subr.mxu1 %v10919_v52  ;;  %7156 = vmatpush3.msra.mxu0 %v10624_v4  ;;  %v4132_v28 = vsub.f32 %v10910_v27, %v10966_v17  ;;  %v11033_v7 = vsub.f32 %v2902_v55, %v10971_v22  ;;  %v11035_v24 = vand.u32 4294901760, %v2900_v58  ;;  %v11064_v4 = vpop.f32.mrf.mxu0 }
 0x27e   : > { %13596 = vst [vmem:[#allocation207_spill] sm:$0xff] %v10940_v63  ;;  %13598 = vst [vmem:[#allocation208_spill] sm:$0xff] %v10949_v33  ;;  %3717 = vmatmul.mubr.f32.gmra.mxu0 %v10496_v0  ;;  %7202 = vmatpush3.msra.mxu1 %v10921_v19  ;;  %v4020_v52 = vsub.f32 %v10924_v40, %v10981_v5  ;;  %v11048_v27 = vsub.f32 %v2886_v51, %v10986_v20  ;;  %v11050_v55 = vand.u32 4294901760, %v2884_v1 }
 0x27f   : > { %13599 = vst [vmem:[#allocation209_spill] sm:$0xff] %v10954_v56  ;;  %13600 = vst [vmem:[#allocation210_spill] sm:$0xff] %v10956_v13  ;;  %v2883_v13 = vld [vmem:[%s12139_s6 + $0x100] sm:$0xff]  ;;  %7157 = vmatprep.subr.mxu0 %v10634_v6  ;;  %7203 = vmatprep.subr.mxu1 %v10933_v38  ;;  %v4139_v0 = vsub.f32 %v10938_v36, %v10996_v32  ;;  %v11057_v19 = vand.u32 4294901760, %v10999_v26  ;;  %v11062_v40 = vand.u32 4294901760, %v2899_v31  ;;  %v11071_v38 = vand.u32 4294901760, %v11016_v59 }
 0x280   : > { %13602 = vst [vmem:[#allocation211_spill] sm:$0xff] %v10963_v18  ;;  %13603 = vst [vmem:[#allocation212_spill] sm:$0xff] %v10966_v17  ;;  %v11045_v17 = vand.u32 4294901760, %v10984_v3  ;;  %7158 = vmatpush3.msra.mxu0 %v10638_v49  ;;  %7204 = vmatpush3.msra.mxu1 %v10949_v33  ;;  %v4027_v51 = vsub.f32 %v10954_v56, %v11013_v61  ;;  %v11076_v36 = vand.u32 4294901760, %v2883_v13  ;;  %v11082_v49 = vand.u32 4294901760, %v4132_v28 }
 0x281   : > { %13604 = vst [vmem:[#allocation213_spill] sm:$0xff] %v10969_v2  ;;  %13605 = vst [vmem:[#allocation214_spill] sm:$0xff] %v10971_v22  ;;  %7159 = vmatprep.subr.mxu0 %v10642_v60  ;;  %7205 = vmatprep.subr.mxu1 %v10963_v18  ;;  %v4146_v33 = vsub.f32 %v10969_v2, %v11030_v34  ;;  %v11090_v56 = vsub.f32 %v2900_v58, %v11035_v24  ;;  %v11096_v60 = vand.u32 4294901760, %v4020_v52 }
 0x282   : > { %13606 = vst [vmem:[#allocation215_spill] sm:$0xff] %v10978_v21  ;;  %13607 = vst [vmem:[#allocation216_spill] sm:$0xff] %v10981_v5  ;;  %v11060_v5 = vsub.f32 %v2901_v44, %v11001_v47  ;;  %v11078_v44 = vpop.f32.mrf.mxu1  ;;  %7160 = vmatpush3.msra.mxu0 %v10644_v57  ;;  %7206 = vmatpush3.msra.mxu1 %v10978_v21  ;;  %v4034_v28 = vsub.f32 %v10984_v3, %v11045_v17  ;;  %v11101_v18 = vand.u32 4294901760, %v11048_v27 }
 0x283   : > { %13608 = vst [vmem:[#allocation217_spill] sm:$0xff] %v10984_v3  ;;  %13609 = vst [vmem:[#allocation218_spill] sm:$0xff] %v10986_v20  ;;  %7161 = vmatprep.subr.mxu0 %v10670_v8  ;;  %7207 = vmatprep.subr.mxu1 %v10993_v35  ;;  %v11108_v58 = vand.u32 4294901760, %v4139_v0  ;;  %v4153_v21 = vsub.f32 %v10999_v26, %v11057_v19 }
 0x284   : > { %13610 = vst [vmem:[#allocation219_spill] sm:$0xff] %v10993_v35  ;;  %13611 = vst [vmem:[#allocation220_spill] sm:$0xff] %v10996_v32  ;;  %v11074_v32 = vsub.f32 %v2885_v43, %v11018_v39  ;;  %v11092_v43 = vpop.f32.mrf.mxu0  ;;  %v11113_v52 = vand.u32 4294901760, %v11060_v5  ;;  %7162 = vmatpush3.msra.mxu0 %v10686_v15  ;;  %7208 = vmatpush3.msra.mxu1 %v11010_v50  ;;  %v4041_v35 = vsub.f32 %v11016_v59, %v11071_v38 }
 0x285   : > { %13612 = vst [vmem:[#allocation221_spill] sm:$0xff] %v10999_v26  ;;  %13613 = vst [vmem:[#allocation222_spill] sm:$0xff] %v11001_v47  ;;  %v11130_v26 = vpop.f32.mrf.mxu1  ;;  %7163 = vmatprep.subr.mxu0 %v10707_v62  ;;  %7209 = vmatprep.subr.mxu1 %v11082_v49 }
 0x286   : > { %13614 = vst [vmem:[#allocation223_spill] sm:$0xff] %v11010_v50  ;;  %13615 = vst [vmem:[#allocation224_spill] sm:$0xff] %v11013_v61  ;;  %v11087_v61 = vand.u32 4294901760, %v11033_v7  ;;  %v11125_v0 = vand.u32 4294901760, %v11074_v32  ;;  %v11139_v50 = vand.u32 4294901760, %v11090_v56  ;;  %7164 = vmatpush3.msra.mxu0 %v10709_v30  ;;  %7210 = vmatpush3.msra.mxu1 %v11096_v60 }
 0x287   : > { %13616 = vst [vmem:[#allocation225_spill] sm:$0xff] %v11016_v59  ;;  %13617 = vst [vmem:[#allocation226_spill] sm:$0xff] %v11018_v39  ;;  %v4048_v59 = vsub.f32 %v11048_v27, %v11101_v18  ;;  %7165 = vmatprep.subr.mxu0 %v10725_v29  ;;  %7211 = vmatprep.subr.mxu1 %v11108_v58 }
 0x288   : > { %13618 = vst [vmem:[#allocation227_spill] sm:$0xff] %v11030_v34  ;;  %13619 = vst [vmem:[#allocation228_spill] sm:$0xff] %v11033_v7  ;;  %v11104_v34 = vsub.f32 %v2884_v1, %v11050_v55  ;;  %v11120_v1 = vand.u32 4294901760, %v4027_v51  ;;  %v4160_v51 = vsub.f32 %v11033_v7, %v11087_v61  ;;  %7166 = vmatpush3.msra.mxu0 %v10738_v16 }
 0x289   : > { %13620 = vst [vmem:[#allocation229_spill] sm:$0xff] %v11035_v24  ;;  %13621 = vst [vmem:[#allocation230_spill] sm:$0xff] %v11045_v17  ;;  %v11116_v17 = vsub.f32 %v2899_v31, %v11062_v40  ;;  %v11134_v31 = vand.u32 4294901760, %v4146_v33  ;;  %7167 = vmatprep.subr.mxu0 %v10749_v46 }
 0x28a   : > { %13622 = vst [vmem:[#allocation231_spill] sm:$0xff] %v11048_v27  ;;  %13623 = vst [vmem:[#allocation232_spill] sm:$0xff] %v11050_v55  ;;  %v11150_v33 = vand.u32 4294901760, %v11104_v34  ;;  %7212 = vmatpush3.msra.mxu1 %v11120_v1  ;;  %7168 = vmatpush3.msra.mxu0 %v10751_v11 }
 0x28b   : > { %13624 = vst [vmem:[#allocation233_spill] sm:$0xff] %v11057_v19  ;;  %13625 = vst [vmem:[#allocation234_spill] sm:$0xff] %v11060_v5  ;;  %v11128_v19 = vsub.f32 %v2883_v13, %v11076_v36  ;;  %v11145_v13 = vand.u32 4294901760, %v4034_v28  ;;  %v11159_v7 = vand.u32 4294901760, %v11116_v17  ;;  %v11163_v28 = vand.u32 4294901760, %v4041_v35  ;;  %7213 = vmatprep.subr.mxu1 %v11134_v31  ;;  %7169 = vmatprep.subr.mxu0 %v10776_v10 }
 0x28c   : > { %13626 = vst [vmem:[#allocation235_spill] sm:$0xff] %v11062_v40  ;;  %13627 = vst [vmem:[#allocation236_spill] sm:$0xff] %v11071_v38  ;;  %v11141_v38 = vpop.f32.mrf.mxu0  ;;  %v11178_v35 = vand.u32 4294901760, %v4048_v59  ;;  %7170 = vmatpush3.msra.mxu0 %v10788_v12 }
 0x28d   : > { %13628 = vst [vmem:[#allocation237_spill] sm:$0xff] %v11074_v32  ;;  %13629 = vst [vmem:[#allocation238_spill] sm:$0xff] %v11076_v36  ;;  %7214 = vmatpush3.msra.mxu1 %v11145_v13  ;;  %7171 = vmatprep.subr.mxu0 %v10855_v42 }
 0x28e   : > { %13630 = vst [vmem:[#allocation239_spill] sm:$0xff] %v11082_v49  ;;  %13631 = vst [vmem:[#allocation240_spill] sm:$0xff] %v11087_v61  ;;  %v11154_v49 = vand.u32 4294901760, %v4153_v21  ;;  %v4167_v61 = vsub.f32 %v11060_v5, %v11113_v52  ;;  %v2252_v21 = vpop.f32.mrf.mxu1  ;;  %v2407_v5 = vpop.f32.mrf.mxu0  ;;  %7172 = vmatpush3.msra.mxu0 %v10868_v48 }
 0x28f   : > { %13632 = vst [vmem:[#allocation241_spill] sm:$0xff] %v11090_v56  ;;  %13633 = vst [vmem:[#allocation242_spill] sm:$0xff] %v11096_v60  ;;  %v4055_v60 = vsub.f32 %v11074_v32, %v11125_v0  ;;  %7173 = vmatprep.subr.mxu0 %v10882_v14 }
 0x290   : > { %13634 = vst [vmem:[#allocation243_spill] sm:$0xff] %v11101_v18  ;;  %13635 = vst [vmem:[#allocation244_spill] sm:$0xff] %v11104_v34  ;;  %v11168_v18 = vand.u32 4294901760, %v11128_v19  ;;  %7215 = vmatprep.subr.mxu1 %v11154_v49  ;;  %7174 = vmatpush3.msra.mxu0 %v10898_v53 }
 0x291   : > { %13636 = vst [vmem:[#allocation245_spill] sm:$0xff] %v11108_v58  ;;  %13637 = vst [vmem:[#allocation246_spill] sm:$0xff] %v11113_v52  ;;  %v11172_v58 = vand.u32 4294901760, %v4160_v51  ;;  %v4174_v52 = vsub.f32 %v11090_v56, %v11139_v50  ;;  %v11184_v51 = vand.u32 4294901760, %v4167_v61  ;;  %7216 = vmatpush3.msra.mxu1 %v11163_v28  ;;  %v2409_v61 = vpop.f32.mrf.mxu0  ;;  %7175 = vmatprep.subr.mxu0 %v10912_v25 }
 0x292   : > { %13638 = vst [vmem:[#allocation247_spill] sm:$0xff] %v11116_v17  ;;  %13639 = vst [vmem:[#allocation248_spill] sm:$0xff] %v11120_v1  ;;  %v4062_v1 = vsub.f32 %v11104_v34, %v11150_v33  ;;  %v4069_v59 = vsub.f32 %v11128_v19, %v11168_v18  ;;  %7176 = vmatpush3.msra.mxu0 %v10926_v54 }
 0x293   : > { %13640 = vst [vmem:[#allocation249_spill] sm:$0xff] %v11125_v0  ;;  %13641 = vst [vmem:[#allocation250_spill] sm:$0xff] %v11128_v19  ;;  %v2520_v0 = vpop.f32.mrf.mxu1  ;;  %7217 = vmatprep.subr.mxu1 %v11172_v58  ;;  %7177 = vmatprep.subr.mxu0 %v10940_v63 }
 0x294   : > { %13642 = vst [vmem:[#allocation251_spill] sm:$0xff] %v11134_v31  ;;  %13643 = vst [vmem:[#allocation252_spill] sm:$0xff] %v11139_v50  ;;  %v4181_v31 = vsub.f32 %v11116_v17, %v11159_v7  ;;  %7218 = vmatpush3.msra.mxu1 %v11178_v35 }
 0x295   : > { %13644 = vst [vmem:[#allocation253_spill] sm:$0xff] %v11145_v13  ;;  %13645 = vst [vmem:[#allocation254_spill] sm:$0xff] %v11150_v33  ;;  %v11190_v13 = vand.u32 4294901760, %v4055_v60  ;;  %v11196_v33 = vand.u32 4294901760, %v4174_v52  ;;  %7219 = vmatprep.subr.mxu1 %v11184_v51  ;;  %v11210_v52 = vand.u32 4294901760, %v4069_v59  ;;  %v1990_v59 = vadd.f32 %v11006_v45, %v10466_v41 }
 0x296   : > { %13646 = vst [vmem:[#allocation255_spill] sm:$0xff] %v11154_v49  ;;  %13647 = vst [vmem:[#allocation256_spill] sm:$0xff] %v11159_v7  ;;  %v11200_v49 = vand.u32 4294901760, %v4062_v1  ;;  %v2522_v7 = vpop.f32.mrf.mxu1  ;;  %v11204_v60 = vand.u32 4294901760, %v4181_v31 }
 0x297   : > { %13648 = vst [vmem:[#allocation257_spill] sm:$0xff] %v11163_v28  ;;  %13649 = vst [vmem:[#allocation258_spill] sm:$0xff] %v11168_v18  ;;  %v13657_v28 = vld [vmem:[#allocation138_spill] sm:$0xff]  ;;  %7220 = vmatpush3.msra.mxu1 %v11190_v13 }
 0x298   : > { %13650 = vst [vmem:[#allocation259_spill] sm:$0xff] %v11172_v58  ;;  %13651 = vst [vmem:[#allocation260_spill] sm:$0xff] %v11178_v35  ;;  %v1974_v18 = vadd.f32 %v10887_v9, %v13657_v28  ;;  %v2713_v58 = vpop.f32.mrf.mxu0  ;;  %7221 = vmatprep.subr.mxu1 %v11196_v33  ;;  %v1976_v1 = vadd.f32 %v10945_v23, %v13657_v28  ;;  %v2532_v9 = vpop.f32.mrf.mxu1  ;;  %v13659_v23 = vld [vmem:[#allocation210_spill] sm:$0xff]  ;;  %v2251_v28 = vadd.f32 %v11130_v26, %v1990_v59  ;;  %v13663_v59 = vld [vmem:[#allocation145_spill] sm:$0xff] }
 0x299   : > { %13652 = vst [vmem:[#allocation261_spill] sm:$0xff] %v11184_v51  ;;  %13653 = vst [vmem:[#allocation262_spill] sm:$0xff] %v11190_v13  ;;  %7222 = vmatpush3.msra.mxu1 %v11200_v49  ;;  %7178 = vmatpush3.msra.mxu0 %v13659_v23 }
 0x29a   : > { %13654 = vst [vmem:[#allocation263_spill] sm:$0xff] %v11196_v33  ;;  %13655 = vst [vmem:[#allocation264_spill] sm:$0xff] %v11200_v49  ;;  %v2243_v31 = vadd.f32 %v11023_v37, %v1974_v18  ;;  %v2715_v51 = vpop.f32.mrf.mxu0  ;;  %7223 = vmatprep.subr.mxu1 %v11204_v60  ;;  %v2245_v33 = vadd.f32 %v11078_v44, %v1976_v1  ;;  %7179 = vmatprep.subr.mxu0 %v10971_v22  ;;  %v13660_v37 = vld [vmem:[#allocation139_spill] sm:$0xff]  ;;  %v2534_v44 = vpop.f32.mrf.mxu1 }
 0x29b   : > { %13656 = vst [vmem:[#allocation265_spill] sm:$0xff] %v11204_v60  ;;  %13658 = vst [vmem:[#allocation138_spill] sm:$0xff] %v11210_v52  ;;  %7224 = vmatpush3.msra.mxu1 %v11210_v52  ;;  %v1992_v18 = vadd.f32 %v11064_v4, %v10466_v41  ;;  %7180 = vmatpush3.msra.mxu0 %v10986_v20 }
 0x29c   : > { %v2398_v13 = vadd.f32 %v11092_v43, %v2243_v31  ;;  %7269 = vmatprep.subr.mxu1 %v13660_v37  ;;  %v2400_v60 = vadd.f32 %v11141_v38, %v2245_v33  ;;  %v2721_v43 = vpop.f32.mrf.mxu0  ;;  %7181 = vmatprep.subr.mxu0 %v11001_v47  ;;  %v2408_v31 = vadd.f32 %v2407_v5, %v2251_v28  ;;  %v2830_v35 = vpop.f32.mrf.mxu1  ;;  %v13661_v5 = vld [vmem:[#allocation6_spill] sm:$0xff] }
 0x29d   : > { %v2253_v1 = vadd.f32 %v2252_v21, %v1992_v18  ;;  %7182 = vmatpush3.msra.mxu0 %v11018_v39 }
 0x29e   : > { %v2521_v45 = vadd.f32 %v2520_v0, %v2398_v13  ;;  %v2523_v52 = vadd.f32 %v2522_v7, %v2400_v60  ;;  %7183 = vmatprep.subr.mxu0 %v11035_v24  ;;  %v2533_v26 = vadd.f32 %v2532_v9, %v2408_v31  ;;  %v2723_v0 = vpop.f32.mrf.mxu0  ;;  %v2832_v13 = vpop.f32.mrf.mxu1 }
 0x29f   : > { %v2410_v41 = vadd.f32 %v2409_v61, %v2253_v1  ;;  %7184 = vmatpush3.msra.mxu0 %v11050_v55 }
 0x2a0   : > { %v2714_v49 = vadd.f32 %v2713_v58, %v2521_v45  ;;  %v2716_v4 = vadd.f32 %v2715_v51, %v2523_v52  ;;  %7185 = vmatprep.subr.mxu0 %v11062_v40  ;;  %v2722_v21 = vadd.f32 %v2721_v43, %v2533_v26  ;;  %v2838_v60 = vpop.f32.mrf.mxu1  ;;  %v13666_v45 = vld [vmem:[#allocation4_spill] sm:$0xff] }
 0x2a1   : > { %v2535_v33 = vadd.f32 %v2534_v44, %v2410_v41  ;;  %7186 = vmatpush3.msra.mxu0 %v11076_v36  ;;  %v13668_v26 = vld [vmem:[#allocation8_spill] sm:$0xff] }
 0x2a2   : > { %v2831_v38 = vadd.f32 %v2830_v35, %v2714_v49  ;;  %v2833_v58 = vadd.f32 %v2832_v13, %v2716_v4  ;;  %7231 = vmatprep.subr.mxu0 %v13663_v59  ;;  %v13664_v35 = vld [vmem:[#allocation9_spill] sm:$0xff]  ;;  %v2839_v52 = vadd.f32 %v2838_v60, %v2722_v21  ;;  %v2840_v9 = vpop.f32.mrf.mxu1  ;;  %v13670_v13 = vld [vmem:[#allocation140_spill] sm:$0xff]  ;;  %v13781_v59 = vld [vmem:[#allocation135_spill] sm:$0xff] }
 0x2a3   : > { %v2724_v61 = vadd.f32 %v2723_v0, %v2535_v33 }
 0x2a4   : > { %v11240_v7 = vadd.f32 %v2831_v38, %v13661_v5  ;;  %v11248_v51 = vadd.f32 %v2833_v58, %v13664_v35  ;;  %v11258_v44 = vadd.f32 %v2839_v52, %v13666_v45  ;;  %v13671_v58 = vld [vmem:[#allocation142_spill] sm:$0xff]  ;;  %v13672_v35 = vld [vmem:[#allocation143_spill] sm:$0xff] }
 0x2a5   : > { %v2841_v43 = vadd.f32 %v2840_v9, %v2724_v61 }
 0x2a6   : > { %13662 = vst [vmem:[#allocation6_spill] sm:$0xff] %v11240_v7  ;;  %v11245_v49 = vand.u32 4294901760, %v11240_v7  ;;  %13665 = vst [vmem:[#allocation9_spill] sm:$0xff] %v11248_v51  ;;  %v11255_v28 = vand.u32 4294901760, %v11248_v51  ;;  %v11264_v41 = vand.u32 4294901760, %v11258_v44 }
 0x2a7   : > { %13667 = vst [vmem:[#allocation4_spill] sm:$0xff] %v11258_v44  ;;  %v11267_v4 = vadd.f32 %v2841_v43, %v13668_v26 }
 0x2a8   : > { %v11252_v18 = vsub.f32 %v11240_v7, %v11245_v49  ;;  %v3930_v31 = vsub.f32 %v11248_v51, %v11255_v28  ;;  %4185 = vmatprep.mubr.f32.mxu1 %v11255_v28  ;;  %v11273_v38 = vsub.f32 %v11258_v44, %v11264_v41 }
 0x2a9   : > { %13669 = vst [vmem:[#allocation8_spill] sm:$0xff] %v11267_v4  ;;  %4187 = vmatmul.mubr.f32.vlgmr.msra.gmra.mxu1 %v11245_v49  ;;  %v11276_v0 = vand.u32 4294901760, %v11267_v4 }
 0x2aa   : > { %v12797_v1 = vand.u32 4294901760, %v11252_v18  ;;  %7270 = vmatpush3.msra.mxu1 %v13670_v13  ;;  %v3931_v33 = vand.u32 4294901760, %v3930_v31  ;;  %v12798_v61 = vand.u32 4294901760, %v11273_v38 }
 0x2ab   : > { %7271 = vmatprep.subr.mxu1 %v10634_v6  ;;  %v11285_v5 = vsub.f32 %v11267_v4, %v11276_v0  ;;  %4192 = vmatprep.mubr.f32.mxu1 %v11276_v0 }
 0x2ac   : > { %v3938_v21 = vsub.f32 %v11252_v18, %v12797_v1  ;;  %7272 = vmatpush3.msra.mxu1 %v13671_v58  ;;  %v3932_v60 = vsub.f32 %v3930_v31, %v3931_v33  ;;  %v3953_v26 = vsub.f32 %v11273_v38, %v12798_v61  ;;  %v13676_v1 = vld [vmem:[#allocation150_spill] sm:$0xff]  ;;  %v13679_v61 = vld [vmem:[#allocation163_spill] sm:$0xff] }
 0x2ad   : > { %7273 = vmatprep.subr.mxu1 %v13672_v35  ;;  %4194 = vmatmul.mubr.f32.gmra.mxu1 %v11264_v41  ;;  %v12796_v9 = vand.u32 4294901760, %v11285_v5 }
 0x2ae   : > { %7274 = vmatpush3.msra.mxu1 %v10644_v57  ;;  %4445 = vmatprep.mubr.f32.mxu1 %v3931_v33  ;;  %v3933_v52 = vand.u32 4294901760, %v3932_v60  ;;  %v3939_v45 = vand.u32 4294901760, %v3938_v21  ;;  %v13673_v33 = vld [vmem:[#allocation146_spill] sm:$0xff]  ;;  %v13674_v21 = vld [vmem:[#allocation147_spill] sm:$0xff] }
 0x2af   : > { %7275 = vmatprep.subr.mxu1 %v10670_v8  ;;  %v3947_v43 = vsub.f32 %v11285_v5, %v12796_v9  ;;  %v3954_v9 = vand.u32 4294901760, %v3953_v26  ;;  %v13680_v26 = vld [vmem:[#allocation167_spill] sm:$0xff] }
 0x2b0   : > { %7276 = vmatpush3.msra.mxu1 %v10686_v15  ;;  %3934 = vmatprep.mubr.f32.mxu0 %v3933_v52  ;;  %v13675_v52 = vld [vmem:[#allocation148_spill] sm:$0xff] }
 0x2b1   : > { %7277 = vmatprep.subr.mxu1 %v10707_v62  ;;  %3940 = vmatmul.mubr.f32.vlgmr.msra.gmra.mxu0 %v3939_v45  ;;  %v3948_v60 = vand.u32 4294901760, %v3947_v43  ;;  %v13677_v45 = vld [vmem:[#allocation151_spill] sm:$0xff] }
 0x2b2   : > { %7232 = vmatpush3.msra.mxu0 %v13673_v33  ;;  %7278 = vmatpush3.msra.mxu1 %v10709_v30  ;;  %v13678_v43 = vld [vmem:[#allocation159_spill] sm:$0xff]  ;;  %v13779_v33 = vld [vmem:[#allocation134_spill] sm:$0xff] }
 0x2b3   : > { %7233 = vmatprep.subr.mxu0 %v13674_v21  ;;  %7279 = vmatprep.subr.mxu1 %v10725_v29  ;;  %v13777_v21 = vld [vmem:[#allocation133_spill] sm:$0xff] }
 0x2b4   : > { %7234 = vmatpush3.msra.mxu0 %v13675_v52  ;;  %7280 = vmatpush3.msra.mxu1 %v10738_v16  ;;  %v13775_v52 = vld [vmem:[#allocation132_spill] sm:$0xff] }
 0x2b5   : > { %3949 = vmatprep.mubr.f32.mxu0 %v3948_v60  ;;  %7235 = vmatprep.subr.mxu0 %v13676_v1  ;;  %v13681_v60 = vld [vmem:[#allocation168_spill] sm:$0xff]  ;;  %v13773_v1 = vld [vmem:[#allocation131_spill] sm:$0xff] }
 0x2b6   : > { %7281 = vmatprep.subr.mxu1 %v10749_v46  ;;  %3955 = vmatmul.mubr.f32.gmra.mxu0 %v3954_v9  ;;  %v13682_v9 = vld [vmem:[#allocation170_spill] sm:$0xff] }
 0x2b7   : > { %7236 = vmatpush3.msra.mxu0 %v13677_v45  ;;  %7282 = vmatpush3.msra.mxu1 %v10751_v11  ;;  %v13771_v45 = vld [vmem:[#allocation130_spill] sm:$0xff] }
 0x2b8   : > { %7237 = vmatprep.subr.mxu0 %v13678_v43  ;;  %4329 = vmatprep.mubr.f32.mxu0 %v3930_v31  ;;  %v13683_v43 = vld [vmem:[#allocation173_spill] sm:$0xff]  ;;  %v13684_v31 = vld [vmem:[#allocation175_spill] sm:$0xff] }
 0x2b9   : > { %7283 = vmatprep.subr.mxu1 %v10776_v10  ;;  %7238 = vmatpush3.msra.mxu0 %v13679_v61  ;;  %v13685_v61 = vld [vmem:[#allocation176_spill] sm:$0xff] }
 0x2ba   : > { %7284 = vmatpush3.msra.mxu1 %v10788_v12  ;;  %7239 = vmatprep.subr.mxu0 %v13680_v26  ;;  %v13686_v26 = vld [vmem:[#allocation183_spill] sm:$0xff] }
 0x2bb   : > { %7285 = vmatprep.subr.mxu1 %v10855_v42  ;;  %7240 = vmatpush3.msra.mxu0 %v13681_v60  ;;  %v13687_v60 = vld [vmem:[#allocation186_spill] sm:$0xff] }
 0x2bc   : > { %7286 = vmatpush3.msra.mxu1 %v10868_v48  ;;  %7241 = vmatprep.subr.mxu0 %v13682_v9  ;;  %v13688_v9 = vld [vmem:[#allocation199_spill] sm:$0xff] }
 0x2bd   : > { %7287 = vmatprep.subr.mxu1 %v10882_v14  ;;  %7242 = vmatpush3.msra.mxu0 %v13683_v43  ;;  %v13689_v43 = vld [vmem:[#allocation203_spill] sm:$0xff] }
 0x2be   : > { %7288 = vmatpush3.msra.mxu1 %v10898_v53  ;;  %7243 = vmatprep.subr.mxu0 %v13684_v31  ;;  %v13690_v31 = vld [vmem:[#allocation206_spill] sm:$0xff] }
 0x2bf   : > { %7289 = vmatprep.subr.mxu1 %v10912_v25  ;;  %7244 = vmatpush3.msra.mxu0 %v13685_v61  ;;  %v13691_v61 = vld [vmem:[#allocation209_spill] sm:$0xff] }
 0x2c0   : > { %7290 = vmatpush3.msra.mxu1 %v10926_v54  ;;  %7245 = vmatprep.subr.mxu0 %v13686_v26  ;;  %v13769_v26 = vld [vmem:[#allocation128_spill] sm:$0xff] }
 0x2c1   : > { %7291 = vmatprep.subr.mxu1 %v10940_v63  ;;  %7246 = vmatpush3.msra.mxu0 %v13687_v60  ;;  %v13767_v60 = vld [vmem:[#allocation126_spill] sm:$0xff] }
 0x2c2   : > { %7292 = vmatpush3.msra.mxu1 %v13659_v23  ;;  %7247 = vmatprep.subr.mxu0 %v13688_v9  ;;  %v13692_v9 = vld [vmem:[#allocation221_spill] sm:$0xff] }
 0x2c3   : > { %7293 = vmatprep.subr.mxu1 %v10971_v22  ;;  %7248 = vmatpush3.msra.mxu0 %v13689_v43  ;;  %v13693_v43 = vld [vmem:[#allocation225_spill] sm:$0xff] }
 0x2c4   : > { %7294 = vmatpush3.msra.mxu1 %v10986_v20  ;;  %7249 = vmatprep.subr.mxu0 %v13690_v31  ;;  %v13694_v31 = vld [vmem:[#allocation228_spill] sm:$0xff] }
 0x2c5   : > { %7295 = vmatprep.subr.mxu1 %v11001_v47  ;;  %7250 = vmatpush3.msra.mxu0 %v13691_v61  ;;  %v13695_v61 = vand.u32 4294901760, %v11252_v18 }
 0x2c6   : > { %7296 = vmatpush3.msra.mxu1 %v11018_v39  ;;  %7251 = vmatprep.subr.mxu0 %v10969_v2  ;;  %v13765_v2 = vld [vmem:[#allocation124_spill] sm:$0xff] }
 0x2c7   : > { %7297 = vmatprep.subr.mxu1 %v11035_v24  ;;  %7252 = vmatpush3.msra.mxu0 %v10984_v3  ;;  %v13696_v3 = vand.u32 4294901760, %v11285_v5 }
 0x2c8   : > { %7298 = vmatpush3.msra.mxu1 %v11050_v55  ;;  %7253 = vmatprep.subr.mxu0 %v13692_v9  ;;  %v13697_v9 = vld [vmem:[#allocation234_spill] sm:$0xff] }
 0x2c9   : > { %7299 = vmatprep.subr.mxu1 %v11062_v40  ;;  %7254 = vmatpush3.msra.mxu0 %v13693_v43  ;;  %v13763_v43 = vld [vmem:[#allocation122_spill] sm:$0xff] }
 0x2ca   : > { %7300 = vmatpush3.msra.mxu1 %v11076_v36  ;;  %7255 = vmatprep.subr.mxu0 %v13694_v31  ;;  %v13761_v31 = vld [vmem:[#allocation119_spill] sm:$0xff] }
 0x2cb   : > { %4449 = vmatmul.mubr.f32.vlgmr.msra.gmra.mxu1 %v13695_v61  ;;  %7345 = vmatprep.subr.mxu1 %v13660_v37  ;;  %v13698_v61 = vand.u32 4294901760, %v11273_v38 }
 0x2cc   : > { %7256 = vmatpush3.msra.mxu0 %v11048_v27  ;;  %4456 = vmatprep.mubr.f32.mxu1 %v13696_v3  ;;  %v13699_v3 = vld [vmem:[#allocation153_spill] sm:$0xff]  ;;  %v13759_v27 = vld [vmem:[#allocation116_spill] sm:$0xff] }
 0x2cd   : > { %7346 = vmatpush3.msra.mxu1 %v13670_v13  ;;  %7257 = vmatprep.subr.mxu0 %v13697_v9  ;;  %v13757_v9 = vld [vmem:[#allocation113_spill] sm:$0xff] }
 0x2ce   : > { %7347 = vmatprep.subr.mxu1 %v10634_v6  ;;  %7258 = vmatpush3.msra.mxu0 %v11074_v32  ;;  %v13755_v32 = vld [vmem:[#allocation75_spill] sm:$0xff] }
 0x2cf   : > { %7348 = vmatpush3.msra.mxu1 %v13671_v58  ;;  %7259 = vmatprep.subr.mxu0 %v11090_v56  ;;  %v13753_v56 = vld [vmem:[#allocation14_spill] sm:$0xff] }
 0x2d0   : > { %4460 = vmatmul.mubr.f32.gmra.mxu1 %v13698_v61  ;;  %7349 = vmatprep.subr.mxu1 %v13672_v35  ;;  %v13700_v61 = vld [vmem:[#allocation154_spill] sm:$0xff] }
 0x2d1   : > { %7260 = vmatpush3.msra.mxu0 %v11104_v34  ;;  %7350 = vmatpush3.msra.mxu1 %v10644_v57  ;;  %v13701_v34 = vld [vmem:[#allocation155_spill] sm:$0xff] }
 0x2d2   : > { %4737 = vmatprep.mubr.f32.mxu1 %v11255_v28  ;;  %7261 = vmatprep.subr.mxu0 %v11116_v17  ;;  %v13702_v17 = vld [vmem:[#allocation158_spill] sm:$0xff] }
 0x2d3   : > { %7351 = vmatprep.subr.mxu1 %v10670_v8  ;;  %7262 = vmatpush3.msra.mxu0 %v11128_v19  ;;  %v13733_v19 = vld [vmem:[#allocation30_spill] sm:$0xff] }
 0x2d4   : > { %7352 = vmatpush3.msra.mxu1 %v10686_v15  ;;  %4332 = vmatmul.mubr.f32.vlgmr.msra.gmra.mxu0 %v11252_v18  ;;  %v13703_v18 = vld [vmem:[#allocation161_spill] sm:$0xff] }
 0x2d5   : > { %7307 = vmatprep.subr.mxu0 %v13699_v3  ;;  %7353 = vmatprep.subr.mxu1 %v10707_v62  ;;  %v13704_v3 = vld [vmem:[#allocation162_spill] sm:$0xff] }
 0x2d6   : > { %4338 = vmatprep.mubr.f32.mxu0 %v11285_v5  ;;  %7308 = vmatpush3.msra.mxu0 %v13700_v61  ;;  %v13705_v5 = vld [vmem:[#allocation169_spill] sm:$0xff]  ;;  %v13731_v61 = vld [vmem:[#allocation67_spill] sm:$0xff] }
 0x2d7   : > { %7354 = vmatpush3.msra.mxu1 %v10709_v30  ;;  %7309 = vmatprep.subr.mxu0 %v13701_v34  ;;  %v13706_v34 = vld [vmem:[#allocation172_spill] sm:$0xff] }
 0x2d8   : > { %7355 = vmatprep.subr.mxu1 %v10725_v29  ;;  %7310 = vmatpush3.msra.mxu0 %v13702_v17  ;;  %v13707_v17 = vld [vmem:[#allocation179_spill] sm:$0xff] }
 0x2d9   : > { %7356 = vmatpush3.msra.mxu1 %v10738_v16  ;;  %4341 = vmatmul.mubr.f32.gmra.mxu0 %v11273_v38  ;;  %v13708_v38 = vld [vmem:[#allocation180_spill] sm:$0xff] }
 0x2da   : > { %7311 = vmatprep.subr.mxu0 %v13703_v18  ;;  %7357 = vmatprep.subr.mxu1 %v10749_v46  ;;  %v13727_v18 = vld [vmem:[#allocation109_spill] sm:$0xff] }
 0x2db   : > { %7312 = vmatpush3.msra.mxu0 %v13704_v3  ;;  %4626 = vmatprep.mubr.f32.mxu0 %v11255_v28  ;;  %v13709_v3 = vld [vmem:[#allocation182_spill] sm:$0xff]  ;;  %v13710_v28 = vld [vmem:[#allocation185_spill] sm:$0xff] }
 0x2dc   : > { %7358 = vmatpush3.msra.mxu1 %v10751_v11  ;;  %7313 = vmatprep.subr.mxu0 %v13705_v5  ;;  %v13711_v5 = vld [vmem:[#allocation188_spill] sm:$0xff] }
 0x2dd   : > { %7359 = vmatprep.subr.mxu1 %v10776_v10  ;;  %7314 = vmatpush3.msra.mxu0 %v13706_v34  ;;  %v13712_v34 = vld [vmem:[#allocation189_spill] sm:$0xff] }
 0x2de   : > { %7360 = vmatpush3.msra.mxu1 %v10788_v12  ;;  %7315 = vmatprep.subr.mxu0 %v13707_v17  ;;  %v13713_v17 = vld [vmem:[#allocation194_spill] sm:$0xff] }
 0x2df   : > { %7361 = vmatprep.subr.mxu1 %v10855_v42  ;;  %7316 = vmatpush3.msra.mxu0 %v13708_v38  ;;  %v13714_v38 = vld [vmem:[#allocation197_spill] sm:$0xff] }
 0x2e0   : > { %7362 = vmatpush3.msra.mxu1 %v10868_v48  ;;  %7317 = vmatprep.subr.mxu0 %v13709_v3  ;;  %v13715_v3 = vld [vmem:[#allocation212_spill] sm:$0xff] }
 0x2e1   : > { %7363 = vmatprep.subr.mxu1 %v10882_v14  ;;  %7318 = vmatpush3.msra.mxu0 %v13710_v28  ;;  %v13716_v28 = vld [vmem:[#allocation216_spill] sm:$0xff] }
 0x2e2   : > { %7364 = vmatpush3.msra.mxu1 %v10898_v53  ;;  %7319 = vmatprep.subr.mxu0 %v13711_v5  ;;  %v13717_v5 = vld [vmem:[#allocation220_spill] sm:$0xff] }
 0x2e3   : > { %7365 = vmatprep.subr.mxu1 %v10912_v25  ;;  %7320 = vmatpush3.msra.mxu0 %v13712_v34  ;;  %v13718_v34 = vld [vmem:[#allocation224_spill] sm:$0xff] }
 0x2e4   : > { %7366 = vmatpush3.msra.mxu1 %v10926_v54  ;;  %7321 = vmatprep.subr.mxu0 %v13713_v17  ;;  %v13719_v17 = vld [vmem:[#allocation227_spill] sm:$0xff] }
 0x2e5   : > { %7367 = vmatprep.subr.mxu1 %v10940_v63  ;;  %7322 = vmatpush3.msra.mxu0 %v13714_v38  ;;  %v13720_v38 = vld [vmem:[#allocation230_spill] sm:$0xff] }
 0x2e6   : > { %7368 = vmatpush3.msra.mxu1 %v13659_v23  ;;  %7323 = vmatprep.subr.mxu0 %v13715_v3  ;;  %v13721_v3 = vld [vmem:[#allocation233_spill] sm:$0xff] }
 0x2e7   : > { %7369 = vmatprep.subr.mxu1 %v10971_v22  ;;  %7324 = vmatpush3.msra.mxu0 %v13716_v28  ;;  %v13722_v28 = vld [vmem:[#allocation236_spill] sm:$0xff] }
 0x2e8   : > { %7370 = vmatpush3.msra.mxu1 %v10986_v20  ;;  %7325 = vmatprep.subr.mxu0 %v13717_v5  ;;  %v13723_v5 = vld [vmem:[#allocation240_spill] sm:$0xff] }
 0x2e9   : > { %7371 = vmatprep.subr.mxu1 %v11001_v47  ;;  %7326 = vmatpush3.msra.mxu0 %v13718_v34  ;;  %v13724_v34 = vld [vmem:[#allocation243_spill] sm:$0xff]  ;;  %v13794_v47 = vld [vmem:[#allocation18_spill] sm:$0xff] }
 0x2ea   : > { %7372 = vmatpush3.msra.mxu1 %v11018_v39  ;;  %7327 = vmatprep.subr.mxu0 %v13719_v17  ;;  %v13725_v17 = vld [vmem:[#allocation246_spill] sm:$0xff]  ;;  %v13792_v39 = vld [vmem:[#allocation77_spill] sm:$0xff] }
 0x2eb   : > { %7373 = vmatprep.subr.mxu1 %v11035_v24  ;;  %7328 = vmatpush3.msra.mxu0 %v13720_v38  ;;  %v13726_v38 = vld [vmem:[#allocation249_spill] sm:$0xff]  ;;  %v13790_v24 = vld [vmem:[#allocation23_spill] sm:$0xff] }
 0x2ec   : > { %7374 = vmatpush3.msra.mxu1 %v11050_v55  ;;  %7329 = vmatprep.subr.mxu0 %v13721_v3  ;;  %v13728_v3 = vld [vmem:[#allocation111_spill] sm:$0xff]  ;;  %v13788_v55 = vld [vmem:[#allocation90_spill] sm:$0xff] }
 0x2ed   : > { %7375 = vmatprep.subr.mxu1 %v11062_v40  ;;  %7330 = vmatpush3.msra.mxu0 %v13722_v28  ;;  %v13729_v28 = vld [vmem:[#allocation254_spill] sm:$0xff]  ;;  %v13785_v40 = vld [vmem:[#allocation137_spill] sm:$0xff] }
 0x2ee   : > { %7376 = vmatpush3.msra.mxu1 %v11076_v36  ;;  %7331 = vmatprep.subr.mxu0 %v13723_v5  ;;  %v13730_v5 = vld [vmem:[#allocation256_spill] sm:$0xff] }
 0x2ef   : > { %4739 = vmatmul.mubr.f32.vlgmr.msra.gmra.mxu1 %v11245_v49  ;;  %7332 = vmatpush3.msra.mxu0 %v13724_v34  ;;  %v13732_v34 = vld [vmem:[#allocation258_spill] sm:$0xff]  ;;  %v13783_v36 = vld [vmem:[#allocation136_spill] sm:$0xff] }
 0x2f0   : > { %4744 = vmatprep.mubr.f32.mxu1 %v11276_v0  ;;  %7333 = vmatprep.subr.mxu0 %v13725_v17  ;;  %v13749_v17 = vld [vmem:[#allocation48_spill] sm:$0xff] }
 0x2f1   : > { %7334 = vmatpush3.msra.mxu0 %v13726_v38  ;;  %7424 = vmatprep.subr.mxu1 %v13727_v18  ;;  %v13734_v38 = vld [vmem:[#allocation79_spill] sm:$0xff]  ;;  %v13735_v18 = vld [vmem:[#allocation98_spill] sm:$0xff] }
 0x2f2   : > { %7335 = vmatprep.subr.mxu0 %v11139_v50  ;;  %7425 = vmatpush3.msra.mxu1 %v13728_v3  ;;  %v13736_v3 = vld [vmem:[#allocation89_spill] sm:$0xff]  ;;  %v13737_v50 = vld [vmem:[#allocation55_spill] sm:$0xff] }
 0x2f3   : > { %4746 = vmatmul.mubr.f32.gmra.mxu1 %v11264_v41  ;;  %7336 = vmatpush3.msra.mxu0 %v13729_v28  ;;  %v13738_v28 = vld [vmem:[#allocation28_spill] sm:$0xff] }
 0x2f4   : > { %7337 = vmatprep.subr.mxu0 %v13730_v5  ;;  %7426 = vmatprep.subr.mxu1 %v13731_v61  ;;  %v13739_v5 = vld [vmem:[#allocation17_spill] sm:$0xff]  ;;  %v13740_v61 = vld [vmem:[#allocation39_spill] sm:$0xff] }
 0x2f5   : > { %7338 = vmatpush3.msra.mxu0 %v13732_v34  ;;  %7427 = vmatpush3.msra.mxu1 %v13733_v19  ;;  %v13741_v19 = vld [vmem:[#allocation78_spill] sm:$0xff]  ;;  %v6959_v22 = vpop.f32.mrf.mxu0 }
 0x2f6   : > { %4628 = vmatmul.mubr.f32.vlgmr.msra.gmra.mxu0 %v11245_v49  ;;  %7428 = vmatprep.subr.mxu1 %v13734_v38  ;;  %v13742_v49 = vld [vmem:[#allocation38_spill] sm:$0xff]  ;;  %v13743_v38 = vld [vmem:[#allocation64_spill] sm:$0xff] }
 0x2f7   : > { %4633 = vmatprep.mubr.f32.mxu0 %v11276_v0  ;;  %7429 = vmatpush3.msra.mxu1 %v13735_v18  ;;  %v13744_v0 = vld [vmem:[#allocation56_spill] sm:$0xff]  ;;  %v13745_v18 = vld [vmem:[#allocation46_spill] sm:$0xff]  ;;  %v6960_v63 = vpop.f32.mrf.mxu0 }
 0x2f8   : > { %7430 = vmatprep.subr.mxu1 %v13736_v3  ;;  %7383 = vmatprep.subr.mxu0 %v13737_v50  ;;  %v13746_v3 = vld [vmem:[#allocation96_spill] sm:$0xff]  ;;  %v13747_v34 = vld [vmem:[#allocation62_spill] sm:$0xff]  ;;  %v6961_v13 = vadd.f32 %v6960_v63, %v6959_v22 }
 0x2f9   : > { %7431 = vmatpush3.msra.mxu1 %v13738_v28  ;;  %7384 = vmatpush3.msra.mxu0 %v13739_v5  ;;  %v13748_v28 = vld [vmem:[#allocation97_spill] sm:$0xff] }
 0x2fa   : > { %4635 = vmatmul.mubr.f32.gmra.mxu0 %v11264_v41  ;;  %7432 = vmatprep.subr.mxu1 %v13740_v61  ;;  %v13750_v41 = vld [vmem:[#allocation19_spill] sm:$0xff]  ;;  %v6962_v25 = vpop.f32.mrf.mxu0 }
 0x2fb   : > { %7433 = vmatpush3.msra.mxu1 %v13741_v19  ;;  %7385 = vmatprep.subr.mxu0 %v13742_v49  ;;  %v13751_v61 = vld [vmem:[#allocation87_spill] sm:$0xff] }
 0x2fc   : > { %7434 = vmatprep.subr.mxu1 %v13743_v38  ;;  %7386 = vmatpush3.msra.mxu0 %v13744_v0  ;;  %v13752_v19 = vld [vmem:[#allocation103_spill] sm:$0xff]  ;;  %v13754_v38 = vld [vmem:[#allocation26_spill] sm:$0xff]  ;;  %v6963_v14 = vpop.f32.mrf.mxu0 }
 0x2fd   : > { %7435 = vmatpush3.msra.mxu1 %v13745_v18  ;;  %7387 = vmatprep.subr.mxu0 %v13746_v3  ;;  %v13756_v18 = vld [vmem:[#allocation32_spill] sm:$0xff] }
 0x2fe   : > { %7436 = vmatprep.subr.mxu1 %v13747_v34  ;;  %7388 = vmatpush3.msra.mxu0 %v13748_v28  ;;  %v13758_v34 = vld [vmem:[#allocation88_spill] sm:$0xff] }
 0x2ff   : > { %7437 = vmatpush3.msra.mxu1 %v13749_v17  ;;  %7389 = vmatprep.subr.mxu0 %v13750_v41  ;;  %v13760_v17 = vld [vmem:[#allocation61_spill] sm:$0xff] }
 0x300   : > { %7438 = vmatprep.subr.mxu1 %v13751_v61  ;;  %7390 = vmatpush3.msra.mxu0 %v13752_v19  ;;  %v13762_v61 = vld [vmem:[#allocation37_spill] sm:$0xff] }
 0x301   : > { %7439 = vmatpush3.msra.mxu1 %v13753_v56  ;;  %7391 = vmatprep.subr.mxu0 %v13754_v38  ;;  %v13764_v56 = vld [vmem:[#allocation104_spill] sm:$0xff] }
 0x302   : > { %7440 = vmatprep.subr.mxu1 %v13755_v32  ;;  %7392 = vmatpush3.msra.mxu0 %v13756_v18  ;;  %v13766_v32 = vld [vmem:[#allocation47_spill] sm:$0xff] }
 0x303   : > { %7441 = vmatpush3.msra.mxu1 %v13757_v9  ;;  %7393 = vmatprep.subr.mxu0 %v13758_v34  ;;  %v13768_v9 = vld [vmem:[#allocation50_spill] sm:$0xff] }
 0x304   : > { %7442 = vmatprep.subr.mxu1 %v13759_v27  ;;  %7394 = vmatpush3.msra.mxu0 %v13760_v17  ;;  %v13770_v27 = vld [vmem:[#allocation69_spill] sm:$0xff] }
 0x305   : > { %7443 = vmatpush3.msra.mxu1 %v13761_v31  ;;  %7395 = vmatprep.subr.mxu0 %v13762_v61  ;;  %v13772_v31 = vld [vmem:[#allocation101_spill] sm:$0xff] }
 0x306   : > { %7444 = vmatprep.subr.mxu1 %v13763_v43  ;;  %7396 = vmatpush3.msra.mxu0 %v13764_v56  ;;  %v13774_v43 = vld [vmem:[#allocation42_spill] sm:$0xff] }
 0x307   : > { %7445 = vmatpush3.msra.mxu1 %v13765_v2  ;;  %7397 = vmatprep.subr.mxu0 %v13766_v32  ;;  %v13776_v2 = vld [vmem:[#allocation74_spill] sm:$0xff] }
 0x308   : > { %7446 = vmatprep.subr.mxu1 %v13767_v60  ;;  %7398 = vmatpush3.msra.mxu0 %v13768_v9  ;;  %v13778_v60 = vld [vmem:[#allocation43_spill] sm:$0xff] }
 0x309   : > { %7447 = vmatpush3.msra.mxu1 %v13769_v26  ;;  %7399 = vmatprep.subr.mxu0 %v13770_v27  ;;  %v13780_v26 = vld [vmem:[#allocation24_spill] sm:$0xff] }
 0x30a   : > { %7448 = vmatprep.subr.mxu1 %v13771_v45  ;;  %7400 = vmatpush3.msra.mxu0 %v13772_v31  ;;  %v13782_v45 = vld [vmem:[#allocation81_spill] sm:$0xff] }
 0x30b   : > { %7449 = vmatpush3.msra.mxu1 %v13773_v1  ;;  %7401 = vmatprep.subr.mxu0 %v13774_v43  ;;  %v13784_v1 = vld [vmem:[#allocation59_spill] sm:$0xff] }
 0x30c   : > { %7450 = vmatprep.subr.mxu1 %v13775_v52  ;;  %7402 = vmatpush3.msra.mxu0 %v13776_v2  ;;  %v13786_v52 = vld [vmem:[#allocation71_spill] sm:$0xff] }
 0x30d   : > { %7451 = vmatpush3.msra.mxu1 %v13777_v21  ;;  %7403 = vmatprep.subr.mxu0 %v13778_v60  ;;  %v13787_v21 = vld [vmem:[#allocation84_spill] sm:$0xff] }
 0x30e   : > { %7452 = vmatprep.subr.mxu1 %v13779_v33  ;;  %7404 = vmatpush3.msra.mxu0 %v13780_v26  ;;  %v13789_v33 = vld [vmem:[#allocation45_spill] sm:$0xff] }
 0x30f   : > { %7453 = vmatpush3.msra.mxu1 %v13781_v59  ;;  %7405 = vmatprep.subr.mxu0 %v13782_v45  ;;  %v13791_v59 = vld [vmem:[#allocation15_spill] sm:$0xff] }
 0x310   : > { %7454 = vmatprep.subr.mxu1 %v13783_v36  ;;  %7406 = vmatpush3.msra.mxu0 %v13784_v1  ;;  %v13793_v36 = vld [vmem:[#allocation70_spill] sm:$0xff] }
 0x311   : > { %7455 = vmatpush3.msra.mxu1 %v13785_v40  ;;  %7407 = vmatprep.subr.mxu0 %v13786_v52  ;;  %v6997_v40 = vpop.f32.mrf.mxu1 }
 0x312   : > { %7506 = vmatprep.subr.mxu1 %v13737_v50  ;;  %7408 = vmatpush3.msra.mxu0 %v13787_v21 }
 0x313   : > { %7409 = vmatprep.subr.mxu0 %v13788_v55  ;;  %v6998_v20 = vpop.f32.mrf.mxu1 }
 0x314   : > { %7410 = vmatpush3.msra.mxu0 %v13789_v33  ;;  %v6999_v37 = vadd.f32 %v6998_v20, %v6997_v40 }
 0x315   : > { %7411 = vmatprep.subr.mxu0 %v13790_v24  ;;  %v7000_v23 = vpop.f32.mrf.mxu1 }
 0x316   : > { %7412 = vmatpush3.msra.mxu0 %v13791_v59  ;;  %v6964_v59 = vadd.f32 %v6963_v14, %v6962_v25 }
 0x317   : > { %7413 = vmatprep.subr.mxu0 %v13792_v39  ;;  %v7001_v54 = vpop.f32.mrf.mxu1  ;;  %v3271_v39 = vadd.f32 %v6999_v37, %v6961_v13 }
 0x318   : > { %7414 = vmatpush3.msra.mxu0 %v13793_v36  ;;  %v7035_v42 = vpop.f32.mrf.mxu0  ;;  %v7002_v33 = vadd.f32 %v7001_v54, %v7000_v23 }
 0x319   : > { %7465 = vmatprep.subr.mxu0 %v13794_v47  ;;  %v7073_v53 = vpop.f32.mrf.mxu1 }
 0x31a   : > { %v7036_v10 = vpop.f32.mrf.mxu0  ;;  %v3278_v1 = vadd.f32 %v7002_v33, %v6964_v59 }
 0x31b   : > { %v7074_v48 = vpop.f32.mrf.mxu1  ;;  %v7037_v51 = vadd.f32 %v7036_v10, %v7035_v42 }
 0x31c   : > { %v7075_v45 = vadd.f32 %v7074_v48, %v7073_v53 }
 0x31d   : > { %v7076_v12 = vpop.f32.mrf.mxu1  ;;  %v7038_v11 = vpop.f32.mrf.mxu0  ;;  %v3416_v55 = vadd.f32 %v7037_v51, %v3271_v39 }
 0x31f   : > { %v7077_v44 = vpop.f32.mrf.mxu1  ;;  %v7039_v16 = vpop.f32.mrf.mxu0  ;;  %v3533_v31 = vadd.f32 %v7075_v45, %v3416_v55 }
 0x320   : > { %v7040_v21 = vadd.f32 %v7039_v16, %v7038_v11  ;;  %v7078_v27 = vadd.f32 %v7077_v44, %v7076_v12 }
 0x322   : > { %v3425_v43 = vadd.f32 %v7040_v21, %v3278_v1 }
 0x324   : > { %v3544_v37 = vadd.f32 %v7078_v27, %v3425_v43 }
 0x332   : > { %v7149_v46 = vpop.f32.mrf.mxu1 }
 0x334   : > { %v7150_v29 = vpop.f32.mrf.mxu1 }
 0x335   : > { %v7151_v20 = vadd.f32 %v7150_v29, %v7149_v46 }
 0x336   : > { %v7152_v47 = vpop.f32.mrf.mxu1 }
 0x338   : > { %v7153_v62 = vpop.f32.mrf.mxu1 }
 0x339   : > { %v7154_v11 = vadd.f32 %v7153_v62, %v7152_v47  ;;  %v13795_v47 = vld [vmem:[#allocation7_spill] sm:$0xff] }
 0x33a   : > { %v7111_v4 = vpop.f32.mrf.mxu0 }
 0x33c   : > { %v7112_v30 = vpop.f32.mrf.mxu0 }
 0x33d   : > { %v7113_v26 = vadd.f32 %v7112_v30, %v7111_v4 }
 0x33e   : > { %v7114_v7 = vpop.f32.mrf.mxu0 }
 0x33f   : > { %v3712_v63 = vadd.f32 %v7113_v26, %v3533_v31 }
 0x340   : > { %v7115_v8 = vpop.f32.mrf.mxu0 }
 0x341   : > { %v7116_v22 = vadd.f32 %v7115_v8, %v7114_v7  ;;  %v3823_v54 = vadd.f32 %v7151_v20, %v3712_v63 }
 0x343   : > { %v3719_v25 = vadd.f32 %v7116_v22, %v3544_v37  ;;  %v13797_v22 = vld [vmem:[#allocation5_spill] sm:$0xff] }
 0x345   : > { %v3830_v51 = vadd.f32 %v7154_v11, %v3719_v25 }
 0x369   : > { %v7225_v15 = vpop.f32.mrf.mxu1 }
 0x36b   : > { %v7226_v57 = vpop.f32.mrf.mxu1 }
 0x36c   : > { %v7227_v30 = vadd.f32 %v7226_v57, %v7225_v15 }
 0x36d   : > { %v7228_v58 = vpop.f32.mrf.mxu1 }
 0x36f   : > { %v7229_v50 = vpop.f32.mrf.mxu1 }
 0x370   : > { %v7230_v7 = vadd.f32 %v7229_v50, %v7228_v58 }
 0x371   : > { %v7187_v35 = vpop.f32.mrf.mxu0 }
 0x373   : > { %v7188_v6 = vpop.f32.mrf.mxu0 }
 0x374   : > { %v7189_v14 = vadd.f32 %v7188_v6, %v7187_v35 }
 0x376   : > { %v7190_v36 = vpop.f32.mrf.mxu0  ;;  %v3942_v23 = vadd.f32 %v7189_v14, %v3823_v54  ;;  %v13799_v14 = vld [vmem:[#allocation3_spill] sm:$0xff]  ;;  %v13801_v54 = vld [vmem:[#allocation2_spill] sm:$0xff] }
 0x378   : > { %v7191_v52 = vpop.f32.mrf.mxu0  ;;  %v4189_v44 = vadd.f32 %v7227_v30, %v3942_v23 }
 0x379   : > { %v7192_v48 = vadd.f32 %v7191_v52, %v7190_v36 }
 0x37b   : > { %v3957_v12 = vadd.f32 %v7192_v48, %v3830_v51 }
 0x37d   : > { %v4196_v35 = vadd.f32 %v7230_v7, %v3957_v12 }
 0x38b   : > { %v7301_v24 = vpop.f32.mrf.mxu1 }
 0x38d   : > { %v7302_v60 = vpop.f32.mrf.mxu1 }
 0x38e   : > { %v7303_v6 = vadd.f32 %v7302_v60, %v7301_v24 }
 0x390   : > { %v7304_v10 = vpop.f32.mrf.mxu1 }
 0x392   : > { %v7305_v39 = vpop.f32.mrf.mxu1 }
 0x393   : > { %v7306_v1 = vadd.f32 %v7305_v39, %v7304_v10 }
 0x394   : > { %v7263_v2 = vpop.f32.mrf.mxu0 }
 0x396   : > { %v7264_v42 = vpop.f32.mrf.mxu0 }
 0x397   : > { %v7265_v4 = vadd.f32 %v7264_v42, %v7263_v2 }
 0x399   : > { %v7266_v16 = vpop.f32.mrf.mxu0  ;;  %v4334_v13 = vadd.f32 %v7265_v4, %v4189_v44 }
 0x39b   : > { %v7267_v55 = vpop.f32.mrf.mxu0  ;;  %v4451_v62 = vadd.f32 %v7303_v6, %v4334_v13 }
 0x39c   : > { %v7268_v46 = vadd.f32 %v7267_v55, %v7266_v16 }
 0x39e   : > { %v4343_v43 = vadd.f32 %v7268_v46, %v4196_v35 }
 0x3a0   : > { %v4462_v21 = vadd.f32 %v7306_v1, %v4343_v43 }
 0x3af   : > { %v7377_v53 = vpop.f32.mrf.mxu1 }
 0x3b1   : > { %v7378_v8 = vpop.f32.mrf.mxu1 }
 0x3b2   : > { %v7379_v15 = vadd.f32 %v7378_v8, %v7377_v53 }
 0x3b3   : > { %v7380_v27 = vpop.f32.mrf.mxu1 }
 0x3b5   : > { %v7381_v2 = vpop.f32.mrf.mxu1 }
 0x3b6   : > { %v7339_v29 = vpop.f32.mrf.mxu0  ;;  %v7382_v50 = vadd.f32 %v7381_v2, %v7380_v27  ;;  %v13803_v2 = vld [vmem:[#allocation20_spill] sm:$0xff] }
 0x3b8   : > { %v7340_v31 = vpop.f32.mrf.mxu0 }
 0x3b9   : > { %v7341_v26 = vadd.f32 %v7340_v31, %v7339_v29 }
 0x3ba   : > { %v7342_v45 = vpop.f32.mrf.mxu0 }
 0x3bb   : > { %v4630_v57 = vadd.f32 %v7341_v26, %v4451_v62 }
 0x3bc   : > { %v7343_v52 = vpop.f32.mrf.mxu0 }
 0x3bd   : > { %v7344_v33 = vadd.f32 %v7343_v52, %v7342_v45  ;;  %v4741_v59 = vadd.f32 %v7379_v15, %v4630_v57 }
 0x3bf   : > { %v4637_v58 = vadd.f32 %v7344_v33, %v4462_v21  ;;  %v4751_v36 = vmul.f32 0.001953125, %v4741_v59  ;;  %v13804_v33 = vld [vmem:[#allocation58_spill] sm:$0xff] }
 0x3c1   : > { %4755 = vperm.xlu1 %7894, %v4751_v36   ;;  %v4748_v24 = vadd.f32 %v7382_v50, %v4637_v58  ;;  %v13805_v58 = vld [vmem:[#allocation102_spill] sm:$0xff] }
 0x3c2   : > { %v13806_v36 = vld [vmem:[#allocation22_spill] sm:$0xff] }
 0x3c3   : > { %v4752_v60 = vmul.f32 0.001953125, %v4748_v24 }
 0x3c5   : > { %4760 = vperm.xlu0 %7893, %v4752_v60  }
 0x43c   : > { %v11504_v40 = vpop.permute.xlu1 %4755 }
 0x43d   : > { %v11508_v63 = vsub.f32 %v13795_v47, %v11504_v40  ;;  %v11512_v10 = vsub.f32 %v13797_v22, %v11504_v40  ;;  %v13807_v47 = vld [vmem:[#allocation65_spill] sm:$0xff]  ;;  %v13808_v22 = vld [vmem:[#allocation54_spill] sm:$0xff] }
 0x43f   : > { %13796 = vst [vmem:[#allocation109_spill] sm:$0xff] %v11508_v63  ;;  %13798 = vst [vmem:[#allocation111_spill] sm:$0xff] %v11512_v10  ;;  %v4771_v42 = vmul.f32 %v11508_v63, %v11508_v63  ;;  %v4772_v20 = vmul.f32 %v11512_v10, %v11512_v10 }
 0x440   : > { %v11518_v37 = vpop.permute.xlu0 %4760 }
 0x441   : > { %v11522_v25 = vsub.f32 %v13799_v14, %v11518_v37  ;;  %v11526_v39 = vsub.f32 %v13801_v54, %v11518_v37  ;;  %v11528_v16 = vand.u32 4294901760, %v4772_v20  ;;  %v11530_v11 = vand.u32 4294901760, %v4771_v42  ;;  %v13810_v14 = vld [vmem:[#allocation35_spill] sm:$0xff]  ;;  %v13811_v54 = vld [vmem:[#allocation69_spill] sm:$0xff] }
 0x443   : > { %13800 = vst [vmem:[#allocation67_spill] sm:$0xff] %v11522_v25  ;;  %13802 = vst [vmem:[#allocation30_spill] sm:$0xff] %v11526_v39  ;;  %v4776_v23 = vmul.f32 %v11526_v39, %v11526_v39  ;;  %v4775_v48 = vmul.f32 %v11522_v25, %v11522_v25  ;;  %v4780_v53 = vmul.f32 %v11526_v39, %v11512_v10  ;;  %5150 = vmatprep.mubr.f32.mxu1 %v11528_v16 }
 0x444   : > { %v4779_v30 = vmul.f32 %v11522_v25, %v11508_v63  ;;  %v11542_v51 = vsub.f32 %v4772_v20, %v11528_v16  ;;  %v11545_v4 = vsub.f32 %v4771_v42, %v11530_v11  ;;  %5152 = vmatmul.mubr.f32.vlgmr.msra.gmra.mxu1 %v11530_v11  ;;  %v13809_v42 = vld [vmem:[#allocation99_spill] sm:$0xff] }
 0x445   : > { %v11548_v55 = vand.u32 4294901760, %v4776_v23  ;;  %v11550_v12 = vand.u32 4294901760, %v4775_v48  ;;  %v11552_v44 = vand.u32 4294901760, %v4780_v53  ;;  %7507 = vmatpush3.msra.mxu1 %v13739_v5 }
 0x446   : > { %v4881_v8 = vand.u32 4294901760, %v11542_v51  ;;  %v4887_v7 = vand.u32 4294901760, %v11545_v4  ;;  %v11557_v13 = vand.u32 4294901760, %v4779_v30  ;;  %7508 = vmatprep.subr.mxu1 %v13742_v49 }
 0x447   : > { %5157 = vmatprep.mubr.f32.mxu1 %v11548_v55  ;;  %v11562_v46 = vsub.f32 %v4776_v23, %v11548_v55  ;;  %v11565_v29 = vsub.f32 %v4775_v48, %v11550_v12  ;;  %v11568_v6 = vsub.f32 %v4780_v53, %v11552_v44  ;;  %7509 = vmatpush3.msra.mxu1 %v13744_v0  ;;  %v13812_v23 = vld [vmem:[#allocation41_spill] sm:$0xff]  ;;  %v13814_v53 = vld [vmem:[#allocation40_spill] sm:$0xff] }
 0x448   : > { %v4882_v35 = vsub.f32 %v11542_v51, %v4881_v8  ;;  %v4888_v27 = vsub.f32 %v11545_v4, %v4887_v7  ;;  %7510 = vmatprep.subr.mxu1 %v13746_v3  ;;  %5159 = vmatmul.mubr.f32.gmra.mxu1 %v11550_v12  ;;  %v11582_v45 = vsub.f32 %v4779_v30, %v11557_v13  ;;  %v13813_v48 = vld [vmem:[#allocation101_spill] sm:$0xff]  ;;  %v13815_v30 = vld [vmem:[#allocation42_spill] sm:$0xff] }
 0x449   : > { %v4896_v31 = vand.u32 4294901760, %v11562_v46  ;;  %v4902_v43 = vand.u32 4294901760, %v11565_v29  ;;  %7511 = vmatpush3.msra.mxu1 %v13748_v28  ;;  %5164 = vmatprep.mubr.f32.mxu1 %v11552_v44  ;;  %v4911_v57 = vand.u32 4294901760, %v11568_v6 }
 0x44a   : > { %v4883_v62 = vand.u32 4294901760, %v4882_v35  ;;  %v4889_v26 = vand.u32 4294901760, %v4888_v27  ;;  %7512 = vmatprep.subr.mxu1 %v13750_v41  ;;  %v4917_v21 = vand.u32 4294901760, %v11582_v45  ;;  %v13817_v35 = vld [vmem:[#allocation74_spill] sm:$0xff]  ;;  %v13818_v27 = vld [vmem:[#allocation51_spill] sm:$0xff] }
 0x44b   : > { %v4897_v1 = vsub.f32 %v11562_v46, %v4896_v31  ;;  %v4903_v15 = vsub.f32 %v11565_v29, %v4902_v43  ;;  %7513 = vmatpush3.msra.mxu1 %v13752_v19  ;;  %v4912_v50 = vsub.f32 %v11568_v6, %v4911_v57 }
 0x44c   : > { %4884 = vmatprep.mubr.f32.mxu0 %v4883_v62  ;;  %7514 = vmatprep.subr.mxu1 %v13754_v38  ;;  %v4918_v24 = vsub.f32 %v11582_v45, %v4917_v21  ;;  %v13819_v62 = vld [vmem:[#allocation43_spill] sm:$0xff] }
 0x44d   : > { %4890 = vmatmul.mubr.f32.vlgmr.msra.gmra.mxu0 %v4889_v26  ;;  %5166 = vmatmul.mubr.f32.gmra.mxu1 %v11557_v13  ;;  %v4898_v52 = vand.u32 4294901760, %v4897_v1  ;;  %v4904_v59 = vand.u32 4294901760, %v4903_v15  ;;  %v4913_v60 = vand.u32 4294901760, %v4912_v50  ;;  %v13820_v26 = vld [vmem:[#allocation107_spill] sm:$0xff]  ;;  %v13821_v1 = vld [vmem:[#allocation24_spill] sm:$0xff] }
 0x44e   : > { %7466 = vmatpush3.msra.mxu0 %v13803_v2  ;;  %7515 = vmatpush3.msra.mxu1 %v13756_v18  ;;  %v4919_v20 = vand.u32 4294901760, %v4918_v24  ;;  %v13822_v15 = vld [vmem:[#allocation63_spill] sm:$0xff]  ;;  %v13823_v2 = vld [vmem:[#allocation81_spill] sm:$0xff]  ;;  %v13828_v50 = vld [vmem:[#allocation60_spill] sm:$0xff] }
 0x44f   : > { %7467 = vmatprep.subr.mxu0 %v13804_v33  ;;  %7516 = vmatprep.subr.mxu1 %v13758_v34  ;;  %v13826_v33 = vld [vmem:[#allocation36_spill] sm:$0xff]  ;;  %v13831_v24 = vld [vmem:[#allocation90_spill] sm:$0xff] }
 0x450   : > { %5426 = vmatprep.mubr.f32.mxu1 %v4881_v8  ;;  %7468 = vmatpush3.msra.mxu0 %v13805_v58  ;;  %v13816_v8 = vld [vmem:[#allocation44_spill] sm:$0xff] }
 0x451   : > { %7517 = vmatpush3.msra.mxu1 %v13760_v17  ;;  %4899 = vmatprep.mubr.f32.mxu0 %v4898_v52  ;;  %v13824_v52 = vld [vmem:[#allocation95_spill] sm:$0xff]  ;;  %v13829_v58 = vld [vmem:[#allocation84_spill] sm:$0xff] }
 0x452   : > { %7469 = vmatprep.subr.mxu0 %v13806_v36  ;;  %7518 = vmatprep.subr.mxu1 %v13762_v61  ;;  %v13830_v36 = vld [vmem:[#allocation86_spill] sm:$0xff] }
 0x453   : > { %4905 = vmatmul.mubr.f32.gmra.mxu0 %v4904_v59  ;;  %7519 = vmatpush3.msra.mxu1 %v13764_v56  ;;  %v13827_v59 = vld [vmem:[#allocation71_spill] sm:$0xff] }
 0x454   : > { %7470 = vmatpush3.msra.mxu0 %v13807_v47  ;;  %4914 = vmatprep.mubr.f32.mxu0 %v4913_v60  ;;  %v13832_v60 = vld [vmem:[#allocation53_spill] sm:$0xff] }
 0x455   : > { %7471 = vmatprep.subr.mxu0 %v13808_v22  ;;  %7520 = vmatprep.subr.mxu1 %v13766_v32  ;;  %v13833_v47 = vld [vmem:[#allocation45_spill] sm:$0xff]  ;;  %v13834_v22 = vld [vmem:[#allocation66_spill] sm:$0xff] }
 0x456   : > { %7472 = vmatpush3.msra.mxu0 %v13809_v42  ;;  %7521 = vmatpush3.msra.mxu1 %v13768_v9  ;;  %v13835_v42 = vld [vmem:[#allocation23_spill] sm:$0xff] }
 0x457   : > { %7473 = vmatprep.subr.mxu0 %v13810_v14  ;;  %7522 = vmatprep.subr.mxu1 %v13811_v54  ;;  %v13837_v14 = vld [vmem:[#allocation15_spill] sm:$0xff] }
 0x458   : > { %4920 = vmatmul.mubr.f32.gmra.mxu0 %v4919_v20  ;;  %7523 = vmatpush3.msra.mxu1 %v13813_v48  ;;  %v13836_v20 = vld [vmem:[#allocation76_spill] sm:$0xff] }
 0x459   : > { %7474 = vmatpush3.msra.mxu0 %v13812_v23  ;;  %5301 = vmatprep.mubr.f32.mxu0 %v11542_v51  ;;  %v13825_v51 = vld [vmem:[#allocation59_spill] sm:$0xff] }
 0x45a   : > { %7475 = vmatprep.subr.mxu0 %v13814_v53  ;;  %7524 = vmatprep.subr.mxu1 %v13815_v30  ;;  %v13838_v23 = vld [vmem:[#allocation83_spill] sm:$0xff]  ;;  %v13839_v53 = vld [vmem:[#allocation77_spill] sm:$0xff] }
 0x45b   : > { %7476 = vmatpush3.msra.mxu0 %v13816_v8  ;;  %7525 = vmatpush3.msra.mxu1 %v13817_v35  ;;  %v13840_v8 = vld [vmem:[#allocation33_spill] sm:$0xff] }
 0x45c   : > { %7477 = vmatprep.subr.mxu0 %v13818_v27  ;;  %7526 = vmatprep.subr.mxu1 %v13819_v62  ;;  %v13841_v27 = vld [vmem:[#allocation70_spill] sm:$0xff] }
 0x45d   : > { %7478 = vmatpush3.msra.mxu0 %v13820_v26  ;;  %7527 = vmatpush3.msra.mxu1 %v13821_v1  ;;  %v13842_v26 = vld [vmem:[#allocation93_spill] sm:$0xff] }
 0x45e   : > { %7479 = vmatprep.subr.mxu0 %v13822_v15  ;;  %7528 = vmatprep.subr.mxu1 %v13823_v2  ;;  %v13843_v15 = vld [vmem:[#allocation55_spill] sm:$0xff] }
 0x45f   : > { %7480 = vmatpush3.msra.mxu0 %v13824_v52  ;;  %7529 = vmatpush3.msra.mxu1 %v13825_v51  ;;  %v13844_v52 = vld [vmem:[#allocation52_spill] sm:$0xff] }
 0x460   : > { %7481 = vmatprep.subr.mxu0 %v13826_v33  ;;  %7530 = vmatprep.subr.mxu1 %v13827_v59  ;;  %v13845_v33 = vld [vmem:[#allocation85_spill] sm:$0xff] }
 0x461   : > { %7482 = vmatpush3.msra.mxu0 %v13828_v50  ;;  %7531 = vmatpush3.msra.mxu1 %v13829_v58  ;;  %v13846_v50 = vld [vmem:[#allocation10_spill] sm:$0xff] }
 0x462   : > { %7483 = vmatprep.subr.mxu0 %v13830_v36  ;;  %7532 = vmatprep.subr.mxu1 %v13831_v24  ;;  %v13847_v36 = vld [vmem:[#allocation112_spill] sm:$0xff] }
 0x463   : > { %7484 = vmatpush3.msra.mxu0 %v13832_v60  ;;  %7533 = vmatpush3.msra.mxu1 %v13833_v47  ;;  %v13884_v60 = vld [vmem:[#allocation184_spill] sm:$0xff] }
 0x464   : > { %7485 = vmatprep.subr.mxu0 %v13834_v22  ;;  %7534 = vmatprep.subr.mxu1 %v13835_v42 }
 0x465   : > { %7486 = vmatpush3.msra.mxu0 %v13836_v20  ;;  %7535 = vmatpush3.msra.mxu1 %v13837_v14  ;;  %v13887_v20 = vld [vmem:[#allocation125_spill] sm:$0xff] }
 0x466   : > { %7487 = vmatprep.subr.mxu0 %v13838_v23  ;;  %7536 = vmatprep.subr.mxu1 %v13839_v53  ;;  %v13889_v23 = vld [vmem:[#allocation127_spill] sm:$0xff] }
 0x467   : > { %7488 = vmatpush3.msra.mxu0 %v13840_v8  ;;  %7537 = vmatpush3.msra.mxu1 %v13841_v27  ;;  %v13891_v8 = vld [vmem:[#allocation129_spill] sm:$0xff] }
 0x468   : > { %7489 = vmatprep.subr.mxu0 %v13842_v26  ;;  %5430 = vmatmul.mubr.f32.vlgmr.msra.gmra.mxu1 %v4887_v7  ;;  %v13848_v7 = vld [vmem:[#allocation115_spill] sm:$0xff]  ;;  %v13892_v26 = vld [vmem:[#allocation196_spill] sm:$0xff] }
 0x469   : > { %7588 = vmatprep.subr.mxu1 %v13843_v15  ;;  %7490 = vmatpush3.msra.mxu0 %v13844_v52  ;;  %v13893_v15 = vld [vmem:[#allocation139_spill] sm:$0xff]  ;;  %v13894_v52 = vld [vmem:[#allocation201_spill] sm:$0xff] }
 0x46a   : > { %5437 = vmatprep.mubr.f32.mxu1 %v4896_v31  ;;  %7589 = vmatpush3.msra.mxu1 %v13739_v5  ;;  %v13849_v5 = vld [vmem:[#allocation118_spill] sm:$0xff]  ;;  %v13869_v31 = vld [vmem:[#allocation12_spill] sm:$0xff] }
 0x46b   : > { %7491 = vmatprep.subr.mxu0 %v13845_v33  ;;  %7590 = vmatprep.subr.mxu1 %v13742_v49  ;;  %v13850_v49 = vld [vmem:[#allocation121_spill] sm:$0xff]  ;;  %v13895_v33 = vld [vmem:[#allocation140_spill] sm:$0xff] }
 0x46c   : > { %7492 = vmatpush3.msra.mxu0 %v13846_v50  ;;  %7591 = vmatpush3.msra.mxu1 %v13744_v0  ;;  %v13851_v0 = vld [vmem:[#allocation31_spill] sm:$0xff]  ;;  %v13896_v50 = vld [vmem:[#allocation202_spill] sm:$0xff] }
 0x46d   : > { %7493 = vmatprep.subr.mxu0 %v13847_v36  ;;  %5441 = vmatmul.mubr.f32.gmra.mxu1 %v4902_v43  ;;  %v13870_v43 = vld [vmem:[#allocation92_spill] sm:$0xff] }
 0x46e   : > { %7592 = vmatprep.subr.mxu1 %v13746_v3  ;;  %7494 = vmatpush3.msra.mxu0 %v13848_v7  ;;  %v13852_v3 = vld [vmem:[#allocation21_spill] sm:$0xff] }
 0x46f   : > { %5448 = vmatprep.mubr.f32.mxu1 %v4911_v57  ;;  %7593 = vmatpush3.msra.mxu1 %v13748_v28  ;;  %v13853_v28 = vld [vmem:[#allocation82_spill] sm:$0xff]  ;;  %v13872_v57 = vld [vmem:[#allocation9_spill] sm:$0xff] }
 0x470   : > { %7495 = vmatprep.subr.mxu0 %v13849_v5  ;;  %7594 = vmatprep.subr.mxu1 %v13750_v41  ;;  %v13854_v41 = vld [vmem:[#allocation57_spill] sm:$0xff] }
 0x471   : > { %7496 = vmatpush3.msra.mxu0 %v13850_v49  ;;  %7595 = vmatpush3.msra.mxu1 %v13752_v19  ;;  %v13855_v19 = vld [vmem:[#allocation91_spill] sm:$0xff]  ;;  %v13897_v7 = vld [vmem:[#allocation141_spill] sm:$0xff]  ;;  %v13900_v49 = vld [vmem:[#allocation208_spill] sm:$0xff] }
 0x472   : > { %5304 = vmatmul.mubr.f32.vlgmr.msra.gmra.mxu0 %v11545_v4  ;;  %5452 = vmatmul.mubr.f32.gmra.mxu1 %v4917_v21  ;;  %v13864_v4 = vld [vmem:[#allocation13_spill] sm:$0xff]  ;;  %v11725_v21 = vsub.f32 %v13872_v57, %v11504_v40  ;;  %v13924_v57 = vld [vmem:[#allocation4_spill] sm:$0xff] }
 0x473   : > { %7547 = vmatprep.subr.mxu0 %v13851_v0  ;;  %7596 = vmatprep.subr.mxu1 %v13754_v38  ;;  %v13856_v38 = vld [vmem:[#allocation100_spill] sm:$0xff]  ;;  %v13898_v5 = vld [vmem:[#allocation205_spill] sm:$0xff]  ;;  %v13901_v0 = vld [vmem:[#allocation143_spill] sm:$0xff] }
 0x474   : > { %5310 = vmatprep.mubr.f32.mxu0 %v11562_v46  ;;  %7548 = vmatpush3.msra.mxu0 %v13852_v3  ;;  %v13865_v46 = vld [vmem:[#allocation29_spill] sm:$0xff]  ;;  %13873 = vst [vmem:[#allocation79_spill] sm:$0xff] %v11725_v21 }
 0x475   : > { %7597 = vmatpush3.msra.mxu1 %v13756_v18  ;;  %5736 = vmatprep.mubr.f32.mxu1 %v11528_v16  ;;  %v13857_v18 = vld [vmem:[#allocation105_spill] sm:$0xff] }
 0x476   : > { %7549 = vmatprep.subr.mxu0 %v13853_v28  ;;  %7598 = vmatprep.subr.mxu1 %v13758_v34  ;;  %v13858_v34 = vld [vmem:[#allocation106_spill] sm:$0xff]  ;;  %v13903_v28 = vld [vmem:[#allocation144_spill] sm:$0xff] }
 0x477   : > { %7550 = vmatpush3.msra.mxu0 %v13854_v41  ;;  %7599 = vmatpush3.msra.mxu1 %v13760_v17  ;;  %v13859_v17 = vld [vmem:[#allocation108_spill] sm:$0xff]  ;;  %v13904_v41 = vld [vmem:[#allocation215_spill] sm:$0xff] }
 0x478   : > { %5313 = vmatmul.mubr.f32.gmra.mxu0 %v11565_v29  ;;  %7551 = vmatprep.subr.mxu0 %v13855_v19  ;;  %v13867_v29 = vld [vmem:[#allocation49_spill] sm:$0xff] }
 0x479   : > { %7600 = vmatprep.subr.mxu1 %v13762_v61  ;;  %5319 = vmatprep.mubr.f32.mxu0 %v11568_v6  ;;  %v13860_v61 = vld [vmem:[#allocation110_spill] sm:$0xff]  ;;  %v13868_v6 = vld [vmem:[#allocation11_spill] sm:$0xff]  ;;  %v13905_v19 = vld [vmem:[#allocation149_spill] sm:$0xff] }
 0x47a   : > { %7552 = vmatpush3.msra.mxu0 %v13856_v38  ;;  %7601 = vmatpush3.msra.mxu1 %v13764_v56  ;;  %v13861_v56 = vld [vmem:[#allocation25_spill] sm:$0xff]  ;;  %v13906_v38 = vld [vmem:[#allocation219_spill] sm:$0xff] }
 0x47b   : > { %7553 = vmatprep.subr.mxu0 %v13857_v18  ;;  %7602 = vmatprep.subr.mxu1 %v13766_v32  ;;  %v13862_v32 = vld [vmem:[#allocation73_spill] sm:$0xff]  ;;  %v13907_v18 = vld [vmem:[#allocation152_spill] sm:$0xff] }
 0x47c   : > { %7554 = vmatpush3.msra.mxu0 %v13858_v34  ;;  %7603 = vmatpush3.msra.mxu1 %v13768_v9  ;;  %v13863_v9 = vld [vmem:[#allocation72_spill] sm:$0xff] }
 0x47d   : > { %5322 = vmatmul.mubr.f32.gmra.mxu0 %v11582_v45  ;;  %7555 = vmatprep.subr.mxu0 %v13859_v17  ;;  %v13871_v45 = vld [vmem:[#allocation34_spill] sm:$0xff] }
 0x47e   : > { %7604 = vmatprep.subr.mxu1 %v13811_v54  ;;  %7556 = vmatpush3.msra.mxu0 %v13860_v61  ;;  %v13874_v54 = vld [vmem:[#allocation27_spill] sm:$0xff]  ;;  %v13909_v17 = vld [vmem:[#allocation6_spill] sm:$0xff] }
 0x47f   : > { %5618 = vmatprep.mubr.f32.mxu0 %v11528_v16  ;;  %7605 = vmatpush3.msra.mxu1 %v13813_v48  ;;  %v13866_v16 = vld [vmem:[#allocation68_spill] sm:$0xff]  ;;  %v13875_v48 = vld [vmem:[#allocation94_spill] sm:$0xff]  ;;  %v11790_v61 = vsub.f32 %v13909_v17, %v11504_v40 }
 0x480   : > { %7557 = vmatprep.subr.mxu0 %v13861_v56  ;;  %7606 = vmatprep.subr.mxu1 %v13815_v30  ;;  %v13876_v30 = vld [vmem:[#allocation16_spill] sm:$0xff]  ;;  %v13912_v56 = vld [vmem:[#allocation239_spill] sm:$0xff]  ;;  %v13947_v17 = vld [vmem:[#allocation214_spill] sm:$0xff] }
 0x481   : > { %7558 = vmatpush3.msra.mxu0 %v13862_v32  ;;  %7607 = vmatpush3.msra.mxu1 %v13817_v35  ;;  %v13877_v35 = vld [vmem:[#allocation80_spill] sm:$0xff]  ;;  %13910 = vst [vmem:[#allocation98_spill] sm:$0xff] %v11790_v61  ;;  %v13913_v32 = vld [vmem:[#allocation157_spill] sm:$0xff]  ;;  %v4773_v40 = vmul.f32 %v11790_v61, %v11790_v61 }
 0x482   : > { %7559 = vmatprep.subr.mxu0 %v13863_v9  ;;  %7608 = vmatprep.subr.mxu1 %v13819_v62  ;;  %v13878_v62 = vld [vmem:[#allocation177_spill] sm:$0xff]  ;;  %v13914_v9 = vld [vmem:[#allocation8_spill] sm:$0xff] }
 0x483   : > { %7560 = vmatpush3.msra.mxu0 %v13864_v4  ;;  %7609 = vmatpush3.msra.mxu1 %v13821_v1  ;;  %v4774_v1 = vmul.f32 %v11725_v21, %v11725_v21  ;;  %v11797_v4 = vsub.f32 %v13914_v9, %v11518_v37 }
 0x484   : > { %7561 = vmatprep.subr.mxu0 %v13865_v46  ;;  %7610 = vmatprep.subr.mxu1 %v13823_v2  ;;  %v13879_v2 = vld [vmem:[#allocation114_spill] sm:$0xff] }
 0x485   : > { %7562 = vmatpush3.msra.mxu0 %v13866_v16  ;;  %7611 = vmatpush3.msra.mxu1 %v13825_v51  ;;  %v13880_v51 = vld [vmem:[#allocation178_spill] sm:$0xff]  ;;  %v11747_v22 = vand.u32 4294901760, %v4774_v1  ;;  %13915 = vst [vmem:[#allocation89_spill] sm:$0xff] %v11797_v4  ;;  %v13917_v16 = vld [vmem:[#allocation160_spill] sm:$0xff] }
 0x486   : > { %7563 = vmatprep.subr.mxu0 %v13867_v29  ;;  %7612 = vmatprep.subr.mxu1 %v13827_v59  ;;  %v13881_v59 = vld [vmem:[#allocation117_spill] sm:$0xff]  ;;  %v13916_v46 = vld [vmem:[#allocation242_spill] sm:$0xff]  ;;  %v13919_v29 = vld [vmem:[#allocation164_spill] sm:$0xff] }
 0x487   : > { %7564 = vmatpush3.msra.mxu0 %v13868_v6  ;;  %7613 = vmatpush3.msra.mxu1 %v13829_v58  ;;  %v13882_v58 = vld [vmem:[#allocation181_spill] sm:$0xff]  ;;  %v13920_v6 = vld [vmem:[#allocation248_spill] sm:$0xff] }
 0x488   : > { %7565 = vmatprep.subr.mxu0 %v13869_v31  ;;  %7614 = vmatprep.subr.mxu1 %v13831_v24  ;;  %v13883_v24 = vld [vmem:[#allocation120_spill] sm:$0xff]  ;;  %v13921_v31 = vld [vmem:[#allocation165_spill] sm:$0xff] }
 0x489   : > { %7566 = vmatpush3.msra.mxu0 %v13870_v43  ;;  %7615 = vmatpush3.msra.mxu1 %v13833_v47  ;;  %v13885_v47 = vld [vmem:[#allocation123_spill] sm:$0xff] }
 0x48a   : > { %7567 = vmatprep.subr.mxu0 %v13871_v45  ;;  %7616 = vmatprep.subr.mxu1 %v13835_v42  ;;  %v13886_v42 = vld [vmem:[#allocation187_spill] sm:$0xff]  ;;  %v13923_v45 = vld [vmem:[#allocation166_spill] sm:$0xff] }
 0x48b   : > { %7568 = vmatpush3.msra.mxu0 %v13874_v54  ;;  %7617 = vmatpush3.msra.mxu1 %v13837_v14  ;;  %v13888_v14 = vld [vmem:[#allocation191_spill] sm:$0xff]  ;;  %v11811_v54 = vsub.f32 %v13924_v57, %v11518_v37  ;;  %v13933_v37 = vld [vmem:[#allocation192_spill] sm:$0xff]  ;;  %v13950_v57 = vld [vmem:[#allocation226_spill] sm:$0xff] }
 0x48c   : > { %7569 = vmatprep.subr.mxu0 %v13875_v48  ;;  %7618 = vmatprep.subr.mxu1 %v13839_v53  ;;  %v13890_v53 = vld [vmem:[#allocation193_spill] sm:$0xff]  ;;  %v13922_v43 = vld [vmem:[#allocation251_spill] sm:$0xff] }
 0x48d   : > { %7570 = vmatpush3.msra.mxu0 %v13876_v30  ;;  %7619 = vmatpush3.msra.mxu1 %v13841_v27  ;;  %v11758_v27 = vsub.f32 %v4774_v1, %v11747_v22  ;;  %13925 = vst [vmem:[#allocation28_spill] sm:$0xff] %v11811_v54  ;;  %v13926_v48 = vld [vmem:[#allocation253_spill] sm:$0xff]  ;;  %v13927_v30 = vld [vmem:[#allocation171_spill] sm:$0xff]  ;;  %v13929_v1 = vld [vmem:[#allocation174_spill] sm:$0xff] }
 0x48e   : > { %7571 = vmatprep.subr.mxu0 %v13877_v35  ;;  %5738 = vmatmul.mubr.f32.vlgmr.msra.gmra.mxu1 %v11530_v11  ;;  %v4778_v35 = vmul.f32 %v11797_v4, %v11797_v4 }
 0x48f   : > { %7670 = vmatprep.subr.mxu1 %v13878_v62  ;;  %7572 = vmatpush3.msra.mxu0 %v13879_v2  ;;  %v5855_v36 = vand.u32 4294901760, %v11758_v27  ;;  %v13928_v62 = vld [vmem:[#allocation255_spill] sm:$0xff]  ;;  %v13930_v2 = vld [vmem:[#allocation257_spill] sm:$0xff] }
 0x490   : > { %5743 = vmatprep.mubr.f32.mxu1 %v11548_v55  ;;  %7671 = vmatpush3.msra.mxu1 %v13880_v51  ;;  %v13931_v51 = vld [vmem:[#allocation190_spill] sm:$0xff] }
 0x491   : > { %7573 = vmatprep.subr.mxu0 %v13881_v59  ;;  %7672 = vmatprep.subr.mxu1 %v13882_v58  ;;  %v5856_v3 = vsub.f32 %v11758_v27, %v5855_v36  ;;  %v11821_v59 = vand.u32 4294901760, %v4773_v40  ;;  %v13932_v58 = vld [vmem:[#allocation259_spill] sm:$0xff] }
 0x492   : > { %7574 = vmatpush3.msra.mxu0 %v13883_v24  ;;  %7673 = vmatpush3.msra.mxu1 %v13884_v60  ;;  %v13934_v24 = vld [vmem:[#allocation260_spill] sm:$0xff]  ;;  %v13935_v60 = vld [vmem:[#allocation195_spill] sm:$0xff] }
 0x493   : > { %7575 = vmatprep.subr.mxu0 %v13885_v47  ;;  %5745 = vmatmul.mubr.f32.gmra.mxu1 %v11550_v12  ;;  %v5857_v34 = vand.u32 4294901760, %v5856_v3  ;;  %v11827_v47 = vand.u32 4294901760, %v4778_v35 }
 0x494   : > { %7674 = vmatprep.subr.mxu1 %v13886_v42  ;;  %7576 = vmatpush3.msra.mxu0 %v13887_v20  ;;  %v4777_v42 = vmul.f32 %v11811_v54, %v11811_v54  ;;  %v13936_v20 = vld [vmem:[#allocation261_spill] sm:$0xff] }
 0x495   : > { %5750 = vmatprep.mubr.f32.mxu1 %v11552_v44  ;;  %7675 = vmatpush3.msra.mxu1 %v13888_v14  ;;  %v13937_v14 = vld [vmem:[#allocation198_spill] sm:$0xff]  ;;  %v11847_v3 = vsub.f32 %v4778_v35, %v11827_v47 }
 0x496   : > { %7577 = vmatprep.subr.mxu0 %v13889_v23  ;;  %7676 = vmatprep.subr.mxu1 %v13890_v53  ;;  %v13938_v23 = vld [vmem:[#allocation262_spill] sm:$0xff]  ;;  %v13939_v53 = vld [vmem:[#allocation200_spill] sm:$0xff] }
 0x497   : > { %7578 = vmatpush3.msra.mxu0 %v13891_v8  ;;  %7677 = vmatpush3.msra.mxu1 %v13892_v26  ;;  %v4782_v8 = vmul.f32 %v11797_v4, %v11725_v21  ;;  %v11838_v26 = vsub.f32 %v4773_v40, %v11821_v59 }
 0x498   : > { %5620 = vmatmul.mubr.f32.vlgmr.msra.gmra.mxu0 %v11530_v11  ;;  %5752 = vmatmul.mubr.f32.gmra.mxu1 %v11557_v13  ;;  %v13899_v11 = vld [vmem:[#allocation142_spill] sm:$0xff] }
 0x499   : > { %7629 = vmatprep.subr.mxu0 %v13893_v15  ;;  %7678 = vmatprep.subr.mxu1 %v13894_v52  ;;  %v13940_v52 = vld [vmem:[#allocation263_spill] sm:$0xff]  ;;  %v5861_v9 = vand.u32 4294901760, %v11838_v26 }
 0x49a   : > { %5625 = vmatprep.mubr.f32.mxu0 %v11548_v55  ;;  %7630 = vmatpush3.msra.mxu0 %v13895_v33  ;;  %v13902_v55 = vld [vmem:[#allocation211_spill] sm:$0xff] }
 0x49b   : > { %7679 = vmatpush3.msra.mxu1 %v13896_v50  ;;  %6124 = vmatprep.mubr.f32.mxu1 %v11747_v22  ;;  %v13941_v50 = vld [vmem:[#allocation204_spill] sm:$0xff] }
 0x49c   : > { %7631 = vmatprep.subr.mxu0 %v13897_v7  ;;  %7680 = vmatprep.subr.mxu1 %v13898_v5  ;;  %v13942_v5 = vld [vmem:[#allocation264_spill] sm:$0xff] }
 0x49d   : > { %7632 = vmatpush3.msra.mxu0 %v13899_v11  ;;  %7681 = vmatpush3.msra.mxu1 %v13900_v49  ;;  %v13943_v49 = vld [vmem:[#allocation207_spill] sm:$0xff] }
 0x49e   : > { %5627 = vmatmul.mubr.f32.gmra.mxu0 %v11550_v12  ;;  %7633 = vmatprep.subr.mxu0 %v13901_v0  ;;  %v13908_v12 = vld [vmem:[#allocation223_spill] sm:$0xff] }
 0x49f   : > { %7682 = vmatprep.subr.mxu1 %v13902_v55  ;;  %5632 = vmatprep.mubr.f32.mxu0 %v11552_v44  ;;  %v13911_v44 = vld [vmem:[#allocation156_spill] sm:$0xff]  ;;  %v11844_v55 = vand.u32 4294901760, %v4777_v42 }
 0x4a0   : > { %7634 = vmatpush3.msra.mxu0 %v13903_v28  ;;  %7683 = vmatpush3.msra.mxu1 %v13904_v41  ;;  %v13944_v41 = vld [vmem:[#allocation265_spill] sm:$0xff] }
 0x4a1   : > { %7635 = vmatprep.subr.mxu0 %v13905_v19  ;;  %7684 = vmatprep.subr.mxu1 %v13906_v38  ;;  %v13945_v38 = vld [vmem:[#allocation210_spill] sm:$0xff]  ;;  %v11864_v40 = vsub.f32 %v4777_v42, %v11844_v55 }
 0x4a2   : > { %7636 = vmatpush3.msra.mxu0 %v13907_v18  ;;  %7685 = vmatpush3.msra.mxu1 %v13908_v12  ;;  %v4781_v12 = vmul.f32 %v11811_v54, %v11790_v61 }
 0x4a3   : > { %5634 = vmatmul.mubr.f32.gmra.mxu0 %v11557_v13  ;;  %7637 = vmatprep.subr.mxu0 %v13911_v44  ;;  %v13918_v13 = vld [vmem:[#allocation245_spill] sm:$0xff] }
 0x4a4   : > { %7686 = vmatprep.subr.mxu1 %v13912_v56  ;;  %7638 = vmatpush3.msra.mxu0 %v13913_v32  ;;  %v11855_v56 = vand.u32 4294901760, %v4782_v8 }
 0x4a5   : > { %5858 = vmatprep.mubr.f32.mxu0 %v5857_v34  ;;  %7687 = vmatpush3.msra.mxu1 %v13916_v46  ;;  %v13946_v34 = vld [vmem:[#allocation138_spill] sm:$0xff] }
 0x4a6   : > { %7639 = vmatprep.subr.mxu0 %v13917_v16  ;;  %7688 = vmatprep.subr.mxu1 %v13918_v13  ;;  %v13948_v46 = vld [vmem:[#allocation218_spill] sm:$0xff]  ;;  %v12872_v13 = vand.u32 4294901760, %v11847_v3  ;;  %v11876_v35 = vsub.f32 %v4782_v8, %v11855_v56 }
 0x4a7   : > { %7640 = vmatpush3.msra.mxu0 %v13919_v29  ;;  %7689 = vmatpush3.msra.mxu1 %v13920_v6  ;;  %v13949_v6 = vld [vmem:[#allocation222_spill] sm:$0xff] }
 0x4a8   : > { %7641 = vmatprep.subr.mxu0 %v13921_v31  ;;  %7690 = vmatprep.subr.mxu1 %v13922_v43  ;;  %v11868_v43 = vand.u32 4294901760, %v4781_v12  ;;  %v12873_v8 = vand.u32 4294901760, %v11876_v35 }
 0x4a9   : > { %7642 = vmatpush3.msra.mxu0 %v13923_v45  ;;  %7691 = vmatpush3.msra.mxu1 %v13926_v48  ;;  %v5862_v48 = vsub.f32 %v11838_v26, %v5861_v9 }
 0x4aa   : > { %7643 = vmatprep.subr.mxu0 %v13927_v30  ;;  %7692 = vmatprep.subr.mxu1 %v13928_v62  ;;  %v13951_v62 = vld [vmem:[#allocation229_spill] sm:$0xff]  ;;  %v11889_v42 = vsub.f32 %v4781_v12, %v11868_v43 }
 0x4ab   : > { %7644 = vmatpush3.msra.mxu0 %v13929_v1  ;;  %7693 = vmatpush3.msra.mxu1 %v13930_v2  ;;  %v5871_v2 = vsub.f32 %v11847_v3, %v12872_v13  ;;  %v13955_v12 = vld [vmem:[#allocation145_spill] sm:$0xff]  ;;  %v13956_v13 = vld [vmem:[#allocation146_spill] sm:$0xff] }
 0x4ac   : > { %7645 = vmatprep.subr.mxu0 %v13931_v51  ;;  %7694 = vmatprep.subr.mxu1 %v13932_v58  ;;  %v5876_v58 = vand.u32 4294901760, %v11864_v40 }
 0x4ad   : > { %7646 = vmatpush3.msra.mxu0 %v13933_v37  ;;  %7695 = vmatpush3.msra.mxu1 %v13934_v24  ;;  %v13952_v24 = vld [vmem:[#allocation232_spill] sm:$0xff] }
 0x4ae   : > { %7647 = vmatprep.subr.mxu0 %v13935_v60  ;;  %7696 = vmatprep.subr.mxu1 %v13936_v20  ;;  %v13953_v20 = vld [vmem:[#allocation235_spill] sm:$0xff] }
 0x4af   : > { %7648 = vmatpush3.msra.mxu0 %v13937_v14  ;;  %7697 = vmatpush3.msra.mxu1 %v13938_v23  ;;  %v5863_v23 = vand.u32 4294901760, %v5862_v48  ;;  %v5886_v48 = vsub.f32 %v11876_v35, %v12873_v8  ;;  %v13959_v8 = vld [vmem:[#allocation150_spill] sm:$0xff] }
 0x4b0   : > { %7649 = vmatprep.subr.mxu0 %v13939_v53  ;;  %7698 = vmatprep.subr.mxu1 %v13940_v52  ;;  %v13954_v52 = vld [vmem:[#allocation238_spill] sm:$0xff] }
 0x4b1   : > { %7650 = vmatpush3.msra.mxu0 %v13941_v50  ;;  %7699 = vmatpush3.msra.mxu1 %v13942_v5  ;;  %v5872_v5 = vand.u32 4294901760, %v5871_v2  ;;  %v13957_v2 = vld [vmem:[#allocation147_spill] sm:$0xff] }
 0x4b2   : > { %7651 = vmatprep.subr.mxu0 %v13943_v49  ;;  %7700 = vmatprep.subr.mxu1 %v13944_v41  ;;  %v5877_v41 = vsub.f32 %v11864_v40, %v5876_v58 }
 0x4b3   : > { %7652 = vmatpush3.msra.mxu0 %v13945_v38  ;;  %7701 = vmatpush3.msra.mxu1 %v13946_v34  ;;  %v5891_v34 = vand.u32 4294901760, %v11889_v42 }
 0x4b4   : > { %7653 = vmatprep.subr.mxu0 %v13947_v17  ;;  %6126 = vmatmul.mubr.f32.vlgmr.msra.gmra.mxu1 %v11821_v59 }
 0x4b5   : > { %7752 = vmatprep.subr.mxu1 %v13893_v15  ;;  %7654 = vmatpush3.msra.mxu0 %v13948_v46 }
 0x4b6   : > { %6131 = vmatprep.mubr.f32.mxu1 %v11827_v47  ;;  %7753 = vmatpush3.msra.mxu1 %v13895_v33 }
 0x4b7   : > { %7655 = vmatprep.subr.mxu0 %v13949_v6  ;;  %7754 = vmatprep.subr.mxu1 %v13897_v7 }
 0x4b8   : > { %7656 = vmatpush3.msra.mxu0 %v13950_v57  ;;  %7755 = vmatpush3.msra.mxu1 %v13899_v11 }
 0x4b9   : > { %7657 = vmatprep.subr.mxu0 %v13951_v62  ;;  %6133 = vmatmul.mubr.f32.gmra.mxu1 %v11844_v55 }
 0x4ba   : > { %7756 = vmatprep.subr.mxu1 %v13901_v0  ;;  %7658 = vmatpush3.msra.mxu0 %v13952_v24 }
 0x4bb   : > { %6138 = vmatprep.mubr.f32.mxu1 %v11855_v56  ;;  %7757 = vmatpush3.msra.mxu1 %v13903_v28 }
 0x4bc   : > { %7659 = vmatprep.subr.mxu0 %v13953_v20  ;;  %7758 = vmatprep.subr.mxu1 %v13905_v19 }
 0x4bd   : > { %7660 = vmatpush3.msra.mxu0 %v13954_v52  ;;  %7759 = vmatpush3.msra.mxu1 %v13907_v18 }
 0x4be   : > { %5864 = vmatmul.mubr.f32.vlgmr.msra.gmra.mxu0 %v5863_v23  ;;  %6140 = vmatmul.mubr.f32.gmra.mxu1 %v11868_v43  ;;  %v5878_v23 = vand.u32 4294901760, %v5877_v41  ;;  %v13961_v41 = vld [vmem:[#allocation159_spill] sm:$0xff] }
 0x4bf   : > { %7711 = vmatprep.subr.mxu0 %v13955_v12  ;;  %7760 = vmatprep.subr.mxu1 %v13911_v44  ;;  %v13958_v12 = vld [vmem:[#allocation148_spill] sm:$0xff] }
 0x4c0   : > { %5873 = vmatprep.mubr.f32.mxu0 %v5872_v5  ;;  %7712 = vmatpush3.msra.mxu0 %v13956_v13  ;;  %v5892_v5 = vsub.f32 %v11889_v42, %v5891_v34  ;;  %v5887_v13 = vand.u32 4294901760, %v5886_v48  ;;  %v13963_v48 = vld [vmem:[#allocation167_spill] sm:$0xff] }
 0x4c1   : > { %7761 = vmatpush3.msra.mxu1 %v13913_v32  ;;  %6400 = vmatprep.mubr.f32.mxu1 %v5855_v36  ;;  %v13960_v36 = vld [vmem:[#allocation151_spill] sm:$0xff] }
 0x4c2   : > { %7713 = vmatprep.subr.mxu0 %v13957_v2  ;;  %7762 = vmatprep.subr.mxu1 %v13917_v16  ;;  %v5893_v2 = vand.u32 4294901760, %v5892_v5  ;;  %v13966_v5 = vld [vmem:[#allocation173_spill] sm:$0xff] }
 0x4c3   : > { %7714 = vmatpush3.msra.mxu0 %v13958_v12  ;;  %7763 = vmatpush3.msra.mxu1 %v13919_v29  ;;  %v13962_v12 = vld [vmem:[#allocation163_spill] sm:$0xff] }
 0x4c4   : > { %5879 = vmatmul.mubr.f32.gmra.mxu0 %v5878_v23  ;;  %7715 = vmatprep.subr.mxu0 %v13959_v8  ;;  %v13964_v8 = vld [vmem:[#allocation168_spill] sm:$0xff]  ;;  %v13965_v23 = vld [vmem:[#allocation170_spill] sm:$0xff] }
 0x4c5   : > { %7764 = vmatprep.subr.mxu1 %v13921_v31  ;;  %5888 = vmatprep.mubr.f32.mxu0 %v5887_v13  ;;  %v13967_v13 = vld [vmem:[#allocation175_spill] sm:$0xff] }
 0x4c6   : > { %7716 = vmatpush3.msra.mxu0 %v13960_v36  ;;  %7765 = vmatpush3.msra.mxu1 %v13923_v45  ;;  %v13968_v36 = vld [vmem:[#allocation176_spill] sm:$0xff] }
 0x4c7   : > { %7717 = vmatprep.subr.mxu0 %v13961_v41  ;;  %7766 = vmatprep.subr.mxu1 %v13927_v30  ;;  %v13969_v41 = vld [vmem:[#allocation183_spill] sm:$0xff] }
 0x4c8   : > { %7718 = vmatpush3.msra.mxu0 %v13962_v12  ;;  %7767 = vmatpush3.msra.mxu1 %v13929_v1  ;;  %v13972_v12 = vld [vmem:[#allocation203_spill] sm:$0xff] }
 0x4c9   : > { %5894 = vmatmul.mubr.f32.gmra.mxu0 %v5893_v2  ;;  %7719 = vmatprep.subr.mxu0 %v13963_v48  ;;  %v13971_v2 = vld [vmem:[#allocation199_spill] sm:$0xff]  ;;  %v13973_v48 = vld [vmem:[#allocation206_spill] sm:$0xff] }
 0x4ca   : > { %7768 = vmatprep.subr.mxu1 %v13931_v51  ;;  %7720 = vmatpush3.msra.mxu0 %v13964_v8  ;;  %v13974_v8 = vld [vmem:[#allocation209_spill] sm:$0xff] }
 0x4cb   : > { %6275 = vmatprep.mubr.f32.mxu0 %v11758_v27  ;;  %7769 = vmatpush3.msra.mxu1 %v13933_v37  ;;  %v13970_v27 = vld [vmem:[#allocation186_spill] sm:$0xff] }
 0x4cc   : > { %7721 = vmatprep.subr.mxu0 %v13965_v23  ;;  %7770 = vmatprep.subr.mxu1 %v13935_v60  ;;  %v13975_v23 = vld [vmem:[#allocation213_spill] sm:$0xff] }
 0x4cd   : > { %7722 = vmatpush3.msra.mxu0 %v13966_v5  ;;  %7771 = vmatpush3.msra.mxu1 %v13937_v14  ;;  %v13976_v5 = vld [vmem:[#allocation217_spill] sm:$0xff] }
 0x4ce   : > { %7723 = vmatprep.subr.mxu0 %v13967_v13  ;;  %7772 = vmatprep.subr.mxu1 %v13939_v53  ;;  %v13977_v13 = vld [vmem:[#allocation221_spill] sm:$0xff] }
 0x4cf   : > { %7724 = vmatpush3.msra.mxu0 %v13968_v36  ;;  %7773 = vmatpush3.msra.mxu1 %v13941_v50  ;;  %v13978_v36 = vld [vmem:[#allocation225_spill] sm:$0xff] }
 0x4d0   : > { %7725 = vmatprep.subr.mxu0 %v13969_v41  ;;  %7774 = vmatprep.subr.mxu1 %v13943_v49  ;;  %v13979_v41 = vld [vmem:[#allocation228_spill] sm:$0xff] }
 0x4d1   : > { %7726 = vmatpush3.msra.mxu0 %v13970_v27  ;;  %7775 = vmatpush3.msra.mxu1 %v13945_v38  ;;  %v13980_v27 = vld [vmem:[#allocation231_spill] sm:$0xff] }
 0x4d2   : > { %7727 = vmatprep.subr.mxu0 %v13971_v2  ;;  %7776 = vmatprep.subr.mxu1 %v13947_v17  ;;  %v13981_v2 = vand.u32 4294901760, %v11847_v3 }
 0x4d3   : > { %7728 = vmatpush3.msra.mxu0 %v13972_v12  ;;  %7777 = vmatpush3.msra.mxu1 %v13948_v46  ;;  %v13982_v12 = vld [vmem:[#allocation234_spill] sm:$0xff] }
 0x4d4   : > { %7729 = vmatprep.subr.mxu0 %v13973_v48  ;;  %7778 = vmatprep.subr.mxu1 %v13949_v6  ;;  %v13983_v48 = vld [vmem:[#allocation237_spill] sm:$0xff] }
 0x4d5   : > { %7730 = vmatpush3.msra.mxu0 %v13974_v8  ;;  %7779 = vmatpush3.msra.mxu1 %v13950_v57  ;;  %v13984_v8 = vld [vmem:[#allocation241_spill] sm:$0xff] }
 0x4d6   : > { %7731 = vmatprep.subr.mxu0 %v13975_v23  ;;  %7780 = vmatprep.subr.mxu1 %v13951_v62 }
 0x4d7   : > { %7732 = vmatpush3.msra.mxu0 %v13976_v5  ;;  %7781 = vmatpush3.msra.mxu1 %v13952_v24 }
 0x4d8   : > { %7733 = vmatprep.subr.mxu0 %v13977_v13  ;;  %7782 = vmatprep.subr.mxu1 %v13953_v20 }
 0x4d9   : > { %7734 = vmatpush3.msra.mxu0 %v13978_v36  ;;  %7783 = vmatpush3.msra.mxu1 %v13954_v52 }
 0x4da   : > { %7735 = vmatprep.subr.mxu0 %v13979_v41  ;;  %6404 = vmatmul.mubr.f32.vlgmr.msra.gmra.mxu1 %v5861_v9  ;;  %v13986_v9 = vand.u32 4294901760, %v11876_v35 }
 0x4db   : > { %7834 = vmatprep.subr.mxu1 %v13893_v15  ;;  %7736 = vmatpush3.msra.mxu0 %v13980_v27  ;;  %v13985_v15 = vld [vmem:[#allocation244_spill] sm:$0xff] }
 0x4dc   : > { %6411 = vmatprep.mubr.f32.mxu1 %v13981_v2  ;;  %7835 = vmatpush3.msra.mxu1 %v13895_v33  ;;  %v13987_v33 = vld [vmem:[#allocation247_spill] sm:$0xff] }
 0x4dd   : > { %7737 = vmatprep.subr.mxu0 %v13982_v12  ;;  %7836 = vmatprep.subr.mxu1 %v13897_v7  ;;  %v13988_v7 = vld [vmem:[#allocation250_spill] sm:$0xff] }
 0x4de   : > { %7738 = vmatpush3.msra.mxu0 %v13983_v48  ;;  %7837 = vmatpush3.msra.mxu1 %v13899_v11  ;;  %v13989_v11 = vld [vmem:[#allocation153_spill] sm:$0xff] }
 0x4df   : > { %7739 = vmatprep.subr.mxu0 %v13984_v8  ;;  %6415 = vmatmul.mubr.f32.gmra.mxu1 %v5876_v58  ;;  %v14020_v58 = vld [vmem:[#allocation258_spill] sm:$0xff] }
 0x4e0   : > { %7838 = vmatprep.subr.mxu1 %v13901_v0  ;;  %7740 = vmatpush3.msra.mxu0 %v13985_v15  ;;  %v13990_v0 = vld [vmem:[#allocation154_spill] sm:$0xff] }
 0x4e1   : > { %6422 = vmatprep.mubr.f32.mxu1 %v13986_v9  ;;  %7839 = vmatpush3.msra.mxu1 %v13903_v28  ;;  %v13991_v28 = vld [vmem:[#allocation155_spill] sm:$0xff] }
 0x4e2   : > { %7741 = vmatprep.subr.mxu0 %v13987_v33  ;;  %7840 = vmatprep.subr.mxu1 %v13905_v19  ;;  %v13992_v19 = vld [vmem:[#allocation158_spill] sm:$0xff] }
 0x4e3   : > { %7742 = vmatpush3.msra.mxu0 %v13988_v7  ;;  %7841 = vmatpush3.msra.mxu1 %v13907_v18  ;;  %v13993_v18 = vld [vmem:[#allocation161_spill] sm:$0xff] }
 0x4e4   : > { %6278 = vmatmul.mubr.f32.vlgmr.msra.gmra.mxu0 %v11838_v26  ;;  %6426 = vmatmul.mubr.f32.gmra.mxu1 %v5891_v34  ;;  %v14002_v26 = vld [vmem:[#allocation189_spill] sm:$0xff] }
 0x4e5   : > { %7793 = vmatprep.subr.mxu0 %v13989_v11  ;;  %7842 = vmatprep.subr.mxu1 %v13911_v44  ;;  %v13994_v44 = vld [vmem:[#allocation162_spill] sm:$0xff] }
 0x4e6   : > { %6284 = vmatprep.mubr.f32.mxu0 %v11847_v3  ;;  %7794 = vmatpush3.msra.mxu0 %v13990_v0  ;;  %v14011_v3 = vld [vmem:[#allocation233_spill] sm:$0xff] }
 0x4e7   : > { %7843 = vmatpush3.msra.mxu1 %v13913_v32  ;;  %6710 = vmatprep.mubr.f32.mxu1 %v11747_v22  ;;  %v13995_v32 = vld [vmem:[#allocation169_spill] sm:$0xff] }
 0x4e8   : > { %7795 = vmatprep.subr.mxu0 %v13991_v28  ;;  %7844 = vmatprep.subr.mxu1 %v13917_v16  ;;  %v13996_v16 = vld [vmem:[#allocation172_spill] sm:$0xff] }
 0x4e9   : > { %7796 = vmatpush3.msra.mxu0 %v13992_v19  ;;  %7845 = vmatpush3.msra.mxu1 %v13919_v29  ;;  %v13997_v29 = vld [vmem:[#allocation179_spill] sm:$0xff] }
 0x4ea   : > { %6287 = vmatmul.mubr.f32.gmra.mxu0 %v11864_v40  ;;  %7797 = vmatprep.subr.mxu0 %v13993_v18  ;;  %v14015_v40 = vld [vmem:[#allocation246_spill] sm:$0xff] }
 0x4eb   : > { %7846 = vmatprep.subr.mxu1 %v13921_v31  ;;  %6293 = vmatprep.mubr.f32.mxu0 %v11876_v35  ;;  %v13998_v31 = vld [vmem:[#allocation180_spill] sm:$0xff]  ;;  %v14018_v35 = vld [vmem:[#allocation254_spill] sm:$0xff] }
 0x4ec   : > { %7798 = vmatpush3.msra.mxu0 %v13994_v44  ;;  %7847 = vmatpush3.msra.mxu1 %v13923_v45  ;;  %v13999_v45 = vld [vmem:[#allocation182_spill] sm:$0xff] }
 0x4ed   : > { %7799 = vmatprep.subr.mxu0 %v13995_v32  ;;  %7848 = vmatprep.subr.mxu1 %v13927_v30  ;;  %v14000_v30 = vld [vmem:[#allocation185_spill] sm:$0xff] }
 0x4ee   : > { %7800 = vmatpush3.msra.mxu0 %v13996_v16  ;;  %7849 = vmatpush3.msra.mxu1 %v13929_v1  ;;  %v14001_v1 = vld [vmem:[#allocation188_spill] sm:$0xff] }
 0x4ef   : > { %6296 = vmatmul.mubr.f32.gmra.mxu0 %v11889_v42  ;;  %7801 = vmatprep.subr.mxu0 %v13997_v29 }
 0x4f0   : > { %7850 = vmatprep.subr.mxu1 %v13931_v51  ;;  %7802 = vmatpush3.msra.mxu0 %v13998_v31  ;;  %v14003_v51 = vld [vmem:[#allocation194_spill] sm:$0xff] }
 0x4f1   : > { %6592 = vmatprep.mubr.f32.mxu0 %v11747_v22  ;;  %7851 = vmatpush3.msra.mxu1 %v13933_v37  ;;  %v14004_v22 = vld [vmem:[#allocation197_spill] sm:$0xff]  ;;  %v14005_v37 = vld [vmem:[#allocation212_spill] sm:$0xff] }
 0x4f2   : > { %7803 = vmatprep.subr.mxu0 %v13999_v45  ;;  %7852 = vmatprep.subr.mxu1 %v13935_v60  ;;  %v14006_v60 = vld [vmem:[#allocation216_spill] sm:$0xff] }
 0x4f3   : > { %7804 = vmatpush3.msra.mxu0 %v14000_v30  ;;  %7853 = vmatpush3.msra.mxu1 %v13937_v14  ;;  %v14007_v14 = vld [vmem:[#allocation220_spill] sm:$0xff] }
 0x4f4   : > { %7805 = vmatprep.subr.mxu0 %v14001_v1  ;;  %7854 = vmatprep.subr.mxu1 %v13939_v53  ;;  %v14008_v53 = vld [vmem:[#allocation224_spill] sm:$0xff] }
 0x4f5   : > { %7806 = vmatpush3.msra.mxu0 %v14002_v26  ;;  %7855 = vmatpush3.msra.mxu1 %v13941_v50  ;;  %v14009_v50 = vld [vmem:[#allocation227_spill] sm:$0xff] }
 0x4f6   : > { %7807 = vmatprep.subr.mxu0 %v14003_v51  ;;  %7856 = vmatprep.subr.mxu1 %v13943_v49  ;;  %v14010_v49 = vld [vmem:[#allocation230_spill] sm:$0xff] }
 0x4f7   : > { %7808 = vmatpush3.msra.mxu0 %v14004_v22  ;;  %7857 = vmatpush3.msra.mxu1 %v13945_v38  ;;  %v14012_v38 = vld [vmem:[#allocation236_spill] sm:$0xff] }
 0x4f8   : > { %7809 = vmatprep.subr.mxu0 %v14005_v37  ;;  %7858 = vmatprep.subr.mxu1 %v13947_v17  ;;  %v14013_v17 = vld [vmem:[#allocation240_spill] sm:$0xff] }
 0x4f9   : > { %7810 = vmatpush3.msra.mxu0 %v14006_v60  ;;  %7859 = vmatpush3.msra.mxu1 %v13948_v46  ;;  %v14014_v46 = vld [vmem:[#allocation243_spill] sm:$0xff] }
 0x4fa   : > { %7811 = vmatprep.subr.mxu0 %v14007_v14  ;;  %7860 = vmatprep.subr.mxu1 %v13949_v6  ;;  %v14016_v6 = vld [vmem:[#allocation249_spill] sm:$0xff] }
 0x4fb   : > { %7812 = vmatpush3.msra.mxu0 %v14008_v53  ;;  %7861 = vmatpush3.msra.mxu1 %v13950_v57  ;;  %v14017_v57 = vld [vmem:[#allocation252_spill] sm:$0xff] }
 0x4fc   : > { %7813 = vmatprep.subr.mxu0 %v14009_v50  ;;  %7862 = vmatprep.subr.mxu1 %v13951_v62  ;;  %v14019_v62 = vld [vmem:[#allocation256_spill] sm:$0xff] }
 0x4fd   : > { %7814 = vmatpush3.msra.mxu0 %v14010_v49  ;;  %7863 = vmatpush3.msra.mxu1 %v13952_v24 }
 0x4fe   : > { %7815 = vmatprep.subr.mxu0 %v14011_v3  ;;  %7864 = vmatprep.subr.mxu1 %v13953_v20 }
 0x4ff   : > { %7816 = vmatpush3.msra.mxu0 %v14012_v38  ;;  %7865 = vmatpush3.msra.mxu1 %v13954_v52 }
 0x500   : > { %7817 = vmatprep.subr.mxu0 %v14013_v17  ;;  %6712 = vmatmul.mubr.f32.vlgmr.msra.gmra.mxu1 %v11821_v59 }
 0x501   : > { %7818 = vmatpush3.msra.mxu0 %v14014_v46  ;;  %6717 = vmatprep.mubr.f32.mxu1 %v11827_v47 }
 0x502   : > { %7819 = vmatprep.subr.mxu0 %v14015_v40 }
 0x503   : > { %7820 = vmatpush3.msra.mxu0 %v14016_v6 }
 0x504   : > { %7821 = vmatprep.subr.mxu0 %v14017_v57  ;;  %6719 = vmatmul.mubr.f32.gmra.mxu1 %v11844_v55  ;;  %v7456_v24 = vpop.f32.mrf.mxu1 }
 0x505   : > { %7822 = vmatpush3.msra.mxu0 %v14018_v35  ;;  %6724 = vmatprep.mubr.f32.mxu1 %v11855_v56 }
 0x506   : > { %7823 = vmatprep.subr.mxu0 %v14019_v62  ;;  %v7457_v42 = vpop.f32.mrf.mxu1 }
 0x507   : > { %7824 = vmatpush3.msra.mxu0 %v14020_v58  ;;  %v7458_v62 = vadd.f32 %v7457_v42, %v7456_v24 }
 0x508   : > { %6594 = vmatmul.mubr.f32.vlgmr.msra.gmra.mxu0 %v11821_v59  ;;  %6726 = vmatmul.mubr.f32.gmra.mxu1 %v11868_v43  ;;  %v7459_v52 = vpop.f32.mrf.mxu1 }
 0x509   : > { %6599 = vmatprep.mubr.f32.mxu0 %v11827_v47 }
 0x50a   : > { %v7460_v23 = vpop.f32.mrf.mxu1 }
 0x50b   : > { %v7461_v58 = vadd.f32 %v7460_v23, %v7459_v52 }
 0x50c   : > { %6601 = vmatmul.mubr.f32.gmra.mxu0 %v11844_v55 }
 0x50d   : > { %6606 = vmatprep.mubr.f32.mxu0 %v11855_v56  ;;  %v7415_v20 = vpop.f32.mrf.mxu0  ;;  %v7462_v13 = vpop.f32.mrf.mxu1 }
 0x50f   : > { %v7416_v34 = vpop.f32.mrf.mxu0  ;;  %v7463_v59 = vpop.f32.mrf.mxu1 }
 0x510   : > { %6608 = vmatmul.mubr.f32.gmra.mxu0 %v11868_v43  ;;  %v7417_v6 = vadd.f32 %v7416_v34, %v7415_v20  ;;  %v7464_v25 = vadd.f32 %v7463_v59, %v7462_v13 }
 0x512   : > { %v5154_v4 = vadd.f32 %v7458_v62, %v7417_v6 }
 0x513   : > { %v7418_v5 = vpop.f32.mrf.mxu0 }
 0x515   : > { %v7419_v36 = vpop.f32.mrf.mxu0 }
 0x516   : > { %v7420_v57 = vadd.f32 %v7419_v36, %v7418_v5 }
 0x518   : > { %v7421_v27 = vpop.f32.mrf.mxu0  ;;  %v5161_v54 = vadd.f32 %v7461_v58, %v7420_v57 }
 0x51a   : > { %v7422_v47 = vpop.f32.mrf.mxu0 }
 0x51b   : > { %v7423_v10 = vadd.f32 %v7422_v47, %v7421_v27 }
 0x528   : > { %v7538_v41 = vpop.f32.mrf.mxu1 }
 0x52a   : > { %v7539_v2 = vpop.f32.mrf.mxu1 }
 0x52d   : > { %v7541_v55 = vpop.f32.mrf.mxu1 }
 0x52f   : > { %v7542_v56 = vpop.f32.mrf.mxu1 }
 0x530   : > { %v7543_v20 = vadd.f32 %v7542_v56, %v7541_v55 }
 0x532   : > { %v7497_v12 = vpop.f32.mrf.mxu0  ;;  %v7544_v43 = vpop.f32.mrf.mxu1 }
 0x534   : > { %v7498_v48 = vpop.f32.mrf.mxu0  ;;  %v7545_v9 = vpop.f32.mrf.mxu1 }
 0x535   : > { %v7499_v21 = vadd.f32 %v7498_v48, %v7497_v12  ;;  %v7546_v23 = vadd.f32 %v7545_v9, %v7544_v43 }
 0x538   : > { %v7500_v8 = vpop.f32.mrf.mxu0 }
 0x53a   : > { %v7501_v15 = vpop.f32.mrf.mxu0 }
 0x53b   : > { %v7502_v61 = vadd.f32 %v7501_v15, %v7500_v8 }
 0x53d   : > { %v7503_v7 = vpop.f32.mrf.mxu0 }
 0x53f   : > { %v7504_v0 = vpop.f32.mrf.mxu0 }
 0x54e   : > { %v7620_v33 = vpop.f32.mrf.mxu1 }
 0x550   : > { %v7621_v11 = vpop.f32.mrf.mxu1 }
 0x551   : > { %v7622_v59 = vadd.f32 %v7621_v11, %v7620_v33 }
 0x553   : > { %v7623_v19 = vpop.f32.mrf.mxu1 }
 0x555   : > { %v7624_v44 = vpop.f32.mrf.mxu1 }
 0x558   : > { %v7579_v28 = vpop.f32.mrf.mxu0  ;;  %v12058_v16 = vpop.f32.mrf.mxu1 }
 0x55a   : > { %v7580_v18 = vpop.f32.mrf.mxu0  ;;  %v7627_v31 = vpop.f32.mrf.mxu1 }
 0x55b   : > { %v7581_v34 = vadd.f32 %v7580_v18, %v7579_v28  ;;  %v7628_v56 = vadd.f32 %v7627_v31, %v12058_v16 }
 0x55e   : > { %v7582_v32 = vpop.f32.mrf.mxu0 }
 0x560   : > { %v7583_v29 = vpop.f32.mrf.mxu0 }
 0x561   : > { %v7584_v5 = vadd.f32 %v7583_v29, %v7582_v32 }
 0x563   : > { %v7585_v30 = vpop.f32.mrf.mxu0 }
 0x565   : > { %v7586_v26 = vpop.f32.mrf.mxu0 }
 0x566   : > { %v7587_v27 = vadd.f32 %v7586_v26, %v7585_v30 }
 0x574   : > { %v12060_v45 = vpop.f32.mrf.mxu1 }
 0x576   : > { %v12062_v1 = vpop.f32.mrf.mxu1 }
 0x577   : > { %14021 = vst [vmem:[#allocation17_spill] sm:$0xff] %v12062_v1  ;;  %v7540_v1 = vadd.f32 %v7539_v2, %v7538_v41 }
 0x579   : > { %v12064_v22 = vpop.f32.mrf.mxu1 }
 0x57a   : > { %14022 = vst [vmem:[#allocation39_spill] sm:$0xff] %v12064_v22 }
 0x57b   : > { %v7706_v60 = vpop.f32.mrf.mxu1 }
 0x57e   : > { %v7661_v51 = vpop.f32.mrf.mxu0  ;;  %v12066_v53 = vpop.f32.mrf.mxu1  ;;  %v14027_v18 = vld [vmem:[#allocation17_spill] sm:$0xff] }
 0x57f   : > { %14023 = vst [vmem:[#allocation78_spill] sm:$0xff] %v12066_v53  ;;  %v5315_v53 = vadd.f32 %v7502_v61, %v5161_v54  ;;  %v7704_v33 = vadd.f32 %v14027_v18, %v12060_v45 }
 0x580   : > { %v7662_v37 = vpop.f32.mrf.mxu0  ;;  %v12068_v49 = vpop.f32.mrf.mxu1 }
 0x581   : > { %14024 = vst [vmem:[#allocation38_spill] sm:$0xff] %v12068_v49  ;;  %v5306_v49 = vadd.f32 %v7499_v21, %v5154_v4  ;;  %v5443_v52 = vadd.f32 %v7543_v20, %v5315_v53  ;;  %v7625_v21 = vadd.f32 %v7624_v44, %v7623_v19  ;;  %v7663_v61 = vadd.f32 %v7662_v37, %v7661_v51  ;;  %v14028_v11 = vld [vmem:[#allocation39_spill] sm:$0xff] }
 0x582   : > { %v7707_v19 = vadd.f32 %v7706_v60, %v14028_v11 }
 0x583   : > { %v5432_v42 = vadd.f32 %v7540_v1, %v5306_v49  ;;  %v5629_v48 = vadd.f32 %v7584_v5, %v5443_v52 }
 0x584   : > { %v7664_v14 = vpop.f32.mrf.mxu0 }
 0x585   : > { %v5622_v12 = vadd.f32 %v7581_v34, %v5432_v42  ;;  %v5747_v2 = vadd.f32 %v7625_v21, %v5629_v48 }
 0x586   : > { %v7665_v50 = vpop.f32.mrf.mxu0  ;;  %v14029_v16 = vld [vmem:[#allocation78_spill] sm:$0xff] }
 0x587   : > { %v5740_v41 = vadd.f32 %v7622_v59, %v5622_v12 }
 0x588   : > { %v14030_v31 = vld [vmem:[#allocation38_spill] sm:$0xff] }
 0x589   : > { %v7667_v38 = vpop.f32.mrf.mxu0  ;;  %v5866_v15 = vadd.f32 %v7663_v61, %v5740_v41 }
 0x58b   : > { %v7668_v46 = vpop.f32.mrf.mxu0  ;;  %v6128_v1 = vadd.f32 %v7704_v33, %v5866_v15 }
 0x58c   : > { %v7669_v9 = vadd.f32 %v7668_v46, %v7667_v38 }
 0x59a   : > { %v12070_v3 = vpop.f32.mrf.mxu1 }
 0x59b   : > { %14025 = vst [vmem:[#allocation64_spill] sm:$0xff] %v12070_v3  ;;  %v7505_v3 = vadd.f32 %v7504_v0, %v7503_v7 }
 0x59c   : > { %v12072_v17 = vpop.f32.mrf.mxu1 }
 0x59d   : > { %14026 = vst [vmem:[#allocation56_spill] sm:$0xff] %v12072_v17  ;;  %v5168_v17 = vadd.f32 %v7464_v25, %v7423_v10  ;;  %v7666_v10 = vadd.f32 %v7665_v50, %v7664_v14  ;;  %v7710_v14 = vadd.f32 %v14030_v31, %v14029_v16 }
 0x59f   : > { %v12074_v35 = vpop.f32.mrf.mxu1  ;;  %v5324_v24 = vadd.f32 %v7505_v3, %v5168_v17  ;;  %v5881_v43 = vadd.f32 %v7666_v10, %v5747_v2 }
 0x5a1   : > { %v7788_v39 = vpop.f32.mrf.mxu1  ;;  %v5454_v13 = vadd.f32 %v7546_v23, %v5324_v24  ;;  %v6135_v26 = vadd.f32 %v7707_v19, %v5881_v43 }
 0x5a2   : > { %v14031_v38 = vld [vmem:[#allocation64_spill] sm:$0xff]  ;;  %v7789_v60 = vadd.f32 %v7788_v39, %v12074_v35 }
 0x5a3   : > { %v5636_v4 = vadd.f32 %v7587_v27, %v5454_v13 }
 0x5a4   : > { %v7743_v40 = vpop.f32.mrf.mxu0  ;;  %v7790_v36 = vpop.f32.mrf.mxu1  ;;  %v14032_v17 = vld [vmem:[#allocation56_spill] sm:$0xff] }
 0x5a5   : > { %v5754_v7 = vadd.f32 %v7628_v56, %v5636_v4  ;;  %v7786_v45 = vadd.f32 %v14032_v17, %v14031_v38 }
 0x5a6   : > { %v7744_v63 = vpop.f32.mrf.mxu0  ;;  %v7791_v8 = vpop.f32.mrf.mxu1 }
 0x5a7   : > { %v7745_v44 = vadd.f32 %v7744_v63, %v7743_v40  ;;  %v5896_v30 = vadd.f32 %v7669_v9, %v5754_v7  ;;  %v7792_v34 = vadd.f32 %v7791_v8, %v7790_v36 }
 0x5a9   : > { %v6280_v53 = vadd.f32 %v7745_v44, %v6128_v1  ;;  %v6142_v63 = vadd.f32 %v7710_v14, %v5896_v30  ;;  %v6760_v30 = vld [vmem:[%s7988_s18 + $0x8] sm:$0xff]  ;;  %v6759_v1 = vld [vmem:[%s7988_s18] sm:$0xff] }
 0x5aa   : > { %v7746_v22 = vpop.f32.mrf.mxu0 }
 0x5ab   : > { %v6406_v57 = vadd.f32 %v7786_v45, %v6280_v53  ;;  %v6761_v53 = vld [vmem:[%s7988_s18 + $0x10] sm:$0xff]  ;;  %v14033_v45 = vld [vmem:[#allocation67_spill] sm:$0xff] }
 0x5ac   : > { %v7747_v47 = vpop.f32.mrf.mxu0 }
 0x5ad   : > { %v7748_v32 = vadd.f32 %v7747_v47, %v7746_v22 }
 0x5af   : > { %v7749_v54 = vpop.f32.mrf.mxu0  ;;  %v6289_v50 = vadd.f32 %v7748_v32, %v6135_v26 }
 0x5b1   : > { %v7750_v0 = vpop.f32.mrf.mxu0  ;;  %v6417_v62 = vadd.f32 %v7789_v60, %v6289_v50  ;;  %v6810_v50 = vld [vmem:[%s7983_s15] sm:$0xff] }
 0x5b2   : > { %v7751_v49 = vadd.f32 %v7750_v0, %v7749_v54 }
 0x5b4   : > { %v6298_v6 = vadd.f32 %v7751_v49, %v6142_v63  ;;  %v14034_v63 = vld [vmem:[#allocation30_spill] sm:$0xff] }
 0x5b6   : > { %v6428_v12 = vadd.f32 %v7792_v34, %v6298_v6  ;;  %v14036_v6 = vld [vmem:[#allocation89_spill] sm:$0xff] }
 0x5c0   : > { %v7866_v25 = vpop.f32.mrf.mxu1 }
 0x5c2   : > { %v7867_v55 = vpop.f32.mrf.mxu1 }
 0x5c3   : > { %v7868_v27 = vadd.f32 %v7867_v55, %v7866_v25 }
 0x5c4   : > { %v7869_v28 = vpop.f32.mrf.mxu1 }
 0x5c6   : > { %v7870_v51 = vpop.f32.mrf.mxu1 }
 0x5c7   : > { %v7871_v5 = vadd.f32 %v7870_v51, %v7869_v28 }
 0x5c8   : > { %v7825_v29 = vpop.f32.mrf.mxu0  ;;  %v7872_v46 = vpop.f32.mrf.mxu1 }
 0x5ca   : > { %v7826_v37 = vpop.f32.mrf.mxu0  ;;  %v7873_v52 = vpop.f32.mrf.mxu1 }
 0x5cb   : > { %v7827_v22 = vadd.f32 %v7826_v37, %v7825_v29  ;;  %v7874_v35 = vadd.f32 %v7873_v52, %v7872_v46  ;;  %v14035_v46 = vld [vmem:[#allocation28_spill] sm:$0xff] }
 0x5cc   : > { %v7828_v3 = vpop.f32.mrf.mxu0 }
 0x5cd   : > { %v6596_v24 = vadd.f32 %v7827_v22, %v6406_v57 }
 0x5ce   : > { %v7829_v40 = vpop.f32.mrf.mxu0 }
 0x5cf   : > { %v7830_v58 = vadd.f32 %v7829_v40, %v7828_v3  ;;  %v6714_v39 = vadd.f32 %v7868_v27, %v6596_v24  ;;  %v6811_v3 = vld [vmem:[%s7983_s15 + $0x8] sm:$0xff] }
 0x5d0   : > { %v7831_v20 = vpop.f32.mrf.mxu0 }
 0x5d1   : > { %v6603_v42 = vadd.f32 %v7830_v58, %v6417_v62  ;;  %v6731_v61 = vmul.f32 0.001953125, %v6714_v39  ;;  %v14037_v62 = vld [vmem:[#allocation109_spill] sm:$0xff] }
 0x5d2   : > { %v7832_v23 = vpop.f32.mrf.mxu0 }
 0x5d3   : > { %v6721_v47 = vadd.f32 %v7871_v5, %v6603_v42  ;;  %v7833_v48 = vadd.f32 %v7832_v23, %v7831_v20  ;;  %v14038_v20 = vld [vmem:[#allocation111_spill] sm:$0xff]  ;;  %v14039_v5 = vld [vmem:[#allocation98_spill] sm:$0xff] }
 0x5d4   : > { %v14040_v42 = vld [vmem:[#allocation79_spill] sm:$0xff] }
 0x5d5   : > { %v6610_v13 = vadd.f32 %v7833_v48, %v6428_v12  ;;  %v6732_v59 = vmul.f32 0.001953125, %v6721_v47 }
 0x5d7   : > { %v6728_v21 = vadd.f32 %v7874_v35, %v6610_v13  ;;  %v6735_v4 = vmul.f32 %v6732_v59, %v6731_v61  ;;  %v6734_v15 = vadd.f32 %v6732_v59, %v6731_v61 }
 0x5d9   : > { %v6733_v10 = vmul.f32 0.001953125, %v6728_v21 }
 0x5db   : > { %v6736_v54 = vmul.f32 %v6733_v10, %v6733_v10  ;;  %v6768_v26 = vsub.f32 0.0, %v6733_v10 }
 0x5dd   : > { %v6737_v41 = vsub.f32 %v6735_v4, %v6736_v54 }
 0x5df   : > { %v6738_v36 = vadd.f32 1e-08, %v6737_v41 }
 0x5e1   : > { %7895 = vrsqrt.f32 %v6738_v36  ;;  %vm6741_vm1 = vcmp.eq.f32.partialorder %v6738_v36, inf  ;;  %v6744_v56 = vand.u32 2147483648, %v6738_v36  ;;  %vm6743_vm2 = vcmp.eq.f32.partialorder %v6738_v36, 0.0 }
 0x5ee   : > { %v7896_v8 = vpop.eup %7895 }
 0x5ef   : > { %v6740_v2 = vmul.f32 %v7896_v8, %v6738_v36 }
 0x5f1   : > { %v6742_v25 = vsel %vm6741_vm1, %v6738_v36, %v6740_v2 }
 0x5f2   : > { %v6745_v55 = vsel %vm6743_vm2, %v6744_v56, %v6742_v25 }
 0x5f3   : > { %v6746_v43 = vmul.f32 2.0, %v6745_v55  ;;  %v6765_v44 = vadd.f32 %v6745_v55, %v6731_v61  ;;  %v6762_v32 = vadd.f32 %v6745_v55, %v6732_v59 }
 0x5f5   : > { %v6747_v9 = vadd.f32 %v6746_v43, %v6734_v15 }
 0x5f7   : > { %7897 = vrsqrt.f32 %v6747_v9  ;;  %vm6750_vm3 = vcmp.eq.f32.partialorder %v6747_v9, inf  ;;  %v6753_v28 = vand.u32 2147483648, %v6747_v9  ;;  %vm6752_vm4 = vcmp.eq.f32.partialorder %v6747_v9, 0.0 }
 0x604   : > { %v7898_v7 = vpop.eup %7897 }
 0x605   : > { %v6749_v0 = vmul.f32 %v7898_v7, %v6747_v9 }
 0x607   : > { %v6751_v18 = vsel %vm6750_vm3, %v6747_v9, %v6749_v0 }
 0x608   : > { %v6754_v33 = vsel %vm6752_vm4, %v6753_v28, %v6751_v18 }
 0x609   : > { %v6755_v11 = vmul.f32 %v6754_v33, %v6745_v55 }
 0x60b   : > { %v6756_v19 = vadd.f32 1e-08, %v6755_v11 }
 0x60d   : > { %7899 = vrcp.f32 %v6756_v19 }
 0x61a   : > { %v7900_v29 = vpop.eup %7899 }
 0x61b   : > { %v6766_v51 = vmul.f32 %v7900_v29, %v6765_v44  ;;  %v6763_v37 = vmul.f32 %v7900_v29, %v6762_v32  ;;  %v6769_v14 = vmul.f32 %v7900_v29, %v6768_v26 }
 0x61d   : > { %v6767_v16 = vmul.f32 %v6766_v51, %v6760_v30  ;;  %v6764_v31 = vmul.f32 %v6763_v37, %v6759_v1  ;;  %v6770_v49 = vmul.f32 %v6769_v14, %v6761_v53 }
 0x61f   : > { %6778 = vperm.xlu0 %7893, %v6767_v16   ;;  %6773 = vperm.xlu1 %7894, %v6764_v31  }
 0x623   : > { %6814 = vperm.xlu0 %7893, %v6810_v50   ;;  %6791 = vperm.xlu1 %7894, %v6770_v49  }
 0x627   : > { %6819 = vperm.xlu1 %7894, %v6811_v3  }
 0x69a   : > { %v6779_v38 = vpop.permute.xlu0 %6778  ;;  %v6774_v17 = vpop.permute.xlu1 %6773 }
 0x69b   : > { %v6785_v60 = vmul.f32 %v6779_v38, %v14033_v45  ;;  %v6786_v22 = vmul.f32 %v6779_v38, %v14034_v63  ;;  %v6787_v40 = vmul.f32 %v6779_v38, %v14035_v46  ;;  %v6788_v57 = vmul.f32 %v6779_v38, %v14036_v6 }
 0x69c   : > { %v6781_v58 = vmul.f32 %v6774_v17, %v14037_v62  ;;  %v6782_v34 = vmul.f32 %v6774_v17, %v14038_v20  ;;  %v6783_v24 = vmul.f32 %v6774_v17, %v14039_v5  ;;  %v6784_v52 = vmul.f32 %v6774_v17, %v14040_v42 }
 0x69e   : > { %v6792_v23 = vpop.permute.xlu1 %6791  ;;  %v6815_v54 = vpop.permute.xlu0 %6814 }
 0x69f   : > { %v6794_v27 = vmul.f32 %v6792_v23, %v14033_v45  ;;  %v6795_v47 = vmul.f32 %v6792_v23, %v14034_v63  ;;  %v6796_v12 = vmul.f32 %v6792_v23, %v14035_v46  ;;  %v6797_v48 = vmul.f32 %v6792_v23, %v14036_v6 }
 0x6a0   : > { %v6798_v39 = vmul.f32 %v6792_v23, %v14037_v62  ;;  %v6799_v35 = vmul.f32 %v6792_v23, %v14038_v20  ;;  %v6800_v13 = vmul.f32 %v6792_v23, %v14039_v5  ;;  %v6801_v59 = vmul.f32 %v6792_v23, %v14040_v42 }
 0x6a1   : > { %v6802_v21 = vadd.f32 %v6794_v27, %v6781_v58  ;;  %v6803_v61 = vadd.f32 %v6795_v47, %v6782_v34  ;;  %v6804_v10 = vadd.f32 %v6796_v12, %v6783_v24  ;;  %v6805_v4 = vadd.f32 %v6797_v48, %v6784_v52 }
 0x6a2   : > { %v6806_v41 = vadd.f32 %v6798_v39, %v6785_v60  ;;  %v6807_v36 = vadd.f32 %v6799_v35, %v6786_v22  ;;  %v6808_v8 = vadd.f32 %v6800_v13, %v6787_v40  ;;  %v6809_v2 = vadd.f32 %v6801_v59, %v6788_v57  ;;  %v6820_v56 = vpop.permute.xlu1 %6819 }
 0x6a3   : > { %v6822_v25 = vadd.f32 %v6815_v54, %v6802_v21  ;;  %v6823_v55 = vadd.f32 %v6815_v54, %v6803_v61  ;;  %v6824_v15 = vadd.f32 %v6815_v54, %v6804_v10  ;;  %v6825_v43 = vadd.f32 %v6815_v54, %v6805_v4 }
 0x6a4   : > { %v6826_v9 = vadd.f32 %v6820_v56, %v6806_v41  ;;  %v6827_v7 = vadd.f32 %v6820_v56, %v6807_v36  ;;  %v6828_v0 = vadd.f32 %v6820_v56, %v6808_v8  ;;  %v6829_v28 = vadd.f32 %v6820_v56, %v6809_v2 }
 0x6a5   : > { %6830 = vst [vmem:[%s12140_s7] sm:$0xff] %v6822_v25  ;;  %6831 = vst [vmem:[%s12140_s7 + $0x8] sm:$0xff] %v6823_v55 }
 0x6a6   : > { %6832 = vst [vmem:[%s12140_s7 + $0x10] sm:$0xff] %v6824_v15  ;;  %6833 = vst [vmem:[%s12140_s7 + $0x18] sm:$0xff] %v6825_v43 }
 0x6a7   : > { %6834 = vst [vmem:[%s12140_s7 + $0x20] sm:$0xff] %v6826_v9  ;;  %6835 = vst [vmem:[%s12140_s7 + $0x28] sm:$0xff] %v6827_v7 }
 0x6a8   : > { %6836 = vst [vmem:[%s12140_s7 + $0x30] sm:$0xff] %v6828_v0  ;;  %6837 = vst [vmem:[%s12140_s7 + $0x38] sm:$0xff] %v6829_v28 }
 0x6a9 PF: > { %s17_s24 = sadd.s32 1, %s7911_s24  }
 0x6aa   : > { %p14_p5 = scmp.ge.s32.totalorder %s17_s24, 5  }
 0x6ac   :  { %16 = sbr.rel (!%p14_p5) target bundleno = 1 (0x1), region = 95 }

</bundles_post_ra>
